<compile_context>
chip_gen: v7x
topology: tpu7x:2x2x1
jax: 0.10.0
libtpu: 0.0.40
codegen_flags: <defaults>
</compile_context>

<pallas_src>
import functools

import numpy as np

import jax
import jax.numpy as jnp
from jax.experimental import pallas as pl
from jax.experimental.pallas import tpu as pltpu

_VMEM_LIMIT = 32 * 1024 * 1024   # explicit scoped-VMEM request (v5e default is only 16 MiB)
_ROW_TILE = 1024                 # M-grid kicks in above this many rows (batch scaling)


# ----------------------------------------------------------------------------
# Pallas kernels
# ----------------------------------------------------------------------------
def _apply_act(y, act):
    if act == "leaky_relu":
        return jnp.where(y >= 0.0, y, 0.2 * y)
    if act == "relu":
        return jnp.maximum(y, 0.0)
    if act == "sigmoid":
        return 1.0 / (1.0 + jnp.exp(-y))
    return y  # "none"


def _gemm_bias_act_kernel(a_ref, w_ref, b_ref, o_ref, *, act):
    # a: (M, K) bf16   w: (K, N) bf16   b: (1, N) f32   o: (M, N)
    z = jnp.dot(a_ref[...], w_ref[...], preferred_element_type=jnp.float32)
    o_ref[...] = _apply_act(z + b_ref[...], act).astype(o_ref.dtype)


def _gemm_bn_act_kernel(a_ref, w_ref, g_ref, b_ref, o_ref, zs_ref, *,
                        act, phases, count, eps=1e-5):
    # Conv GEMM (conv bias dropped: exactly cancelled by the train-mode BN mean
    # subtraction), then BatchNorm with one-pass batch statistics, then act.
    # Columns are laid out as `phases` blocks of C channels each; statistics
    # pool over rows AND phases (count = true rows * phases; `a` has no padded
    # rows, so every row contributes).
    zs_ref[...] = jnp.dot(a_ref[...], w_ref[...],
                          preferred_element_type=jnp.float32)
    C = g_ref.shape[1]
    s = jnp.zeros((1, C), jnp.float32)
    sq = jnp.zeros((1, C), jnp.float32)
    for p in range(phases):
        zp = zs_ref[:, p * C:(p + 1) * C]
        s = s + jnp.sum(zp, axis=0, keepdims=True)
        sq = sq + jnp.sum(zp * zp, axis=0, keepdims=True)
    inv_n = 1.0 / float(count)
    mean = s * inv_n
    var = jnp.maximum(sq * inv_n - mean * mean, 0.0)   # guard one-pass cancellation
    scale = g_ref[...] * jax.lax.rsqrt(var + eps)
    shift = b_ref[...] - mean * scale
    for p in range(phases):                            # per-phase apply; no lane concat
        zp = zs_ref[:, p * C:(p + 1) * C]
        o_ref[:, p * C:(p + 1) * C] = _apply_act(zp * scale + shift,
                                                 act).astype(o_ref.dtype)


def _dis_tail_kernel(a_ref, w_ref, g_ref, b_ref, w3_ref, b3_ref, sel_ref,
                     o_ref, zs_ref, *, count, eps=1e-5):
    # Discriminator conv2 GEMM (bias cancelled by BN) + BatchNorm(128) +
    # LeakyReLU + final 7x7 Conv2d(128 -> 1), fused; the (M,128) activation
    # never leaves VMEM.
    zs_ref[...] = jnp.dot(a_ref[...], w_ref[...],
                          preferred_element_type=jnp.float32)
    z = zs_ref[...]
    s = jnp.sum(z, axis=0, keepdims=True)
    sq = jnp.sum(z * z, axis=0, keepdims=True)
    inv_n = 1.0 / float(count)
    mean = s * inv_n
    var = jnp.maximum(sq * inv_n - mean * mean, 0.0)
    scale = g_ref[...] * jax.lax.rsqrt(var + eps)
    shift = b_ref[...] - mean * scale
    h = z * scale + shift
    h = jnp.where(h >= 0.0, h, 0.2 * h)
    prod = h * w3_ref[...]                                       # (M, 128)
    per_batch = jnp.dot(sel_ref[...], prod,
                        preferred_element_type=jnp.float32)      # (B, 128)
    o_ref[...] = jnp.sum(per_batch, axis=1, keepdims=True) + b3_ref[...]


# ----------------------------------------------------------------------------
# Pallas wrappers
# ----------------------------------------------------------------------------
def _cparams(parallel=False):
    kw = dict(vmem_limit_bytes=_VMEM_LIMIT)
    if parallel:
        kw["dimension_semantics"] = ("parallel",)
    return pltpu.CompilerParams(**kw)


def gemm_bias_act(a, w, b, act, out_dtype):
    M, K = a.shape
    N = w.shape[1]
    kern = functools.partial(_gemm_bias_act_kernel, act=act)
    out_shape = jax.ShapeDtypeStruct((M, N), out_dtype)
    if M <= _ROW_TILE:
        # Whole stage is one VMEM block at these sizes; no grid overhead.
        return pl.pallas_call(kern, out_shape=out_shape,
                              compiler_params=_cparams())(a, w, b)
    # Batch-scaling path: M-tiled grid, shard across TensorCores (v7x).
    tm = _ROW_TILE
    return pl.pallas_call(
        kern,
        grid=(pl.cdiv(M, tm),),
        in_specs=[pl.BlockSpec((tm, K), lambda i: (i, 0)),
                  pl.BlockSpec((K, N), lambda i: (0, 0)),
                  pl.BlockSpec((1, N), lambda i: (0, 0))],
        out_specs=pl.BlockSpec((tm, N), lambda i: (i, 0)),
        out_shape=out_shape,
        compiler_params=_cparams(parallel=True),
    )(a, w, b)


def gemm_bn_act(a, w, gamma, beta, act, phases, out_dtype):
    # BN needs full-batch statistics, so this stays a single block (see TODO on
    # a two-pass split for large batch).  count = exact rows * phases.
    M, K = a.shape
    N = w.shape[1]
    return pl.pallas_call(
        functools.partial(_gemm_bn_act_kernel, act=act, phases=phases,
                          count=M * phases),
        out_shape=jax.ShapeDtypeStruct((M, N), out_dtype),
        scratch_shapes=[pltpu.VMEM((M, N), jnp.float32)],
        compiler_params=_cparams(),
    )(a, w, gamma, beta)


def dis_tail(a, w, gamma, beta, w3_big, b3, sel):
    M, K = a.shape
    N = w.shape[1]
    B = sel.shape[0]
    return pl.pallas_call(
        functools.partial(_dis_tail_kernel, count=M),
        out_shape=jax.ShapeDtypeStruct((B, 1), jnp.float32),
        scratch_shapes=[pltpu.VMEM((M, N), jnp.float32)],
        compiler_params=_cparams(),
    )(a, w, gamma, beta, w3_big, b3, sel)


# ----------------------------------------------------------------------------
# im2col / phase glue (pad, slice, reshape only — compute stays in Pallas)
# ----------------------------------------------------------------------------
def _im2col(x, kh, kw, stride, pad):
    B, H, W, C = x.shape
    xp = jnp.pad(x, ((0, 0), (pad, pad), (pad, pad), (0, 0)))
    OH = (H + 2 * pad - kh) // stride + 1
    OW = (W + 2 * pad - kw) // stride + 1
    cols = []
    for i in range(kh):
        for j in range(kw):
            cols.append(xp[:, i:i + (OH - 1) * stride + 1:stride,
                           j:j + (OW - 1) * stride + 1:stride, :])
    patches = jnp.stack(cols, axis=3)                # (B, OH, OW, kh*kw, C)
    # bf16 GEMM operands: halves DMA bytes of the patch slabs; MXU accumulates f32.
    return patches.reshape(B * OH * OW, kh * kw * C).astype(jnp.bfloat16), (B, OH, OW)


def _phase_deinterleave(y, B, H, W, c):
    # y: (B*H*W, 4*c); column block p = ph*2 + pw is output phase (2j+ph, 2l+pw)
    # -> NHWC output (B, 2H, 2W, c).  Pure reshape/transpose (no dead lanes).
    y = y.reshape(B, H, W, 2, 2, c)
    y = jnp.transpose(y, (0, 1, 3, 2, 4, 5))
    return y.reshape(B, 2 * H, 2 * W, c)


# ----------------------------------------------------------------------------
# Parameter preparation (done once, outside the jitted forward)
# ----------------------------------------------------------------------------
def _conv_weight_mat(w):
    # PyTorch Conv2d weight (Cout, Cin, KH, KW) -> (KH*KW*Cin, Cout)
    Cout, Cin, KH, KW = w.shape
    return jnp.transpose(w, (2, 3, 1, 0)).reshape(KH * KW * Cin, Cout)


# For output parity ph (0=even, 1=odd): maps patch row-tap a (offset a-1) to the
# transposed-conv kernel index kh that contributes (unlisted taps unused).
_PHASE_TAPS = {0: {0: 3, 1: 1}, 1: {1: 2, 2: 0}}


def _deconv_phase_weight_mat(w):
    # PyTorch ConvTranspose2d weight (Cin, Cout, 4, 4) with stride=2, pad=1 ->
    # GEMM weight (9*Cin, 4*Cout) acting on 3x3/pad-1 patches of the *undilated*
    # input; column block p = ph*2 + pw is output phase (2j+ph, 2l+pw).
    Cin, Cout = int(w.shape[0]), int(w.shape[1])
    w_np = np.asarray(w, dtype=np.float32)
    wm = np.zeros((9 * Cin, 4 * Cout), np.float32)
    for ph in range(2):
        for pw in range(2):
            p = ph * 2 + pw
            for a, kh in _PHASE_TAPS[ph].items():
                for b2, kw in _PHASE_TAPS[pw].items():
                    tap = a * 3 + b2
                    wm[tap * Cin:(tap + 1) * Cin,
                       p * Cout:(p + 1) * Cout] = w_np[:, :, kh, kw]
    return jnp.asarray(wm)


def prepare_params(p, batch):
    """PyTorch-layout params -> GEMM-ready bf16 weights + hoisted static tensors."""
    f32, bf16 = jnp.float32, jnp.bfloat16
    pp = {}
    # encoder
    pp["enc1_w"] = _conv_weight_mat(p["enc_w1"]).astype(bf16)          # (16, 64)
    pp["enc1_b"] = p["enc_b1"].reshape(1, 64).astype(f32)
    pp["enc2_w"] = _conv_weight_mat(p["enc_w2"]).astype(bf16)          # (1024, 128); bias dropped (BN)
    pp["enc_bn_g"] = p["enc_bn_g"].reshape(1, 128).astype(f32)
    pp["enc_bn_b"] = p["enc_bn_b"].reshape(1, 128).astype(f32)
    # decoder
    pp["dec1_w"] = _deconv_phase_weight_mat(p["dec_w1"]).astype(bf16)  # (1152, 256); bias dropped (BN)
    pp["dec_bn_g"] = p["dec_bn_g"].reshape(1, 64).astype(f32)
    pp["dec_bn_b"] = p["dec_bn_b"].reshape(1, 64).astype(f32)
    pp["dec2_w"] = _deconv_phase_weight_mat(p["dec_w2"]).astype(bf16)  # (576, 4) — only live columns
    pp["dec2_b"] = jnp.full((1, 4), p["dec_b2"][0], f32)
    # discriminator
    pp["dis1_w"] = _conv_weight_mat(p["dis_w1"]).astype(bf16)          # (16, 64)
    pp["dis1_b"] = p["dis_b1"].reshape(1, 64).astype(f32)
    pp["dis2_w"] = _conv_weight_mat(p["dis_w2"]).astype(bf16)          # (1024, 128); bias dropped (BN)
    pp["dis_bn_g"] = p["dis_bn_g"].reshape(1, 128).astype(f32)
    pp["dis_bn_b"] = p["dis_bn_b"].reshape(1, 128).astype(f32)
    # final 7x7 conv: (1, 128, 7, 7) -> (49, 128) in (oh, ow) row order, tiled per
    # batch, plus the batch-selector matrix — both hoisted out of the forward.
    w3 = jnp.transpose(p["dis_w3"][0], (1, 2, 0)).reshape(49, 128).astype(f32)
    pp["dis3_w_big"] = jnp.tile(w3, (batch, 1))                        # (B*49, 128)
    pp["dis3_b"] = p["dis_b3"].reshape(1, 1).astype(f32)
    pp["dis_sel"] = (jnp.arange(batch * 49)[None, :] // 49
                     == jnp.arange(batch)[:, None]).astype(f32)        # (B, B*49)
    return pp


# ----------------------------------------------------------------------------
# GANomaly forward
# ----------------------------------------------------------------------------
def ganomaly_forward(x_nchw, pp):
    x = jnp.transpose(x_nchw, (0, 2, 3, 1))           # NCHW -> NHWC (B,28,28,1)
    B = x.shape[0]
    assert pp["dis_sel"].shape[0] == B, "prepare_params(batch) must match input batch"

    # ---- encoder ----
    a, _ = _im2col(x, 4, 4, 2, 1)                     # (B*196, 16) bf16
    h = gemm_bias_act(a, pp["enc1_w"], pp["enc1_b"], "leaky_relu", jnp.bfloat16)
    h = h.reshape(B, 14, 14, 64)

    a, _ = _im2col(h, 4, 4, 2, 1)                     # (B*49, 1024) bf16
    latent_flat = gemm_bn_act(a, pp["enc2_w"], pp["enc_bn_g"], pp["enc_bn_b"],
                              act="leaky_relu", phases=1,
                              out_dtype=jnp.float32)  # (B*49, 128)
    latent = latent_flat.reshape(B, 7, 7, 128)

    # ---- decoder ----
    a, _ = _im2col(latent, 3, 3, 1, 1)                # (B*49, 1152) bf16
    d = gemm_bn_act(a, pp["dec1_w"], pp["dec_bn_g"], pp["dec_bn_b"],
                    act="relu", phases=4, out_dtype=jnp.bfloat16)   # (B*49, 256)
    d = _phase_deinterleave(d, B, 7, 7, 64)           # (B,14,14,64)

    a, _ = _im2col(d, 3, 3, 1, 1)                     # (B*196, 576) bf16
    r = gemm_bias_act(a, pp["dec2_w"], pp["dec2_b"], "sigmoid",
                      jnp.float32)                    # (B*196, 4) — no dead lanes
    recon = _phase_deinterleave(r, B, 14, 14, 1)      # (B,28,28,1)

    # ---- discriminator ----
    a, _ = _im2col(recon, 4, 4, 2, 1)                 # (B*196, 16) bf16
    q = gemm_bias_act(a, pp["dis1_w"], pp["dis1_b"], "leaky_relu", jnp.bfloat16)
    q = q.reshape(B, 14, 14, 64)

    a, _ = _im2col(q, 4, 4, 2, 1)                     # (B*49, 1024) bf16
    pred = dis_tail(a, pp["dis2_w"], pp["dis_bn_g"], pp["dis_bn_b"],
                    pp["dis3_w_big"], pp["dis3_b"], pp["dis_sel"]).reshape(-1)

    recon_nchw = jnp.transpose(recon, (0, 3, 1, 2))
    latent_nchw = jnp.transpose(latent, (0, 3, 1, 2))
    return recon_nchw, latent_nchw, pred


# ----------------------------------------------------------------------------
# Deterministic parameter init (shapes from the PyTorch __init__)
# ----------------------------------------------------------------------------
def init_params():
    key = jax.random.PRNGKey(7)
    ks = jax.random.split(key, 12)

    def w(k, shape, scale=0.05):
        return (scale * jax.random.normal(k, shape)).astype(jnp.float32)

    return {
        # encoder
        "enc_w1": w(ks[0], (64, 1, 4, 4)), "enc_b1": w(ks[1], (64,), 0.01),
        "enc_w2": w(ks[2], (128, 64, 4, 4)), "enc_b2": w(ks[3], (128,), 0.01),  # cancelled by BN
        "enc_bn_g": jnp.ones((128,), jnp.float32),
        "enc_bn_b": jnp.zeros((128,), jnp.float32),
        # decoder (ConvTranspose2d weights: (Cin, Cout, KH, KW))
        "dec_w1": w(ks[4], (128, 64, 4, 4)), "dec_b1": w(ks[5], (64,), 0.01),   # cancelled by BN
        "dec_bn_g": jnp.ones((64,), jnp.float32),
        "dec_bn_b": jnp.zeros((64,), jnp.float32),
        "dec_w2": w(ks[6], (64, 1, 4, 4)), "dec_b2": w(ks[7], (1,), 0.01),
        # discriminator
        "dis_w1": w(ks[8], (64, 1, 4, 4)), "dis_b1": w(ks[9], (64,), 0.01),
        "dis_w2": w(ks[10], (128, 64, 4, 4)), "dis_b2": w(ks[11], (128,), 0.01),  # cancelled by BN
        "dis_bn_g": jnp.ones((128,), jnp.float32),
        "dis_bn_b": jnp.zeros((128,), jnp.float32),
        "dis_w3": w(jax.random.PRNGKey(42), (1, 128, 7, 7)),
        "dis_b3": w(jax.random.PRNGKey(43), (1,), 0.01),
    }


if __name__ == "__main__":
    B = 2
    params = init_params()
    prepared = prepare_params(params, B)

    # 28x28 input (MNIST-like) so the discriminator's final 7x7 conv is valid.
    x = jax.random.normal(jax.random.PRNGKey(0), (B, 1, 28, 28), dtype=jnp.float32)

    fwd = jax.jit(functools.partial(ganomaly_forward, pp=prepared))
    recon, latent, pred = fwd(x)
    jax.block_until_ready((recon, latent, pred))

    assert recon.shape == (B, 1, 28, 28), recon.shape
    assert latent.shape == (B, 128, 7, 7), latent.shape
    assert pred.shape == (B,), pred.shape
    assert bool(jnp.all(jnp.isfinite(recon)))
    assert bool(jnp.all(jnp.isfinite(latent)))
    assert bool(jnp.all(jnp.isfinite(pred)))
    print("KERNEL_OK")
</pallas_src>

<mosaic_0001>
module attributes {stable_mosaic.version = 11 : i64} {
  func.func @_gemm_bias_act_kernel(%arg0: memref<392x16xbf16, #tpu.memory_space<vmem>>, %arg1: memref<16x64xbf16, #tpu.memory_space<vmem>>, %arg2: memref<1x64xf32, #tpu.memory_space<vmem>>, %arg3: memref<392x64xbf16, #tpu.memory_space<vmem>>) attributes {dimension_semantics = [], scalar_prefetch = 0 : i64, scratch_operands = 0 : i64, tpu.core_type = #tpu.core_type<tc>} {
    %c0 = arith.constant 0 : index
    %c0_0 = arith.constant 0 : index
    %0 = vector.load %arg0[%c0, %c0_0] : memref<392x16xbf16, #tpu.memory_space<vmem>>, vector<392x16xbf16>
    %c0_1 = arith.constant 0 : index
    %c0_2 = arith.constant 0 : index
    %1 = vector.load %arg1[%c0_1, %c0_2] : memref<16x64xbf16, #tpu.memory_space<vmem>>, vector<16x64xbf16>
    %cst = arith.constant dense<0.000000e+00> : vector<392x64xf32>
    %2 = tpu.matmul %0, %1, %cst {dimension_numbers = #tpu.dot_dimension_numbers<[1], [0], [0], [1], [0, 0, 1, 1], [], []>} : vector<392x16xbf16>, vector<16x64xbf16>, vector<392x64xf32> -> vector<392x64xf32>
    %c0_3 = arith.constant 0 : index
    %c0_4 = arith.constant 0 : index
    %3 = vector.load %arg2[%c0_3, %c0_4] : memref<1x64xf32, #tpu.memory_space<vmem>>, vector<1x64xf32>
    %4 = vector.broadcast %3 : vector<1x64xf32> to vector<392x64xf32>
    %5 = arith.addf %2, %4 : vector<392x64xf32>
    %cst_5 = arith.constant 0.000000e+00 : f32
    %6 = vector.broadcast %cst_5 : f32 to vector<392x64xf32>
    %7 = arith.cmpf oge, %5, %6 : vector<392x64xf32>
    %cst_6 = arith.constant 2.000000e-01 : f32
    %8 = vector.broadcast %cst_6 : f32 to vector<392x64xf32>
    %9 = arith.mulf %8, %5 : vector<392x64xf32>
    %10 = arith.select %7, %5, %9 : vector<392x64xi1>, vector<392x64xf32>
    %11 = arith.truncf %10 : vector<392x64xf32> to vector<392x64xbf16>
    %c0_7 = arith.constant 0 : index
    %c0_8 = arith.constant 0 : index
    %12 = vector.load %arg3[%c0_7, %c0_8] : memref<392x64xbf16, #tpu.memory_space<vmem>>, vector<392x64xbf16>
    tpu.vector_store %arg3[%c0_7, %c0_8], %11 {strides = array<i32>} : memref<392x64xbf16, #tpu.memory_space<vmem>>, vector<392x64xbf16>,
    return
  }
}

module attributes {stable_mosaic.version = 11 : i64} {
  func.func @_gemm_bn_act_kernel(%arg0: memref<98x1024xbf16, #tpu.memory_space<vmem>>, %arg1: memref<1024x128xbf16, #tpu.memory_space<vmem>>, %arg2: memref<1x128xf32, #tpu.memory_space<vmem>>, %arg3: memref<1x128xf32, #tpu.memory_space<vmem>>, %arg4: memref<98x128xf32, #tpu.memory_space<vmem>>, %arg5: memref<98x128xf32, #tpu.memory_space<vmem>>) attributes {dimension_semantics = [], scalar_prefetch = 0 : i64, scratch_operands = 1 : i64, tpu.core_type = #tpu.core_type<tc>} {
    %c0 = arith.constant 0 : index
    %c0_0 = arith.constant 0 : index
    %0 = vector.load %arg0[%c0, %c0_0] : memref<98x1024xbf16, #tpu.memory_space<vmem>>, vector<98x1024xbf16>
    %c0_1 = arith.constant 0 : index
    %c0_2 = arith.constant 0 : index
    %1 = vector.load %arg1[%c0_1, %c0_2] : memref<1024x128xbf16, #tpu.memory_space<vmem>>, vector<1024x128xbf16>
    %cst = arith.constant dense<0.000000e+00> : vector<98x128xf32>
    %2 = tpu.matmul %0, %1, %cst {dimension_numbers = #tpu.dot_dimension_numbers<[1], [0], [0], [1], [0, 0, 1, 1], [], []>} : vector<98x1024xbf16>, vector<1024x128xbf16>, vector<98x128xf32> -> vector<98x128xf32>
    %c0_3 = arith.constant 0 : index
    %c0_4 = arith.constant 0 : index
    %3 = vector.load %arg5[%c0_3, %c0_4] : memref<98x128xf32, #tpu.memory_space<vmem>>, vector<98x128xf32>
    tpu.vector_store %arg5[%c0_3, %c0_4], %2 {strides = array<i32>} : memref<98x128xf32, #tpu.memory_space<vmem>>, vector<98x128xf32>,
    %cst_5 = arith.constant 0.000000e+00 : f32
    %4 = vector.broadcast %cst_5 : f32 to vector<1x128xf32>
    %cst_6 = arith.constant 0.000000e+00 : f32
    %5 = vector.broadcast %cst_6 : f32 to vector<1x128xf32>
    %c0_7 = arith.constant 0 : index
    %c0_8 = arith.constant 0 : index
    %6 = vector.load %arg5[%c0_7, %c0_8] : memref<98x128xf32, #tpu.memory_space<vmem>>, vector<98x128xf32>
    %cst_9 = arith.constant dense<0.000000e+00> : vector<128xf32>
    %7 = vector.multi_reduction <add>, %6, %cst_9 [0] : vector<98x128xf32> to vector<128xf32>
    %8 = vector.shape_cast %7 : vector<128xf32> to vector<1x128xf32>
    %9 = arith.addf %4, %8 : vector<1x128xf32>
    %10 = arith.mulf %6, %6 : vector<98x128xf32>
    %cst_10 = arith.constant dense<0.000000e+00> : vector<128xf32>
    %11 = vector.multi_reduction <add>, %10, %cst_10 [0] : vector<98x128xf32> to vector<128xf32>
    %12 = vector.shape_cast %11 : vector<128xf32> to vector<1x128xf32>
    %13 = arith.addf %5, %12 : vector<1x128xf32>
    %cst_11 = arith.constant 0.0102040814 : f32
    %14 = vector.broadcast %cst_11 : f32 to vector<1x128xf32>
    %15 = arith.mulf %9, %14 : vector<1x128xf32>
    %cst_12 = arith.constant 0.0102040814 : f32
    %16 = vector.broadcast %cst_12 : f32 to vector<1x128xf32>
    %17 = arith.mulf %13, %16 : vector<1x128xf32>
    %18 = arith.mulf %15, %15 : vector<1x128xf32>
    %19 = arith.subf %17, %18 : vector<1x128xf32>
    %cst_13 = arith.constant 0.000000e+00 : f32
    %20 = vector.broadcast %cst_13 : f32 to vector<1x128xf32>
    %21 = arith.maximumf %19, %20 : vector<1x128xf32>
    %c0_14 = arith.constant 0 : index
    %c0_15 = arith.constant 0 : index
    %22 = vector.load %arg2[%c0_14, %c0_15] : memref<1x128xf32, #tpu.memory_space<vmem>>, vector<1x128xf32>
    %cst_16 = arith.constant 9.99999974E-6 : f32
    %23 = vector.broadcast %cst_16 : f32 to vector<1x128xf32>
    %24 = arith.addf %21, %23 : vector<1x128xf32>
    %25 = math.rsqrt %24 : vector<1x128xf32>
    %26 = arith.mulf %22, %25 : vector<1x128xf32>
    %c0_17 = arith.constant 0 : index
    %c0_18 = arith.constant 0 : index
    %27 = vector.load %arg3[%c0_17, %c0_18] : memref<1x128xf32, #tpu.memory_space<vmem>>, vector<1x128xf32>
    %28 = arith.mulf %15, %26 : vector<1x128xf32>
    %29 = arith.subf %27, %28 : vector<1x128xf32>
    %c0_19 = arith.constant 0 : index
    %c0_20 = arith.constant 0 : index
    %30 = vector.load %arg5[%c0_19, %c0_20] : memref<98x128xf32, #tpu.memory_space<vmem>>, vector<98x128xf32>
    %31 = vector.broadcast %26 : vector<1x128xf32> to vector<98x128xf32>
    %32 = arith.mulf %30, %31 : vector<98x128xf32>
    %33 = vector.broadcast %29 : vector<1x128xf32> to vector<98x128xf32>
    %34 = arith.addf %32, %33 : vector<98x128xf32>
    %cst_21 = arith.constant 0.000000e+00 : f32
    %35 = vector.broadcast %cst_21 : f32 to vector<98x128xf32>
    %36 = arith.cmpf oge, %34, %35 : vector<98x128xf32>
    %cst_22 = arith.constant 2.000000e-01 : f32
    %37 = vector.broadcast %cst_22 : f32 to vector<98x128xf32>
    %38 = arith.mulf %37, %34 : vector<98x128xf32>
    %39 = arith.select %36, %34, %38 : vector<98x128xi1>, vector<98x128xf32>
    %c0_23 = arith.constant 0 : index
    %c0_24 = arith.constant 0 : index
    %40 = vector.load %arg4[%c0_23, %c0_24] : memref<98x128xf32, #tpu.memory_space<vmem>>, vector<98x128xf32>
    tpu.vector_store %arg4[%c0_23, %c0_24], %39 {strides = array<i32>} : memref<98x128xf32, #tpu.memory_space<vmem>>, vector<98x128xf32>,
    return
  }
}

module attributes {stable_mosaic.version = 11 : i64} {
  func.func @_gemm_bn_act_kernel(%arg0: memref<98x1152xbf16, #tpu.memory_space<vmem>>, %arg1: memref<1152x256xbf16, #tpu.memory_space<vmem>>, %arg2: memref<1x64xf32, #tpu.memory_space<vmem>>, %arg3: memref<1x64xf32, #tpu.memory_space<vmem>>, %arg4: memref<98x256xbf16, #tpu.memory_space<vmem>>, %arg5: memref<98x256xf32, #tpu.memory_space<vmem>>) attributes {dimension_semantics = [], scalar_prefetch = 0 : i64, scratch_operands = 1 : i64, tpu.core_type = #tpu.core_type<tc>} {
    %c0 = arith.constant 0 : index
    %c0_0 = arith.constant 0 : index
    %0 = vector.load %arg0[%c0, %c0_0] : memref<98x1152xbf16, #tpu.memory_space<vmem>>, vector<98x1152xbf16>
    %c0_1 = arith.constant 0 : index
    %c0_2 = arith.constant 0 : index
    %1 = vector.load %arg1[%c0_1, %c0_2] : memref<1152x256xbf16, #tpu.memory_space<vmem>>, vector<1152x256xbf16>
    %cst = arith.constant dense<0.000000e+00> : vector<98x256xf32>
    %2 = tpu.matmul %0, %1, %cst {dimension_numbers = #tpu.dot_dimension_numbers<[1], [0], [0], [1], [0, 0, 1, 1], [], []>} : vector<98x1152xbf16>, vector<1152x256xbf16>, vector<98x256xf32> -> vector<98x256xf32>
    %c0_3 = arith.constant 0 : index
    %c0_4 = arith.constant 0 : index
    %3 = vector.load %arg5[%c0_3, %c0_4] : memref<98x256xf32, #tpu.memory_space<vmem>>, vector<98x256xf32>
    tpu.vector_store %arg5[%c0_3, %c0_4], %2 {strides = array<i32>} : memref<98x256xf32, #tpu.memory_space<vmem>>, vector<98x256xf32>,
    %cst_5 = arith.constant 0.000000e+00 : f32
    %4 = vector.broadcast %cst_5 : f32 to vector<1x64xf32>
    %cst_6 = arith.constant 0.000000e+00 : f32
    %5 = vector.broadcast %cst_6 : f32 to vector<1x64xf32>
    %c0_7 = arith.constant 0 : index
    %c0_8 = arith.constant 0 : index
    %6 = vector.load %arg5[%c0_7, %c0_8] : memref<98x256xf32, #tpu.memory_space<vmem>>, vector<98x64xf32>
    %cst_9 = arith.constant dense<0.000000e+00> : vector<64xf32>
    %7 = vector.multi_reduction <add>, %6, %cst_9 [0] : vector<98x64xf32> to vector<64xf32>
    %8 = vector.shape_cast %7 : vector<64xf32> to vector<1x64xf32>
    %9 = arith.addf %4, %8 : vector<1x64xf32>
    %10 = arith.mulf %6, %6 : vector<98x64xf32>
    %cst_10 = arith.constant dense<0.000000e+00> : vector<64xf32>
    %11 = vector.multi_reduction <add>, %10, %cst_10 [0] : vector<98x64xf32> to vector<64xf32>
    %12 = vector.shape_cast %11 : vector<64xf32> to vector<1x64xf32>
    %13 = arith.addf %5, %12 : vector<1x64xf32>
    %c0_11 = arith.constant 0 : index
    %c64 = arith.constant 64 : index
    %14 = vector.load %arg5[%c0_11, %c64] : memref<98x256xf32, #tpu.memory_space<vmem>>, vector<98x64xf32>
    %cst_12 = arith.constant dense<0.000000e+00> : vector<64xf32>
    %15 = vector.multi_reduction <add>, %14, %cst_12 [0] : vector<98x64xf32> to vector<64xf32>
    %16 = vector.shape_cast %15 : vector<64xf32> to vector<1x64xf32>
    %17 = arith.addf %9, %16 : vector<1x64xf32>
    %18 = arith.mulf %14, %14 : vector<98x64xf32>
    %cst_13 = arith.constant dense<0.000000e+00> : vector<64xf32>
    %19 = vector.multi_reduction <add>, %18, %cst_13 [0] : vector<98x64xf32> to vector<64xf32>
    %20 = vector.shape_cast %19 : vector<64xf32> to vector<1x64xf32>
    %21 = arith.addf %13, %20 : vector<1x64xf32>
    %c0_14 = arith.constant 0 : index
    %c128 = arith.constant 128 : index
    %22 = vector.load %arg5[%c0_14, %c128] : memref<98x256xf32, #tpu.memory_space<vmem>>, vector<98x64xf32>
    %cst_15 = arith.constant dense<0.000000e+00> : vector<64xf32>
    %23 = vector.multi_reduction <add>, %22, %cst_15 [0] : vector<98x64xf32> to vector<64xf32>
    %24 = vector.shape_cast %23 : vector<64xf32> to vector<1x64xf32>
    %25 = arith.addf %17, %24 : vector<1x64xf32>
    %26 = arith.mulf %22, %22 : vector<98x64xf32>
    %cst_16 = arith.constant dense<0.000000e+00> : vector<64xf32>
    %27 = vector.multi_reduction <add>, %26, %cst_16 [0] : vector<98x64xf32> to vector<64xf32>
    %28 = vector.shape_cast %27 : vector<64xf32> to vector<1x64xf32>
    %29 = arith.addf %21, %28 : vector<1x64xf32>
    %c0_17 = arith.constant 0 : index
    %c192 = arith.constant 192 : index
    %30 = vector.load %arg5[%c0_17, %c192] : memref<98x256xf32, #tpu.memory_space<vmem>>, vector<98x64xf32>
    %cst_18 = arith.constant dense<0.000000e+00> : vector<64xf32>
    %31 = vector.multi_reduction <add>, %30, %cst_18 [0] : vector<98x64xf32> to vector<64xf32>
    %32 = vector.shape_cast %31 : vector<64xf32> to vector<1x64xf32>
    %33 = arith.addf %25, %32 : vector<1x64xf32>
    %34 = arith.mulf %30, %30 : vector<98x64xf32>
    %cst_19 = arith.constant dense<0.000000e+00> : vector<64xf32>
    %35 = vector.multi_reduction <add>, %34, %cst_19 [0] : vector<98x64xf32> to vector<64xf32>
    %36 = vector.shape_cast %35 : vector<64xf32> to vector<1x64xf32>
    %37 = arith.addf %29, %36 : vector<1x64xf32>
    %cst_20 = arith.constant 0.00255102036 : f32
    %38 = vector.broadcast %cst_20 : f32 to vector<1x64xf32>
    %39 = arith.mulf %33, %38 : vector<1x64xf32>
    %cst_21 = arith.constant 0.00255102036 : f32
    %40 = vector.broadcast %cst_21 : f32 to vector<1x64xf32>
    %41 = arith.mulf %37, %40 : vector<1x64xf32>
    %42 = arith.mulf %39, %39 : vector<1x64xf32>
    %43 = arith.subf %41, %42 : vector<1x64xf32>
    %cst_22 = arith.constant 0.000000e+00 : f32
    %44 = vector.broadcast %cst_22 : f32 to vector<1x64xf32>
    %45 = arith.maximumf %43, %44 : vector<1x64xf32>
    %c0_23 = arith.constant 0 : index
    %c0_24 = arith.constant 0 : index
    %46 = vector.load %arg2[%c0_23, %c0_24] : memref<1x64xf32, #tpu.memory_space<vmem>>, vector<1x64xf32>
    %cst_25 = arith.constant 9.99999974E-6 : f32
    %47 = vector.broadcast %cst_25 : f32 to vector<1x64xf32>
    %48 = arith.addf %45, %47 : vector<1x64xf32>
    %49 = math.rsqrt %48 : vector<1x64xf32>
    %50 = arith.mulf %46, %49 : vector<1x64xf32>
    %c0_26 = arith.constant 0 : index
    %c0_27 = arith.constant 0 : index
    %51 = vector.load %arg3[%c0_26, %c0_27] : memref<1x64xf32, #tpu.memory_space<vmem>>, vector<1x64xf32>
    %52 = arith.mulf %39, %50 : vector<1x64xf32>
    %53 = arith.subf %51, %52 : vector<1x64xf32>
    %c0_28 = arith.constant 0 : index
    %c0_29 = arith.constant 0 : index
    %54 = vector.load %arg5[%c0_28, %c0_29] : memref<98x256xf32, #tpu.memory_space<vmem>>, vector<98x64xf32>
    %55 = vector.broadcast %50 : vector<1x64xf32> to vector<98x64xf32>
    %56 = arith.mulf %54, %55 : vector<98x64xf32>
    %57 = vector.broadcast %53 : vector<1x64xf32> to vector<98x64xf32>
    %58 = arith.addf %56, %57 : vector<98x64xf32>
    %cst_30 = arith.constant 0.000000e+00 : f32
    %59 = vector.broadcast %cst_30 : f32 to vector<98x64xf32>
    %60 = arith.maximumf %58, %59 : vector<98x64xf32>
    %61 = arith.truncf %60 : vector<98x64xf32> to vector<98x64xbf16>
    %c0_31 = arith.constant 0 : index
    %c0_32 = arith.constant 0 : index
    %62 = vector.load %arg4[%c0_31, %c0_32] : memref<98x256xbf16, #tpu.memory_space<vmem>>, vector<98x64xbf16>
    tpu.vector_store %arg4[%c0_31, %c0_32], %61 {strides = array<i32>} : memref<98x256xbf16, #tpu.memory_space<vmem>>, vector<98x64xbf16>,
    %c0_33 = arith.constant 0 : index
    %c64_34 = arith.constant 64 : index
    %63 = vector.load %arg5[%c0_33, %c64_34] : memref<98x256xf32, #tpu.memory_space<vmem>>, vector<98x64xf32>
    %64 = vector.broadcast %50 : vector<1x64xf32> to vector<98x64xf32>
    %65 = arith.mulf %63, %64 : vector<98x64xf32>
    %66 = vector.broadcast %53 : vector<1x64xf32> to vector<98x64xf32>
    %67 = arith.addf %65, %66 : vector<98x64xf32>
    %cst_35 = arith.constant 0.000000e+00 : f32
    %68 = vector.broadcast %cst_35 : f32 to vector<98x64xf32>
    %69 = arith.maximumf %67, %68 : vector<98x64xf32>
    %70 = arith.truncf %69 : vector<98x64xf32> to vector<98x64xbf16>
    %c0_36 = arith.constant 0 : index
    %c64_37 = arith.constant 64 : index
    %71 = vector.load %arg4[%c0_36, %c64_37] : memref<98x256xbf16, #tpu.memory_space<vmem>>, vector<98x64xbf16>
    tpu.vector_store %arg4[%c0_36, %c64_37], %70 {strides = array<i32>} : memref<98x256xbf16, #tpu.memory_space<vmem>>, vector<98x64xbf16>,
    %c0_38 = arith.constant 0 : index
    %c128_39 = arith.constant 128 : index
    %72 = vector.load %arg5[%c0_38, %c128_39] : memref<98x256xf32, #tpu.memory_space<vmem>>, vector<98x64xf32>
    %73 = vector.broadcast %50 : vector<1x64xf32> to vector<98x64xf32>
    %74 = arith.mulf %72, %73 : vector<98x64xf32>
    %75 = vector.broadcast %53 : vector<1x64xf32> to vector<98x64xf32>
    %76 = arith.addf %74, %75 : vector<98x64xf32>
    %cst_40 = arith.constant 0.000000e+00 : f32
    %77 = vector.broadcast %cst_40 : f32 to vector<98x64xf32>
    %78 = arith.maximumf %76, %77 : vector<98x64xf32>
    %79 = arith.truncf %78 : vector<98x64xf32> to vector<98x64xbf16>
    %c0_41 = arith.constant 0 : index
    %c128_42 = arith.constant 128 : index
    %80 = vector.load %arg4[%c0_41, %c128_42] : memref<98x256xbf16, #tpu.memory_space<vmem>>, vector<98x64xbf16>
    tpu.vector_store %arg4[%c0_41, %c128_42], %79 {strides = array<i32>} : memref<98x256xbf16, #tpu.memory_space<vmem>>, vector<98x64xbf16>,
    %c0_43 = arith.constant 0 : index
    %c192_44 = arith.constant 192 : index
    %81 = vector.load %arg5[%c0_43, %c192_44] : memref<98x256xf32, #tpu.memory_space<vmem>>, vector<98x64xf32>
    %82 = vector.broadcast %50 : vector<1x64xf32> to vector<98x64xf32>
    %83 = arith.mulf %81, %82 : vector<98x64xf32>
    %84 = vector.broadcast %53 : vector<1x64xf32> to vector<98x64xf32>
    %85 = arith.addf %83, %84 : vector<98x64xf32>
    %cst_45 = arith.constant 0.000000e+00 : f32
    %86 = vector.broadcast %cst_45 : f32 to vector<98x64xf32>
    %87 = arith.maximumf %85, %86 : vector<98x64xf32>
    %88 = arith.truncf %87 : vector<98x64xf32> to vector<98x64xbf16>
    %c0_46 = arith.constant 0 : index
    %c192_47 = arith.constant 192 : index
    %89 = vector.load %arg4[%c0_46, %c192_47] : memref<98x256xbf16, #tpu.memory_space<vmem>>, vector<98x64xbf16>
    tpu.vector_store %arg4[%c0_46, %c192_47], %88 {strides = array<i32>} : memref<98x256xbf16, #tpu.memory_space<vmem>>, vector<98x64xbf16>,
    return
  }
}

module attributes {stable_mosaic.version = 11 : i64} {
  func.func @_gemm_bias_act_kernel(%arg0: memref<392x576xbf16, #tpu.memory_space<vmem>>, %arg1: memref<576x4xbf16, #tpu.memory_space<vmem>>, %arg2: memref<1x4xf32, #tpu.memory_space<vmem>>, %arg3: memref<392x4xf32, #tpu.memory_space<vmem>>) attributes {dimension_semantics = [], scalar_prefetch = 0 : i64, scratch_operands = 0 : i64, tpu.core_type = #tpu.core_type<tc>} {
    %c0 = arith.constant 0 : index
    %c0_0 = arith.constant 0 : index
    %0 = vector.load %arg0[%c0, %c0_0] : memref<392x576xbf16, #tpu.memory_space<vmem>>, vector<392x576xbf16>
    %c0_1 = arith.constant 0 : index
    %c0_2 = arith.constant 0 : index
    %1 = vector.load %arg1[%c0_1, %c0_2] : memref<576x4xbf16, #tpu.memory_space<vmem>>, vector<576x4xbf16>
    %cst = arith.constant dense<0.000000e+00> : vector<392x4xf32>
    %2 = tpu.matmul %0, %1, %cst {dimension_numbers = #tpu.dot_dimension_numbers<[1], [0], [0], [1], [0, 0, 1, 1], [], []>} : vector<392x576xbf16>, vector<576x4xbf16>, vector<392x4xf32> -> vector<392x4xf32>
    %c0_3 = arith.constant 0 : index
    %c0_4 = arith.constant 0 : index
    %3 = vector.load %arg2[%c0_3, %c0_4] : memref<1x4xf32, #tpu.memory_space<vmem>>, vector<1x4xf32>
    %4 = vector.broadcast %3 : vector<1x4xf32> to vector<392x4xf32>
    %5 = arith.addf %2, %4 : vector<392x4xf32>
    %cst_5 = arith.constant 0.000000e+00 : f32
    %6 = vector.broadcast %cst_5 : f32 to vector<392x4xf32>
    %7 = arith.subf %6, %5 : vector<392x4xf32>
    %8 = math.exp %7 : vector<392x4xf32>
    %cst_6 = arith.constant 1.000000e+00 : f32
    %9 = vector.broadcast %cst_6 : f32 to vector<392x4xf32>
    %10 = arith.addf %9, %8 : vector<392x4xf32>
    %cst_7 = arith.constant 1.000000e+00 : f32
    %11 = vector.broadcast %cst_7 : f32 to vector<392x4xf32>
    %12 = arith.divf %11, %10 : vector<392x4xf32>
    %c0_8 = arith.constant 0 : index
    %c0_9 = arith.constant 0 : index
    %13 = vector.load %arg3[%c0_8, %c0_9] : memref<392x4xf32, #tpu.memory_space<vmem>>, vector<392x4xf32>
    tpu.vector_store %arg3[%c0_8, %c0_9], %12 {strides = array<i32>} : memref<392x4xf32, #tpu.memory_space<vmem>>, vector<392x4xf32>,
    return
  }
}

module attributes {stable_mosaic.version = 11 : i64} {
  func.func @_dis_tail_kernel(%arg0: memref<98x1024xbf16, #tpu.memory_space<vmem>>, %arg1: memref<1024x128xbf16, #tpu.memory_space<vmem>>, %arg2: memref<1x128xf32, #tpu.memory_space<vmem>>, %arg3: memref<1x128xf32, #tpu.memory_space<vmem>>, %arg4: memref<98x128xf32, #tpu.memory_space<vmem>>, %arg5: memref<1x1xf32, #tpu.memory_space<vmem>>, %arg6: memref<2x98xf32, #tpu.memory_space<vmem>>, %arg7: memref<2x1xf32, #tpu.memory_space<vmem>>, %arg8: memref<98x128xf32, #tpu.memory_space<vmem>>) attributes {dimension_semantics = [], scalar_prefetch = 0 : i64, scratch_operands = 1 : i64, tpu.core_type = #tpu.core_type<tc>} {
    %c0 = arith.constant 0 : index
    %c0_0 = arith.constant 0 : index
    %0 = vector.load %arg0[%c0, %c0_0] : memref<98x1024xbf16, #tpu.memory_space<vmem>>, vector<98x1024xbf16>
    %c0_1 = arith.constant 0 : index
    %c0_2 = arith.constant 0 : index
    %1 = vector.load %arg1[%c0_1, %c0_2] : memref<1024x128xbf16, #tpu.memory_space<vmem>>, vector<1024x128xbf16>
    %cst = arith.constant dense<0.000000e+00> : vector<98x128xf32>
    %2 = tpu.matmul %0, %1, %cst {dimension_numbers = #tpu.dot_dimension_numbers<[1], [0], [0], [1], [0, 0, 1, 1], [], []>} : vector<98x1024xbf16>, vector<1024x128xbf16>, vector<98x128xf32> -> vector<98x128xf32>
    %c0_3 = arith.constant 0 : index
    %c0_4 = arith.constant 0 : index
    %3 = vector.load %arg8[%c0_3, %c0_4] : memref<98x128xf32, #tpu.memory_space<vmem>>, vector<98x128xf32>
    tpu.vector_store %arg8[%c0_3, %c0_4], %2 {strides = array<i32>} : memref<98x128xf32, #tpu.memory_space<vmem>>, vector<98x128xf32>,
    %c0_5 = arith.constant 0 : index
    %c0_6 = arith.constant 0 : index
    %4 = vector.load %arg8[%c0_5, %c0_6] : memref<98x128xf32, #tpu.memory_space<vmem>>, vector<98x128xf32>
    %cst_7 = arith.constant dense<0.000000e+00> : vector<128xf32>
    %5 = vector.multi_reduction <add>, %4, %cst_7 [0] : vector<98x128xf32> to vector<128xf32>
    %6 = vector.shape_cast %5 : vector<128xf32> to vector<1x128xf32>
    %7 = arith.mulf %4, %4 : vector<98x128xf32>
    %cst_8 = arith.constant dense<0.000000e+00> : vector<128xf32>
    %8 = vector.multi_reduction <add>, %7, %cst_8 [0] : vector<98x128xf32> to vector<128xf32>
    %9 = vector.shape_cast %8 : vector<128xf32> to vector<1x128xf32>
    %cst_9 = arith.constant 0.0102040814 : f32
    %10 = vector.broadcast %cst_9 : f32 to vector<1x128xf32>
    %11 = arith.mulf %6, %10 : vector<1x128xf32>
    %cst_10 = arith.constant 0.0102040814 : f32
    %12 = vector.broadcast %cst_10 : f32 to vector<1x128xf32>
    %13 = arith.mulf %9, %12 : vector<1x128xf32>
    %14 = arith.mulf %11, %11 : vector<1x128xf32>
    %15 = arith.subf %13, %14 : vector<1x128xf32>
    %cst_11 = arith.constant 0.000000e+00 : f32
    %16 = vector.broadcast %cst_11 : f32 to vector<1x128xf32>
    %17 = arith.maximumf %15, %16 : vector<1x128xf32>
    %c0_12 = arith.constant 0 : index
    %c0_13 = arith.constant 0 : index
    %18 = vector.load %arg2[%c0_12, %c0_13] : memref<1x128xf32, #tpu.memory_space<vmem>>, vector<1x128xf32>
    %cst_14 = arith.constant 9.99999974E-6 : f32
    %19 = vector.broadcast %cst_14 : f32 to vector<1x128xf32>
    %20 = arith.addf %17, %19 : vector<1x128xf32>
    %21 = math.rsqrt %20 : vector<1x128xf32>
    %22 = arith.mulf %18, %21 : vector<1x128xf32>
    %c0_15 = arith.constant 0 : index
    %c0_16 = arith.constant 0 : index
    %23 = vector.load %arg3[%c0_15, %c0_16] : memref<1x128xf32, #tpu.memory_space<vmem>>, vector<1x128xf32>
    %24 = arith.mulf %11, %22 : vector<1x128xf32>
    %25 = arith.subf %23, %24 : vector<1x128xf32>
    %26 = vector.broadcast %22 : vector<1x128xf32> to vector<98x128xf32>
    %27 = arith.mulf %4, %26 : vector<98x128xf32>
    %28 = vector.broadcast %25 : vector<1x128xf32> to vector<98x128xf32>
    %29 = arith.addf %27, %28 : vector<98x128xf32>
    %cst_17 = arith.constant 0.000000e+00 : f32
    %30 = vector.broadcast %cst_17 : f32 to vector<98x128xf32>
    %31 = arith.cmpf oge, %29, %30 : vector<98x128xf32>
    %cst_18 = arith.constant 2.000000e-01 : f32
    %32 = vector.broadcast %cst_18 : f32 to vector<98x128xf32>
    %33 = arith.mulf %32, %29 : vector<98x128xf32>
    %34 = arith.select %31, %29, %33 : vector<98x128xi1>, vector<98x128xf32>
    %c0_19 = arith.constant 0 : index
    %c0_20 = arith.constant 0 : index
    %35 = vector.load %arg4[%c0_19, %c0_20] : memref<98x128xf32, #tpu.memory_space<vmem>>, vector<98x128xf32>
    %36 = arith.mulf %34, %35 : vector<98x128xf32>
    %c0_21 = arith.constant 0 : index
    %c0_22 = arith.constant 0 : index
    %37 = vector.load %arg6[%c0_21, %c0_22] : memref<2x98xf32, #tpu.memory_space<vmem>>, vector<2x98xf32>
    %cst_23 = arith.constant dense<0.000000e+00> : vector<2x128xf32>
    %38 = tpu.matmul %37, %36, %cst_23 {dimension_numbers = #tpu.dot_dimension_numbers<[1], [0], [0], [1], [0, 0, 1, 1], [], []>} : vector<2x98xf32>, vector<98x128xf32>, vector<2x128xf32> -> vector<2x128xf32>
    %cst_24 = arith.constant dense<0.000000e+00> : vector<2xf32>
    %39 = vector.multi_reduction <add>, %38, %cst_24 [1] : vector<2x128xf32> to vector<2xf32>
    %40 = vector.shape_cast %39 : vector<2xf32> to vector<2x1xf32>
    %c0_25 = arith.constant 0 : index
    %c0_26 = arith.constant 0 : index
    %41 = vector.load %arg5[%c0_25, %c0_26] : memref<1x1xf32, #tpu.memory_space<vmem>>, vector<1x1xf32>
    %42 = vector.broadcast %41 : vector<1x1xf32> to vector<2x1xf32>
    %43 = arith.addf %40, %42 : vector<2x1xf32>
    %c0_27 = arith.constant 0 : index
    %c0_28 = arith.constant 0 : index
    %44 = vector.load %arg7[%c0_27, %c0_28] : memref<2x1xf32, #tpu.memory_space<vmem>>, vector<2x1xf32>
    tpu.vector_store %arg7[%c0_27, %c0_28], %43 {strides = array<i32>} : memref<2x1xf32, #tpu.memory_space<vmem>>, vector<2x1xf32>,
    return
  }
}

module attributes {stable_mosaic.version = 11 : i64} {
  func.func @_gemm_bias_act_kernel(%arg0: memref<392x16xbf16, #tpu.memory_space<vmem>>, %arg1: memref<16x64xbf16, #tpu.memory_space<vmem>>, %arg2: memref<1x64xf32, #tpu.memory_space<vmem>>, %arg3: memref<392x64xbf16, #tpu.memory_space<vmem>>) attributes {dimension_semantics = [], scalar_prefetch = 0 : i64, scratch_operands = 0 : i64, tpu.core_type = #tpu.core_type<tc>} {
    %c0 = arith.constant 0 : index
    %c0_0 = arith.constant 0 : index
    %0 = vector.load %arg0[%c0, %c0_0] : memref<392x16xbf16, #tpu.memory_space<vmem>>, vector<392x16xbf16>
    %c0_1 = arith.constant 0 : index
    %c0_2 = arith.constant 0 : index
    %1 = vector.load %arg1[%c0_1, %c0_2] : memref<16x64xbf16, #tpu.memory_space<vmem>>, vector<16x64xbf16>
    %cst = arith.constant dense<0.000000e+00> : vector<392x64xf32>
    %2 = tpu.matmul %0, %1, %cst {dimension_numbers = #tpu.dot_dimension_numbers<[1], [0], [0], [1], [0, 0, 1, 1], [], []>} : vector<392x16xbf16>, vector<16x64xbf16>, vector<392x64xf32> -> vector<392x64xf32>
    %c0_3 = arith.constant 0 : index
    %c0_4 = arith.constant 0 : index
    %3 = vector.load %arg2[%c0_3, %c0_4] : memref<1x64xf32, #tpu.memory_space<vmem>>, vector<1x64xf32>
    %4 = vector.broadcast %3 : vector<1x64xf32> to vector<392x64xf32>
    %5 = arith.addf %2, %4 : vector<392x64xf32>
    %cst_5 = arith.constant 0.000000e+00 : f32
    %6 = vector.broadcast %cst_5 : f32 to vector<392x64xf32>
    %7 = arith.cmpf oge, %5, %6 : vector<392x64xf32>
    %cst_6 = arith.constant 2.000000e-01 : f32
    %8 = vector.broadcast %cst_6 : f32 to vector<392x64xf32>
    %9 = arith.mulf %8, %5 : vector<392x64xf32>
    %10 = arith.select %7, %5, %9 : vector<392x64xi1>, vector<392x64xf32>
    %11 = arith.truncf %10 : vector<392x64xf32> to vector<392x64xbf16>
    %c0_7 = arith.constant 0 : index
    %c0_8 = arith.constant 0 : index
    %12 = vector.load %arg3[%c0_7, %c0_8] : memref<392x64xbf16, #tpu.memory_space<vmem>>, vector<392x64xbf16>
    tpu.vector_store %arg3[%c0_7, %c0_8], %11 {strides = array<i32>} : memref<392x64xbf16, #tpu.memory_space<vmem>>, vector<392x64xbf16>,
    return
  }
}

</mosaic_0001>

<bundles_post_ra>
// kernel: ganomaly_forward.6
= control target key start
LH: loop header
LB: loop body
LE: loop exit
PB: predicated region body
PF: predicated region fallthrough
CT: control target
= control target key end

     0   :  { %8 = vsyncpa [#allocation3], 0  ;;  %s1745_s0 = inlined_call_operand.vmem [shape: bf16[392,16], index: 0, kind: input, shape index: {}]   ;;  %s1746_s1 = inlined_call_operand.hbm [shape: bf16[16,64], index: 1, kind: input, shape index: {}]   ;;  %s1747_s2 = inlined_call_operand.hbm [shape: f32[1,64], index: 2, kind: input, shape index: {}]   ;;  %s1748_s3 = inlined_call_operand.vmem [shape: bf16[392,64], index: 3, kind: output, shape index: {}]  }
   0x1   :  { %9 = vsyncpa [#allocation5], 0  ;;  %s1296_s12 = smov [#allocation2]   ;;  %s1248_s16 = scalar_lea.hbm %s1746_s1, 128 }
   0x2   :  { %s17_s13 = sshll.u32 %s1296_s12, 4  ;;  %p1249_p0 = scmp.ne.s32.totalorder %s1746_s1, %s1248_s16  ;;  %s18_s13 = int_to_ptr.vmem [resolvable:$true] %s17_s13 }
   0x3   :  { %p1252_p1 = scmp.lt.u32.totalorder %s1248_s16, %s1746_s1 }
   0x5   :  { %p1254_p2 = pnand %p1252_p1, %p1249_p0 }
   0x7   :  { %1257 = shalt.err (!%p1254_p2)
}
   0x8   :  { %s1258_s21 = scalar_lea.vmem %s18_s13, 128  ;;  %p1263_p4 = scmp.lt.s32.totalorder %s18_s13, %s18_s13 }
   0x9   :  { %p1259_p3 = scmp.ne.s32.totalorder %s18_s13, %s1258_s21  ;;  %p1264_p5 = scmp.lt.s32.totalorder %s1258_s21, %s1258_s21 }
   0xb   :  { %p1265_p6 = por %p1264_p5, %p1263_p4 }
   0xd   :  { %p1266_p7 = pnand %p1265_p6, %p1259_p3 }
   0xf   :  { %1269 = shalt.err (!%p1266_p7)
}
  0x10   :  { %s1297_s22 = smov 64   ;;  %s1298_s23 = smov 4  }
  0x11   :  { %23 = dma.hbm_to_vmem [thread:$0]  %s1746_s1, 128, %s18_s13, [#allocation3], %s1297_s22, %s1297_s22, %s1298_s23  }
  0x12   :  { %s1299_s26 = smov [#allocation4]   ;;  %s1270_s30 = scalar_lea.hbm %s1747_s2, 16 }
  0x13   :  { %s30_s27 = sshll.u32 %s1299_s26, 4  ;;  %p1271_p8 = scmp.ne.s32.totalorder %s1747_s2, %s1270_s30  ;;  %s31_s27 = int_to_ptr.vmem [resolvable:$true] %s30_s27 }
  0x14   :  { %p1274_p9 = scmp.lt.u32.totalorder %s1270_s30, %s1747_s2 }
  0x16   :  { %p1276_p10 = pnand %p1274_p9, %p1271_p8 }
  0x18   :  { %1279 = shalt.err (!%p1276_p10)
}
  0x19   :  { %s1280_s8 = scalar_lea.vmem %s31_s27, 16  ;;  %s1284_s1 = scalar_lea.vmem %s31_s27, 32 }
  0x1a   :  { %p1281_p11 = scmp.ne.s32.totalorder %s31_s27, %s1280_s8  ;;  %p1285_p12 = scmp.lt.s32.totalorder %s31_s27, %s31_s27 }
  0x1b   :  { %p1286_p13 = scmp.lt.s32.totalorder %s1284_s1, %s1280_s8 }
  0x1d   :  { %p1287_p0 = por %p1286_p13, %p1285_p12 }
  0x1f   :  { %p1288_p1 = pnand %p1287_p0, %p1281_p11 }
  0x21   :  { %1291 = shalt.err (!%p1288_p1)
}
  0x22   :  { %33 = dma.hbm_to_vmem [thread:$0]  %s1747_s2, 16, %s31_s27, [#allocation5]  }
  0x23   :  { %1292 = dma.done.wait [#allocation3], 128  }
  0x24   :  { %1293 = vsyncadd [#allocation3], 4294967168 }
  0x25   :  { %1294 = dma.done.wait [#allocation5], 16  }
  0x26   :  { %1295 = vsyncadd [#allocation5], 4294967280  ;;  %v1300_v0 = vmov 0.0   ;;  %vm1301_vm0 = vmmov 0   ;;  %v1222_v1 = vld [vmem:[#allocation2] sm:$0xff]   ;;  %vm228_vm1 = vcmask 130048  }
  0x27   :  { %1112 = vmatprep.subr.bf16.mxu0 %v1300_v0  ;;  %1114 = vmatprep.mubr.msk.bf16.mxu0 %vm1301_vm0, %v1300_v0  ;;  %v1223_v2 = vld [vmem:[%s1745_s0] sm:$0xff]   ;;  %v1224_v3 = vld [vmem:[%s1745_s0 + $0x68] sm:$0xff]   ;;  %v1226_v5 = vld [vmem:[%s1745_s0 + $0x70] sm:$0xff]   ;;  %vm880_vm4 = vcmask 519168  }
  0x28   :  { %1214 = vmatprep.subr.bf16.mxu1 %v1300_v0  ;;  %1166 = vmatprep.mubr.msk.bf16.mxu1 %vm1301_vm0, %v1300_v0  ;;  %v1225_v4 = vld [vmem:[%s1745_s0 + $0x8] sm:$0xff]   ;;  %v1227_v6 = vld [vmem:[%s1745_s0 + $0x10] sm:$0xff]   ;;  %v1228_v7 = vld [vmem:[%s1745_s0 + $0x78] sm:$0xff]  }
  0x29   :  { %1113 = vmatpush3.bf16.msra.mxu0 %v1222_v1  ;;  %1215 = vmatpush3.bf16.msra.mxu1 %v1222_v1  ;;  %v1229_v8 = vld [vmem:[%s1745_s0 + $0x18] sm:$0xff]   ;;  %v1230_v9 = vld [vmem:[%s1745_s0 + $0x80] sm:$0xff]   ;;  %v1232_v11 = vld [vmem:[%s1745_s0 + $0x88] sm:$0xff]  }
  0x2a   :  { %v1231_v10 = vld [vmem:[%s1745_s0 + $0x20] sm:$0xff]   ;;  %v1233_v12 = vld [vmem:[%s1745_s0 + $0x28] sm:$0xff]   ;;  %v1234_v13 = vld [vmem:[%s1745_s0 + $0x90] sm:$0xff]  }
  0x2b   :  { %v1235_v14 = vld [vmem:[%s1745_s0 + $0x30] sm:$0xff]   ;;  %v1236_v15 = vld [vmem:[%s1745_s0 + $0x98] sm:$0xff]   ;;  %v1238_v17 = vld [vmem:[%s1745_s0 + $0xa0] sm:$0xff]  }
  0x2c   :  { %1115 = vmatmul.mubr.msk.bf16.vlgmr.msra.gmra.mrb[0].mxu0 %vm228_vm1, %v1223_v2  ;;  %1167 = vmatmul.mubr.msk.bf16.vlgmr.msra.gmra.mrb[0].mxu1 %vm228_vm1, %v1224_v3  ;;  %v1237_v16 = vld [vmem:[%s1745_s0 + $0x38] sm:$0xff]   ;;  %v1239_v18 = vld [vmem:[%s1745_s0 + $0x40] sm:$0xff]   ;;  %v1240_v19 = vld [vmem:[%s1745_s0 + $0xa8] sm:$0xff]  }
  0x2d   :  { %1118 = vmatprep.mubr.msk.bf16.mxu0 %vm1301_vm0, %v1300_v0  ;;  %1170 = vmatprep.mubr.msk.bf16.mxu1 %vm1301_vm0, %v1300_v0  ;;  %v1241_v20 = vld [vmem:[%s1745_s0 + $0x48] sm:$0xff]   ;;  %v1242_v21 = vld [vmem:[%s1745_s0 + $0xb0] sm:$0xff]   ;;  %v1244_v23 = vld [vmem:[%s1745_s0 + $0xb8] sm:$0xff]  }
  0x2e   :  { %v1243_v22 = vld [vmem:[%s1745_s0 + $0x50] sm:$0xff]   ;;  %v1245_v24 = vld [vmem:[%s1745_s0 + $0x58] sm:$0xff]   ;;  %v1246_v25 = vld [vmem:[%s1745_s0 + $0xc0] ss:$0 sps:$4 sm:$0xff]  }
  0x2f   :  { %v1247_v26 = vld [vmem:[%s1745_s0 + $0x60] sm:$0xff]   ;;  %v1498_v27 = vld [vmem:[#allocation4] ss:$0 sm:$0xff] }
  0x34   :  { %1119 = vmatmul.mubr.msk.bf16.gmra.mrb[4].mxu0 %vm228_vm1, %v1225_v4  ;;  %1171 = vmatmul.mubr.msk.bf16.gmra.mrb[4].mxu1 %vm228_vm1, %v1226_v5 }
  0x35   :  { %1122 = vmatprep.mubr.msk.bf16.mxu0 %vm1301_vm0, %v1300_v0  ;;  %1174 = vmatprep.mubr.msk.bf16.mxu1 %vm1301_vm0, %v1300_v0 }
  0x3c   :  { %1123 = vmatmul.mubr.msk.bf16.gmra.mrb[8].mxu0 %vm228_vm1, %v1227_v6  ;;  %1175 = vmatmul.mubr.msk.bf16.gmra.mrb[8].mxu1 %vm228_vm1, %v1228_v7 }
  0x3d   :  { %1126 = vmatprep.mubr.msk.bf16.mxu0 %vm1301_vm0, %v1300_v0  ;;  %1178 = vmatprep.mubr.msk.bf16.mxu1 %vm1301_vm0, %v1300_v0 }
  0x44   :  { %1127 = vmatmul.mubr.msk.bf16.gmra.mrb[12].mxu0 %vm228_vm1, %v1229_v8  ;;  %1179 = vmatmul.mubr.msk.bf16.gmra.mrb[12].mxu1 %vm228_vm1, %v1230_v9 }
  0x45   :  { %1130 = vmatprep.mubr.msk.bf16.mxu0 %vm1301_vm0, %v1300_v0  ;;  %1182 = vmatprep.mubr.msk.bf16.mxu1 %vm1301_vm0, %v1300_v0 }
  0x4c   :  { %1131 = vmatmul.mubr.msk.bf16.gmra.mrb[16].mxu0 %vm228_vm1, %v1231_v10  ;;  %1183 = vmatmul.mubr.msk.bf16.gmra.mrb[16].mxu1 %vm228_vm1, %v1232_v11 }
  0x4d   :  { %1134 = vmatprep.mubr.msk.bf16.mxu0 %vm1301_vm0, %v1300_v0  ;;  %1186 = vmatprep.mubr.msk.bf16.mxu1 %vm1301_vm0, %v1300_v0 }
  0x54   :  { %1135 = vmatmul.mubr.msk.bf16.gmra.mrb[20].mxu0 %vm228_vm1, %v1233_v12  ;;  %1187 = vmatmul.mubr.msk.bf16.gmra.mrb[20].mxu1 %vm228_vm1, %v1234_v13 }
  0x55   :  { %1138 = vmatprep.mubr.msk.bf16.mxu0 %vm1301_vm0, %v1300_v0  ;;  %1190 = vmatprep.mubr.msk.bf16.mxu1 %vm1301_vm0, %v1300_v0 }
  0x5c   :  { %1139 = vmatmul.mubr.msk.bf16.gmra.mrb[24].mxu0 %vm228_vm1, %v1235_v14  ;;  %1191 = vmatmul.mubr.msk.bf16.gmra.mrb[24].mxu1 %vm228_vm1, %v1236_v15 }
  0x5d   :  { %1142 = vmatprep.mubr.msk.bf16.mxu0 %vm1301_vm0, %v1300_v0  ;;  %1194 = vmatprep.mubr.msk.bf16.mxu1 %vm1301_vm0, %v1300_v0 }
  0x64   :  { %1143 = vmatmul.mubr.msk.bf16.gmra.mrb[28].mxu0 %vm228_vm1, %v1237_v16  ;;  %1195 = vmatmul.mubr.msk.bf16.gmra.mrb[28].mxu1 %vm228_vm1, %v1238_v17 }
  0x65   :  { %1146 = vmatprep.mubr.msk.bf16.mxu0 %vm1301_vm0, %v1300_v0  ;;  %1198 = vmatprep.mubr.msk.bf16.mxu1 %vm1301_vm0, %v1300_v0 }
  0x6c   :  { %1147 = vmatmul.mubr.msk.bf16.gmra.mrb[32].mxu0 %vm228_vm1, %v1239_v18  ;;  %1199 = vmatmul.mubr.msk.bf16.gmra.mrb[32].mxu1 %vm228_vm1, %v1240_v19 }
  0x6d   :  { %1150 = vmatprep.mubr.msk.bf16.mxu0 %vm1301_vm0, %v1300_v0  ;;  %1202 = vmatprep.mubr.msk.bf16.mxu1 %vm1301_vm0, %v1300_v0 }
  0x74   :  { %1151 = vmatmul.mubr.msk.bf16.gmra.mrb[36].mxu0 %vm228_vm1, %v1241_v20  ;;  %1203 = vmatmul.mubr.msk.bf16.gmra.mrb[36].mxu1 %vm228_vm1, %v1242_v21 }
  0x75   :  { %1154 = vmatprep.mubr.msk.bf16.mxu0 %vm1301_vm0, %v1300_v0  ;;  %1206 = vmatprep.mubr.msk.bf16.mxu1 %vm1301_vm0, %v1300_v0 }
  0x7c   :  { %1155 = vmatmul.mubr.msk.bf16.gmra.mrb[40].mxu0 %vm228_vm1, %v1243_v22  ;;  %1207 = vmatmul.mubr.msk.bf16.gmra.mrb[40].mxu1 %vm228_vm1, %v1244_v23 }
  0x7d   :  { %1158 = vmatprep.mubr.msk.bf16.mxu0 %vm1301_vm0, %v1300_v0  ;;  %1210 = vmatprep.mubr.msk.bf16.mxu1 %vm1301_vm0, %v1300_v0 }
  0x84   :  { %1159 = vmatmul.mubr.msk.bf16.gmra.mrb[44].mxu0 %vm228_vm1, %v1245_v24  ;;  %1211 = vmatmul.mubr.msk.bf16.gmra.mrb[44].mxu1 %vm228_vm1, %v1246_v25 }
  0x85   :  { %1162 = vmatprep.mubr.msk.bf16.mxu0 %vm1301_vm0, %v1300_v0 }
  0x8c   :  { %1163 = vmatmul.mubr.msk.bf16.gmra.mrb[48].mxu0 %vm228_vm1, %v1247_v26 }
  0xff   :  { %v338_v28 = vpop.f32.mrb[0].mxu0  ;;  %v442_v29 = vpop.f32.mrb[0].mxu1 }
 0x100   :  { %v339_v30 = vadd.f32 %v1498_v27, %v338_v28  ;;  %v1116_v31 = vpop.f32.mrb[1].mxu0  ;;  %v443_v32 = vadd.f32 %v1498_v27, %v442_v29  ;;  %v1168_v33 = vpop.f32.mrb[1].mxu1 }
 0x101   :  { %v341_v34 = vpop.f32.mrb[2].mxu0  ;;  %v445_v35 = vpop.f32.mrb[2].mxu1 }
 0x102   :  { %vm536_vm2 = vcmp.ge.f32.partialorder %v339_v30, 0.0  ;;  %v585_v36 = vmul.f32 0.2, %v339_v30  ;;  %v342_v37 = vadd.f32 %v1498_v27, %v341_v34  ;;  %v1117_v38 = vpop.f32.mrb[3].mxu0  ;;  %vm562_vm3 = vcmp.ge.f32.partialorder %v443_v32, 0.0  ;;  %v1169_v39 = vpop.f32.mrb[3].mxu1 }
 0x103   :  { %v611_v40 = vmul.f32 0.2, %v443_v32  ;;  %v446_v41 = vadd.f32 %v1498_v27, %v445_v35 }
 0x104   :  { %v634_v42 = vsel %vm536_vm2, %v339_v30, %v585_v36  ;;  %vm537_vm5 = vcmp.ge.f32.partialorder %v342_v37, 0.0  ;;  %v586_v43 = vmul.f32 0.2, %v342_v37 }
 0x105   :  { %v1037_v44 = vpack.c.bf16 %v634_v42, %v634_v42  ;;  %v660_v45 = vsel %vm562_vm3, %v443_v32, %v611_v40  ;;  %vm563_vm6 = vcmp.ge.f32.partialorder %v446_v41, 0.0  ;;  %v612_v46 = vmul.f32 0.2, %v446_v41 }
 0x106   :  { %v635_v47 = vsel %vm537_vm5, %v342_v37, %v586_v43  ;;  %v1063_v48 = vpack.c.bf16 %v660_v45, %v660_v45 }
 0x107   :  { %881 = vst.msk [vmem:[%s1748_s3] sm:$0xf] %vm880_vm4, %v1037_v44  ;;  %v1038_v49 = vpack.c.bf16 %v635_v47, %v635_v47  ;;  %v346_v50 = vpop.f32.mrb[4].mxu0  ;;  %v661_v51 = vsel %vm563_vm6, %v446_v41, %v612_v46  ;;  %v450_v52 = vpop.f32.mrb[4].mxu1 }
 0x108   :  { %907 = vst.msk [vmem:[%s1748_s3 + $0x68] sm:$0xf] %vm880_vm4, %v1063_v48  ;;  %v347_v53 = vadd.f32 %v1498_v27, %v346_v50  ;;  %v1064_v54 = vpack.c.bf16 %v661_v51, %v661_v51  ;;  %v1120_v55 = vpop.f32.mrb[5].mxu0  ;;  %v451_v56 = vadd.f32 %v1498_v27, %v450_v52  ;;  %v1172_v57 = vpop.f32.mrb[5].mxu1 }
 0x109   :  { %882 = vst.msk [vmem:[%s1748_s3 + $0x4] sm:$0xf] %vm880_vm4, %v1038_v49  ;;  %v349_v58 = vpop.f32.mrb[6].mxu0  ;;  %v453_v59 = vpop.f32.mrb[6].mxu1 }
 0x10a   :  { %vm538_vm7 = vcmp.ge.f32.partialorder %v347_v53, 0.0  ;;  %v587_v60 = vmul.f32 0.2, %v347_v53  ;;  %908 = vst.msk [vmem:[%s1748_s3 + $0x6c] sm:$0xf] %vm880_vm4, %v1064_v54  ;;  %v350_v61 = vadd.f32 %v1498_v27, %v349_v58  ;;  %v1121_v62 = vpop.f32.mrb[7].mxu0  ;;  %v454_v1 = vadd.f32 %v1498_v27, %v453_v59 }
 0x10b   :  { %vm564_vm8 = vcmp.ge.f32.partialorder %v451_v56, 0.0  ;;  %v1173_v63 = vpop.f32.mrb[7].mxu1  ;;  %v613_v0 = vmul.f32 0.2, %v451_v56 }
 0x10c   :  { %v636_v2 = vsel %vm538_vm7, %v347_v53, %v587_v60  ;;  %vm539_vm9 = vcmp.ge.f32.partialorder %v350_v61, 0.0  ;;  %v588_v3 = vmul.f32 0.2, %v350_v61  ;;  %vm565_vm10 = vcmp.ge.f32.partialorder %v454_v1, 0.0 }
 0x10d   :  { %v1039_v4 = vpack.c.bf16 %v636_v2, %v636_v2  ;;  %v662_v5 = vsel %vm564_vm8, %v451_v56, %v613_v0  ;;  %v614_v6 = vmul.f32 0.2, %v454_v1 }
 0x10e   :  { %v637_v7 = vsel %vm539_vm9, %v350_v61, %v588_v3  ;;  %v1065_v8 = vpack.c.bf16 %v662_v5, %v662_v5 }
 0x10f   :  { %883 = vst.msk [vmem:[%s1748_s3 + $0x8] sm:$0xf] %vm880_vm4, %v1039_v4  ;;  %v1040_v9 = vpack.c.bf16 %v637_v7, %v637_v7  ;;  %v354_v10 = vpop.f32.mrb[8].mxu0  ;;  %v663_v11 = vsel %vm565_vm10, %v454_v1, %v614_v6  ;;  %v458_v12 = vpop.f32.mrb[8].mxu1 }
 0x110   :  { %909 = vst.msk [vmem:[%s1748_s3 + $0x70] sm:$0xf] %vm880_vm4, %v1065_v8  ;;  %v355_v13 = vadd.f32 %v1498_v27, %v354_v10  ;;  %v1066_v14 = vpack.c.bf16 %v663_v11, %v663_v11  ;;  %v1124_v15 = vpop.f32.mrb[9].mxu0  ;;  %v459_v16 = vadd.f32 %v1498_v27, %v458_v12  ;;  %v1176_v17 = vpop.f32.mrb[9].mxu1 }
 0x111   :  { %884 = vst.msk [vmem:[%s1748_s3 + $0xc] sm:$0xf] %vm880_vm4, %v1040_v9  ;;  %v357_v18 = vpop.f32.mrb[10].mxu0  ;;  %v461_v19 = vpop.f32.mrb[10].mxu1 }
 0x112   :  { %vm540_vm11 = vcmp.ge.f32.partialorder %v355_v13, 0.0  ;;  %v589_v20 = vmul.f32 0.2, %v355_v13  ;;  %910 = vst.msk [vmem:[%s1748_s3 + $0x74] sm:$0xf] %vm880_vm4, %v1066_v14  ;;  %v358_v21 = vadd.f32 %v1498_v27, %v357_v18  ;;  %v1125_v22 = vpop.f32.mrb[11].mxu0  ;;  %v462_v25 = vadd.f32 %v1498_v27, %v461_v19 }
 0x113   :  { %vm566_vm12 = vcmp.ge.f32.partialorder %v459_v16, 0.0  ;;  %v1177_v23 = vpop.f32.mrb[11].mxu1  ;;  %v615_v24 = vmul.f32 0.2, %v459_v16 }
 0x114   :  { %v638_v26 = vsel %vm540_vm11, %v355_v13, %v589_v20  ;;  %vm541_vm13 = vcmp.ge.f32.partialorder %v358_v21, 0.0  ;;  %v590_v28 = vmul.f32 0.2, %v358_v21  ;;  %vm567_vm14 = vcmp.ge.f32.partialorder %v462_v25, 0.0 }
 0x115   :  { %v1041_v29 = vpack.c.bf16 %v638_v26, %v638_v26  ;;  %v664_v30 = vsel %vm566_vm12, %v459_v16, %v615_v24  ;;  %v616_v31 = vmul.f32 0.2, %v462_v25 }
 0x116   :  { %v639_v32 = vsel %vm541_vm13, %v358_v21, %v590_v28  ;;  %v1067_v33 = vpack.c.bf16 %v664_v30, %v664_v30 }
 0x117   :  { %885 = vst.msk [vmem:[%s1748_s3 + $0x10] sm:$0xf] %vm880_vm4, %v1041_v29  ;;  %v1042_v34 = vpack.c.bf16 %v639_v32, %v639_v32  ;;  %v362_v35 = vpop.f32.mrb[12].mxu0  ;;  %v665_v36 = vsel %vm567_vm14, %v462_v25, %v616_v31  ;;  %v466_v37 = vpop.f32.mrb[12].mxu1 }
 0x118   :  { %911 = vst.msk [vmem:[%s1748_s3 + $0x78] sm:$0xf] %vm880_vm4, %v1067_v33  ;;  %v363_v38 = vadd.f32 %v1498_v27, %v362_v35  ;;  %v1068_v39 = vpack.c.bf16 %v665_v36, %v665_v36  ;;  %v1128_v40 = vpop.f32.mrb[13].mxu0  ;;  %v467_v41 = vadd.f32 %v1498_v27, %v466_v37  ;;  %v1180_v42 = vpop.f32.mrb[13].mxu1 }
 0x119   :  { %886 = vst.msk [vmem:[%s1748_s3 + $0x14] sm:$0xf] %vm880_vm4, %v1042_v34  ;;  %v365_v43 = vpop.f32.mrb[14].mxu0  ;;  %v469_v44 = vpop.f32.mrb[14].mxu1 }
 0x11a   :  { %vm542_vm15 = vcmp.ge.f32.partialorder %v363_v38, 0.0  ;;  %v591_v45 = vmul.f32 0.2, %v363_v38  ;;  %912 = vst.msk [vmem:[%s1748_s3 + $0x7c] sm:$0xf] %vm880_vm4, %v1068_v39  ;;  %v366_v46 = vadd.f32 %v1498_v27, %v365_v43  ;;  %v1129_v47 = vpop.f32.mrb[15].mxu0  ;;  %v470_v50 = vadd.f32 %v1498_v27, %v469_v44 }
 0x11b   :  { %vm568_vm0 = vcmp.ge.f32.partialorder %v467_v41, 0.0  ;;  %v1181_v48 = vpop.f32.mrb[15].mxu1  ;;  %v617_v49 = vmul.f32 0.2, %v467_v41 }
 0x11c   :  { %v640_v51 = vsel %vm542_vm15, %v363_v38, %v591_v45  ;;  %vm543_vm1 = vcmp.ge.f32.partialorder %v366_v46, 0.0  ;;  %v592_v52 = vmul.f32 0.2, %v366_v46  ;;  %vm569_vm2 = vcmp.ge.f32.partialorder %v470_v50, 0.0 }
 0x11d   :  { %v1043_v53 = vpack.c.bf16 %v640_v51, %v640_v51  ;;  %v666_v54 = vsel %vm568_vm0, %v467_v41, %v617_v49  ;;  %v618_v55 = vmul.f32 0.2, %v470_v50 }
 0x11e   :  { %v641_v56 = vsel %vm543_vm1, %v366_v46, %v592_v52  ;;  %v1069_v57 = vpack.c.bf16 %v666_v54, %v666_v54 }
 0x11f   :  { %887 = vst.msk [vmem:[%s1748_s3 + $0x18] sm:$0xf] %vm880_vm4, %v1043_v53  ;;  %v1044_v58 = vpack.c.bf16 %v641_v56, %v641_v56  ;;  %v370_v59 = vpop.f32.mrb[16].mxu0  ;;  %v667_v60 = vsel %vm569_vm2, %v470_v50, %v618_v55  ;;  %v474_v61 = vpop.f32.mrb[16].mxu1 }
 0x120   :  { %913 = vst.msk [vmem:[%s1748_s3 + $0x80] sm:$0xf] %vm880_vm4, %v1069_v57  ;;  %v371_v62 = vadd.f32 %v1498_v27, %v370_v59  ;;  %v1070_v63 = vpack.c.bf16 %v667_v60, %v667_v60  ;;  %v1132_v0 = vpop.f32.mrb[17].mxu0  ;;  %v475_v1 = vadd.f32 %v1498_v27, %v474_v61  ;;  %v1184_v2 = vpop.f32.mrb[17].mxu1 }
 0x121   :  { %888 = vst.msk [vmem:[%s1748_s3 + $0x1c] sm:$0xf] %vm880_vm4, %v1044_v58  ;;  %v373_v3 = vpop.f32.mrb[18].mxu0  ;;  %v477_v4 = vpop.f32.mrb[18].mxu1 }
 0x122   :  { %vm544_vm3 = vcmp.ge.f32.partialorder %v371_v62, 0.0  ;;  %v593_v5 = vmul.f32 0.2, %v371_v62  ;;  %914 = vst.msk [vmem:[%s1748_s3 + $0x84] sm:$0xf] %vm880_vm4, %v1070_v63  ;;  %v374_v6 = vadd.f32 %v1498_v27, %v373_v3  ;;  %v1133_v7 = vpop.f32.mrb[19].mxu0  ;;  %v478_v10 = vadd.f32 %v1498_v27, %v477_v4 }
 0x123   :  { %vm570_vm5 = vcmp.ge.f32.partialorder %v475_v1, 0.0  ;;  %v1185_v8 = vpop.f32.mrb[19].mxu1  ;;  %v619_v9 = vmul.f32 0.2, %v475_v1 }
 0x124   :  { %v642_v11 = vsel %vm544_vm3, %v371_v62, %v593_v5  ;;  %vm545_vm6 = vcmp.ge.f32.partialorder %v374_v6, 0.0  ;;  %v594_v12 = vmul.f32 0.2, %v374_v6  ;;  %vm571_vm7 = vcmp.ge.f32.partialorder %v478_v10, 0.0 }
 0x125   :  { %v1045_v13 = vpack.c.bf16 %v642_v11, %v642_v11  ;;  %v668_v14 = vsel %vm570_vm5, %v475_v1, %v619_v9  ;;  %v620_v15 = vmul.f32 0.2, %v478_v10 }
 0x126   :  { %v643_v16 = vsel %vm545_vm6, %v374_v6, %v594_v12  ;;  %v1071_v17 = vpack.c.bf16 %v668_v14, %v668_v14 }
 0x127   :  { %889 = vst.msk [vmem:[%s1748_s3 + $0x20] sm:$0xf] %vm880_vm4, %v1045_v13  ;;  %v1046_v18 = vpack.c.bf16 %v643_v16, %v643_v16  ;;  %v378_v19 = vpop.f32.mrb[20].mxu0  ;;  %v669_v20 = vsel %vm571_vm7, %v478_v10, %v620_v15  ;;  %v482_v21 = vpop.f32.mrb[20].mxu1 }
 0x128   :  { %915 = vst.msk [vmem:[%s1748_s3 + $0x88] sm:$0xf] %vm880_vm4, %v1071_v17  ;;  %v379_v22 = vadd.f32 %v1498_v27, %v378_v19  ;;  %v1072_v23 = vpack.c.bf16 %v669_v20, %v669_v20  ;;  %v1136_v24 = vpop.f32.mrb[21].mxu0  ;;  %v483_v25 = vadd.f32 %v1498_v27, %v482_v21  ;;  %v1188_v26 = vpop.f32.mrb[21].mxu1 }
 0x129   :  { %890 = vst.msk [vmem:[%s1748_s3 + $0x24] sm:$0xf] %vm880_vm4, %v1046_v18  ;;  %v381_v28 = vpop.f32.mrb[22].mxu0  ;;  %v485_v29 = vpop.f32.mrb[22].mxu1 }
 0x12a   :  { %vm546_vm8 = vcmp.ge.f32.partialorder %v379_v22, 0.0  ;;  %v595_v30 = vmul.f32 0.2, %v379_v22  ;;  %916 = vst.msk [vmem:[%s1748_s3 + $0x8c] sm:$0xf] %vm880_vm4, %v1072_v23  ;;  %v382_v31 = vadd.f32 %v1498_v27, %v381_v28  ;;  %v1137_v32 = vpop.f32.mrb[23].mxu0  ;;  %v486_v35 = vadd.f32 %v1498_v27, %v485_v29 }
 0x12b   :  { %vm572_vm9 = vcmp.ge.f32.partialorder %v483_v25, 0.0  ;;  %v1189_v33 = vpop.f32.mrb[23].mxu1  ;;  %v621_v34 = vmul.f32 0.2, %v483_v25 }
 0x12c   :  { %v644_v36 = vsel %vm546_vm8, %v379_v22, %v595_v30  ;;  %vm547_vm10 = vcmp.ge.f32.partialorder %v382_v31, 0.0  ;;  %v596_v37 = vmul.f32 0.2, %v382_v31  ;;  %vm573_vm11 = vcmp.ge.f32.partialorder %v486_v35, 0.0 }
 0x12d   :  { %v1047_v38 = vpack.c.bf16 %v644_v36, %v644_v36  ;;  %v670_v39 = vsel %vm572_vm9, %v483_v25, %v621_v34  ;;  %v622_v40 = vmul.f32 0.2, %v486_v35 }
 0x12e   :  { %v645_v41 = vsel %vm547_vm10, %v382_v31, %v596_v37  ;;  %v1073_v42 = vpack.c.bf16 %v670_v39, %v670_v39 }
 0x12f   :  { %891 = vst.msk [vmem:[%s1748_s3 + $0x28] sm:$0xf] %vm880_vm4, %v1047_v38  ;;  %v1048_v43 = vpack.c.bf16 %v645_v41, %v645_v41  ;;  %v386_v44 = vpop.f32.mrb[24].mxu0  ;;  %v671_v45 = vsel %vm573_vm11, %v486_v35, %v622_v40  ;;  %v490_v46 = vpop.f32.mrb[24].mxu1 }
 0x130   :  { %917 = vst.msk [vmem:[%s1748_s3 + $0x90] sm:$0xf] %vm880_vm4, %v1073_v42  ;;  %v387_v47 = vadd.f32 %v1498_v27, %v386_v44  ;;  %v1074_v48 = vpack.c.bf16 %v671_v45, %v671_v45  ;;  %v1140_v49 = vpop.f32.mrb[25].mxu0  ;;  %v491_v50 = vadd.f32 %v1498_v27, %v490_v46  ;;  %v1192_v51 = vpop.f32.mrb[25].mxu1 }
 0x131   :  { %892 = vst.msk [vmem:[%s1748_s3 + $0x2c] sm:$0xf] %vm880_vm4, %v1048_v43  ;;  %v389_v52 = vpop.f32.mrb[26].mxu0  ;;  %v493_v53 = vpop.f32.mrb[26].mxu1 }
 0x132   :  { %vm548_vm12 = vcmp.ge.f32.partialorder %v387_v47, 0.0  ;;  %v597_v54 = vmul.f32 0.2, %v387_v47  ;;  %918 = vst.msk [vmem:[%s1748_s3 + $0x94] sm:$0xf] %vm880_vm4, %v1074_v48  ;;  %v390_v55 = vadd.f32 %v1498_v27, %v389_v52  ;;  %v1141_v56 = vpop.f32.mrb[27].mxu0  ;;  %v494_v59 = vadd.f32 %v1498_v27, %v493_v53 }
 0x133   :  { %vm574_vm13 = vcmp.ge.f32.partialorder %v491_v50, 0.0  ;;  %v1193_v57 = vpop.f32.mrb[27].mxu1  ;;  %v623_v58 = vmul.f32 0.2, %v491_v50 }
 0x134   :  { %v646_v60 = vsel %vm548_vm12, %v387_v47, %v597_v54  ;;  %vm549_vm14 = vcmp.ge.f32.partialorder %v390_v55, 0.0  ;;  %v598_v61 = vmul.f32 0.2, %v390_v55  ;;  %vm575_vm15 = vcmp.ge.f32.partialorder %v494_v59, 0.0 }
 0x135   :  { %v1049_v62 = vpack.c.bf16 %v646_v60, %v646_v60  ;;  %v672_v63 = vsel %vm574_vm13, %v491_v50, %v623_v58  ;;  %v624_v0 = vmul.f32 0.2, %v494_v59 }
 0x136   :  { %v647_v1 = vsel %vm549_vm14, %v390_v55, %v598_v61  ;;  %v1075_v2 = vpack.c.bf16 %v672_v63, %v672_v63 }
 0x137   :  { %893 = vst.msk [vmem:[%s1748_s3 + $0x30] sm:$0xf] %vm880_vm4, %v1049_v62  ;;  %v1050_v3 = vpack.c.bf16 %v647_v1, %v647_v1  ;;  %v394_v4 = vpop.f32.mrb[28].mxu0  ;;  %v673_v5 = vsel %vm575_vm15, %v494_v59, %v624_v0  ;;  %v498_v6 = vpop.f32.mrb[28].mxu1 }
 0x138   :  { %919 = vst.msk [vmem:[%s1748_s3 + $0x98] sm:$0xf] %vm880_vm4, %v1075_v2  ;;  %v395_v7 = vadd.f32 %v1498_v27, %v394_v4  ;;  %v1076_v8 = vpack.c.bf16 %v673_v5, %v673_v5  ;;  %v1144_v9 = vpop.f32.mrb[29].mxu0  ;;  %v499_v10 = vadd.f32 %v1498_v27, %v498_v6  ;;  %v1196_v11 = vpop.f32.mrb[29].mxu1 }
 0x139   :  { %894 = vst.msk [vmem:[%s1748_s3 + $0x34] sm:$0xf] %vm880_vm4, %v1050_v3  ;;  %v397_v12 = vpop.f32.mrb[30].mxu0  ;;  %v501_v13 = vpop.f32.mrb[30].mxu1 }
 0x13a   :  { %vm550_vm0 = vcmp.ge.f32.partialorder %v395_v7, 0.0  ;;  %v599_v14 = vmul.f32 0.2, %v395_v7  ;;  %920 = vst.msk [vmem:[%s1748_s3 + $0x9c] sm:$0xf] %vm880_vm4, %v1076_v8  ;;  %v398_v15 = vadd.f32 %v1498_v27, %v397_v12  ;;  %v1145_v16 = vpop.f32.mrb[31].mxu0  ;;  %v502_v19 = vadd.f32 %v1498_v27, %v501_v13 }
 0x13b   :  { %vm576_vm1 = vcmp.ge.f32.partialorder %v499_v10, 0.0  ;;  %v1197_v17 = vpop.f32.mrb[31].mxu1  ;;  %v625_v18 = vmul.f32 0.2, %v499_v10 }
 0x13c   :  { %v648_v20 = vsel %vm550_vm0, %v395_v7, %v599_v14  ;;  %vm551_vm2 = vcmp.ge.f32.partialorder %v398_v15, 0.0  ;;  %v600_v21 = vmul.f32 0.2, %v398_v15  ;;  %vm577_vm3 = vcmp.ge.f32.partialorder %v502_v19, 0.0 }
 0x13d   :  { %v1051_v22 = vpack.c.bf16 %v648_v20, %v648_v20  ;;  %v674_v23 = vsel %vm576_vm1, %v499_v10, %v625_v18  ;;  %v626_v24 = vmul.f32 0.2, %v502_v19 }
 0x13e   :  { %v649_v25 = vsel %vm551_vm2, %v398_v15, %v600_v21  ;;  %v1077_v26 = vpack.c.bf16 %v674_v23, %v674_v23 }
 0x13f   :  { %895 = vst.msk [vmem:[%s1748_s3 + $0x38] sm:$0xf] %vm880_vm4, %v1051_v22  ;;  %v1052_v28 = vpack.c.bf16 %v649_v25, %v649_v25  ;;  %v402_v29 = vpop.f32.mrb[32].mxu0  ;;  %v675_v30 = vsel %vm577_vm3, %v502_v19, %v626_v24  ;;  %v506_v31 = vpop.f32.mrb[32].mxu1 }
 0x140   :  { %921 = vst.msk [vmem:[%s1748_s3 + $0xa0] sm:$0xf] %vm880_vm4, %v1077_v26  ;;  %v403_v32 = vadd.f32 %v1498_v27, %v402_v29  ;;  %v1078_v33 = vpack.c.bf16 %v675_v30, %v675_v30  ;;  %v1148_v34 = vpop.f32.mrb[33].mxu0  ;;  %v507_v35 = vadd.f32 %v1498_v27, %v506_v31  ;;  %v1200_v36 = vpop.f32.mrb[33].mxu1 }
 0x141   :  { %896 = vst.msk [vmem:[%s1748_s3 + $0x3c] sm:$0xf] %vm880_vm4, %v1052_v28  ;;  %v405_v37 = vpop.f32.mrb[34].mxu0  ;;  %v509_v38 = vpop.f32.mrb[34].mxu1 }
 0x142   :  { %vm552_vm5 = vcmp.ge.f32.partialorder %v403_v32, 0.0  ;;  %v601_v39 = vmul.f32 0.2, %v403_v32  ;;  %922 = vst.msk [vmem:[%s1748_s3 + $0xa4] sm:$0xf] %vm880_vm4, %v1078_v33  ;;  %v406_v40 = vadd.f32 %v1498_v27, %v405_v37  ;;  %v1149_v41 = vpop.f32.mrb[35].mxu0  ;;  %v510_v44 = vadd.f32 %v1498_v27, %v509_v38 }
 0x143   :  { %vm578_vm6 = vcmp.ge.f32.partialorder %v507_v35, 0.0  ;;  %v1201_v42 = vpop.f32.mrb[35].mxu1  ;;  %v627_v43 = vmul.f32 0.2, %v507_v35 }
 0x144   :  { %v650_v45 = vsel %vm552_vm5, %v403_v32, %v601_v39  ;;  %vm553_vm7 = vcmp.ge.f32.partialorder %v406_v40, 0.0  ;;  %v602_v46 = vmul.f32 0.2, %v406_v40  ;;  %vm579_vm8 = vcmp.ge.f32.partialorder %v510_v44, 0.0 }
 0x145   :  { %v1053_v47 = vpack.c.bf16 %v650_v45, %v650_v45  ;;  %v676_v48 = vsel %vm578_vm6, %v507_v35, %v627_v43  ;;  %v628_v49 = vmul.f32 0.2, %v510_v44 }
 0x146   :  { %v651_v50 = vsel %vm553_vm7, %v406_v40, %v602_v46  ;;  %v1079_v51 = vpack.c.bf16 %v676_v48, %v676_v48 }
 0x147   :  { %897 = vst.msk [vmem:[%s1748_s3 + $0x40] sm:$0xf] %vm880_vm4, %v1053_v47  ;;  %v1054_v52 = vpack.c.bf16 %v651_v50, %v651_v50  ;;  %v410_v53 = vpop.f32.mrb[36].mxu0  ;;  %v677_v54 = vsel %vm579_vm8, %v510_v44, %v628_v49  ;;  %v514_v55 = vpop.f32.mrb[36].mxu1 }
 0x148   :  { %923 = vst.msk [vmem:[%s1748_s3 + $0xa8] sm:$0xf] %vm880_vm4, %v1079_v51  ;;  %v411_v56 = vadd.f32 %v1498_v27, %v410_v53  ;;  %v1080_v57 = vpack.c.bf16 %v677_v54, %v677_v54  ;;  %v1152_v58 = vpop.f32.mrb[37].mxu0  ;;  %v515_v59 = vadd.f32 %v1498_v27, %v514_v55  ;;  %v1204_v60 = vpop.f32.mrb[37].mxu1 }
 0x149   :  { %898 = vst.msk [vmem:[%s1748_s3 + $0x44] sm:$0xf] %vm880_vm4, %v1054_v52  ;;  %v413_v61 = vpop.f32.mrb[38].mxu0  ;;  %v517_v62 = vpop.f32.mrb[38].mxu1 }
 0x14a   :  { %vm554_vm9 = vcmp.ge.f32.partialorder %v411_v56, 0.0  ;;  %v603_v63 = vmul.f32 0.2, %v411_v56  ;;  %924 = vst.msk [vmem:[%s1748_s3 + $0xac] sm:$0xf] %vm880_vm4, %v1080_v57  ;;  %v414_v0 = vadd.f32 %v1498_v27, %v413_v61  ;;  %v1153_v1 = vpop.f32.mrb[39].mxu0  ;;  %v518_v4 = vadd.f32 %v1498_v27, %v517_v62 }
 0x14b   :  { %vm580_vm10 = vcmp.ge.f32.partialorder %v515_v59, 0.0  ;;  %v1205_v2 = vpop.f32.mrb[39].mxu1  ;;  %v629_v3 = vmul.f32 0.2, %v515_v59 }
 0x14c   :  { %v652_v5 = vsel %vm554_vm9, %v411_v56, %v603_v63  ;;  %vm555_vm11 = vcmp.ge.f32.partialorder %v414_v0, 0.0  ;;  %v604_v6 = vmul.f32 0.2, %v414_v0  ;;  %vm581_vm12 = vcmp.ge.f32.partialorder %v518_v4, 0.0 }
 0x14d   :  { %v1055_v7 = vpack.c.bf16 %v652_v5, %v652_v5  ;;  %v678_v8 = vsel %vm580_vm10, %v515_v59, %v629_v3  ;;  %v630_v9 = vmul.f32 0.2, %v518_v4 }
 0x14e   :  { %v653_v10 = vsel %vm555_vm11, %v414_v0, %v604_v6  ;;  %v1081_v11 = vpack.c.bf16 %v678_v8, %v678_v8 }
 0x14f   :  { %899 = vst.msk [vmem:[%s1748_s3 + $0x48] sm:$0xf] %vm880_vm4, %v1055_v7  ;;  %v1056_v12 = vpack.c.bf16 %v653_v10, %v653_v10  ;;  %v418_v13 = vpop.f32.mrb[40].mxu0  ;;  %v679_v14 = vsel %vm581_vm12, %v518_v4, %v630_v9  ;;  %v522_v15 = vpop.f32.mrb[40].mxu1 }
 0x150   :  { %925 = vst.msk [vmem:[%s1748_s3 + $0xb0] sm:$0xf] %vm880_vm4, %v1081_v11  ;;  %v419_v16 = vadd.f32 %v1498_v27, %v418_v13  ;;  %v1082_v17 = vpack.c.bf16 %v679_v14, %v679_v14  ;;  %v1156_v18 = vpop.f32.mrb[41].mxu0  ;;  %v523_v19 = vadd.f32 %v1498_v27, %v522_v15  ;;  %v1208_v20 = vpop.f32.mrb[41].mxu1 }
 0x151   :  { %900 = vst.msk [vmem:[%s1748_s3 + $0x4c] sm:$0xf] %vm880_vm4, %v1056_v12  ;;  %v421_v21 = vpop.f32.mrb[42].mxu0  ;;  %v525_v22 = vpop.f32.mrb[42].mxu1 }
 0x152   :  { %vm556_vm13 = vcmp.ge.f32.partialorder %v419_v16, 0.0  ;;  %v605_v23 = vmul.f32 0.2, %v419_v16  ;;  %926 = vst.msk [vmem:[%s1748_s3 + $0xb4] sm:$0xf] %vm880_vm4, %v1082_v17  ;;  %v422_v24 = vadd.f32 %v1498_v27, %v421_v21  ;;  %v1157_v25 = vpop.f32.mrb[43].mxu0  ;;  %v526_v29 = vadd.f32 %v1498_v27, %v525_v22 }
 0x153   :  { %vm582_vm14 = vcmp.ge.f32.partialorder %v523_v19, 0.0  ;;  %v1209_v26 = vpop.f32.mrb[43].mxu1  ;;  %v631_v28 = vmul.f32 0.2, %v523_v19 }
 0x154   :  { %v654_v30 = vsel %vm556_vm13, %v419_v16, %v605_v23  ;;  %vm557_vm15 = vcmp.ge.f32.partialorder %v422_v24, 0.0  ;;  %v606_v31 = vmul.f32 0.2, %v422_v24  ;;  %vm583_vm0 = vcmp.ge.f32.partialorder %v526_v29, 0.0 }
 0x155   :  { %v1057_v32 = vpack.c.bf16 %v654_v30, %v654_v30  ;;  %v680_v33 = vsel %vm582_vm14, %v523_v19, %v631_v28  ;;  %v632_v34 = vmul.f32 0.2, %v526_v29 }
 0x156   :  { %v655_v35 = vsel %vm557_vm15, %v422_v24, %v606_v31  ;;  %v1083_v36 = vpack.c.bf16 %v680_v33, %v680_v33 }
 0x157   :  { %901 = vst.msk [vmem:[%s1748_s3 + $0x50] sm:$0xf] %vm880_vm4, %v1057_v32  ;;  %v1058_v37 = vpack.c.bf16 %v655_v35, %v655_v35  ;;  %v426_v38 = vpop.f32.mrb[44].mxu0  ;;  %v681_v39 = vsel %vm583_vm0, %v526_v29, %v632_v34  ;;  %v530_v40 = vpop.f32.mrb[44].mxu1 }
 0x158   :  { %927 = vst.msk [vmem:[%s1748_s3 + $0xb8] sm:$0xf] %vm880_vm4, %v1083_v36  ;;  %v427_v41 = vadd.f32 %v1498_v27, %v426_v38  ;;  %v1084_v42 = vpack.c.bf16 %v681_v39, %v681_v39  ;;  %v1160_v43 = vpop.f32.mrb[45].mxu0  ;;  %v531_v44 = vadd.f32 %v1498_v27, %v530_v40  ;;  %v1212_v45 = vpop.f32.mrb[45].mxu1 }
 0x159   :  { %902 = vst.msk [vmem:[%s1748_s3 + $0x54] sm:$0xf] %vm880_vm4, %v1058_v37  ;;  %v429_v46 = vpop.f32.mrb[46].mxu0  ;;  %v533_v47 = vpop.f32.mrb[46].mxu1 }
 0x15a   :  { %vm558_vm1 = vcmp.ge.f32.partialorder %v427_v41, 0.0  ;;  %v607_v48 = vmul.f32 0.2, %v427_v41  ;;  %928 = vst.msk [vmem:[%s1748_s3 + $0xbc] sm:$0xf] %vm880_vm4, %v1084_v42  ;;  %v430_v49 = vadd.f32 %v1498_v27, %v429_v46  ;;  %v1161_v50 = vpop.f32.mrb[47].mxu0 }
 0x15b   :  { %vm584_vm2 = vcmp.ge.f32.partialorder %v531_v44, 0.0  ;;  %v1213_v51 = vpop.f32.mrb[47].mxu1  ;;  %v633_v52 = vmul.f32 0.2, %v531_v44 }
 0x15c   :  { %v656_v53 = vsel %vm558_vm1, %v427_v41, %v607_v48  ;;  %vm559_vm3 = vcmp.ge.f32.partialorder %v430_v49, 0.0  ;;  %v608_v54 = vmul.f32 0.2, %v430_v49 }
 0x15d   :  { %v1059_v55 = vpack.c.bf16 %v656_v53, %v656_v53  ;;  %v682_v56 = vsel %vm584_vm2, %v531_v44, %v633_v52 }
 0x15e   :  { %v657_v57 = vsel %vm559_vm3, %v430_v49, %v608_v54  ;;  %v1085_v58 = vpack.c.bf16 %v682_v56, %v682_v56 }
 0x15f   :  { %903 = vst.msk [vmem:[%s1748_s3 + $0x58] sm:$0xf] %vm880_vm4, %v1059_v55  ;;  %v1060_v59 = vpack.c.bf16 %v657_v57, %v657_v57  ;;  %v434_v60 = vpop.f32.mrb[48].mxu0 }
 0x160   :  { %929 = vst.msk [vmem:[%s1748_s3 + $0xc0] sm:$0xf] %vm880_vm4, %v1085_v58  ;;  %v435_v61 = vadd.f32 %v1498_v27, %v434_v60  ;;  %v1164_v62 = vpop.f32.mrb[49].mxu0 }
 0x161   :  { %904 = vst.msk [vmem:[%s1748_s3 + $0x5c] sm:$0xf] %vm880_vm4, %v1060_v59  ;;  %v437_v63 = vpop.f32.mrb[50].mxu0 }
 0x162   :  { %vm560_vm5 = vcmp.ge.f32.partialorder %v435_v61, 0.0  ;;  %v609_v0 = vmul.f32 0.2, %v435_v61  ;;  %v438_v1 = vadd.f32 %v1498_v27, %v437_v63  ;;  %v1165_v2 = vpop.f32.mrb[51].mxu0 }
 0x164   :  { %v658_v3 = vsel %vm560_vm5, %v435_v61, %v609_v0  ;;  %vm561_vm6 = vcmp.ge.f32.partialorder %v438_v1, 0.0  ;;  %v610_v4 = vmul.f32 0.2, %v438_v1 }
 0x165   :  { %v1061_v5 = vpack.c.bf16 %v658_v3, %v658_v3 }
 0x166   :  { %v659_v6 = vsel %vm561_vm6, %v438_v1, %v610_v4 }
 0x167   :  { %905 = vst.msk [vmem:[%s1748_s3 + $0x60] sm:$0xf] %vm880_vm4, %v1061_v5  ;;  %v1062_v7 = vpack.c.bf16 %v659_v6, %v659_v6 }
 0x169   :  { %906 = vst.msk [vmem:[%s1748_s3 + $0x64] sm:$0xf] %vm880_vm4, %v1062_v7 }
 0x16a   :  { %934 = vsyncpa [#allocation3], 1 }
 0x16b   :  { %935 = vsyncpa [#allocation5], 1 }

// kernel: ganomaly_forward.7
= control target key start
LH: loop header
LB: loop body
LE: loop exit
PB: predicated region body
PF: predicated region fallthrough
CT: control target
= control target key end

     0   :  { %vm1239_vm0 = vcmask 1041408   ;;  %s2356_s1 = inlined_call_operand.vmem [shape: bf16[1024,128], index: 1, kind: input, shape index: {}]   ;;  %s2357_s0 = inlined_call_operand.vmem [shape: bf16[98,1024], index: 0, kind: input, shape index: {}]   ;;  %s2358_s2 = inlined_call_operand.vmem [shape: f32[1,128], index: 2, kind: input, shape index: {}]   ;;  %s2359_s3 = inlined_call_operand.vmem [shape: f32[1,128], index: 3, kind: input, shape index: {}]   ;;  %s2360_s4 = inlined_call_operand.vmem [shape: f32[98,128], index: 4, kind: output, shape index: {}]  }
   0x1   :  { %v1740_v0 = vld [vmem:[%s2356_s1 + $0x40] sm:$0xff]   ;;  %v1744_v4 = vld [vmem:[%s2356_s1 + $0x48] sm:$0xff]   ;;  %v1748_v8 = vld [vmem:[%s2356_s1 + $0x50] sm:$0xff]  }
   0x2   :  { %v1741_v1 = vld [vmem:[%s2356_s1 + $0xc0] sm:$0xff]   ;;  %1508 = vmatprep.subr.bf16.mxu0 %v1740_v0  ;;  %v1745_v5 = vld [vmem:[%s2356_s1 + $0xc8] sm:$0xff]   ;;  %v1749_v9 = vld [vmem:[%s2356_s1 + $0xd0] sm:$0xff]  }
   0x3   :  { %v1742_v2 = vld [vmem:[%s2356_s1] sm:$0xff]   ;;  %1566 = vmatprep.subr.bf16.mxu1 %v1741_v1  ;;  %v1746_v6 = vld [vmem:[%s2356_s1 + $0x8] sm:$0xff]   ;;  %v1750_v10 = vld [vmem:[%s2356_s1 + $0x10] sm:$0xff]  }
   0x4   :  { %v1743_v3 = vld [vmem:[%s2356_s1 + $0x80] sm:$0xff]   ;;  %1509 = vmatpush3.bf16.msra.mxu0 %v1742_v2  ;;  %v1747_v7 = vld [vmem:[%s2356_s1 + $0x88] sm:$0xff]   ;;  %v1751_v11 = vld [vmem:[%s2356_s1 + $0x90] sm:$0xff]  }
   0x5   :  { %1567 = vmatpush3.bf16.msra.mxu1 %v1743_v3  ;;  %1510 = vmatprep.subr.bf16.mxu0 %v1744_v4  ;;  %v1752_v12 = vld [vmem:[%s2356_s1 + $0x58] sm:$0xff]   ;;  %v1756_v16 = vld [vmem:[%s2356_s1 + $0x60] sm:$0xff]   ;;  %v1760_v20 = vld [vmem:[%s2356_s1 + $0x68] sm:$0xff]  }
   0x6   :  { %1568 = vmatprep.subr.bf16.mxu1 %v1745_v5  ;;  %v1753_v13 = vld [vmem:[%s2356_s1 + $0xd8] sm:$0xff]   ;;  %v1757_v17 = vld [vmem:[%s2356_s1 + $0xe0] sm:$0xff]   ;;  %v1761_v21 = vld [vmem:[%s2356_s1 + $0xe8] sm:$0xff]  }
   0x7   :  { %v1754_v14 = vld [vmem:[%s2356_s1 + $0x18] sm:$0xff]   ;;  %v1758_v18 = vld [vmem:[%s2356_s1 + $0x20] sm:$0xff]   ;;  %v1762_v22 = vld [vmem:[%s2356_s1 + $0x28] sm:$0xff]  }
   0x8   :  { %1511 = vmatpush3.bf16.msra.mxu0 %v1746_v6  ;;  %v1755_v15 = vld [vmem:[%s2356_s1 + $0x98] sm:$0xff]   ;;  %v1759_v19 = vld [vmem:[%s2356_s1 + $0xa0] sm:$0xff]   ;;  %v1763_v23 = vld [vmem:[%s2356_s1 + $0xa8] sm:$0xff]  }
   0x9   :  { %1569 = vmatpush3.bf16.msra.mxu1 %v1747_v7  ;;  %1512 = vmatprep.subr.bf16.mxu0 %v1748_v8  ;;  %v1764_v24 = vld [vmem:[%s2356_s1 + $0x70] sm:$0xff]   ;;  %v1768_v28 = vld [vmem:[%s2356_s1 + $0x78] sm:$0xff]   ;;  %v18_v32 = vld [vmem:[%s2357_s0] sm:$0xff] }
   0xa   :  { %1570 = vmatprep.subr.bf16.mxu1 %v1749_v9  ;;  %v1765_v25 = vld [vmem:[%s2356_s1 + $0xf0] sm:$0xff]   ;;  %v1769_v29 = vld [vmem:[%s2356_s1 + $0xf8] sm:$0xff]   ;;  %v22_v33 = vld [vmem:[%s2357_s0 + $0x20] sm:$0xff] }
   0xb   :  { %v1766_v26 = vld [vmem:[%s2356_s1 + $0x30] sm:$0xff]   ;;  %v1770_v30 = vld [vmem:[%s2356_s1 + $0x38] sm:$0xff]   ;;  %v19_v34 = vld [vmem:[%s2357_s0 + $0x8] sm:$0xff]  ;;  %v1388_v35 = vcombine.low %v18_v32, %v22_v33  ;;  %v1389_v36 = vcombine.high %v18_v32, %v22_v33 }
   0xc   :  { %1513 = vmatpush3.bf16.msra.mxu0 %v1750_v10  ;;  %v1767_v27 = vld [vmem:[%s2356_s1 + $0xb0] sm:$0xff]   ;;  %v1771_v31 = vld [vmem:[%s2356_s1 + $0xb8] sm:$0xff]   ;;  %v23_v37 = vld [vmem:[%s2357_s0 + $0x28] sm:$0xff] }
   0xd   :  { %1571 = vmatpush3.bf16.msra.mxu1 %v1751_v11  ;;  %1514 = vmatprep.subr.bf16.mxu0 %v1752_v12  ;;  %v1390_v38 = vcombine.low %v19_v34, %v23_v37  ;;  %v1391_v39 = vcombine.high %v19_v34, %v23_v37  ;;  %v1772_v40 = vld [vmem:[%s2356_s1 + $0x140] sm:$0xff]   ;;  %v27_v47 = vld [vmem:[%s2357_s0 + $0x48] sm:$0xff]  ;;  %v1780_v56 = vld [vmem:[%s2356_s1 + $0x150] sm:$0xff]  }
   0xe   :  { %1572 = vmatprep.subr.bf16.mxu1 %v1753_v13  ;;  %882 = vmatprep.mubr.bf16.mxu0 %v1389_v36  ;;  %v1773_v41 = vld [vmem:[%s2356_s1 + $0x100] sm:$0xff]   ;;  %v31_v48 = vld [vmem:[%s2357_s0 + $0x68] sm:$0xff]  ;;  %v1781_v63 = vld [vmem:[%s2356_s1 + $0x110] sm:$0xff]  }
   0xf   :  { %970 = vmatprep.mubr.bf16.mxu1 %v1391_v39  ;;  %v1774_v42 = vld [vmem:[%s2356_s1 + $0x1c0] sm:$0xff]   ;;  %v1399_v49 = vcombine.high %v27_v47, %v31_v48  ;;  %v1776_v50 = vld [vmem:[%s2356_s1 + $0x148] sm:$0xff]   ;;  %v1398_v53 = vcombine.low %v27_v47, %v31_v48  ;;  %v1782_v0 = vld [vmem:[%s2356_s1 + $0x1d0] sm:$0xff]  }
  0x10   :  { %1515 = vmatpush3.bf16.msra.mxu0 %v1754_v14  ;;  %v1775_v43 = vld [vmem:[%s2356_s1 + $0x180] sm:$0xff]   ;;  %v1777_v52 = vld [vmem:[%s2356_s1 + $0x108] sm:$0xff]   ;;  %v1783_v1 = vld [vmem:[%s2356_s1 + $0x190] sm:$0xff]  }
  0x11   :  { %1573 = vmatpush3.bf16.msra.mxu1 %v1755_v15  ;;  %1516 = vmatprep.subr.bf16.mxu0 %v1756_v16  ;;  %v26_v44 = vld [vmem:[%s2357_s0 + $0x40] sm:$0xff]  ;;  %v1778_v54 = vld [vmem:[%s2356_s1 + $0x1c8] sm:$0xff]   ;;  %v1784_v3 = vld [vmem:[%s2356_s1 + $0x158] sm:$0xff]  }
  0x12   :  { %1574 = vmatprep.subr.bf16.mxu1 %v1757_v17  ;;  %v30_v45 = vld [vmem:[%s2357_s0 + $0x60] sm:$0xff]  ;;  %v1779_v55 = vld [vmem:[%s2356_s1 + $0x188] sm:$0xff]   ;;  %v1785_v5 = vld [vmem:[%s2356_s1 + $0x118] sm:$0xff]  }
  0x13   :  { %v1397_v46 = vcombine.high %v26_v44, %v30_v45  ;;  %v1396_v51 = vcombine.low %v26_v44, %v30_v45  ;;  %v34_v57 = vld [vmem:[%s2357_s0 + $0x80] sm:$0xff]  ;;  %v35_v59 = vld [vmem:[%s2357_s0 + $0x88] sm:$0xff]  ;;  %v1786_v12 = vld [vmem:[%s2356_s1 + $0x1d8] sm:$0xff]  }
  0x14   :  { %1517 = vmatpush3.bf16.msra.mxu0 %v1758_v18  ;;  %v38_v58 = vld [vmem:[%s2357_s0 + $0xa0] sm:$0xff]  ;;  %v39_v60 = vld [vmem:[%s2357_s0 + $0xa8] sm:$0xff]  ;;  %v1787_v13 = vld [vmem:[%s2356_s1 + $0x198] sm:$0xff]  }
  0x15   :  { %1575 = vmatpush3.bf16.msra.mxu1 %v1759_v19  ;;  %1518 = vmatprep.subr.bf16.mxu0 %v1760_v20  ;;  %v1405_v61 = vcombine.high %v34_v57, %v38_v58  ;;  %v1407_v62 = vcombine.high %v35_v59, %v39_v60  ;;  %v1404_v2 = vcombine.low %v34_v57, %v38_v58  ;;  %v42_v6 = vld [vmem:[%s2357_s0 + $0xc0] sm:$0xff]  ;;  %v43_v8 = vld [vmem:[%s2357_s0 + $0xc8] sm:$0xff]  ;;  %v1804_v44 = vld [vmem:[%s2356_s1 + $0x178] sm:$0xff]  }
  0x16   :  { %1576 = vmatprep.subr.bf16.mxu1 %v1761_v21  ;;  %v1406_v4 = vcombine.low %v35_v59, %v39_v60  ;;  %v46_v7 = vld [vmem:[%s2357_s0 + $0xe0] sm:$0xff]  ;;  %v47_v10 = vld [vmem:[%s2357_s0 + $0xe8] sm:$0xff]  ;;  %v1805_v45 = vld [vmem:[%s2356_s1 + $0x138] sm:$0xff]  }
  0x17   :  { %v1413_v9 = vcombine.high %v42_v6, %v46_v7  ;;  %v1415_v11 = vcombine.high %v43_v8, %v47_v10  ;;  %v1788_v14 = vld [vmem:[%s2356_s1 + $0x160] sm:$0xff]   ;;  %v1412_v16 = vcombine.low %v42_v6, %v46_v7  ;;  %v1414_v20 = vcombine.low %v43_v8, %v47_v10  ;;  %v59_v32 = vld [vmem:[%s2357_s0 + $0x148] sm:$0xff]  ;;  %v1807_v48 = vld [vmem:[%s2356_s1 + $0x1b8] sm:$0xff]  }
  0x18   :  { %1519 = vmatpush3.bf16.msra.mxu0 %v1762_v22  ;;  %v1789_v15 = vld [vmem:[%s2356_s1 + $0x120] sm:$0xff]   ;;  %v51_v22 = vld [vmem:[%s2357_s0 + $0x108] sm:$0xff]  ;;  %v28_v60 = vld [vmem:[%s2357_s0 + $0x50] sm:$0xff] }
  0x19   :  { %1577 = vmatpush3.bf16.msra.mxu1 %v1763_v23  ;;  %1520 = vmatprep.subr.bf16.mxu0 %v1764_v24  ;;  %v1790_v17 = vld [vmem:[%s2356_s1 + $0x1e0] sm:$0xff]   ;;  %v55_v23 = vld [vmem:[%s2357_s0 + $0x128] sm:$0xff]  ;;  %v37_v6 = vld [vmem:[%s2357_s0 + $0x98] sm:$0xff] }
  0x1a   :  { %1578 = vmatprep.subr.bf16.mxu1 %v1765_v25  ;;  %v50_v18 = vld [vmem:[%s2357_s0 + $0x100] sm:$0xff]  ;;  %v1423_v24 = vcombine.high %v51_v22, %v55_v23  ;;  %v63_v33 = vld [vmem:[%s2357_s0 + $0x168] sm:$0xff]  ;;  %v1422_v36 = vcombine.low %v51_v22, %v55_v23  ;;  %v41_v7 = vld [vmem:[%s2357_s0 + $0xb8] sm:$0xff] }
  0x1b   :  { %v54_v19 = vld [vmem:[%s2357_s0 + $0x120] sm:$0xff]  ;;  %v1431_v39 = vcombine.high %v59_v32, %v63_v33  ;;  %v53_v22 = vld [vmem:[%s2357_s0 + $0x118] sm:$0xff] }
  0x1c   :  { %1521 = vmatpush3.bf16.msra.mxu0 %v1766_v26  ;;  %v1421_v21 = vcombine.high %v50_v18, %v54_v19  ;;  %v1791_v25 = vld [vmem:[%s2356_s1 + $0x1a0] sm:$0xff]   ;;  %v1792_v26 = vld [vmem:[%s2356_s1 + $0x168] sm:$0xff]   ;;  %v1420_v34 = vcombine.low %v50_v18, %v54_v19  ;;  %v57_v23 = vld [vmem:[%s2357_s0 + $0x138] sm:$0xff] }
  0x1d   :  { %1579 = vmatpush3.bf16.msra.mxu1 %v1767_v27  ;;  %1522 = vmatprep.subr.bf16.mxu0 %v1768_v28  ;;  %v1793_v27 = vld [vmem:[%s2356_s1 + $0x128] sm:$0xff]  }
  0x1e   :  { %1580 = vmatprep.subr.bf16.mxu1 %v1769_v29  ;;  %v1794_v28 = vld [vmem:[%s2356_s1 + $0x1e8] sm:$0xff]  }
  0x1f   :  { %v1795_v29 = vld [vmem:[%s2356_s1 + $0x1a8] sm:$0xff]  }
  0x20   :  { %1523 = vmatpush3.bf16.msra.mxu0 %v1770_v30  ;;  %v58_v30 = vld [vmem:[%s2357_s0 + $0x140] sm:$0xff] }
  0x21   :  { %1581 = vmatpush3.bf16.msra.mxu1 %v1771_v31  ;;  %1624 = vmatprep.subr.bf16.mxu0 %v1772_v40  ;;  %v62_v31 = vld [vmem:[%s2357_s0 + $0x160] sm:$0xff]  ;;  %v1798_v40 = vld [vmem:[%s2356_s1 + $0x1f0] sm:$0xff]  }
  0x22   :  { %1682 = vmatprep.subr.bf16.mxu1 %v1774_v42  ;;  %v1429_v37 = vcombine.high %v58_v30, %v62_v31  ;;  %v66_v42 = vld [vmem:[%s2357_s0 + $0x180] sm:$0x11]  ;;  %v1428_v47 = vcombine.low %v58_v30, %v62_v31  ;;  %v61_v30 = vld [vmem:[%s2357_s0 + $0x158] sm:$0xff] }
  0x23   :  { %883 = vmatmul.mubr.bf16.vlgmr.msra.gmra.mrb[0].mxu0 %v1388_v35  ;;  %v1796_v35 = vld [vmem:[%s2356_s1 + $0x170] sm:$0xff]   ;;  %v65_v31 = vld [vmem:[%s2357_s0 + $0x178] sm:$0xff] }
  0x24   :  { %971 = vmatmul.mubr.bf16.vlgmr.msra.gmra.mrb[0].mxu1 %v1390_v38  ;;  %1625 = vmatpush3.bf16.msra.mxu0 %v1773_v41  ;;  %v1797_v38 = vld [vmem:[%s2356_s1 + $0x130] sm:$0xff]  }
  0x25   :  { %1683 = vmatpush3.bf16.msra.mxu1 %v1775_v43  ;;  %890 = vmatprep.mubr.bf16.mxu0 %v1397_v46  ;;  %v1799_v41 = vld [vmem:[%s2356_s1 + $0x1b0] sm:$0xff]   ;;  %v67_v43 = vld [vmem:[%s2357_s0 + $0x188] sm:$0x11]  ;;  %v1806_v46 = vld [vmem:[%s2356_s1 + $0x1f8] sm:$0xff]  }
  0x26   :  { %978 = vmatprep.mubr.bf16.mxu1 %v1399_v49  ;;  %1626 = vmatprep.subr.bf16.mxu0 %v1776_v50  ;;  %v1430_v49 = vcombine.low %v59_v32, %v63_v33  ;;  %v1437_v50 = vcombine.high %v66_v42, %v66_v42  ;;  %v1438_v57 = vcombine.low %v67_v43, %v67_v43 }
  0x27   :  { %1684 = vmatprep.subr.bf16.mxu1 %v1778_v54  ;;  %v21_v54 = vld [vmem:[%s2357_s0 + $0x18] sm:$0xff]  ;;  %v1426_v33 = vcombine.low %v53_v22, %v57_v23 }
  0x28   :  { %1627 = vmatpush3.bf16.msra.mxu0 %v1777_v52  ;;  %v20_v52 = vld [vmem:[%s2357_s0 + $0x10] sm:$0xff] }
  0x29   :  { %1685 = vmatpush3.bf16.msra.mxu1 %v1779_v55  ;;  %1628 = vmatprep.subr.bf16.mxu0 %v1780_v56  ;;  %v25_v55 = vld [vmem:[%s2357_s0 + $0x38] sm:$0xff]  ;;  %v1436_v56 = vcombine.low %v66_v42, %v66_v42 }
  0x2a   :  { %1686 = vmatprep.subr.bf16.mxu1 %v1782_v0  ;;  %v1395_v59 = vcombine.high %v21_v54, %v25_v55 }
  0x2b   :  { %891 = vmatmul.mubr.bf16.gmra.mrb[4].mxu0 %v1396_v51  ;;  %v1439_v51 = vcombine.high %v67_v43, %v67_v43 }
  0x2c   :  { %979 = vmatmul.mubr.bf16.gmra.mrb[4].mxu1 %v1398_v53  ;;  %898 = vmatprep.mubr.bf16.mxu0 %v1405_v61  ;;  %v24_v53 = vld [vmem:[%s2357_s0 + $0x30] sm:$0xff] }
  0x2d   :  { %986 = vmatprep.mubr.bf16.mxu1 %v1407_v62  ;;  %1629 = vmatpush3.bf16.msra.mxu0 %v1781_v63  ;;  %v1393_v58 = vcombine.high %v20_v52, %v24_v53  ;;  %v32_v61 = vld [vmem:[%s2357_s0 + $0x70] sm:$0xff]  ;;  %v29_v62 = vld [vmem:[%s2357_s0 + $0x58] sm:$0xff]  ;;  %v1392_v0 = vcombine.low %v20_v52, %v24_v53 }
  0x2e   :  { %1687 = vmatpush3.bf16.msra.mxu1 %v1783_v1  ;;  %1630 = vmatprep.subr.bf16.mxu0 %v1784_v3  ;;  %v33_v63 = vld [vmem:[%s2357_s0 + $0x78] sm:$0xff]  ;;  %v1394_v1 = vcombine.low %v21_v54, %v25_v55  ;;  %v1400_v8 = vcombine.low %v28_v60, %v32_v61 }
  0x2f   :  { %1688 = vmatprep.subr.bf16.mxu1 %v1786_v12  ;;  %v1403_v3 = vcombine.high %v29_v62, %v33_v63  ;;  %v44_v12 = vld [vmem:[%s2357_s0 + $0xd0] sm:$0xff] }
  0x31   :  { %1631 = vmatpush3.bf16.msra.mxu0 %v1785_v5  ;;  %v40_v5 = vld [vmem:[%s2357_s0 + $0xb0] sm:$0xff] }
  0x32   :  { %1689 = vmatpush3.bf16.msra.mxu1 %v1787_v13  ;;  %1632 = vmatprep.subr.bf16.mxu0 %v1788_v14  ;;  %v48_v13 = vld [vmem:[%s2357_s0 + $0xf0] sm:$0xff]  ;;  %v45_v14 = vld [vmem:[%s2357_s0 + $0xd8] sm:$0xff] }
  0x33   :  { %899 = vmatmul.mubr.bf16.gmra.mrb[8].mxu0 %v1404_v2  ;;  %1690 = vmatprep.subr.bf16.mxu1 %v1790_v17  ;;  %v1401_v2 = vcombine.high %v28_v60, %v32_v61  ;;  %v1410_v17 = vcombine.low %v37_v6, %v41_v7  ;;  %v1417_v18 = vcombine.high %v44_v12, %v48_v13 }
  0x34   :  { %987 = vmatmul.mubr.bf16.gmra.mrb[8].mxu1 %v1406_v4  ;;  %906 = vmatprep.mubr.bf16.mxu0 %v1413_v9  ;;  %v36_v4 = vld [vmem:[%s2357_s0 + $0x90] sm:$0xff]  ;;  %v1402_v9 = vcombine.low %v29_v62, %v33_v63 }
  0x35   :  { %994 = vmatprep.mubr.bf16.mxu1 %v1415_v11  ;;  %1633 = vmatpush3.bf16.msra.mxu0 %v1789_v15  ;;  %v1409_v10 = vcombine.high %v36_v4, %v40_v5  ;;  %v1411_v11 = vcombine.high %v37_v6, %v41_v7  ;;  %v49_v15 = vld [vmem:[%s2357_s0 + $0xf8] sm:$0xff] }
  0x36   :  { %1691 = vmatpush3.bf16.msra.mxu1 %v1791_v25  ;;  %1634 = vmatprep.subr.bf16.mxu0 %v1792_v26  ;;  %v1419_v19 = vcombine.high %v45_v14, %v49_v15  ;;  %v1418_v25 = vcombine.low %v45_v14, %v49_v15 }
  0x37   :  { %1692 = vmatprep.subr.bf16.mxu1 %v1794_v28  ;;  %v60_v28 = vld [vmem:[%s2357_s0 + $0x150] sm:$0xff] }
  0x39   :  { %1635 = vmatpush3.bf16.msra.mxu0 %v1793_v27  ;;  %v1427_v27 = vcombine.high %v53_v22, %v57_v23 }
  0x3a   :  { %1693 = vmatpush3.bf16.msra.mxu1 %v1795_v29  ;;  %1636 = vmatprep.subr.bf16.mxu0 %v1796_v35  ;;  %v64_v29 = vld [vmem:[%s2357_s0 + $0x170] sm:$0xff]  ;;  %v1435_v35 = vcombine.high %v61_v30, %v65_v31 }
  0x3b   :  { %907 = vmatmul.mubr.bf16.gmra.mrb[12].mxu0 %v1412_v16  ;;  %1694 = vmatprep.subr.bf16.mxu1 %v1798_v40  ;;  %v1408_v16 = vcombine.low %v36_v4, %v40_v5 }
  0x3c   :  { %995 = vmatmul.mubr.bf16.gmra.mrb[12].mxu1 %v1414_v20  ;;  %914 = vmatprep.mubr.bf16.mxu0 %v1421_v21  ;;  %v52_v20 = vld [vmem:[%s2357_s0 + $0x110] sm:$0xff] }
  0x3d   :  { %1002 = vmatprep.mubr.bf16.mxu1 %v1423_v24  ;;  %1637 = vmatpush3.bf16.msra.mxu0 %v1797_v38  ;;  %v56_v21 = vld [vmem:[%s2357_s0 + $0x130] sm:$0xff]  ;;  %v1416_v24 = vcombine.low %v44_v12, %v48_v13  ;;  %v1432_v38 = vcombine.low %v60_v28, %v64_v29 }
  0x3e   :  { %1695 = vmatpush3.bf16.msra.mxu1 %v1799_v41  ;;  %1638 = vmatprep.subr.bf16.mxu0 %v1804_v44  ;;  %v1425_v26 = vcombine.high %v52_v20, %v56_v21  ;;  %v1424_v32 = vcombine.low %v52_v20, %v56_v21 }
  0x3f   :  { %1696 = vmatprep.subr.bf16.mxu1 %v1806_v46 }
  0x41   :  { %1639 = vmatpush3.bf16.msra.mxu0 %v1805_v45 }
  0x42   :  { %1697 = vmatpush3.bf16.msra.mxu1 %v1807_v48 }
  0x43   :  { %915 = vmatmul.mubr.bf16.gmra.mrb[16].mxu0 %v1420_v34  ;;  %v1433_v34 = vcombine.high %v60_v28, %v64_v29 }
  0x44   :  { %1003 = vmatmul.mubr.bf16.gmra.mrb[16].mxu1 %v1422_v36  ;;  %922 = vmatprep.mubr.bf16.mxu0 %v1429_v37  ;;  %v68_v36 = vld [vmem:[%s2357_s0 + $0x190] sm:$0x11]  ;;  %v69_v37 = vld [vmem:[%s2357_s0 + $0x198] sm:$0x11] }
  0x45   :  { %1010 = vmatprep.mubr.bf16.mxu1 %v1431_v39  ;;  %v1434_v39 = vcombine.low %v61_v30, %v65_v31  ;;  %v1441_v40 = vcombine.high %v68_v36, %v68_v36  ;;  %v1443_v41 = vcombine.high %v69_v37, %v69_v37  ;;  %v1440_v42 = vcombine.low %v68_v36, %v68_v36 }
  0x46   :  { %v1442_v43 = vcombine.low %v69_v37, %v69_v37 }
  0x4b   :  { %923 = vmatmul.mubr.bf16.gmra.mrb[20].mxu0 %v1428_v47 }
  0x4c   :  { %1011 = vmatmul.mubr.bf16.gmra.mrb[20].mxu1 %v1430_v49  ;;  %930 = vmatprep.mubr.bf16.mxu0 %v1437_v50 }
  0x4d   :  { %1018 = vmatprep.mubr.bf16.mxu1 %v1439_v51 }
  0x53   :  { %931 = vmatmul.mubr.bf16.gmra.mrb[24].mxu0 %v1436_v56 }
  0x54   :  { %1019 = vmatmul.mubr.bf16.gmra.mrb[24].mxu1 %v1438_v57  ;;  %1058 = vmatprep.mubr.bf16.mxu0 %v1393_v58 }
  0x55   :  { %1146 = vmatprep.mubr.bf16.mxu1 %v1395_v59 }
  0x5b   :  { %1059 = vmatmul.mubr.bf16.vlgmr.msra.gmra.mrb[28].mxu0 %v1392_v0 }
  0x5c   :  { %1147 = vmatmul.mubr.bf16.vlgmr.msra.gmra.mrb[28].mxu1 %v1394_v1  ;;  %1066 = vmatprep.mubr.bf16.mxu0 %v1401_v2 }
  0x5d   :  { %1154 = vmatprep.mubr.bf16.mxu1 %v1403_v3 }
  0x63   :  { %1067 = vmatmul.mubr.bf16.gmra.mrb[32].mxu0 %v1400_v8 }
  0x64   :  { %1155 = vmatmul.mubr.bf16.gmra.mrb[32].mxu1 %v1402_v9  ;;  %1074 = vmatprep.mubr.bf16.mxu0 %v1409_v10 }
  0x65   :  { %1162 = vmatprep.mubr.bf16.mxu1 %v1411_v11 }
  0x6b   :  { %1075 = vmatmul.mubr.bf16.gmra.mrb[36].mxu0 %v1408_v16 }
  0x6c   :  { %1163 = vmatmul.mubr.bf16.gmra.mrb[36].mxu1 %v1410_v17  ;;  %1082 = vmatprep.mubr.bf16.mxu0 %v1417_v18 }
  0x6d   :  { %1170 = vmatprep.mubr.bf16.mxu1 %v1419_v19 }
  0x73   :  { %1083 = vmatmul.mubr.bf16.gmra.mrb[40].mxu0 %v1416_v24 }
  0x74   :  { %1171 = vmatmul.mubr.bf16.gmra.mrb[40].mxu1 %v1418_v25  ;;  %1090 = vmatprep.mubr.bf16.mxu0 %v1425_v26 }
  0x75   :  { %1178 = vmatprep.mubr.bf16.mxu1 %v1427_v27 }
  0x7b   :  { %1091 = vmatmul.mubr.bf16.gmra.mrb[44].mxu0 %v1424_v32 }
  0x7c   :  { %1179 = vmatmul.mubr.bf16.gmra.mrb[44].mxu1 %v1426_v33  ;;  %1098 = vmatprep.mubr.bf16.mxu0 %v1433_v34 }
  0x7d   :  { %1186 = vmatprep.mubr.bf16.mxu1 %v1435_v35 }
  0x83   :  { %1099 = vmatmul.mubr.bf16.gmra.mrb[48].mxu0 %v1432_v38 }
  0x84   :  { %1187 = vmatmul.mubr.bf16.gmra.mrb[48].mxu1 %v1434_v39  ;;  %1106 = vmatprep.mubr.bf16.mxu0 %v1441_v40 }
  0x85   :  { %1194 = vmatprep.mubr.bf16.mxu1 %v1443_v41 }
  0x8b   :  { %1107 = vmatmul.mubr.bf16.gmra.mrb[52].mxu0 %v1440_v42 }
  0x8c   :  { %1195 = vmatmul.mubr.bf16.gmra.mrb[52].mxu1 %v1442_v43 }
  0xf6   :  { %v1524_v44 = vpop.f32.mrb[0].mxu0 }
  0xf7   :  { %v1582_v45 = vpop.f32.mrb[0].mxu1  ;;  %v1525_v46 = vpop.f32.mrb[1].mxu0 }
  0xf8   :  { %v1526_v47 = vadd.f32 %v1525_v46, %v1524_v44  ;;  %v1583_v48 = vpop.f32.mrb[1].mxu1  ;;  %v1527_v49 = vpop.f32.mrb[2].mxu0 }
  0xf9   :  { %v1584_v50 = vadd.f32 %v1583_v48, %v1582_v45  ;;  %v1585_v51 = vpop.f32.mrb[2].mxu1  ;;  %v1528_v52 = vpop.f32.mrb[3].mxu0 }
  0xfa   :  { %v1529_v53 = vadd.f32 %v1528_v52, %v1527_v49  ;;  %v1586_v54 = vpop.f32.mrb[3].mxu1 }
  0xfb   :  { %v2187_v55 = vadd.f32 %v1584_v50, %v1526_v47  ;;  %v1587_v56 = vadd.f32 %v1586_v54, %v1585_v51 }
  0xfd   :  { %v2189_v57 = vadd.f32 %v1587_v56, %v1529_v53 }
  0xfe   :  { %v1530_v58 = vpop.f32.mrb[4].mxu0 }
  0xff   :  { %v1588_v59 = vpop.f32.mrb[4].mxu1  ;;  %v1531_v60 = vpop.f32.mrb[5].mxu0 }
 0x100   :  { %v1532_v61 = vadd.f32 %v1531_v60, %v1530_v58  ;;  %v1589_v62 = vpop.f32.mrb[5].mxu1  ;;  %v1533_v63 = vpop.f32.mrb[6].mxu0 }
 0x101   :  { %v1590_v0 = vadd.f32 %v1589_v62, %v1588_v59  ;;  %v1591_v1 = vpop.f32.mrb[6].mxu1  ;;  %v1534_v2 = vpop.f32.mrb[7].mxu0 }
 0x102   :  { %v1535_v3 = vadd.f32 %v1534_v2, %v1533_v63  ;;  %v1592_v4 = vpop.f32.mrb[7].mxu1 }
 0x103   :  { %v2191_v5 = vadd.f32 %v1590_v0, %v1532_v61  ;;  %v1593_v6 = vadd.f32 %v1592_v4, %v1591_v1 }
 0x105   :  { %v2193_v7 = vadd.f32 %v1593_v6, %v1535_v3 }
 0x106   :  { %v1536_v8 = vpop.f32.mrb[8].mxu0 }
 0x107   :  { %v1594_v9 = vpop.f32.mrb[8].mxu1  ;;  %v1537_v10 = vpop.f32.mrb[9].mxu0 }
 0x108   :  { %v1538_v11 = vadd.f32 %v1537_v10, %v1536_v8  ;;  %v1595_v12 = vpop.f32.mrb[9].mxu1  ;;  %v1539_v13 = vpop.f32.mrb[10].mxu0 }
 0x109   :  { %v1596_v14 = vadd.f32 %v1595_v12, %v1594_v9  ;;  %v1597_v15 = vpop.f32.mrb[10].mxu1  ;;  %v1540_v16 = vpop.f32.mrb[11].mxu0 }
 0x10a   :  { %v1541_v17 = vadd.f32 %v1540_v16, %v1539_v13  ;;  %v1598_v18 = vpop.f32.mrb[11].mxu1 }
 0x10b   :  { %v2195_v19 = vadd.f32 %v1596_v14, %v1538_v11  ;;  %v1599_v20 = vadd.f32 %v1598_v18, %v1597_v15 }
 0x10d   :  { %v2197_v21 = vadd.f32 %v1599_v20, %v1541_v17 }
 0x10e   :  { %v1542_v22 = vpop.f32.mrb[12].mxu0 }
 0x10f   :  { %v1600_v23 = vpop.f32.mrb[12].mxu1  ;;  %v1543_v24 = vpop.f32.mrb[13].mxu0 }
 0x110   :  { %v1544_v25 = vadd.f32 %v1543_v24, %v1542_v22  ;;  %v1601_v26 = vpop.f32.mrb[13].mxu1  ;;  %v1545_v27 = vpop.f32.mrb[14].mxu0 }
 0x111   :  { %v1602_v28 = vadd.f32 %v1601_v26, %v1600_v23  ;;  %v1603_v29 = vpop.f32.mrb[14].mxu1  ;;  %v1546_v30 = vpop.f32.mrb[15].mxu0 }
 0x112   :  { %v1547_v31 = vadd.f32 %v1546_v30, %v1545_v27  ;;  %v1604_v32 = vpop.f32.mrb[15].mxu1 }
 0x113   :  { %v2199_v33 = vadd.f32 %v1602_v28, %v1544_v25  ;;  %v1605_v34 = vadd.f32 %v1604_v32, %v1603_v29 }
 0x115   :  { %v2201_v35 = vadd.f32 %v1605_v34, %v1547_v31 }
 0x116   :  { %v1548_v36 = vpop.f32.mrb[16].mxu0 }
 0x117   :  { %v1606_v37 = vpop.f32.mrb[16].mxu1  ;;  %v1549_v38 = vpop.f32.mrb[17].mxu0 }
 0x118   :  { %v1550_v39 = vadd.f32 %v1549_v38, %v1548_v36  ;;  %v1607_v40 = vpop.f32.mrb[17].mxu1  ;;  %v1551_v41 = vpop.f32.mrb[18].mxu0 }
 0x119   :  { %v1608_v42 = vadd.f32 %v1607_v40, %v1606_v37  ;;  %v1609_v43 = vpop.f32.mrb[18].mxu1  ;;  %v1552_v44 = vpop.f32.mrb[19].mxu0 }
 0x11a   :  { %v1553_v45 = vadd.f32 %v1552_v44, %v1551_v41  ;;  %v1610_v46 = vpop.f32.mrb[19].mxu1 }
 0x11b   :  { %v2203_v47 = vadd.f32 %v1608_v42, %v1550_v39  ;;  %v1611_v48 = vadd.f32 %v1610_v46, %v1609_v43 }
 0x11d   :  { %v2205_v49 = vadd.f32 %v1611_v48, %v1553_v45 }
 0x11e   :  { %v1554_v50 = vpop.f32.mrb[20].mxu0 }
 0x11f   :  { %v1612_v51 = vpop.f32.mrb[20].mxu1  ;;  %v1555_v52 = vpop.f32.mrb[21].mxu0 }
 0x120   :  { %v1556_v53 = vadd.f32 %v1555_v52, %v1554_v50  ;;  %v1613_v54 = vpop.f32.mrb[21].mxu1  ;;  %v1557_v56 = vpop.f32.mrb[22].mxu0 }
 0x121   :  { %v1614_v58 = vadd.f32 %v1613_v54, %v1612_v51  ;;  %v1615_v59 = vpop.f32.mrb[22].mxu1  ;;  %v1558_v60 = vpop.f32.mrb[23].mxu0 }
 0x122   :  { %v1559_v61 = vadd.f32 %v1558_v60, %v1557_v56  ;;  %v1616_v62 = vpop.f32.mrb[23].mxu1 }
 0x123   :  { %v2207_v63 = vadd.f32 %v1614_v58, %v1556_v53  ;;  %v1617_v0 = vadd.f32 %v1616_v62, %v1615_v59 }
 0x125   :  { %v2209_v1 = vadd.f32 %v1617_v0, %v1559_v61 }
 0x126   :  { %v1560_v2 = vpop.f32.mrb[24].mxu0 }
 0x127   :  { %v1618_v3 = vpop.f32.mrb[24].mxu1  ;;  %v1561_v4 = vpop.f32.mrb[25].mxu0 }
 0x128   :  { %v1562_v6 = vadd.f32 %v1561_v4, %v1560_v2  ;;  %v1619_v8 = vpop.f32.mrb[25].mxu1  ;;  %v1563_v9 = vpop.f32.mrb[26].mxu0 }
 0x129   :  { %v1620_v10 = vadd.f32 %v1619_v8, %v1618_v3  ;;  %v1621_v11 = vpop.f32.mrb[26].mxu1  ;;  %v1564_v12 = vpop.f32.mrb[27].mxu0 }
 0x12a   :  { %v1622_v13 = vpop.f32.mrb[27].mxu1 }
 0x12b   :  { %v2211_v14 = vadd.f32 %v1620_v10, %v1562_v6 }
 0x12e   :  { %v1640_v15 = vpop.f32.mrb[28].mxu0 }
 0x12f   :  { %v1698_v16 = vpop.f32.mrb[28].mxu1  ;;  %v1641_v17 = vpop.f32.mrb[29].mxu0 }
 0x130   :  { %v1642_v18 = vadd.f32 %v1641_v17, %v1640_v15  ;;  %v1699_v20 = vpop.f32.mrb[29].mxu1  ;;  %v1643_v22 = vpop.f32.mrb[30].mxu0 }
 0x131   :  { %v1700_v23 = vadd.f32 %v1699_v20, %v1698_v16  ;;  %v1701_v24 = vpop.f32.mrb[30].mxu1  ;;  %v1644_v25 = vpop.f32.mrb[31].mxu0 }
 0x132   :  { %v1061_v26 = vadd.f32 %v1642_v18, %v2187_v55  ;;  %v1645_v27 = vadd.f32 %v1644_v25, %v1643_v22  ;;  %v1702_v28 = vpop.f32.mrb[31].mxu1 }
 0x133   :  { %v1703_v29 = vadd.f32 %v1702_v28, %v1701_v24 }
 0x134   :  { %v2214_v30 = vadd.f32 %v1700_v23, %v1061_v26  ;;  %v1064_v31 = vadd.f32 %v1645_v27, %v2189_v57 }
 0x136   :  { %v2217_v32 = vadd.f32 %v1703_v29, %v1064_v31  ;;  %v1646_v34 = vpop.f32.mrb[32].mxu0 }
 0x137   :  { %v1704_v36 = vpop.f32.mrb[32].mxu1  ;;  %v1647_v37 = vpop.f32.mrb[33].mxu0 }
 0x138   :  { %v1648_v38 = vadd.f32 %v1647_v37, %v1646_v34  ;;  %v1705_v39 = vpop.f32.mrb[33].mxu1  ;;  %v1649_v40 = vpop.f32.mrb[34].mxu0  ;;  %v1228_v4 = vadd.f32 %v2217_v32, %v2214_v30 }
 0x139   :  { %v1706_v41 = vadd.f32 %v1705_v39, %v1704_v36  ;;  %v1707_v42 = vpop.f32.mrb[34].mxu1  ;;  %v1650_v43 = vpop.f32.mrb[35].mxu0 }
 0x13a   :  { %v1069_v55 = vadd.f32 %v1648_v38, %v2191_v5  ;;  %v1651_v44 = vadd.f32 %v1650_v43, %v1649_v40  ;;  %v1708_v45 = vpop.f32.mrb[35].mxu1  ;;  %v1250_v5 = vmul.f32 %v2217_v32, %v2217_v32 }
 0x13b   :  { %v1709_v46 = vadd.f32 %v1708_v45, %v1707_v42 }
 0x13c   :  { %v2220_v48 = vadd.f32 %v1706_v41, %v1069_v55  ;;  %v1072_v57 = vadd.f32 %v1651_v44, %v2193_v7  ;;  %v1249_v7 = vmul.f32 %v2214_v30, %v2214_v30 }
 0x13e   :  { %v2223_v50 = vadd.f32 %v1709_v46, %v1072_v57  ;;  %v1652_v51 = vpop.f32.mrb[36].mxu0  ;;  %v1251_v6 = vmul.f32 %v2220_v48, %v2220_v48  ;;  %v1262_v10 = vadd.f32 %v1250_v5, %v1249_v7  ;;  %v1229_v11 = vadd.f32 %v1228_v4, %v2220_v48 }
 0x13f   :  { %v1710_v52 = vpop.f32.mrb[36].mxu1  ;;  %v1653_v53 = vpop.f32.mrb[37].mxu0 }
 0x140   :  { %v1654_v54 = vadd.f32 %v1653_v53, %v1652_v51  ;;  %v1711_v56 = vpop.f32.mrb[37].mxu1  ;;  %v1655_v58 = vpop.f32.mrb[38].mxu0  ;;  %v1263_v16 = vadd.f32 %v1262_v10, %v1251_v6  ;;  %v1252_v17 = vmul.f32 %v2223_v50, %v2223_v50 }
 0x141   :  { %v1712_v59 = vadd.f32 %v1711_v56, %v1710_v52  ;;  %v1713_v60 = vpop.f32.mrb[38].mxu1  ;;  %v1656_v61 = vpop.f32.mrb[39].mxu0 }
 0x142   :  { %v1077_v62 = vadd.f32 %v1654_v54, %v2195_v19  ;;  %v1657_v0 = vadd.f32 %v1656_v61, %v1655_v58  ;;  %v1714_v2 = vpop.f32.mrb[39].mxu1  ;;  %v1264_v34 = vadd.f32 %v1263_v16, %v1252_v17 }
 0x143   :  { %v1715_v3 = vadd.f32 %v1714_v2, %v1713_v60 }
 0x144   :  { %v2234_v8 = vadd.f32 %v1712_v59, %v1077_v62  ;;  %v1080_v9 = vadd.f32 %v1657_v0, %v2197_v21  ;;  %v1230_v21 = vadd.f32 %v1229_v11, %v2223_v50 }
 0x146   :  { %v2238_v19 = vadd.f32 %v1715_v3, %v1080_v9  ;;  %v1658_v12 = vpop.f32.mrb[40].mxu0  ;;  %v1253_v26 = vmul.f32 %v2234_v8, %v2234_v8  ;;  %v1231_v36 = vadd.f32 %v1230_v21, %v2234_v8 }
 0x147   :  { %v1716_v13 = vpop.f32.mrb[40].mxu1  ;;  %v1659_v15 = vpop.f32.mrb[41].mxu0 }
 0x148   :  { %v1660_v18 = vadd.f32 %v1659_v15, %v1658_v12  ;;  %v1717_v20 = vpop.f32.mrb[41].mxu1  ;;  %v1661_v22 = vpop.f32.mrb[42].mxu0  ;;  %v1265_v39 = vadd.f32 %v1264_v34, %v1253_v26  ;;  %v1254_v40 = vmul.f32 %v2238_v19, %v2238_v19 }
 0x149   :  { %v1718_v23 = vadd.f32 %v1717_v20, %v1716_v13  ;;  %v1719_v24 = vpop.f32.mrb[42].mxu1  ;;  %v1662_v25 = vpop.f32.mrb[43].mxu0 }
 0x14a   :  { %v1085_v27 = vadd.f32 %v1660_v18, %v2199_v33  ;;  %v1663_v28 = vadd.f32 %v1662_v25, %v1661_v22  ;;  %v1720_v29 = vpop.f32.mrb[43].mxu1  ;;  %v1232_v33 = vadd.f32 %v1231_v36, %v2238_v19  ;;  %v1266_v53 = vadd.f32 %v1265_v39, %v1254_v40 }
 0x14b   :  { %v1721_v31 = vadd.f32 %v1720_v29, %v1719_v24 }
 0x14c   :  { %v2247_v37 = vadd.f32 %v1718_v23, %v1085_v27  ;;  %v1088_v38 = vadd.f32 %v1663_v28, %v2201_v35 }
 0x14e   :  { %v2252_v41 = vadd.f32 %v1721_v31, %v1088_v38  ;;  %v1664_v42 = vpop.f32.mrb[44].mxu0  ;;  %v1255_v44 = vmul.f32 %v2247_v37, %v2247_v37  ;;  %v1233_v54 = vadd.f32 %v1232_v33, %v2247_v37 }
 0x14f   :  { %v1722_v43 = vpop.f32.mrb[44].mxu1  ;;  %v1665_v55 = vpop.f32.mrb[45].mxu0 }
 0x150   :  { %v1666_v45 = vadd.f32 %v1665_v55, %v1664_v42  ;;  %v1723_v46 = vpop.f32.mrb[45].mxu1  ;;  %v1667_v57 = vpop.f32.mrb[46].mxu0  ;;  %v1267_v61 = vadd.f32 %v1266_v53, %v1255_v44  ;;  %v1256_v5 = vmul.f32 %v2252_v41, %v2252_v41  ;;  %v1234_v2 = vadd.f32 %v1233_v54, %v2252_v41 }
 0x151   :  { %v1724_v51 = vadd.f32 %v1723_v46, %v1722_v43  ;;  %v1725_v52 = vpop.f32.mrb[46].mxu1  ;;  %v1668_v35 = vpop.f32.mrb[47].mxu0 }
 0x152   :  { %v1093_v56 = vadd.f32 %v1666_v45, %v2203_v47  ;;  %v1669_v58 = vadd.f32 %v1668_v35, %v1667_v57  ;;  %v1726_v59 = vpop.f32.mrb[47].mxu1  ;;  %v1268_v9 = vadd.f32 %v1267_v61, %v1256_v5 }
 0x153   :  { %v1727_v60 = vadd.f32 %v1726_v59, %v1725_v52 }
 0x154   :  { %v2261_v62 = vadd.f32 %v1724_v51, %v1093_v56  ;;  %v1096_v0 = vadd.f32 %v1669_v58, %v2205_v49 }
 0x156   :  { %v1257_v7 = vmul.f32 %v2261_v62, %v2261_v62  ;;  %v2267_v3 = vadd.f32 %v1727_v60, %v1096_v0  ;;  %v1670_v4 = vpop.f32.mrb[48].mxu0  ;;  %v1235_v10 = vadd.f32 %v1234_v2, %v2261_v62 }
 0x157   :  { %v1728_v47 = vpop.f32.mrb[48].mxu1  ;;  %v1671_v6 = vpop.f32.mrb[49].mxu0 }
 0x158   :  { %v1672_v11 = vadd.f32 %v1671_v6, %v1670_v4  ;;  %v1729_v12 = vpop.f32.mrb[49].mxu1  ;;  %v1673_v13 = vpop.f32.mrb[50].mxu0  ;;  %v1269_v49 = vadd.f32 %v1268_v9, %v1257_v7  ;;  %v1258_v18 = vmul.f32 %v2267_v3, %v2267_v3  ;;  %v1236_v25 = vadd.f32 %v1235_v10, %v2267_v3 }
 0x159   :  { %v1730_v15 = vadd.f32 %v1729_v12, %v1728_v47  ;;  %v1731_v16 = vpop.f32.mrb[50].mxu1  ;;  %v1674_v17 = vpop.f32.mrb[51].mxu0 }
 0x15a   :  { %v1101_v20 = vadd.f32 %v1672_v11, %v2207_v63  ;;  %v1675_v22 = vadd.f32 %v1674_v17, %v1673_v13  ;;  %v1732_v23 = vpop.f32.mrb[51].mxu1  ;;  %v1270_v27 = vadd.f32 %v1269_v49, %v1258_v18  ;;  %v1295_v17 = vlaneseq  ;;  %v1287_v18 = vld [vmem:[%s2358_s2] sm:$0x1] }
 0x15b   :  { %v1733_v24 = vadd.f32 %v1732_v23, %v1731_v16 }
 0x15c   :  { %v2274_v21 = vadd.f32 %v1730_v15, %v1101_v20  ;;  %v1104_v26 = vadd.f32 %v1675_v22, %v2209_v1  ;;  %v1296_v49 = vshrl.u32 %v1295_v17, 7 }
 0x15e   :  { %v1237_v28 = vadd.f32 %v1236_v25, %v2274_v21  ;;  %v1259_v29 = vmul.f32 %v2274_v21, %v2274_v21  ;;  %v2280_v31 = vadd.f32 %v1733_v24, %v1104_v26  ;;  %v1676_v34 = vpop.f32.mrb[52].mxu0  ;;  %v1297_v20 = vsub.s32 0, %v1296_v49  ;;  %v1291_v24 = vld [vmem:[%s2359_s3] sm:$0x1] }
 0x15f   :  { %v1734_v36 = vpop.f32.mrb[52].mxu1  ;;  %v1677_v63 = vpop.f32.mrb[53].mxu0 }
 0x160   :  { %v1271_v38 = vadd.f32 %v1270_v27, %v1259_v29  ;;  %v1238_v39 = vadd.f32 %v1237_v28, %v2280_v31  ;;  %v1260_v40 = vmul.f32 %v2280_v31, %v2280_v31  ;;  %v1678_v42 = vadd.f32 %v1677_v63, %v1676_v34  ;;  %v1735_v43 = vpop.f32.mrb[53].mxu1  ;;  %v1679_v1 = vpop.f32.mrb[54].mxu0 }
 0x161   :  { %v1736_v55 = vadd.f32 %v1735_v43, %v1734_v36  ;;  %v1737_v33 = vpop.f32.mrb[54].mxu1  ;;  %v1680_v44 = vpop.f32.mrb[55].mxu0 }
 0x162   :  { %v1272_v45 = vadd.f32 %v1271_v38, %v1260_v40  ;;  %v1109_v46 = vadd.f32 %v1678_v42, %v2211_v14  ;;  %v1738_v57 = vpop.f32.mrb[55].mxu1 }
 0x164   :  { %v1197_v51 = vadd.f32 %v1736_v55, %v1109_v46 }
 0x166   :  { %1214 = vst [vmem:[#allocation2 + $0x60] sm:$0x3] %v1197_v51 }
 0x16d   :  { %v1227_v52 = vld [vmem:[#allocation2 + $0x60] sm:$0x3] }
 0x16e   :  { %v1240_v35 = vsel %vm1239_vm0, %v1227_v52, 0.0  ;;  %v1261_v53 = vmul.f32 %v1227_v52, %v1227_v52 }
 0x16f   :  { %v1241_v54 = vadd.f32 %v1240_v35, %v1238_v39 }
 0x170   :  { %v1273_v56 = vsel %vm1239_vm0, %v1261_v53, 0.0 }
 0x171   :  { %v1242_v58 = vrot.slane %v1241_v54, 4  ;;  %v1274_v59 = vadd.f32 %v1273_v56, %v1272_v45 }
 0x173   :  { %v1243_v60 = vadd.f32 %v1242_v58, %v1241_v54  ;;  %v1275_v61 = vrot.slane %v1274_v59, 4 }
 0x175   :  { %v1244_v5 = vrot.slane %v1243_v60, 2  ;;  %v1276_v0 = vadd.f32 %v1275_v61, %v1274_v59 }
 0x177   :  { %v1245_v2 = vadd.f32 %v1244_v5, %v1243_v60  ;;  %v1277_v7 = vrot.slane %v1276_v0, 2 }
 0x179   :  { %v1246_v4 = vrot.slane %v1245_v2, 1  ;;  %v1278_v47 = vadd.f32 %v1277_v7, %v1276_v0 }
 0x17b   :  { %v1247_v14 = vadd.f32 %v1246_v4, %v1245_v2  ;;  %v1279_v6 = vrot.slane %v1278_v47, 1 }
 0x17d   :  { %v1280_v9 = vadd.f32 %v1279_v6, %v1278_v47  ;;  %v1282_v10 = vmul.f32 0.010204081, %v1247_v14 }
 0x17f   :  { %v1283_v11 = vmul.f32 0.010204081, %v1280_v9  ;;  %v1284_v12 = vmul.f32 %v1282_v10, %v1282_v10 }
 0x181   :  { %v1285_v13 = vsub.f32 %v1283_v11, %v1284_v12 }
 0x183   :  { %v1286_v15 = vmax.f32 %v1285_v13, 0.0 }
 0x185   :  { %v1288_v16 = vadd.f32 1e-05, %v1286_v15 }
 0x187   :  { %1812 = vrsqrt.f32 %v1288_v16 }
 0x191   :  { %v1813_v22 = vpop.eup %1812 }
 0x192   :  { %v1290_v23 = vmul.f32 %v1813_v22, %v1287_v18 }
 0x194   :  { %v1292_v25 = vmul.f32 %v1290_v23, %v1282_v10  ;;  %v1298_v26 = vrot.slane %v1290_v23, %v1297_v20 }
 0x196   :  { %v1293_v27 = vsub.f32 %v1291_v24, %v1292_v25  ;;  %v1300_v28 = vmul.f32 %v1298_v26, %v2214_v30  ;;  %v1301_v29 = vmul.f32 %v1298_v26, %v2217_v32  ;;  %v1302_v34 = vmul.f32 %v1298_v26, %v2220_v48 }
 0x197   :  { %v1303_v36 = vmul.f32 %v1298_v26, %v2223_v50  ;;  %v1309_v63 = vmul.f32 %v1298_v26, %v2267_v3  ;;  %v1310_v38 = vmul.f32 %v1298_v26, %v2274_v21  ;;  %v1304_v39 = vmul.f32 %v1298_v26, %v2234_v8 }
 0x198   :  { %v1305_v40 = vmul.f32 %v1298_v26, %v2238_v19  ;;  %v1311_v42 = vmul.f32 %v1298_v26, %v2280_v31  ;;  %v1317_v43 = vrot.slane %v1293_v27, %v1297_v20  ;;  %v1306_v1 = vmul.f32 %v1298_v26, %v2247_v37 }
 0x199   :  { %v1307_v30 = vmul.f32 %v1298_v26, %v2252_v41  ;;  %v1308_v32 = vmul.f32 %v1298_v26, %v2261_v62  ;;  %v1312_v48 = vmul.f32 %v1298_v26, %v1227_v52 }
 0x19a   :  { %v1319_v55 = vadd.f32 %v1317_v43, %v1300_v28  ;;  %v1320_v50 = vadd.f32 %v1317_v43, %v1301_v29  ;;  %v1321_v33 = vadd.f32 %v1317_v43, %v1302_v34  ;;  %v1322_v3 = vadd.f32 %v1317_v43, %v1303_v36 }
 0x19b   :  { %v1323_v44 = vadd.f32 %v1317_v43, %v1304_v39  ;;  %v1324_v21 = vadd.f32 %v1317_v43, %v1305_v40  ;;  %v1325_v45 = vadd.f32 %v1317_v43, %v1306_v1  ;;  %v1326_v8 = vadd.f32 %v1317_v43, %v1307_v30 }
 0x19c   :  { %v1327_v46 = vadd.f32 %v1317_v43, %v1308_v32  ;;  %v1328_v19 = vadd.f32 %v1317_v43, %v1309_v63  ;;  %v1329_v57 = vadd.f32 %v1317_v43, %v1310_v38  ;;  %v1330_v31 = vadd.f32 %v1317_v43, %v1311_v42 }
 0x19d   :  { %v1331_v51 = vadd.f32 %v1317_v43, %v1312_v48  ;;  %vm1332_vm1 = vcmp.ge.f32.partialorder %v1319_v55, 0.0  ;;  %vm1333_vm2 = vcmp.ge.f32.partialorder %v1320_v50, 0.0  ;;  %vm1334_vm3 = vcmp.ge.f32.partialorder %v1321_v33, 0.0 }
 0x19e   :  { %vm1335_vm4 = vcmp.ge.f32.partialorder %v1322_v3, 0.0  ;;  %vm1336_vm5 = vcmp.ge.f32.partialorder %v1323_v44, 0.0  ;;  %vm1337_vm6 = vcmp.ge.f32.partialorder %v1324_v21, 0.0  ;;  %vm1338_vm7 = vcmp.ge.f32.partialorder %v1325_v45, 0.0 }
 0x19f   :  { %vm1339_vm8 = vcmp.ge.f32.partialorder %v1326_v8, 0.0  ;;  %vm1340_vm9 = vcmp.ge.f32.partialorder %v1327_v46, 0.0  ;;  %vm1341_vm10 = vcmp.ge.f32.partialorder %v1328_v19, 0.0  ;;  %vm1342_vm11 = vcmp.ge.f32.partialorder %v1329_v57, 0.0 }
 0x1a0   :  { %vm1343_vm12 = vcmp.ge.f32.partialorder %v1330_v31, 0.0  ;;  %vm1344_vm13 = vcmp.ge.f32.partialorder %v1331_v51, 0.0  ;;  %v1345_v37 = vmul.f32 0.2, %v1319_v55  ;;  %v1346_v41 = vmul.f32 0.2, %v1320_v50 }
 0x1a1   :  { %v1347_v62 = vmul.f32 0.2, %v1321_v33  ;;  %v1348_v52 = vmul.f32 0.2, %v1322_v3  ;;  %v1349_v35 = vmul.f32 0.2, %v1323_v44 }
 0x1a2   :  { %v1350_v53 = vmul.f32 0.2, %v1324_v21  ;;  %v1351_v54 = vmul.f32 0.2, %v1325_v45  ;;  %v1352_v56 = vmul.f32 0.2, %v1326_v8  ;;  %v1358_v58 = vsel %vm1332_vm1, %v1319_v55, %v1345_v37 }
 0x1a3   :  { %v1353_v59 = vmul.f32 0.2, %v1327_v46  ;;  %v1354_v60 = vmul.f32 0.2, %v1328_v19  ;;  %v1355_v61 = vmul.f32 0.2, %v1329_v57  ;;  %v1359_v5 = vsel %vm1333_vm2, %v1320_v50, %v1346_v41  ;;  %1371 = vst [vmem:[%s2360_s4] sm:$0xff] %v1358_v58 }
 0x1a4   :  { %v1356_v0 = vmul.f32 0.2, %v1330_v31  ;;  %v1357_v2 = vmul.f32 0.2, %v1331_v51  ;;  %v1360_v7 = vsel %vm1334_vm3, %v1321_v33, %v1347_v62  ;;  %v1361_v4 = vsel %vm1335_vm4, %v1322_v3, %v1348_v52  ;;  %1372 = vst [vmem:[%s2360_s4 + $0x8] sm:$0xff] %v1359_v5 }
 0x1a5   :  { %v1362_v47 = vsel %vm1336_vm5, %v1323_v44, %v1349_v35  ;;  %v1363_v14 = vsel %vm1337_vm6, %v1324_v21, %v1350_v53  ;;  %v1364_v6 = vsel %vm1338_vm7, %v1325_v45, %v1351_v54  ;;  %v1365_v9 = vsel %vm1339_vm8, %v1326_v8, %v1352_v56  ;;  %1373 = vst [vmem:[%s2360_s4 + $0x10] sm:$0xff] %v1360_v7 }
 0x1a6   :  { %1374 = vst [vmem:[%s2360_s4 + $0x18] sm:$0xff] %v1361_v4  ;;  %v1366_v10 = vsel %vm1340_vm9, %v1327_v46, %v1353_v59  ;;  %v1367_v11 = vsel %vm1341_vm10, %v1328_v19, %v1354_v60  ;;  %v1368_v12 = vsel %vm1342_vm11, %v1329_v57, %v1355_v61  ;;  %v1369_v13 = vsel %vm1343_vm12, %v1330_v31, %v1356_v0 }
 0x1a7   :  { %1375 = vst [vmem:[%s2360_s4 + $0x20] sm:$0xff] %v1362_v47  ;;  %1376 = vst [vmem:[%s2360_s4 + $0x28] sm:$0xff] %v1363_v14  ;;  %v1370_v15 = vsel %vm1344_vm13, %v1331_v51, %v1357_v2 }
 0x1a8   :  { %1377 = vst [vmem:[%s2360_s4 + $0x30] sm:$0xff] %v1364_v6  ;;  %1378 = vst [vmem:[%s2360_s4 + $0x38] sm:$0xff] %v1365_v9 }
 0x1a9   :  { %1379 = vst [vmem:[%s2360_s4 + $0x40] sm:$0xff] %v1366_v10  ;;  %1380 = vst [vmem:[%s2360_s4 + $0x48] sm:$0xff] %v1367_v11 }
 0x1aa   :  { %1381 = vst [vmem:[%s2360_s4 + $0x50] sm:$0xff] %v1368_v12  ;;  %1382 = vst [vmem:[%s2360_s4 + $0x58] sm:$0xff] %v1369_v13 }
 0x1ab   :  { %1383 = vst [vmem:[%s2360_s4 + $0x60] sm:$0x3] %v1370_v15 }

// kernel: ganomaly_forward.8
= control target key start
LH: loop header
LB: loop body
LE: loop exit
PB: predicated region body
PF: predicated region fallthrough
CT: control target
= control target key end

     0   :  { %vm1878_vm0 = vcmask 1048064   ;;  %vm1799_vm1 = vcmask 523264   ;;  %vm1902_vm2 = vcmask 1041920   ;;  %vm1823_vm3 = vcmask 517120   ;;  %s4946_s1 = inlined_call_operand.vmem [shape: bf16[1152,256], index: 1, kind: input, shape index: {}]   ;;  %s4947_s0 = inlined_call_operand.vmem [shape: bf16[98,1152], index: 0, kind: input, shape index: {}]   ;;  %s4948_s2 = inlined_call_operand.vmem [shape: f32[1,64], index: 2, kind: input, shape index: {}]   ;;  %s4949_s3 = inlined_call_operand.vmem [shape: f32[1,64], index: 3, kind: input, shape index: {}]   ;;  %s4950_s4 = inlined_call_operand.vmem [shape: bf16[98,256], index: 4, kind: output, shape index: {}]  }
   0x1   :  { %v3062_v0 = vld [vmem:[%s4946_s1 + $0x4] ss:$8 sps:$4 sm:$0xff]   ;;  %v3066_v2 = vld [vmem:[%s4946_s1] ss:$8 sps:$4 sm:$0xff]   ;;  %v3068_v4 = vld [vmem:[%s4946_s1 + $0x14] ss:$8 sps:$4 sm:$0xff]  }
   0x2   :  { %v3064_v1 = vld [vmem:[%s4946_s1 + $0x204] ss:$8 sps:$4 sm:$0xff]   ;;  %1255 = vmatprep.subr.bf16.mxu1 %v3062_v0  ;;  %v3067_v3 = vld [vmem:[%s4946_s1 + $0x200] ss:$8 sps:$4 sm:$0xff]   ;;  %v3070_v5 = vld [vmem:[%s4946_s1 + $0x214] ss:$8 sps:$4 sm:$0xff]  }
   0x3   :  { %1457 = vmatprep.subr.bf16.mxu0 %v3064_v1  ;;  %1256 = vmatpush1.bf16.msra.mxu1 %v3066_v2  ;;  %v3072_v6 = vld [vmem:[%s4946_s1 + $0x10] ss:$8 sps:$4 sm:$0xff]   ;;  %v3074_v8 = vld [vmem:[%s4946_s1 + $0x24] ss:$8 sps:$4 sm:$0xff]   ;;  %v3078_v10 = vld [vmem:[%s4946_s1 + $0x20] ss:$8 sps:$4 sm:$0xff]  }
   0x4   :  { %1458 = vmatpush1.bf16.msra.mxu0 %v3067_v3  ;;  %1257 = vmatprep.subr.bf16.mxu1 %v3068_v4  ;;  %v3073_v7 = vld [vmem:[%s4946_s1 + $0x210] ss:$8 sps:$4 sm:$0xff]   ;;  %v3076_v9 = vld [vmem:[%s4946_s1 + $0x224] ss:$8 sps:$4 sm:$0xff]   ;;  %v3079_v11 = vld [vmem:[%s4946_s1 + $0x220] ss:$8 sps:$4 sm:$0xff]  }
   0x5   :  { %1459 = vmatprep.subr.bf16.mxu0 %v3070_v5  ;;  %v3080_v12 = vld [vmem:[%s4946_s1 + $0x34] ss:$8 sps:$4 sm:$0xff]   ;;  %v3084_v14 = vld [vmem:[%s4946_s1 + $0x30] ss:$8 sps:$4 sm:$0xff]   ;;  %v3086_v16 = vld [vmem:[%s4946_s1 + $0x44] ss:$8 sps:$4 sm:$0xff]  }
   0x6   :  { %v3082_v13 = vld [vmem:[%s4946_s1 + $0x234] ss:$8 sps:$4 sm:$0xff]   ;;  %v3085_v15 = vld [vmem:[%s4946_s1 + $0x230] ss:$8 sps:$4 sm:$0xff]   ;;  %v3088_v17 = vld [vmem:[%s4946_s1 + $0x244] ss:$8 sps:$4 sm:$0xff]  }
   0x7   :  { %1258 = vmatpush1.bf16.msra.mxu1 %v3072_v6  ;;  %v3090_v18 = vld [vmem:[%s4946_s1 + $0x40] ss:$8 sps:$4 sm:$0xff]   ;;  %v3092_v20 = vld [vmem:[%s4946_s1 + $0x54] ss:$8 sps:$4 sm:$0xff]   ;;  %v3096_v22 = vld [vmem:[%s4946_s1 + $0x50] ss:$8 sps:$4 sm:$0xff]  }
   0x8   :  { %1460 = vmatpush1.bf16.msra.mxu0 %v3073_v7  ;;  %1259 = vmatprep.subr.bf16.mxu1 %v3074_v8  ;;  %v3091_v19 = vld [vmem:[%s4946_s1 + $0x240] ss:$8 sps:$4 sm:$0xff]   ;;  %v3094_v21 = vld [vmem:[%s4946_s1 + $0x254] ss:$8 sps:$4 sm:$0xff]   ;;  %v3097_v23 = vld [vmem:[%s4946_s1 + $0x250] ss:$8 sps:$4 sm:$0xff]  }
   0x9   :  { %1461 = vmatprep.subr.bf16.mxu0 %v3076_v9  ;;  %v3098_v24 = vld [vmem:[%s4946_s1 + $0x64] ss:$8 sps:$4 sm:$0xff]   ;;  %v3102_v26 = vld [vmem:[%s4946_s1 + $0x60] ss:$8 sps:$4 sm:$0xff]   ;;  %v3104_v28 = vld [vmem:[%s4946_s1 + $0x74] ss:$8 sps:$4 sm:$0xff]  }
   0xa   :  { %v3100_v25 = vld [vmem:[%s4946_s1 + $0x264] ss:$8 sps:$4 sm:$0xff]   ;;  %v3103_v27 = vld [vmem:[%s4946_s1 + $0x260] ss:$8 sps:$4 sm:$0xff]   ;;  %v3106_v29 = vld [vmem:[%s4946_s1 + $0x274] ss:$8 sps:$4 sm:$0xff]  }
   0xb   :  { %1260 = vmatpush1.bf16.msra.mxu1 %v3078_v10  ;;  %v3108_v30 = vld [vmem:[%s4946_s1 + $0x70] ss:$8 sps:$4 sm:$0xff]   ;;  %v3110_v32 = vld [vmem:[%s4946_s1 + $0x84] ss:$8 sps:$4 sm:$0xff]   ;;  %v3114_v34 = vld [vmem:[%s4946_s1 + $0x80] ss:$8 sps:$4 sm:$0xff]  }
   0xc   :  { %1462 = vmatpush1.bf16.msra.mxu0 %v3079_v11  ;;  %1261 = vmatprep.subr.bf16.mxu1 %v3080_v12  ;;  %v3109_v31 = vld [vmem:[%s4946_s1 + $0x270] ss:$8 sps:$4 sm:$0xff]   ;;  %v3112_v33 = vld [vmem:[%s4946_s1 + $0x284] ss:$8 sps:$4 sm:$0xff]   ;;  %v3115_v35 = vld [vmem:[%s4946_s1 + $0x280] ss:$8 sps:$4 sm:$0xff]  }
   0xd   :  { %1463 = vmatprep.subr.bf16.mxu0 %v3082_v13  ;;  %v3116_v36 = vld [vmem:[%s4946_s1 + $0x94] ss:$8 sps:$4 sm:$0xff]   ;;  %v3120_v38 = vld [vmem:[%s4946_s1 + $0x90] ss:$8 sps:$4 sm:$0xff]   ;;  %v3122_v40 = vld [vmem:[%s4946_s1 + $0xa4] ss:$8 sps:$4 sm:$0xff]  }
   0xe   :  { %v3118_v37 = vld [vmem:[%s4946_s1 + $0x294] ss:$8 sps:$4 sm:$0xff]   ;;  %v3121_v39 = vld [vmem:[%s4946_s1 + $0x290] ss:$8 sps:$4 sm:$0xff]   ;;  %v3124_v41 = vld [vmem:[%s4946_s1 + $0x2a4] ss:$8 sps:$4 sm:$0xff]  }
   0xf   :  { %1262 = vmatpush1.bf16.msra.mxu1 %v3084_v14  ;;  %v3126_v42 = vld [vmem:[%s4946_s1 + $0xa0] ss:$8 sps:$4 sm:$0xff]   ;;  %v3128_v44 = vld [vmem:[%s4946_s1 + $0xb4] ss:$8 sps:$4 sm:$0xff]   ;;  %v3132_v46 = vld [vmem:[%s4946_s1 + $0xb0] ss:$8 sps:$4 sm:$0xff]  }
  0x10   :  { %1464 = vmatpush1.bf16.msra.mxu0 %v3085_v15  ;;  %1263 = vmatprep.subr.bf16.mxu1 %v3086_v16  ;;  %v3127_v43 = vld [vmem:[%s4946_s1 + $0x2a0] ss:$8 sps:$4 sm:$0xff]   ;;  %v3130_v45 = vld [vmem:[%s4946_s1 + $0x2b4] ss:$8 sps:$4 sm:$0xff]   ;;  %v3133_v47 = vld [vmem:[%s4946_s1 + $0x2b0] ss:$8 sps:$4 sm:$0xff]  }
  0x11   :  { %1465 = vmatprep.subr.bf16.mxu0 %v3088_v17  ;;  %v3160_v48 = vld [vmem:[%s4947_s0 + $0x4] ss:$36 sps:$4 sm:$0xff]   ;;  %v3166_v51 = vld [vmem:[%s4947_s0 + $0x14] ss:$36 sps:$4 sm:$0xff]   ;;  %v3188_v10 = vld [vmem:[%s4947_s0 + $0x5c] ss:$36 sps:$4 sm:$0xff]  }
  0x12   :  { %v3134_v49 = vld [vmem:[%s4946_s1 + $0xc4] ss:$8 sps:$4 sm:$0xff]   ;;  %1287 = vmatprep.mubr.bf16.mxu1 %v3160_v48  ;;  %v3138_v52 = vld [vmem:[%s4946_s1 + $0xc0] ss:$8 sps:$4 sm:$0xff]   ;;  %v3140_v54 = vld [vmem:[%s4946_s1 + $0xd4] ss:$8 sps:$4 sm:$0xff]   ;;  %1489 = vmatprep.mubr.bf16.mxu0 %v3166_v51 }
  0x13   :  { %1264 = vmatpush1.bf16.msra.mxu1 %v3090_v18  ;;  %v3136_v50 = vld [vmem:[%s4946_s1 + $0x2c4] ss:$8 sps:$4 sm:$0xff]   ;;  %v3139_v53 = vld [vmem:[%s4946_s1 + $0x2c0] ss:$8 sps:$4 sm:$0xff]   ;;  %v3142_v55 = vld [vmem:[%s4946_s1 + $0x2d4] ss:$8 sps:$4 sm:$0xff]  }
  0x14   :  { %1466 = vmatpush1.bf16.msra.mxu0 %v3091_v19  ;;  %1265 = vmatprep.subr.bf16.mxu1 %v3092_v20  ;;  %v3144_v56 = vld [vmem:[%s4946_s1 + $0xd0] ss:$8 sps:$4 sm:$0xff]   ;;  %v3146_v58 = vld [vmem:[%s4946_s1 + $0xe4] ss:$8 sps:$4 sm:$0xff]   ;;  %v3150_v60 = vld [vmem:[%s4946_s1 + $0xe0] ss:$8 sps:$4 sm:$0xff]  }
  0x15   :  { %1467 = vmatprep.subr.bf16.mxu0 %v3094_v21  ;;  %v3145_v57 = vld [vmem:[%s4946_s1 + $0x2d0] ss:$8 sps:$4 sm:$0xff]   ;;  %v3148_v59 = vld [vmem:[%s4946_s1 + $0x2e4] ss:$8 sps:$4 sm:$0xff]   ;;  %v3151_v61 = vld [vmem:[%s4946_s1 + $0x2e0] ss:$8 sps:$4 sm:$0xff]  }
  0x16   :  { %v3152_v62 = vld [vmem:[%s4946_s1 + $0xf4] ss:$8 sps:$4 sm:$0xff]   ;;  %v3156_v0 = vld [vmem:[%s4946_s1 + $0xf0] ss:$8 sps:$4 sm:$0xff]   ;;  %v3163_v2 = vld [vmem:[%s4946_s1 + $0x104] ss:$8 sps:$4 sm:$0xff]  }
  0x17   :  { %1266 = vmatpush1.bf16.msra.mxu1 %v3096_v22  ;;  %v3154_v63 = vld [vmem:[%s4946_s1 + $0x2f4] ss:$8 sps:$4 sm:$0xff]   ;;  %v3157_v1 = vld [vmem:[%s4946_s1 + $0x2f0] ss:$8 sps:$4 sm:$0xff]   ;;  %v3610_v3 = vld [vmem:[%s4946_s1 + $0x304] ss:$8 sps:$4 sm:$0xff]  }
  0x18   :  { %1468 = vmatpush1.bf16.msra.mxu0 %v3097_v23  ;;  %1267 = vmatprep.subr.bf16.mxu1 %v3098_v24  ;;  %v3158_v4 = vld [vmem:[%s4947_s0] ss:$36 sps:$4 sm:$0xff]   ;;  %v3164_v6 = vld [vmem:[%s4947_s0 + $0x10] ss:$36 sps:$4 sm:$0xff]   ;;  %v3192_v18 = vld [vmem:[%s4947_s0 + $0x58] ss:$36 sps:$4 sm:$0xff]  }
  0x19   :  { %1469 = vmatprep.subr.bf16.mxu0 %v3100_v25  ;;  %v3161_v5 = vld [vmem:[%s4946_s1 + $0x100] ss:$8 sps:$4 sm:$0xff]   ;;  %v3172_v8 = vld [vmem:[%s4946_s1 + $0x114] ss:$8 sps:$4 sm:$0xff]   ;;  %v3190_v11 = vld [vmem:[%s4947_s0 + $0x4c] ss:$36 sps:$4 sm:$0xff]  }
  0x1a   :  { %v3624_v7 = vld [vmem:[%s4946_s1 + $0x300] ss:$8 sps:$4 sm:$0xff]   ;;  %v3633_v9 = vld [vmem:[%s4946_s1 + $0x314] ss:$8 sps:$4 sm:$0xff]   ;;  %v3170_v12 = vld [vmem:[%s4946_s1 + $0x110] ss:$8 sps:$4 sm:$0xff]  }
  0x1b   :  { %1268 = vmatpush1.bf16.msra.mxu1 %v3102_v26  ;;  %v3647_v13 = vld [vmem:[%s4946_s1 + $0x310] ss:$8 sps:$4 sm:$0xff]   ;;  %v3178_v14 = vld [vmem:[%s4946_s1 + $0x124] ss:$8 sps:$4 sm:$0xff]   ;;  %v3176_v16 = vld [vmem:[%s4946_s1 + $0x120] ss:$8 sps:$4 sm:$0xff]  }
  0x1c   :  { %1470 = vmatpush1.bf16.msra.mxu0 %v3103_v27  ;;  %1269 = vmatprep.subr.bf16.mxu1 %v3104_v28  ;;  %v3657_v15 = vld [vmem:[%s4946_s1 + $0x324] ss:$8 sps:$4 sm:$0xff]   ;;  %v3665_v17 = vld [vmem:[%s4946_s1 + $0x320] ss:$8 sps:$4 sm:$0xff]   ;;  %v3184_v20 = vld [vmem:[%s4946_s1 + $0x134] ss:$8 sps:$4 sm:$0xff]  }
  0x1d   :  { %1471 = vmatprep.subr.bf16.mxu0 %v3106_v29  ;;  %v3193_v19 = vld [vmem:[%s4947_s0 + $0x48] ss:$36 sps:$4 sm:$0xff]   ;;  %v3681_v21 = vld [vmem:[%s4946_s1 + $0x334] ss:$8 sps:$4 sm:$0xff]   ;;  %v3182_v24 = vld [vmem:[%s4946_s1 + $0x130] ss:$8 sps:$4 sm:$0xff]  }
  0x1e   :  { %v3206_v22 = vld [vmem:[%s4947_s0 + $0xa4] ss:$36 sps:$4 sm:$0xff]   ;;  %v3208_v23 = vld [vmem:[%s4947_s0 + $0x94] ss:$36 sps:$4 sm:$0xff]   ;;  %vm2230_vm4 = vcmask 519168   ;;  %vm2243_vm5 = vcmask 516096  }
  0x1f   :  { %1270 = vmatpush1.bf16.msra.mxu1 %v3108_v30  ;;  %v3695_v25 = vld [vmem:[%s4946_s1 + $0x330] ss:$8 sps:$4 sm:$0xff]   ;;  %v3196_v26 = vld [vmem:[%s4946_s1 + $0x144] ss:$8 sps:$4 sm:$0xff]   ;;  %v3194_v28 = vld [vmem:[%s4946_s1 + $0x140] ss:$8 sps:$4 sm:$0xff]  }
  0x20   :  { %1472 = vmatpush1.bf16.msra.mxu0 %v3109_v31  ;;  %1271 = vmatprep.subr.bf16.mxu1 %v3110_v32  ;;  %v3705_v27 = vld [vmem:[%s4946_s1 + $0x344] ss:$8 sps:$4 sm:$0xff]   ;;  %v3713_v29 = vld [vmem:[%s4946_s1 + $0x340] ss:$8 sps:$4 sm:$0xff]   ;;  %v3211_v31 = vld [vmem:[%s4947_s0 + $0x90] ss:$36 sps:$4 sm:$0xff]  }
  0x21   :  { %1473 = vmatprep.subr.bf16.mxu0 %v3112_v33  ;;  %v3210_v30 = vld [vmem:[%s4947_s0 + $0xa0] ss:$36 sps:$4 sm:$0xff]   ;;  %v3202_v32 = vld [vmem:[%s4946_s1 + $0x154] ss:$8 sps:$4 sm:$0xff]   ;;  %v3218_v48 = vld [vmem:[%s4946_s1 + $0x170] ss:$8 sps:$4 sm:$0xff]  }
  0x22   :  { %v3729_v33 = vld [vmem:[%s4946_s1 + $0x354] ss:$8 sps:$4 sm:$0xff]   ;;  %v3801_v51 = vld [vmem:[%s4946_s1 + $0x384] ss:$8 sps:$4 sm:$0xff]   ;;  %vm2356_vm6 = vcmask 1043968   ;;  %vm2369_vm7 = vcmask 1040896  }
  0x23   :  { %1272 = vmatpush1.bf16.msra.mxu1 %v3114_v34  ;;  %v3224_v34 = vld [vmem:[%s4947_s0 + $0xec] ss:$36 sps:$4 sm:$0xff]  }
  0x24   :  { %1474 = vmatpush1.bf16.msra.mxu0 %v3115_v35  ;;  %1273 = vmatprep.subr.bf16.mxu1 %v3116_v36  ;;  %v3226_v35 = vld [vmem:[%s4947_s0 + $0xdc] ss:$36 sps:$4 sm:$0xff]   ;;  %v3200_v36 = vld [vmem:[%s4946_s1 + $0x150] ss:$8 sps:$4 sm:$0xff]  }
  0x25   :  { %1475 = vmatprep.subr.bf16.mxu0 %v3118_v37  ;;  %v3743_v37 = vld [vmem:[%s4946_s1 + $0x350] ss:$8 sps:$4 sm:$0xff]  }
  0x27   :  { %1274 = vmatpush1.bf16.msra.mxu1 %v3120_v38  ;;  %v3214_v38 = vld [vmem:[%s4946_s1 + $0x164] ss:$8 sps:$4 sm:$0xff]  }
  0x28   :  { %1476 = vmatpush1.bf16.msra.mxu0 %v3121_v39  ;;  %1275 = vmatprep.subr.bf16.mxu1 %v3122_v40  ;;  %v3753_v39 = vld [vmem:[%s4946_s1 + $0x364] ss:$8 sps:$4 sm:$0xff]   ;;  %v3212_v40 = vld [vmem:[%s4946_s1 + $0x160] ss:$8 sps:$4 sm:$0xff]  }
  0x29   :  { %1477 = vmatprep.subr.bf16.mxu0 %v3124_v41  ;;  %v3761_v41 = vld [vmem:[%s4946_s1 + $0x360] ss:$8 sps:$4 sm:$0xff]  }
  0x2b   :  { %1276 = vmatpush1.bf16.msra.mxu1 %v3126_v42  ;;  %v3228_v42 = vld [vmem:[%s4947_s0 + $0xe8] ss:$36 sps:$4 sm:$0xff]  }
  0x2c   :  { %1478 = vmatpush1.bf16.msra.mxu0 %v3127_v43  ;;  %1277 = vmatprep.subr.bf16.mxu1 %v3128_v44  ;;  %v3229_v43 = vld [vmem:[%s4947_s0 + $0xd8] ss:$36 sps:$4 sm:$0xff]  }
  0x2d   :  { %1479 = vmatprep.subr.bf16.mxu0 %v3130_v45  ;;  %v3220_v44 = vld [vmem:[%s4946_s1 + $0x174] ss:$8 sps:$4 sm:$0xff]  }
  0x2e   :  { %v3777_v45 = vld [vmem:[%s4946_s1 + $0x374] ss:$8 sps:$4 sm:$0xff]  }
  0x2f   :  { %1278 = vmatpush1.bf16.msra.mxu1 %v3132_v46  ;;  %v3242_v46 = vld [vmem:[%s4947_s0 + $0x134] ss:$36 sps:$4 sm:$0xff]  }
  0x30   :  { %1480 = vmatpush1.bf16.msra.mxu0 %v3133_v47  ;;  %1279 = vmatprep.subr.bf16.mxu1 %v3134_v49  ;;  %v3244_v47 = vld [vmem:[%s4947_s0 + $0x124] ss:$36 sps:$4 sm:$0xff]   ;;  %v3791_v49 = vld [vmem:[%s4946_s1 + $0x370] ss:$8 sps:$4 sm:$0xff]  }
  0x31   :  { %1481 = vmatprep.subr.bf16.mxu0 %v3136_v50  ;;  %v3232_v50 = vld [vmem:[%s4946_s1 + $0x184] ss:$8 sps:$4 sm:$0xff]  }
  0x33   :  { %1280 = vmatpush1.bf16.msra.mxu1 %v3138_v52  ;;  %v3230_v52 = vld [vmem:[%s4946_s1 + $0x180] ss:$8 sps:$4 sm:$0xff]  }
  0x34   :  { %1482 = vmatpush1.bf16.msra.mxu0 %v3139_v53  ;;  %1281 = vmatprep.subr.bf16.mxu1 %v3140_v54  ;;  %v3246_v53 = vld [vmem:[%s4947_s0 + $0x130] ss:$36 sps:$4 sm:$0xff]   ;;  %v3247_v54 = vld [vmem:[%s4947_s0 + $0x120] ss:$36 sps:$4 sm:$0xff]  }
  0x35   :  { %1483 = vmatprep.subr.bf16.mxu0 %v3142_v55  ;;  %v3816_v55 = vld [vmem:[%s4946_s1 + $0x380] ss:$8 sps:$4 sm:$0xff]  }
  0x37   :  { %1282 = vmatpush1.bf16.msra.mxu1 %v3144_v56  ;;  %v3238_v56 = vld [vmem:[%s4946_s1 + $0x194] ss:$8 sps:$4 sm:$0xff]  }
  0x38   :  { %1484 = vmatpush1.bf16.msra.mxu0 %v3145_v57  ;;  %1283 = vmatprep.subr.bf16.mxu1 %v3146_v58  ;;  %v3825_v57 = vld [vmem:[%s4946_s1 + $0x394] ss:$8 sps:$4 sm:$0xff]  }
  0x39   :  { %1485 = vmatprep.subr.bf16.mxu0 %v3148_v59  ;;  %v3260_v58 = vld [vmem:[%s4947_s0 + $0x17c] ss:$36 sps:$4 sm:$0xff]   ;;  %v3236_v59 = vld [vmem:[%s4946_s1 + $0x190] ss:$8 sps:$4 sm:$0xff]  }
  0x3b   :  { %1284 = vmatpush1.bf16.msra.mxu1 %v3150_v60  ;;  %v3262_v60 = vld [vmem:[%s4947_s0 + $0x16c] ss:$36 sps:$4 sm:$0xff]  }
  0x3c   :  { %1486 = vmatpush1.bf16.msra.mxu0 %v3151_v61  ;;  %1285 = vmatprep.subr.bf16.mxu1 %v3152_v62  ;;  %v3839_v61 = vld [vmem:[%s4946_s1 + $0x390] ss:$8 sps:$4 sm:$0xff]   ;;  %v3250_v62 = vld [vmem:[%s4946_s1 + $0x1a4] ss:$8 sps:$4 sm:$0xff]  }
  0x3d   :  { %1487 = vmatprep.subr.bf16.mxu0 %v3154_v63  ;;  %v3848_v63 = vld [vmem:[%s4946_s1 + $0x3a4] ss:$8 sps:$4 sm:$0xff]  }
  0x3f   :  { %1286 = vmatpush1.bf16.msra.mxu1 %v3156_v0  ;;  %v3264_v0 = vld [vmem:[%s4947_s0 + $0x178] ss:$36 sps:$4 sm:$0xff]  }
  0x40   :  { %1488 = vmatpush1.bf16.msra.mxu0 %v3157_v1  ;;  %1356 = vmatprep.subr.bf16.mxu1 %v3163_v2  ;;  %v3265_v1 = vld [vmem:[%s4947_s0 + $0x168] ss:$36 sps:$4 sm:$0xff]   ;;  %v80_v2 = vld [vmem:[%s4947_s0 + $0x1c0] sm:$0x11] }
  0x41   :  { %1558 = vmatprep.subr.bf16.mxu0 %v3610_v3 }
  0x42   :  { %1288 = vmatmul.mubr.bf16.vlgmr.msra.gmra.mrb[0].mxu1 %v3158_v4  ;;  %v78_v4 = vld [vmem:[%s4947_s0 + $0x1b0] sm:$0x11] }
  0x43   :  { %1490 = vmatmul.mubr.bf16.vlgmr.msra.gmra.mrb[0].mxu0 %v3164_v6  ;;  %1357 = vmatpush1.bf16.msra.mxu1 %v3161_v5  ;;  %v3248_v5 = vld [vmem:[%s4946_s1 + $0x1a0] ss:$8 sps:$4 sm:$0xff]  }
  0x44   :  { %1559 = vmatpush1.bf16.msra.mxu0 %v3624_v7  ;;  %1358 = vmatprep.subr.bf16.mxu1 %v3172_v8  ;;  %v3870_v6 = vld [vmem:[%s4946_s1 + $0x3a0] ss:$8 sps:$4 sm:$0xff]   ;;  %v3256_v8 = vld [vmem:[%s4946_s1 + $0x1b4] ss:$8 sps:$4 sm:$0xff]  }
  0x45   :  { %1560 = vmatprep.subr.bf16.mxu0 %v3633_v9  ;;  %1499 = vmatprep.mubr.bf16.mxu0 %v3188_v10  ;;  %v3879_v10 = vld [vmem:[%s4946_s1 + $0x3b4] ss:$8 sps:$4 sm:$0xff]  }
  0x46   :  { %1297 = vmatprep.mubr.bf16.mxu1 %v3190_v11  ;;  %v2670_v11 = vcombine.high %v80_v2, %v80_v2 }
  0x47   :  { %1359 = vmatpush1.bf16.msra.mxu1 %v3170_v12  ;;  %v2666_v12 = vcombine.high %v78_v4, %v78_v4 }
  0x48   :  { %1561 = vmatpush1.bf16.msra.mxu0 %v3647_v13  ;;  %1360 = vmatprep.subr.bf16.mxu1 %v3178_v14  ;;  %v3254_v14 = vld [vmem:[%s4946_s1 + $0x1b0] ss:$8 sps:$4 sm:$0xff]  }
  0x49   :  { %1562 = vmatprep.subr.bf16.mxu0 %v3657_v15 }
  0x4a   :  { %1298 = vmatmul.mubr.bf16.gmra.mrb[4].mxu1 %v3193_v19  ;;  %v3897_v19 = vld [vmem:[%s4946_s1 + $0x3c4] ss:$8 sps:$4 sm:$0xff]  }
  0x4b   :  { %1500 = vmatmul.mubr.bf16.gmra.mrb[4].mxu0 %v3192_v18  ;;  %1361 = vmatpush1.bf16.msra.mxu1 %v3176_v16  ;;  %v3888_v16 = vld [vmem:[%s4946_s1 + $0x3b0] ss:$8 sps:$4 sm:$0xff]   ;;  %v3268_v18 = vld [vmem:[%s4946_s1 + $0x1c4] ss:$8 sps:$4 sm:$0xff]  }
  0x4c   :  { %1563 = vmatpush1.bf16.msra.mxu0 %v3665_v17  ;;  %1362 = vmatprep.subr.bf16.mxu1 %v3184_v20  ;;  %v3266_v20 = vld [vmem:[%s4946_s1 + $0x1c0] ss:$8 sps:$4 sm:$0xff]  }
  0x4d   :  { %1564 = vmatprep.subr.bf16.mxu0 %v3681_v21  ;;  %1509 = vmatprep.mubr.bf16.mxu0 %v3206_v22  ;;  %v2669_v22 = vcombine.low %v80_v2, %v80_v2  ;;  %v3329_v2 = vld [vmem:[%s4946_s1 + $0x454] ss:$8 sps:$4 sm:$0xff]  }
  0x4e   :  { %1307 = vmatprep.mubr.bf16.mxu1 %v3208_v23  ;;  %v2665_v23 = vcombine.low %v78_v4, %v78_v4  ;;  %v3330_v4 = vld [vmem:[%s4947_s0 + $0xe4] ss:$36 sps:$4 sm:$0xff]  }
  0x4f   :  { %1363 = vmatpush1.bf16.msra.mxu1 %v3182_v24  ;;  %v3906_v24 = vld [vmem:[%s4946_s1 + $0x3c0] ss:$8 sps:$4 sm:$0xff]  }
  0x50   :  { %1565 = vmatpush1.bf16.msra.mxu0 %v3695_v25  ;;  %1364 = vmatprep.subr.bf16.mxu1 %v3196_v26  ;;  %v3274_v26 = vld [vmem:[%s4946_s1 + $0x1d4] ss:$8 sps:$4 sm:$0xff]  }
  0x51   :  { %1566 = vmatprep.subr.bf16.mxu0 %v3705_v27 }
  0x52   :  { %1308 = vmatmul.mubr.bf16.gmra.mrb[8].mxu1 %v3211_v31  ;;  %v3299_v31 = vld [vmem:[%s4947_s0 + $0x1c] ss:$36 sps:$4 sm:$0xff]  }
  0x53   :  { %1510 = vmatmul.mubr.bf16.gmra.mrb[8].mxu0 %v3210_v30  ;;  %1365 = vmatpush1.bf16.msra.mxu1 %v3194_v28  ;;  %v3915_v28 = vld [vmem:[%s4946_s1 + $0x3d4] ss:$8 sps:$4 sm:$0xff]   ;;  %v3296_v30 = vld [vmem:[%s4947_s0 + $0xc] ss:$36 sps:$4 sm:$0xff]  }
  0x54   :  { %1567 = vmatpush1.bf16.msra.mxu0 %v3713_v29  ;;  %1366 = vmatprep.subr.bf16.mxu1 %v3202_v32  ;;  %v3272_v32 = vld [vmem:[%s4946_s1 + $0x1d0] ss:$8 sps:$4 sm:$0xff]  }
  0x55   :  { %1568 = vmatprep.subr.bf16.mxu0 %v3729_v33  ;;  %1519 = vmatprep.mubr.bf16.mxu0 %v3224_v34  ;;  %v3930_v34 = vld [vmem:[%s4946_s1 + $0x3d0] ss:$8 sps:$4 sm:$0xff]  }
  0x56   :  { %1317 = vmatprep.mubr.bf16.mxu1 %v3226_v35  ;;  %v3284_v35 = vld [vmem:[%s4946_s1 + $0x1e4] ss:$8 sps:$4 sm:$0xff]  }
  0x57   :  { %1367 = vmatpush1.bf16.msra.mxu1 %v3200_v36  ;;  %v3939_v36 = vld [vmem:[%s4946_s1 + $0x3e4] ss:$8 sps:$4 sm:$0xff]  }
  0x58   :  { %1569 = vmatpush1.bf16.msra.mxu0 %v3743_v37  ;;  %1368 = vmatprep.subr.bf16.mxu1 %v3214_v38  ;;  %v3282_v38 = vld [vmem:[%s4946_s1 + $0x1e0] ss:$8 sps:$4 sm:$0xff]  }
  0x59   :  { %1570 = vmatprep.subr.bf16.mxu0 %v3753_v39 }
  0x5a   :  { %1318 = vmatmul.mubr.bf16.gmra.mrb[12].mxu1 %v3229_v43  ;;  %v3957_v43 = vld [vmem:[%s4946_s1 + $0x3f4] ss:$8 sps:$4 sm:$0xff]  }
  0x5b   :  { %1520 = vmatmul.mubr.bf16.gmra.mrb[12].mxu0 %v3228_v42  ;;  %1369 = vmatpush1.bf16.msra.mxu1 %v3212_v40  ;;  %v3948_v40 = vld [vmem:[%s4946_s1 + $0x3e0] ss:$8 sps:$4 sm:$0xff]   ;;  %v3290_v42 = vld [vmem:[%s4946_s1 + $0x1f4] ss:$8 sps:$4 sm:$0xff]  }
  0x5c   :  { %1571 = vmatpush1.bf16.msra.mxu0 %v3761_v41  ;;  %1370 = vmatprep.subr.bf16.mxu1 %v3220_v44  ;;  %v3288_v44 = vld [vmem:[%s4946_s1 + $0x1f0] ss:$8 sps:$4 sm:$0xff]  }
  0x5d   :  { %1572 = vmatprep.subr.bf16.mxu0 %v3777_v45  ;;  %1529 = vmatprep.mubr.bf16.mxu0 %v3242_v46  ;;  %v3966_v46 = vld [vmem:[%s4946_s1 + $0x3f0] ss:$8 sps:$4 sm:$0xff]  }
  0x5e   :  { %1327 = vmatprep.mubr.bf16.mxu1 %v3244_v47  ;;  %v3302_v47 = vld [vmem:[%s4946_s1 + $0x404] ss:$8 sps:$4 sm:$0xff]  }
  0x5f   :  { %1371 = vmatpush1.bf16.msra.mxu1 %v3218_v48  ;;  %v3294_v48 = vld [vmem:[%s4947_s0 + $0x8] ss:$36 sps:$4 sm:$0xff]  }
  0x60   :  { %1573 = vmatpush1.bf16.msra.mxu0 %v3791_v49  ;;  %1372 = vmatprep.subr.bf16.mxu1 %v3232_v50  ;;  %v3297_v50 = vld [vmem:[%s4947_s0 + $0x18] ss:$36 sps:$4 sm:$0xff]  }
  0x61   :  { %1574 = vmatprep.subr.bf16.mxu0 %v3801_v51 }
  0x62   :  { %1328 = vmatmul.mubr.bf16.gmra.mrb[16].mxu1 %v3247_v54  ;;  %v3306_v54 = vld [vmem:[%s4947_s0 + $0x54] ss:$36 sps:$4 sm:$0xff]  }
  0x63   :  { %1530 = vmatmul.mubr.bf16.gmra.mrb[16].mxu0 %v3246_v53  ;;  %1373 = vmatpush1.bf16.msra.mxu1 %v3230_v52  ;;  %v3300_v52 = vld [vmem:[%s4946_s1 + $0x400] ss:$8 sps:$4 sm:$0xff]   ;;  %v3305_v53 = vld [vmem:[%s4946_s1 + $0x414] ss:$8 sps:$4 sm:$0xff]  }
  0x64   :  { %1575 = vmatpush1.bf16.msra.mxu0 %v3816_v55  ;;  %1374 = vmatprep.subr.bf16.mxu1 %v3238_v56  ;;  %v3308_v56 = vld [vmem:[%s4947_s0 + $0x64] ss:$36 sps:$4 sm:$0xff]  }
  0x65   :  { %1576 = vmatprep.subr.bf16.mxu0 %v3825_v57  ;;  %1539 = vmatprep.mubr.bf16.mxu0 %v3260_v58  ;;  %v3303_v58 = vld [vmem:[%s4946_s1 + $0x410] ss:$8 sps:$4 sm:$0xff]  }
  0x66   :  { %1337 = vmatprep.mubr.bf16.mxu1 %v3262_v60  ;;  %v3317_v60 = vld [vmem:[%s4946_s1 + $0x434] ss:$8 sps:$4 sm:$0xff]  }
  0x67   :  { %1375 = vmatpush1.bf16.msra.mxu1 %v3236_v59  ;;  %v3310_v59 = vld [vmem:[%s4947_s0 + $0x50] ss:$36 sps:$4 sm:$0xff]  }
  0x68   :  { %1577 = vmatpush1.bf16.msra.mxu0 %v3839_v61  ;;  %1376 = vmatprep.subr.bf16.mxu1 %v3250_v62  ;;  %v3318_v62 = vld [vmem:[%s4947_s0 + $0x9c] ss:$36 sps:$4 sm:$0xff]  }
  0x69   :  { %1578 = vmatprep.subr.bf16.mxu0 %v3848_v63 }
  0x6a   :  { %1338 = vmatmul.mubr.bf16.gmra.mrb[20].mxu1 %v3265_v1  ;;  %v3322_v1 = vld [vmem:[%s4947_s0 + $0x98] ss:$36 sps:$4 sm:$0xff]  }
  0x6b   :  { %1540 = vmatmul.mubr.bf16.gmra.mrb[20].mxu0 %v3264_v0  ;;  %1377 = vmatpush1.bf16.msra.mxu1 %v3248_v5  ;;  %v3326_v0 = vld [vmem:[%s4946_s1 + $0x444] ss:$8 sps:$4 sm:$0xff]  }
  0x6c   :  { %1579 = vmatpush1.bf16.msra.mxu0 %v3870_v6  ;;  %1378 = vmatprep.subr.bf16.mxu1 %v3256_v8  ;;  %v3338_v5 = vld [vmem:[%s4946_s1 + $0x464] ss:$8 sps:$4 sm:$0xff]  }
  0x6d   :  { %1580 = vmatprep.subr.bf16.mxu0 %v3879_v10  ;;  %1549 = vmatprep.mubr.bf16.mxu0 %v2670_v11  ;;  %v3334_v8 = vld [vmem:[%s4947_s0 + $0xe0] ss:$36 sps:$4 sm:$0xff]   ;;  %v3341_v11 = vld [vmem:[%s4946_s1 + $0x474] ss:$8 sps:$4 sm:$0xff]  }
  0x6e   :  { %1347 = vmatprep.mubr.bf16.mxu1 %v2666_v12  ;;  %v3342_v12 = vld [vmem:[%s4947_s0 + $0x12c] ss:$36 sps:$4 sm:$0xff]  }
  0x6f   :  { %1379 = vmatpush1.bf16.msra.mxu1 %v3254_v14  ;;  %v3344_v14 = vld [vmem:[%s4947_s0 + $0x128] ss:$36 sps:$4 sm:$0xff]  }
  0x70   :  { %1581 = vmatpush1.bf16.msra.mxu0 %v3888_v16  ;;  %1380 = vmatprep.subr.bf16.mxu1 %v3268_v18  ;;  %v3345_v18 = vld [vmem:[%s4947_s0 + $0x20] ss:$36 sps:$4 sm:$0xff]  }
  0x71   :  { %1582 = vmatprep.subr.bf16.mxu0 %v3897_v19 }
  0x72   :  { %1348 = vmatmul.mubr.bf16.gmra.mrb[24].mxu1 %v2665_v23  ;;  %v3361_v23 = vld [vmem:[%s4947_s0 + $0x188] ss:$36 sps:$4 sm:$0xff]  }
  0x73   :  { %1550 = vmatmul.mubr.bf16.gmra.mrb[24].mxu0 %v2669_v22  ;;  %1381 = vmatpush1.bf16.msra.mxu1 %v3266_v20  ;;  %v3360_v22 = vld [vmem:[%s4947_s0 + $0x180] ss:$36 sps:$4 sm:$0xff]  }
  0x74   :  { %1583 = vmatpush1.bf16.msra.mxu0 %v3906_v24  ;;  %1382 = vmatprep.subr.bf16.mxu1 %v3274_v26 }
  0x75   :  { %1584 = vmatprep.subr.bf16.mxu0 %v3915_v28  ;;  %1388 = vmatprep.mubr.bf16.mxu1 %v3296_v30 }
  0x76   :  { %1590 = vmatprep.mubr.bf16.mxu0 %v3299_v31 }
  0x77   :  { %1383 = vmatpush1.bf16.msra.mxu1 %v3272_v32 }
  0x78   :  { %1585 = vmatpush1.bf16.msra.mxu0 %v3930_v34  ;;  %1384 = vmatprep.subr.bf16.mxu1 %v3284_v35 }
  0x79   :  { %1586 = vmatprep.subr.bf16.mxu0 %v3939_v36 }
  0x7b   :  { %1385 = vmatpush1.bf16.msra.mxu1 %v3282_v38 }
  0x7c   :  { %1587 = vmatpush1.bf16.msra.mxu0 %v3948_v40  ;;  %1386 = vmatprep.subr.bf16.mxu1 %v3290_v42 }
  0x7d   :  { %1588 = vmatprep.subr.bf16.mxu0 %v3957_v43 }
  0x7f   :  { %1387 = vmatpush1.bf16.msra.mxu1 %v3288_v44 }
  0x80   :  { %1589 = vmatpush1.bf16.msra.mxu0 %v3966_v46  ;;  %2922 = vmatprep.subr.bf16.mxu1 %v3610_v3  ;;  %v3314_v3 = vld [vmem:[%s4946_s1 + $0x424] ss:$8 sps:$4 sm:$0xff]  }
  0x81   :  { %1659 = vmatprep.subr.bf16.mxu0 %v3302_v47 }
  0x82   :  { %1389 = vmatmul.mubr.bf16.vlgmr.msra.gmra.mrb[0].mxu1 %v3294_v48 }
  0x83   :  { %1591 = vmatmul.mubr.bf16.vlgmr.msra.gmra.mrb[0].mxu0 %v3297_v50  ;;  %2938 = vmatpush1.bf16.msra.mxu1 %v3624_v7  ;;  %v3311_v7 = vld [vmem:[%s4947_s0 + $0x60] ss:$36 sps:$4 sm:$0xff]  }
  0x84   :  { %1660 = vmatpush1.bf16.msra.mxu0 %v3300_v52  ;;  %2923 = vmatprep.subr.bf16.mxu1 %v3633_v9  ;;  %v3312_v9 = vld [vmem:[%s4946_s1 + $0x420] ss:$8 sps:$4 sm:$0xff]  }
  0x85   :  { %1661 = vmatprep.subr.bf16.mxu0 %v3305_v53  ;;  %1398 = vmatprep.mubr.bf16.mxu1 %v3306_v54 }
  0x86   :  { %1600 = vmatprep.mubr.bf16.mxu0 %v3308_v56 }
  0x87   :  { %2939 = vmatpush1.bf16.msra.mxu1 %v3647_v13  ;;  %v3320_v13 = vld [vmem:[%s4947_s0 + $0xac] ss:$36 sps:$4 sm:$0xff]  }
  0x88   :  { %1662 = vmatpush1.bf16.msra.mxu0 %v3303_v58  ;;  %2924 = vmatprep.subr.bf16.mxu1 %v3657_v15  ;;  %v3315_v15 = vld [vmem:[%s4946_s1 + $0x430] ss:$8 sps:$4 sm:$0xff]  }
  0x89   :  { %1663 = vmatprep.subr.bf16.mxu0 %v3314_v3 }
  0x8a   :  { %1399 = vmatmul.mubr.bf16.gmra.mrb[4].mxu1 %v3310_v59 }
  0x8b   :  { %1601 = vmatmul.mubr.bf16.gmra.mrb[4].mxu0 %v3311_v7  ;;  %2940 = vmatpush1.bf16.msra.mxu1 %v3665_v17  ;;  %v3323_v17 = vld [vmem:[%s4947_s0 + $0xa8] ss:$36 sps:$4 sm:$0xff]  }
  0x8c   :  { %1664 = vmatpush1.bf16.msra.mxu0 %v3312_v9  ;;  %2925 = vmatprep.subr.bf16.mxu1 %v3681_v21  ;;  %v3324_v21 = vld [vmem:[%s4946_s1 + $0x440] ss:$8 sps:$4 sm:$0xff]  }
  0x8d   :  { %1665 = vmatprep.subr.bf16.mxu0 %v3317_v60  ;;  %1408 = vmatprep.mubr.bf16.mxu1 %v3318_v62 }
  0x8e   :  { %1610 = vmatprep.mubr.bf16.mxu0 %v3320_v13 }
  0x8f   :  { %2941 = vmatpush1.bf16.msra.mxu1 %v3695_v25  ;;  %v3332_v25 = vld [vmem:[%s4947_s0 + $0xf4] ss:$36 sps:$4 sm:$0xff]  }
  0x90   :  { %1666 = vmatpush1.bf16.msra.mxu0 %v3315_v15  ;;  %2926 = vmatprep.subr.bf16.mxu1 %v3705_v27  ;;  %v3327_v27 = vld [vmem:[%s4946_s1 + $0x450] ss:$8 sps:$4 sm:$0xff]  }
  0x91   :  { %1667 = vmatprep.subr.bf16.mxu0 %v3326_v0 }
  0x92   :  { %1409 = vmatmul.mubr.bf16.gmra.mrb[8].mxu1 %v3322_v1 }
  0x93   :  { %1611 = vmatmul.mubr.bf16.gmra.mrb[8].mxu0 %v3323_v17  ;;  %2942 = vmatpush1.bf16.msra.mxu1 %v3713_v29  ;;  %v3335_v29 = vld [vmem:[%s4947_s0 + $0xf0] ss:$36 sps:$4 sm:$0xff]  }
  0x94   :  { %1668 = vmatpush1.bf16.msra.mxu0 %v3324_v21  ;;  %2927 = vmatprep.subr.bf16.mxu1 %v3729_v33  ;;  %v3336_v33 = vld [vmem:[%s4946_s1 + $0x460] ss:$8 sps:$4 sm:$0xff]  }
  0x95   :  { %1669 = vmatprep.subr.bf16.mxu0 %v3329_v2  ;;  %1418 = vmatprep.mubr.bf16.mxu1 %v3330_v4 }
  0x96   :  { %1620 = vmatprep.mubr.bf16.mxu0 %v3332_v25 }
  0x97   :  { %2943 = vmatpush1.bf16.msra.mxu1 %v3743_v37  ;;  %v3339_v37 = vld [vmem:[%s4946_s1 + $0x470] ss:$8 sps:$4 sm:$0xff]  }
  0x98   :  { %1670 = vmatpush1.bf16.msra.mxu0 %v3327_v27  ;;  %2928 = vmatprep.subr.bf16.mxu1 %v3753_v39  ;;  %v3379_v39 = vmov 0  }
  0x99   :  { %1671 = vmatprep.subr.bf16.mxu0 %v3338_v5 }
  0x9a   :  { %1419 = vmatmul.mubr.bf16.gmra.mrb[12].mxu1 %v3334_v8 }
  0x9b   :  { %1621 = vmatmul.mubr.bf16.gmra.mrb[12].mxu0 %v3335_v29  ;;  %2944 = vmatpush1.bf16.msra.mxu1 %v3761_v41  ;;  %v3346_v41 = vld [vmem:[%s4947_s0 + $0x174] ss:$36 sps:$4 sm:$0xff]  }
  0x9c   :  { %1672 = vmatpush1.bf16.msra.mxu0 %v3336_v33  ;;  %2929 = vmatprep.subr.bf16.mxu1 %v3777_v45  ;;  %v79_v45 = vld [vmem:[%s4947_s0 + $0x1b8] sm:$0x11] }
  0x9d   :  { %1673 = vmatprep.subr.bf16.mxu0 %v3341_v11  ;;  %1428 = vmatprep.mubr.bf16.mxu1 %v3342_v12  ;;  %v2668_v20 = vcombine.high %v79_v45, %v79_v45 }
  0x9e   :  { %1691 = vmatprep.mubr.bf16.mxu0 %v3379_v39 }
  0x9f   :  { %2945 = vmatpush1.bf16.msra.mxu1 %v3791_v49  ;;  %v3348_v49 = vld [vmem:[%s4947_s0 + $0x170] ss:$36 sps:$4 sm:$0xff]  }
  0xa0   :  { %1674 = vmatpush1.bf16.msra.mxu0 %v3339_v37  ;;  %2930 = vmatprep.subr.bf16.mxu1 %v3801_v51  ;;  %v3349_v51 = vld [vmem:[%s4947_s0 + $0x68] ss:$36 sps:$4 sm:$0xff]  }
  0xa2   :  { %1429 = vmatmul.mubr.bf16.gmra.mrb[16].mxu1 %v3344_v14 }
  0xa3   :  { %1692 = vmatmul.mubr.bf16.vlgmr.msra.gmra.mrb[0].mxu0 %v3345_v18  ;;  %2946 = vmatpush1.bf16.msra.mxu1 %v3816_v55  ;;  %v2667_v55 = vcombine.low %v79_v45, %v79_v45 }
  0xa4   :  { %1438 = vmatprep.mubr.bf16.mxu1 %v3346_v41  ;;  %2931 = vmatprep.subr.bf16.mxu1 %v3825_v57  ;;  %v3352_v57 = vld [vmem:[%s4947_s0 + $0xb0] ss:$36 sps:$4 sm:$0xff]  }
  0xa5   :  { %1701 = vmatprep.mubr.bf16.mxu0 %v3379_v39 }
  0xa7   :  { %2947 = vmatpush1.bf16.msra.mxu1 %v3839_v61  ;;  %v3356_v61 = vld [vmem:[%s4947_s0 + $0x13c] ss:$36 sps:$4 sm:$0xff]  }
  0xa8   :  { %2932 = vmatprep.subr.bf16.mxu1 %v3848_v63  ;;  %v3353_v63 = vld [vmem:[%s4947_s0 + $0xf8] ss:$36 sps:$4 sm:$0xff]  }
  0xaa   :  { %1439 = vmatmul.mubr.bf16.gmra.mrb[20].mxu1 %v3348_v49 }
  0xab   :  { %1702 = vmatmul.mubr.bf16.gmra.mrb[4].mxu0 %v3349_v51  ;;  %2948 = vmatpush1.bf16.msra.mxu1 %v3870_v6  ;;  %v3354_v6 = vld [vmem:[%s4947_s0 + $0x138] ss:$36 sps:$4 sm:$0xff]  }
  0xac   :  { %1448 = vmatprep.mubr.bf16.mxu1 %v2668_v20  ;;  %2933 = vmatprep.subr.bf16.mxu1 %v3879_v10  ;;  %v3357_v10 = vld [vmem:[%s4947_s0 + $0x140] ss:$36 sps:$4 sm:$0xff]  }
  0xad   :  { %1711 = vmatprep.mubr.bf16.mxu0 %v3379_v39 }
  0xaf   :  { %2949 = vmatpush1.bf16.msra.mxu1 %v3888_v16  ;;  %v3358_v16 = vld [vmem:[%s4947_s0 + $0x184] ss:$36 sps:$4 sm:$0xff]  }
  0xb0   :  { %2934 = vmatprep.subr.bf16.mxu1 %v3897_v19  ;;  %v81_v19 = vld [vmem:[%s4947_s0 + $0x1c8] sm:$0x11] }
  0xb1   :  { %v2671_v26 = vcombine.low %v81_v19, %v81_v19 }
  0xb2   :  { %1449 = vmatmul.mubr.bf16.gmra.mrb[24].mxu1 %v2667_v55 }
  0xb3   :  { %1712 = vmatmul.mubr.bf16.gmra.mrb[8].mxu0 %v3352_v57  ;;  %2950 = vmatpush1.bf16.msra.mxu1 %v3906_v24  ;;  %v2672_v24 = vcombine.high %v81_v19, %v81_v19 }
  0xb4   :  { %1721 = vmatprep.mubr.bf16.mxu0 %v3379_v39  ;;  %2935 = vmatprep.subr.bf16.mxu1 %v3915_v28  ;;  %v3364_v28 = vld [vmem:[%s4947_s0 + $0x1d0] ss:$0 sps:$4 sm:$0x11]   ;;  %s3380_s0 = smov 64  }
  0xb5   :  { %1630 = vmatprep.mubr.bf16.mxu1 %v3356_v61 }
  0xb7   :  { %2951 = vmatpush1.bf16.msra.mxu1 %v3930_v34 }
  0xb8   :  { %2936 = vmatprep.subr.bf16.mxu1 %v3939_v36 }
  0xbb   :  { %1722 = vmatmul.mubr.bf16.gmra.mrb[12].mxu0 %v3353_v63  ;;  %2952 = vmatpush1.bf16.msra.mxu1 %v3948_v40 }
  0xbc   :  { %1731 = vmatprep.mubr.bf16.mxu0 %v3379_v39  ;;  %2937 = vmatprep.subr.bf16.mxu1 %v3957_v43 }
  0xbf   :  { %2953 = vmatpush1.bf16.msra.mxu1 %v3966_v46 }
  0xc2   :  { %1631 = vmatmul.mubr.bf16.vlgmr.msra.gmra.mrb[28].mxu1 %v3354_v6 }
  0xc3   :  { %1732 = vmatmul.mubr.bf16.gmra.mrb[28].mxu0 %v3357_v10  ;;  %1640 = vmatprep.mubr.bf16.mxu1 %v3358_v16 }
  0xc4   :  { %1741 = vmatprep.mubr.bf16.mxu0 %v3379_v39 }
  0xca   :  { %1641 = vmatmul.mubr.bf16.gmra.mrb[32].mxu1 %v3360_v22 }
  0xcb   :  { %1742 = vmatmul.mubr.bf16.gmra.mrb[32].mxu0 %v3361_v23  ;;  %1650 = vmatprep.mubr.bf16.mxu1 %v2672_v24 }
  0xcc   :  { %1751 = vmatprep.mubr.bf16.mxu0 %v3379_v39 }
  0xd2   :  { %1651 = vmatmul.mubr.bf16.gmra.mrb[36].mxu1 %v2671_v26 }
  0xd3   :  { %1752 = vmatmul.mubr.bf16.gmra.mrb[36].mxu0 %v3364_v28 }
 0x136   :  { %v1531_v30 = vpop.f32.mrb[16].mxu0 }
 0x137   :  { %v1533_v31 = vpop.f32.mrb[17].mxu0 }
 0x138   :  { %v1535_v32 = vpop.f32.mrb[18].mxu0 }
 0x139   :  { %v1537_v34 = vpop.f32.mrb[19].mxu0 }
 0x13e   :  { %v1541_v35 = vpop.f32.mrb[20].mxu0 }
 0x13f   :  { %v1543_v36 = vpop.f32.mrb[21].mxu0 }
 0x140   :  { %v1545_v38 = vpop.f32.mrb[22].mxu0 }
 0x141   :  { %v1547_v40 = vpop.f32.mrb[23].mxu0 }
 0x146   :  { %v1551_v42 = vpop.f32.mrb[24].mxu0 }
 0x147   :  { %v4143_v43 = vpop.f32.mrb[25].mxu0 }
 0x148   :  { %v1555_v44 = vpop.f32.mrb[26].mxu0 }
 0x149   :  { %v1556_v46 = vpop.f32.mrb[27].mxu0 }
 0x155   :  { %v1390_v47 = vpop.f32.mrb[0].mxu1 }
 0x156   :  { %v1392_v48 = vpop.f32.mrb[1].mxu1 }
 0x157   :  { %v1394_v50 = vpop.f32.mrb[2].mxu1 }
 0x158   :  { %v1396_v52 = vpop.f32.mrb[3].mxu1 }
 0x15d   :  { %v1400_v53 = vpop.f32.mrb[4].mxu1 }
 0x15e   :  { %v1402_v54 = vpop.f32.mrb[5].mxu1 }
 0x15f   :  { %v1404_v56 = vpop.f32.mrb[6].mxu1 }
 0x160   :  { %v1406_v58 = vpop.f32.mrb[7].mxu1 }
 0x165   :  { %v1410_v3 = vpop.f32.mrb[8].mxu1 }
 0x166   :  { %v1412_v59 = vpop.f32.mrb[9].mxu1 }
 0x167   :  { %v1414_v7 = vpop.f32.mrb[10].mxu1 }
 0x168   :  { %v4145_v9 = vpop.f32.mrb[11].mxu1 }
 0x16d   :  { %v4147_v60 = vpop.f32.mrb[12].mxu1 }
 0x16e   :  { %v4149_v62 = vpop.f32.mrb[13].mxu1 }
 0x16f   :  { %v4151_v13 = vpop.f32.mrb[14].mxu1 }
 0x170   :  { %v4153_v15 = vpop.f32.mrb[15].mxu1 }
 0x175   :  { %v1430_v0 = vpop.f32.mrb[16].mxu1 }
 0x176   :  { %v1693_v1 = vpop.f32.mrb[0].mxu0  ;;  %v4155_v17 = vadd.f32 %v1531_v30, %v1430_v0  ;;  %v1432_v2 = vpop.f32.mrb[17].mxu1 }
 0x177   :  { %v4157_v21 = vadd.f32 %v1693_v1, %v1390_v47  ;;  %v1695_v4 = vpop.f32.mrb[1].mxu0  ;;  %v4159_v25 = vadd.f32 %v1533_v31, %v1432_v2  ;;  %v1434_v5 = vpop.f32.mrb[18].mxu1 }
 0x178   :  { %v4161_v27 = vadd.f32 %v1695_v4, %v1392_v48  ;;  %v1697_v8 = vpop.f32.mrb[2].mxu0  ;;  %v4164_v29 = vadd.f32 %v1535_v32, %v1434_v5  ;;  %v1436_v11 = vpop.f32.mrb[19].mxu1 }
 0x179   :  { %1760 = vst [vmem:[#allocation2] sm:$0xff] %v4157_v21  ;;  %v4166_v33 = vadd.f32 %v1697_v8, %v1394_v50  ;;  %v1699_v12 = vpop.f32.mrb[3].mxu0  ;;  %v4169_v37 = vadd.f32 %v1537_v34, %v1436_v11 }
 0x17a   :  { %1761 = vst [vmem:[#allocation2 + $0x8] sm:$0xff] %v4161_v27  ;;  %v4171_v39 = vadd.f32 %v1699_v12, %v1396_v52  ;;  %v1879_v52 = vsel %vm1878_vm0, %v4157_v21, 0.0 }
 0x17b   :  { %1762 = vst [vmem:[#allocation2 + $0x10] sm:$0xff] %v4166_v33  ;;  %v1834_v47 = vmul.f32 %v4166_v33, %v4166_v33 }
 0x17c   :  { %1763 = vst [vmem:[#allocation2 + $0x18] sm:$0xff] %v4171_v39  ;;  %v4219_v48 = vmul.f32 %v4171_v39, %v4171_v39 }
 0x17d   :  { %v1440_v14 = vpop.f32.mrb[20].mxu1  ;;  %v1917_v0 = vsel %vm1878_vm0, %v1834_v47, 0.0 }
 0x17e   :  { %v1703_v18 = vpop.f32.mrb[4].mxu0  ;;  %v4175_v41 = vadd.f32 %v1541_v35, %v1440_v14  ;;  %v1442_v49 = vpop.f32.mrb[21].mxu1  ;;  %v2079_v2 = vsel %vm1878_vm0, %v4219_v48, 0.0 }
 0x17f   :  { %v4177_v45 = vadd.f32 %v1703_v18, %v1400_v53  ;;  %v1705_v51 = vpop.f32.mrb[5].mxu0  ;;  %v4179_v20 = vadd.f32 %v1543_v36, %v1442_v49  ;;  %v1444_v57 = vpop.f32.mrb[22].mxu1 }
 0x180   :  { %v4181_v55 = vadd.f32 %v1705_v51, %v1402_v54  ;;  %v1707_v61 = vpop.f32.mrb[6].mxu0  ;;  %v4184_v63 = vadd.f32 %v1545_v38, %v1444_v57  ;;  %v1446_v10 = vpop.f32.mrb[23].mxu1  ;;  %v1833_v38 = vmul.f32 %v4157_v21, %v4157_v21  ;;  %v2043_v54 = vsel %vm1878_vm0, %v4171_v39, 0.0 }
 0x181   :  { %1764 = vst [vmem:[#allocation2 + $0x20] sm:$0xff] %v4177_v45  ;;  %v4186_v6 = vadd.f32 %v1707_v61, %v1404_v56  ;;  %v1709_v16 = vpop.f32.mrb[7].mxu0  ;;  %v4189_v19 = vadd.f32 %v1547_v40, %v1446_v10  ;;  %v4208_v40 = vmul.f32 %v4161_v27, %v4161_v27  ;;  %v1882_v53 = vsel %vm1878_vm0, %v4177_v45, 0.0 }
 0x182   :  { %1765 = vst [vmem:[#allocation2 + $0x28] sm:$0xff] %v4181_v55  ;;  %v4191_v22 = vadd.f32 %v1709_v16, %v1406_v58  ;;  %v4234_v56 = vmul.f32 %v4177_v45, %v4177_v45  ;;  %v4238_v58 = vmul.f32 %v4181_v55, %v4181_v55 }
 0x183   :  { %1766 = vst [vmem:[#allocation2 + $0x30] sm:$0xff] %v4186_v6  ;;  %v2078_v1 = vsel %vm1878_vm0, %v4208_v40, 0.0  ;;  %v1884_v8 = vsel %vm1878_vm0, %v4186_v6, 0.0  ;;  %v4255_v12 = vmul.f32 %v4186_v6, %v4186_v6 }
 0x184   :  { %1767 = vst [vmem:[#allocation2 + $0x38] sm:$0xff] %v4191_v22  ;;  %v1919_v49 = vsel %vm1878_vm0, %v4234_v56, 0.0  ;;  %v4264_v51 = vmul.f32 %v4191_v22, %v4191_v22  ;;  %v2081_v57 = vsel %vm1878_vm0, %v4238_v58, 0.0 }
 0x185   :  { %v1450_v23 = vpop.f32.mrb[24].mxu1 }
 0x186   :  { %v1713_v24 = vpop.f32.mrb[8].mxu0  ;;  %v4195_v26 = vadd.f32 %v1551_v42, %v1450_v23  ;;  %v1452_v30 = vpop.f32.mrb[25].mxu1 }
 0x187   :  { %v4197_v28 = vadd.f32 %v1713_v24, %v1410_v3  ;;  %v1715_v31 = vpop.f32.mrb[9].mxu0  ;;  %v4200_v32 = vadd.f32 %v4143_v43, %v1452_v30  ;;  %v1454_v35 = vpop.f32.mrb[26].mxu1  ;;  %v1880_v43 = vsel %vm1878_vm0, %v4166_v33, 0.0  ;;  %v2080_v24 = vadd.f32 %v2079_v2, %v2078_v1 }
 0x188   :  { %v4202_v34 = vadd.f32 %v1715_v31, %v1412_v59  ;;  %v1717_v36 = vpop.f32.mrb[10].mxu0  ;;  %v1455_v44 = vpop.f32.mrb[27].mxu1  ;;  %v1881_v3 = vadd.f32 %v1880_v43, %v1879_v52  ;;  %v2042_v59 = vsel %vm1878_vm0, %v4161_v27, 0.0  ;;  %v2047_v35 = vsel %vm1878_vm0, %v4191_v22, 0.0 }
 0x189   :  { %1768 = vst [vmem:[#allocation2 + $0x40] sm:$0xff] %v4197_v28  ;;  %v4211_v42 = vadd.f32 %v1717_v36, %v1414_v7  ;;  %v1719_v46 = vpop.f32.mrb[11].mxu0  ;;  %v1916_v7 = vsel %vm1878_vm0, %v1833_v38, 0.0  ;;  %v2044_v11 = vadd.f32 %v2043_v54, %v2042_v59  ;;  %v1886_v31 = vsel %vm1878_vm0, %v4197_v28, 0.0 }
 0x18a   :  { %1769 = vst [vmem:[#allocation2 + $0x48] sm:$0xff] %v4202_v34  ;;  %v4223_v50 = vadd.f32 %v1719_v46, %v4145_v9  ;;  %v2045_v9 = vsel %vm1878_vm0, %v4181_v55, 0.0  ;;  %v1883_v5 = vadd.f32 %v1882_v53, %v1881_v3  ;;  %v1918_v23 = vadd.f32 %v1917_v0, %v1916_v7 }
 0x18b   :  { %1770 = vst [vmem:[#allocation2 + $0x50] sm:$0xff] %v4211_v42  ;;  %v2046_v16 = vadd.f32 %v2045_v9, %v2044_v11  ;;  %v4280_v36 = vmul.f32 %v4197_v28, %v4197_v28  ;;  %v2082_v43 = vadd.f32 %v2081_v57, %v2080_v24  ;;  %v1921_v52 = vsel %vm1878_vm0, %v4255_v12, 0.0 }
 0x18c   :  { %1771 = vst [vmem:[#allocation2 + $0x58] sm:$0xff] %v4223_v50  ;;  %v1885_v44 = vadd.f32 %v1884_v8, %v1883_v5  ;;  %v1920_v46 = vadd.f32 %v1919_v49, %v1918_v23  ;;  %v4291_v53 = vmul.f32 %v4202_v34, %v4202_v34  ;;  %v2083_v54 = vsel %vm1878_vm0, %v4264_v51, 0.0 }
 0x18d   :  { %v2048_v59 = vadd.f32 %v2047_v35, %v2046_v16  ;;  %v1923_v7 = vsel %vm1878_vm0, %v4280_v36, 0.0  ;;  %v1846_v9 = vsel %vm1799_vm1, %v1833_v38, 0.0  ;;  %v2084_v5 = vadd.f32 %v2083_v54, %v2082_v43 }
 0x18e   :  { %v1723_v4 = vpop.f32.mrb[12].mxu0  ;;  %v1887_v3 = vadd.f32 %v1886_v31, %v1885_v44  ;;  %v1847_v8 = vsel %vm1799_vm1, %v1834_v47, 0.0  ;;  %v4304_v57 = vmul.f32 %v4211_v42, %v4211_v42  ;;  %v2085_v38 = vsel %vm1878_vm0, %v4291_v53, 0.0 }
 0x18f   :  { %v4258_v14 = vadd.f32 %v1723_v4, %v4147_v60  ;;  %v1725_v18 = vpop.f32.mrb[13].mxu0  ;;  %v1922_v4 = vadd.f32 %v1921_v52, %v1920_v46 }
 0x190   :  { %v4269_v61 = vadd.f32 %v1725_v18, %v4149_v62  ;;  %v1727_v10 = vpop.f32.mrb[14].mxu0 }
 0x191   :  { %v4272_v60 = vadd.f32 %v1727_v10, %v4151_v13  ;;  %v1729_v30 = vpop.f32.mrb[15].mxu0  ;;  %v2049_v13 = vsel %vm1878_vm0, %v4202_v34, 0.0  ;;  %v4308_v10 = vmul.f32 %v4223_v50, %v4223_v50  ;;  %v1890_v43 = vsel %vm1878_vm0, %v4258_v14, 0.0 }
 0x192   :  { %v4283_v62 = vadd.f32 %v1729_v30, %v4153_v15  ;;  %v1888_v15 = vsel %vm1878_vm0, %v4211_v42, 0.0  ;;  %v2050_v2 = vadd.f32 %v2049_v13, %v2048_v59  ;;  %v1924_v30 = vadd.f32 %v1923_v7, %v1922_v4 }
 0x193   :  { %v1889_v47 = vadd.f32 %v1888_v15, %v1887_v3  ;;  %v4320_v13 = vadd.f32 %v1847_v8, %v1846_v9  ;;  %v4327_v54 = vmul.f32 %v4258_v14, %v4258_v14  ;;  %v2086_v3 = vadd.f32 %v2085_v38, %v2084_v5 }
 0x194   :  { %4957 = vst [vmem:[#allocation3_spill] sm:$0xff] %v4283_v62  ;;  %v4335_v15 = vmul.f32 %v4269_v61, %v4269_v61  ;;  %v2087_v7 = vsel %vm1878_vm0, %v4308_v10, 0.0 }
 0x195   :  { %v1632_v0 = vpop.f32.mrb[28].mxu1  ;;  %v2088_v38 = vadd.f32 %v2087_v7, %v2086_v3 }
 0x196   :  { %v1733_v1 = vpop.f32.mrb[28].mxu0  ;;  %v2971_v11 = vadd.f32 %v4155_v17, %v1632_v0  ;;  %v1634_v18 = vpop.f32.mrb[29].mxu1  ;;  %v2051_v17 = vsel %vm1878_vm0, %v4223_v50, 0.0  ;;  %v2053_v0 = vsel %vm1878_vm0, %v4269_v61, 0.0 }
 0x197   :  { %v1735_v49 = vpop.f32.mrb[29].mxu0  ;;  %v2974_v16 = vadd.f32 %v4159_v25, %v1634_v18  ;;  %v1636_v23 = vpop.f32.mrb[30].mxu1  ;;  %v2052_v4 = vadd.f32 %v2051_v17, %v2050_v2  ;;  %v2089_v2 = vsel %vm1878_vm0, %v4335_v15, 0.0 }
 0x198   :  { %v1737_v24 = vpop.f32.mrb[30].mxu0  ;;  %v4315_v31 = vadd.f32 %v2971_v11, %v1733_v1  ;;  %v2977_v35 = vadd.f32 %v4164_v29, %v1636_v23  ;;  %v1638_v44 = vpop.f32.mrb[31].mxu1  ;;  %v1925_v29 = vsel %vm1878_vm0, %v4304_v57, 0.0  ;;  %v1892_v1 = vsel %vm1878_vm0, %v4272_v60, 0.0 }
 0x199   :  { %v1739_v46 = vpop.f32.mrb[31].mxu0  ;;  %v4322_v52 = vadd.f32 %v2974_v16, %v1735_v49  ;;  %v2980_v25 = vadd.f32 %v4169_v37, %v1638_v44  ;;  %v1891_v37 = vadd.f32 %v1890_v43, %v1889_v47  ;;  %v4347_v11 = vmul.f32 %v4272_v60, %v4272_v60 }
 0x19a   :  { %4958 = vst [vmem:[#allocation4_spill] sm:$0xff] %v4315_v31  ;;  %v4329_v59 = vadd.f32 %v2977_v35, %v1737_v24  ;;  %v1926_v18 = vadd.f32 %v1925_v29, %v1924_v30  ;;  %v1927_v49 = vsel %vm1878_vm0, %v4327_v54, 0.0  ;;  %v2054_v47 = vadd.f32 %v2053_v0, %v2052_v4 }
 0x19b   :  { %4959 = vst [vmem:[#allocation5_spill] sm:$0xff] %v4322_v52  ;;  %v4339_v9 = vadd.f32 %v2980_v25, %v1739_v46  ;;  %v4354_v35 = vmul.f32 %v4283_v62, %v4283_v62  ;;  %v1893_v46 = vadd.f32 %v1892_v1, %v1891_v37  ;;  %v2055_v43 = vsel %vm1878_vm0, %v4283_v62, 0.0 }
 0x19c   :  { %v1928_v0 = vadd.f32 %v1927_v49, %v1926_v18  ;;  %v1929_v1 = vsel %vm1878_vm0, %v4347_v11, 0.0 }
 0x19d   :  { %v1642_v5 = vpop.f32.mrb[32].mxu1  ;;  %v2091_v18 = vsel %vm1878_vm0, %v4354_v35, 0.0 }
 0x19e   :  { %v1743_v8 = vpop.f32.mrb[32].mxu0  ;;  %v2983_v16 = vadd.f32 %v4175_v41, %v1642_v5  ;;  %v1644_v23 = vpop.f32.mrb[33].mxu1  ;;  %v4363_v41 = vmul.f32 %v4315_v31, %v4315_v31  ;;  %v2090_v5 = vadd.f32 %v2089_v2, %v2088_v38  ;;  %v4395_v2 = vmul.f32 %v4339_v9, %v4339_v9 }
 0x19f   :  { %v1745_v24 = vpop.f32.mrb[33].mxu0  ;;  %v2986_v17 = vadd.f32 %v4179_v20, %v1644_v23  ;;  %v1646_v44 = vpop.f32.mrb[34].mxu1  ;;  %v4370_v20 = vmul.f32 %v4322_v52, %v4322_v52 }
 0x1a0   :  { %v1747_v30 = vpop.f32.mrb[34].mxu0  ;;  %v4365_v25 = vadd.f32 %v2983_v16, %v1743_v8  ;;  %v2989_v3 = vadd.f32 %v4184_v63, %v1646_v44  ;;  %v1648_v29 = vpop.f32.mrb[35].mxu1  ;;  %v1894_v63 = vsel %vm1878_vm0, %v4315_v31, 0.0  ;;  %v2057_v8 = vsel %vm1878_vm0, %v4322_v52, 0.0 }
 0x1a1   :  { %v1749_v7 = vpop.f32.mrb[35].mxu0  ;;  %v4372_v4 = vadd.f32 %v2986_v17, %v1745_v24  ;;  %v2992_v37 = vadd.f32 %v4189_v19, %v1648_v29  ;;  %v2056_v16 = vadd.f32 %v2055_v43, %v2054_v47  ;;  %v4389_v19 = vmul.f32 %v4329_v59, %v4329_v59 }
 0x1a2   :  { %v4377_v23 = vadd.f32 %v2989_v3, %v1747_v30  ;;  %v1931_v38 = vsel %vm1878_vm0, %v4363_v41, 0.0  ;;  %v1930_v24 = vadd.f32 %v1929_v1, %v1928_v0  ;;  %v2093_v17 = vsel %vm1878_vm0, %v4370_v20, 0.0 }
 0x1a3   :  { %v4385_v49 = vadd.f32 %v2992_v37, %v1749_v7  ;;  %v1895_v3 = vadd.f32 %v1894_v63, %v1893_v46  ;;  %v1896_v47 = vsel %vm1878_vm0, %v4329_v59, 0.0  ;;  %v2058_v43 = vadd.f32 %v2057_v8, %v2056_v16 }
 0x1a4   :  { %v2092_v29 = vadd.f32 %v2091_v18, %v2090_v5  ;;  %v4404_v0 = vmul.f32 %v4365_v25, %v4365_v25  ;;  %v1932_v1 = vadd.f32 %v1931_v38, %v1930_v24  ;;  %v4408_v62 = vmul.f32 %v4372_v4, %v4372_v4 }
 0x1a5   :  { %v1652_v44 = vpop.f32.mrb[36].mxu1  ;;  %v2059_v5 = vsel %vm1878_vm0, %v4339_v9, 0.0  ;;  %v2095_v38 = vsel %vm1878_vm0, %v4395_v2, 0.0  ;;  %v1849_v24 = vsel %vm1799_vm1, %v4234_v56, 0.0 }
 0x1a6   :  { %v1753_v30 = vpop.f32.mrb[36].mxu0  ;;  %v2995_v7 = vadd.f32 %v4195_v26, %v1652_v44  ;;  %v1654_v37 = vpop.f32.mrb[37].mxu1  ;;  %v1933_v26 = vsel %vm1878_vm0, %v4389_v19, 0.0  ;;  %v2094_v8 = vadd.f32 %v2093_v17, %v2092_v29  ;;  %v2061_v17 = vsel %vm1878_vm0, %v4372_v4, 0.0 }
 0x1a7   :  { %v1755_v52 = vpop.f32.mrb[37].mxu0  ;;  %v2998_v46 = vadd.f32 %v4200_v32, %v1654_v37  ;;  %v1656_v63 = vpop.f32.mrb[38].mxu1  ;;  %v1851_v32 = vsel %vm1799_vm1, %v4255_v12, 0.0  ;;  %v1897_v37 = vadd.f32 %v1896_v47, %v1895_v3  ;;  %v1934_v29 = vadd.f32 %v1933_v26, %v1932_v1 }
 0x1a8   :  { %v1757_v31 = vpop.f32.mrb[38].mxu0  ;;  %v2996_v18 = vadd.f32 %v2995_v7, %v1753_v30  ;;  %v1657_v16 = vpop.f32.mrb[39].mxu1  ;;  %v1898_v63 = vsel %vm1878_vm0, %v4365_v25, 0.0  ;;  %v2060_v30 = vadd.f32 %v2059_v5, %v2058_v43  ;;  %v1935_v7 = vsel %vm1878_vm0, %v4404_v0, 0.0 }
 0x1a9   :  { %v1758_v44 = vpop.f32.mrb[39].mxu0  ;;  %v2999_v31 = vadd.f32 %v2998_v46, %v1755_v52  ;;  %v2097_v56 = vsel %vm1878_vm0, %v4408_v62, 0.0  ;;  %v1844_v12 = vmul.f32 %v4377_v23, %v4377_v23  ;;  %v4433_v52 = vmul.f32 %v4385_v49, %v4385_v49 }
 0x1aa   :  { %1784 = vst [vmem:[#allocation2 + $0xc0] sm:$0x3] %v2996_v18  ;;  %v2096_v3 = vadd.f32 %v2095_v38, %v2094_v8  ;;  %v1850_v47 = vadd.f32 %v1849_v24, %v4320_v13  ;;  %v1899_v46 = vadd.f32 %v1898_v63, %v1897_v37  ;;  %v1900_v43 = vsel %vm1878_vm0, %v4377_v23, 0.0 }
 0x1ab   :  { %1785 = vst [vmem:[#allocation2 + $0xc8] sm:$0x3] %v2999_v31  ;;  %v2062_v1 = vadd.f32 %v2061_v17, %v2060_v30  ;;  %v1853_v5 = vsel %vm1799_vm1, %v4280_v36, 0.0  ;;  %v2063_v26 = vsel %vm1878_vm0, %v4385_v49, 0.0  ;;  %v1936_v18 = vadd.f32 %v1935_v7, %v1934_v29 }
 0x1ac   :  { %v2098_v16 = vadd.f32 %v2097_v56, %v2096_v3  ;;  %v1852_v44 = vadd.f32 %v1851_v32, %v1850_v47  ;;  %v1855_v31 = vsel %vm1799_vm1, %v4304_v57, 0.0  ;;  %v2010_v13 = vsel %vm1799_vm1, %v4208_v40, 0.0 }
 0x1ad   :  { %v2011_v8 = vsel %vm1799_vm1, %v4219_v48, 0.0  ;;  %v2013_v38 = vsel %vm1799_vm1, %v4238_v58, 0.0  ;;  %v1937_v36 = vsel %vm1878_vm0, %v1844_v12, 0.0  ;;  %v2099_v24 = vsel %vm1878_vm0, %v4433_v52, 0.0 }
 0x1ae   :  { %v1854_v37 = vadd.f32 %v1853_v5, %v1852_v44  ;;  %v2012_v63 = vadd.f32 %v2011_v8, %v2010_v13  ;;  %v1857_v32 = vsel %vm1799_vm1, %v4327_v54, 0.0  ;;  %v2015_v57 = vsel %vm1799_vm1, %v4264_v51, 0.0 }
 0x1af   :  { %v1901_v17 = vadd.f32 %v1900_v43, %v1899_v46  ;;  %v2064_v48 = vadd.f32 %v2063_v26, %v2062_v1  ;;  %v1938_v56 = vadd.f32 %v1937_v36, %v1936_v18  ;;  %v2100_v3 = vadd.f32 %v2099_v24, %v2098_v16 }
 0x1b0   :  { %v1856_v30 = vadd.f32 %v1855_v31, %v1854_v37  ;;  %v2014_v29 = vadd.f32 %v2013_v38, %v2012_v63  ;;  %v1859_v51 = vsel %vm1799_vm1, %v4347_v11, 0.0  ;;  %v1861_v18 = vsel %vm1799_vm1, %v4363_v41, 0.0 }
 0x1b1   :  { %v4457_v40 = vld [vmem:[#allocation2 + $0xc0] sm:$0x3]  ;;  %v2017_v13 = vsel %vm1799_vm1, %v4291_v53, 0.0  ;;  %v1863_v38 = vsel %vm1799_vm1, %v4389_v19, 0.0  ;;  %v2019_v36 = vsel %vm1799_vm1, %v4308_v10, 0.0  ;;  %v2021_v53 = vsel %vm1799_vm1, %v4335_v15, 0.0 }
 0x1b2   :  { %v1903_v58 = vsel %vm1902_vm2, %v4457_v40, 0.0  ;;  %v1845_v7 = vmul.f32 %v4457_v40, %v4457_v40  ;;  %v4463_v5 = vld [vmem:[#allocation2 + $0xc8] sm:$0x3]  ;;  %v1858_v54 = vadd.f32 %v1857_v32, %v1856_v30  ;;  %v2016_v46 = vadd.f32 %v2015_v57, %v2014_v29 }
 0x1b3   :  { %v1904_v47 = vadd.f32 %v1903_v58, %v1901_v17  ;;  %v2065_v43 = vsel %vm1902_vm2, %v4463_v5, 0.0  ;;  %v2009_v26 = vmul.f32 %v4463_v5, %v4463_v5  ;;  %v1865_v57 = vsel %vm1799_vm1, %v4404_v0, 0.0 }
 0x1b4   :  { %v1939_v1 = vsel %vm1902_vm2, %v1845_v7, 0.0  ;;  %v2066_v44 = vadd.f32 %v2065_v43, %v2064_v48  ;;  %v1860_v8 = vadd.f32 %v1859_v51, %v1858_v54  ;;  %v2018_v17 = vadd.f32 %v2017_v13, %v2016_v46 }
 0x1b5   :  { %v1905_v16 = vrot.slane %v1904_v47, 4  ;;  %v1940_v31 = vadd.f32 %v1939_v1, %v1938_v56  ;;  %v2101_v11 = vsel %vm1902_vm2, %v2009_v26, 0.0  ;;  %v1867_v56 = vsel %vm1799_vm1, %v1844_v12, 0.0 }
 0x1b6   :  { %v2067_v37 = vrot.slane %v2066_v44, 4  ;;  %v2102_v32 = vadd.f32 %v2101_v11, %v2100_v3  ;;  %v1862_v41 = vadd.f32 %v1861_v18, %v1860_v8  ;;  %v2020_v10 = vadd.f32 %v2019_v36, %v2018_v17 }
 0x1b7   :  { %v1906_v24 = vadd.f32 %v1905_v16, %v1904_v47  ;;  %v1941_v63 = vrot.slane %v1940_v31, 4  ;;  %v2023_v47 = vsel %vm1799_vm1, %v4354_v35, 0.0  ;;  %v1869_v46 = vsel %vm1823_vm3, %v1845_v7, 0.0 }
 0x1b8   :  { %v2068_v30 = vadd.f32 %v2067_v37, %v2066_v44  ;;  %v2103_v58 = vrot.slane %v2102_v32, 4  ;;  %v1864_v19 = vadd.f32 %v1863_v38, %v1862_v41  ;;  %v2022_v1 = vadd.f32 %v2021_v53, %v2020_v10 }
 0x1b9   :  { %v1907_v48 = vrot.slane %v1906_v24, 2  ;;  %v1942_v29 = vadd.f32 %v1941_v63, %v1940_v31  ;;  %v2025_v15 = vsel %vm1799_vm1, %v4370_v20, 0.0  ;;  %v2027_v35 = vsel %vm1799_vm1, %v4395_v2, 0.0 }
 0x1ba   :  { %v2069_v54 = vrot.slane %v2068_v30, 2  ;;  %v2104_v43 = vadd.f32 %v2103_v58, %v2102_v32  ;;  %v1866_v0 = vadd.f32 %v1865_v57, %v1864_v19  ;;  %v2024_v13 = vadd.f32 %v2023_v47, %v2022_v1 }
 0x1bb   :  { %v1908_v3 = vadd.f32 %v1907_v48, %v1906_v24  ;;  %v1943_v51 = vrot.slane %v1942_v29, 2  ;;  %v2029_v63 = vsel %vm1799_vm1, %v4408_v62, 0.0  ;;  %v2031_v2 = vsel %vm1799_vm1, %v4433_v52, 0.0 }
 0x1bc   :  { %v2070_v16 = vadd.f32 %v2069_v54, %v2068_v30  ;;  %v2105_v31 = vrot.slane %v2104_v43, 2  ;;  %v1868_v12 = vadd.f32 %v1867_v56, %v1866_v0  ;;  %v2026_v7 = vadd.f32 %v2025_v15, %v2024_v13 }
 0x1bd   :  { %v1909_v18 = vrot.slane %v1908_v3, 1  ;;  %v1944_v44 = vadd.f32 %v1943_v51, %v1942_v29  ;;  %v2033_v53 = vsel %vm1823_vm3, %v2009_v26, 0.0  ;;  %v1801_v62 = vsel %vm1799_vm1, %v4166_v33, 0.0 }
 0x1be   :  { %v2071_v8 = vrot.slane %v2070_v16, 1  ;;  %v2106_v36 = vadd.f32 %v2105_v31, %v2104_v43  ;;  %v4493_v24 = vadd.f32 %v1869_v46, %v1868_v12  ;;  %v2028_v32 = vadd.f32 %v2027_v35, %v2026_v7 }
 0x1bf   :  { %v1910_v11 = vadd.f32 %v1909_v18, %v1908_v3  ;;  %v1945_v38 = vrot.slane %v1944_v44, 1  ;;  %v1800_v29 = vsel %vm1799_vm1, %v4157_v21, 0.0  ;;  %v1803_v58 = vsel %vm1799_vm1, %v4177_v45, 0.0 }
 0x1c0   :  { %v2072_v20 = vadd.f32 %v2071_v8, %v2070_v16  ;;  %v2107_v37 = vrot.slane %v2106_v36, 1  ;;  %v2030_v57 = vadd.f32 %v2029_v63, %v2028_v32  ;;  %v1966_v52 = vsel %vm1799_vm1, %v4171_v39, 0.0  ;;  %v4962_v32 = vld [vmem:[#allocation5_spill] sm:$0xff] }
 0x1c1   :  { %1912 = vrot.lane.b32.xlu0 %v1910_v11, %s3380_s0  ;;  %v1946_v41 = vadd.f32 %v1945_v38, %v1944_v44  ;;  %v1802_v19 = vadd.f32 %v1801_v62, %v1800_v29  ;;  %v1965_v26 = vsel %vm1799_vm1, %v4161_v27, 0.0  ;;  %v1968_v56 = vsel %vm1799_vm1, %v4181_v55, 0.0 }
 0x1c2   :  { %2074 = vrot.lane.b32.xlu1 %v2072_v20, %s3380_s0  ;;  %v2108_v17 = vadd.f32 %v2107_v37, %v2106_v36  ;;  %v2032_v48 = vadd.f32 %v2031_v2, %v2030_v57  ;;  %v1967_v47 = vadd.f32 %v1966_v52, %v1965_v26  ;;  %v1805_v3 = vsel %vm1799_vm1, %v4186_v6, 0.0  ;;  %v4960_v36 = vld [vmem:[#allocation4_spill] sm:$0xff]  ;;  %v4961_v20 = vld [vmem:[#allocation3_spill] sm:$0xff] }
 0x1c3   :  { %v1804_v10 = vadd.f32 %v1803_v58, %v1802_v19  ;;  %v1807_v51 = vsel %vm1799_vm1, %v4197_v28, 0.0  ;;  %v1970_v43 = vsel %vm1799_vm1, %v4191_v22, 0.0  ;;  %v1972_v46 = vsel %vm1799_vm1, %v4202_v34, 0.0 }
 0x1c4   :  { %v2034_v30 = vadd.f32 %v2033_v53, %v2032_v48  ;;  %v1969_v54 = vadd.f32 %v1968_v56, %v1967_v47  ;;  %v1809_v18 = vsel %vm1799_vm1, %v4211_v42, 0.0  ;;  %v1811_v44 = vsel %vm1799_vm1, %v4258_v14, 0.0 }
 0x1c5   :  { %1948 = vrot.lane.b32.xlu0 %v1946_v41, %s3380_s0  ;;  %v1806_v0 = vadd.f32 %v1805_v3, %v1804_v10  ;;  %v1974_v31 = vsel %vm1799_vm1, %v4223_v50, 0.0  ;;  %v1976_v13 = vsel %vm1799_vm1, %v4269_v61, 0.0  ;;  %v1813_v8 = vsel %vm1799_vm1, %v4272_v60, 0.0 }
 0x1c6   :  { %2110 = vrot.lane.b32.xlu1 %v2108_v17, %s3380_s0  ;;  %v1971_v15 = vadd.f32 %v1970_v43, %v1969_v54  ;;  %v1815_v7 = vsel %vm1799_vm1, %v4960_v36, 0.0  ;;  %v1978_v37 = vsel %vm1799_vm1, %v4961_v20, 0.0  ;;  %v1980_v41 = vsel %vm1799_vm1, %v4962_v32, 0.0 }
 0x1c7   :  { %v1808_v1 = vadd.f32 %v1807_v51, %v1806_v0  ;;  %v1817_v17 = vsel %vm1799_vm1, %v4329_v59, 0.0  ;;  %v1819_v48 = vsel %vm1799_vm1, %v4365_v25, 0.0  ;;  %v1982_v62 = vsel %vm1799_vm1, %v4339_v9, 0.0 }
 0x1c8   :  { %v1973_v16 = vadd.f32 %v1972_v46, %v1971_v15  ;;  %v1984_v58 = vsel %vm1799_vm1, %v4372_v4, 0.0  ;;  %v1821_v26 = vsel %vm1799_vm1, %v4377_v23, 0.0  ;;  %v1824_v10 = vsel %vm1823_vm3, %v4457_v40, 0.0 }
 0x1c9   :  { %v1810_v12 = vadd.f32 %v1809_v18, %v1808_v1  ;;  %v1986_v47 = vsel %vm1799_vm1, %v4385_v49, 0.0  ;;  %v1988_v54 = vsel %vm1823_vm3, %v4463_v5, 0.0  ;;  %v1871_v18 = vrot.slane %v4493_v24, 4 }
 0x1ca   :  { %v1975_v11 = vadd.f32 %v1974_v31, %v1973_v16 }
 0x1cb   :  { %v1812_v35 = vadd.f32 %v1811_v44, %v1810_v12  ;;  %v2035_v44 = vrot.slane %v2034_v30, 4  ;;  %v1872_v12 = vadd.f32 %v1871_v18, %v4493_v24  ;;  %v2119_v18 = vld [vmem:[%s4948_s2] sm:$0x1] }
 0x1cc   :  { %v1977_v38 = vadd.f32 %v1976_v13, %v1975_v11 }
 0x1cd   :  { %v1814_v63 = vadd.f32 %v1813_v8, %v1812_v35  ;;  %v2036_v35 = vadd.f32 %v2035_v44, %v2034_v30  ;;  %v1873_v8 = vrot.slane %v1872_v12, 2 }
 0x1ce   :  { %v1979_v57 = vadd.f32 %v1978_v37, %v1977_v38 }
 0x1cf   :  { %v1816_v2 = vadd.f32 %v1815_v7, %v1814_v63  ;;  %v2037_v7 = vrot.slane %v2036_v35, 2  ;;  %v1874_v37 = vadd.f32 %v1873_v8, %v1872_v12  ;;  %v2123_v12 = vld [vmem:[%s4949_s3] sm:$0x1] }
 0x1d0   :  { %v1981_v53 = vadd.f32 %v1980_v41, %v1979_v57 }
 0x1d1   :  { %v1818_v29 = vadd.f32 %v1817_v17, %v1816_v2  ;;  %v2038_v41 = vadd.f32 %v2037_v7, %v2036_v35  ;;  %v1875_v57 = vrot.slane %v1874_v37, 1 }
 0x1d2   :  { %v1983_v19 = vadd.f32 %v1982_v62, %v1981_v53 }
 0x1d3   :  { %v1820_v52 = vadd.f32 %v1819_v48, %v1818_v29  ;;  %v2039_v62 = vrot.slane %v2038_v41, 1 }
 0x1d4   :  { %v1985_v56 = vadd.f32 %v1984_v58, %v1983_v19 }
 0x1d5   :  { %v1822_v3 = vadd.f32 %v1821_v26, %v1820_v52  ;;  %v1876_v52 = vadd.f32 %v1875_v57, %v1874_v37  ;;  %v2040_v26 = vadd.f32 %v2039_v62, %v2038_v41 }
 0x1d6   :  { %v1987_v43 = vadd.f32 %v1986_v47, %v1985_v56 }
 0x1d7   :  { %v1825_v51 = vadd.f32 %v1824_v10, %v1822_v3 }
 0x1d8   :  { %v1989_v0 = vadd.f32 %v1988_v54, %v1987_v43 }
 0x1d9   :  { %v1826_v46 = vrot.slane %v1825_v51, 4 }
 0x1da   :  { %v1990_v1 = vrot.slane %v1989_v0, 4 }
 0x1db   :  { %v1827_v15 = vadd.f32 %v1826_v46, %v1825_v51 }
 0x1dc   :  { %v1991_v16 = vadd.f32 %v1990_v1, %v1989_v0  ;;  %v2127_v1 = vlaneseq }
 0x1dd   :  { %v1828_v31 = vrot.slane %v1827_v15, 2 }
 0x1de   :  { %v1992_v13 = vrot.slane %v1991_v16, 2 }
 0x1df   :  { %v1829_v11 = vadd.f32 %v1828_v31, %v1827_v15  ;;  %v2128_v15 = vshrl.u32 %v2127_v1, 7 }
 0x1e0   :  { %v1993_v38 = vadd.f32 %v1992_v13, %v1991_v16 }
 0x1e1   :  { %v1830_v5 = vrot.slane %v1829_v11, 1  ;;  %v2129_v16 = vsub.s32 0, %v2128_v15 }
 0x1e2   :  { %v1994_v63 = vrot.slane %v1993_v38, 1 }
 0x1e3   :  { %v1831_v2 = vadd.f32 %v1830_v5, %v1829_v11 }
 0x1e4   :  { %v1995_v48 = vadd.f32 %v1994_v63, %v1993_v38 }
 0x233   :  { %v1913_v17 = vpop.permute.xlu0 %1912 }
 0x234   :  { %v1915_v53 = vadd.f32 %v1913_v17, %v1831_v2  ;;  %v2075_v29 = vpop.permute.xlu1 %2074 }
 0x236   :  { %v1996_v58 = vadd.f32 %v1995_v48, %v1915_v53 }
 0x237   :  { %v1949_v24 = vpop.permute.xlu0 %1948 }
 0x238   :  { %v2077_v19 = vadd.f32 %v2075_v29, %v1996_v58  ;;  %v1951_v30 = vadd.f32 %v1949_v24, %v1876_v52  ;;  %v2111_v47 = vpop.permute.xlu1 %2110 }
 0x23a   :  { %v2114_v56 = vmul.f32 0.0025510204, %v2077_v19  ;;  %v2041_v10 = vadd.f32 %v2040_v26, %v1951_v30 }
 0x23c   :  { %v2113_v3 = vadd.f32 %v2111_v47, %v2041_v10  ;;  %v2116_v54 = vmul.f32 %v2114_v56, %v2114_v56 }
 0x23e   :  { %v2115_v51 = vmul.f32 0.0025510204, %v2113_v3 }
 0x240   :  { %v2117_v43 = vsub.f32 %v2115_v51, %v2116_v54 }
 0x242   :  { %v2118_v0 = vmax.f32 %v2117_v43, 0.0 }
 0x244   :  { %v2120_v46 = vadd.f32 1e-05, %v2118_v0 }
 0x246   :  { %3365 = vrsqrt.f32 %v2120_v46 }
 0x250   :  { %v3366_v44 = vpop.eup %3365 }
 0x251   :  { %v2122_v31 = vmul.f32 %v3366_v44, %v2119_v18 }
 0x253   :  { %v2124_v13 = vmul.f32 %v2122_v31, %v2114_v56  ;;  %v2130_v35 = vrot.slane %v2122_v31, %v2129_v16 }
 0x255   :  { %v2125_v11 = vsub.f32 %v2123_v12, %v2124_v13  ;;  %2258 = vrot.lane.b32.xlu0 %v2130_v35, %s3380_s0  ;;  %v2132_v8 = vmul.f32 %v4157_v21, %v2130_v35  ;;  %v2133_v38 = vmul.f32 %v4166_v33, %v2130_v35  ;;  %v2134_v7 = vmul.f32 %v4177_v45, %v2130_v35 }
 0x256   :  { %v2135_v5 = vmul.f32 %v4186_v6, %v2130_v35  ;;  %v2136_v37 = vmul.f32 %v4197_v28, %v2130_v35  ;;  %v2137_v63 = vmul.f32 %v4211_v42, %v2130_v35  ;;  %v2138_v41 = vmul.f32 %v4258_v14, %v2130_v35 }
 0x257   :  { %v4572_v2 = vrot.slane %v2125_v11, %v2129_v16  ;;  %v2139_v57 = vmul.f32 %v4272_v60, %v2130_v35  ;;  %v2140_v17 = vmul.f32 %v4960_v36, %v2130_v35  ;;  %v2141_v21 = vmul.f32 %v4329_v59, %v2130_v35 }
 0x258   :  { %v2142_v33 = vmul.f32 %v4365_v25, %v2130_v35  ;;  %v2143_v45 = vmul.f32 %v4377_v23, %v2130_v35  ;;  %v2144_v6 = vmul.f32 %v2130_v35, %v4457_v40  ;;  %v4581_v28 = vmul.f32 %v4161_v27, %v2130_v35  ;;  %v2383_v40 = vld [vmem:[#allocation2 + $0xc8] sm:$0x3] }
 0x259   :  { %2274 = vrot.lane.b32.xlu1 %v4572_v2, %s3380_s0  ;;  %v4586_v42 = vmul.f32 %v4171_v39, %v2130_v35  ;;  %v4589_v53 = vmul.f32 %v4181_v55, %v2130_v35  ;;  %v4592_v48 = vmul.f32 %v4191_v22, %v2130_v35  ;;  %v4595_v62 = vmul.f32 %v4202_v34, %v2130_v35 }
 0x25a   :  { %v4598_v27 = vmul.f32 %v4223_v50, %v2130_v35  ;;  %v4601_v29 = vmul.f32 %v4269_v61, %v2130_v35  ;;  %v4604_v58 = vmul.f32 %v4961_v20, %v2130_v35  ;;  %v4607_v39 = vmul.f32 %v4962_v32, %v2130_v35 }
 0x25b   :  { %v4610_v55 = vmul.f32 %v4339_v9, %v2130_v35  ;;  %v4613_v22 = vmul.f32 %v4372_v4, %v2130_v35  ;;  %v4616_v34 = vmul.f32 %v4385_v49, %v2130_v35  ;;  %v4618_v50 = vmul.f32 %v2383_v40, %v2130_v35 }
 0x25c   :  { %v2151_v52 = vadd.f32 %v4572_v2, %v2132_v8  ;;  %v2152_v24 = vadd.f32 %v4572_v2, %v2133_v38  ;;  %v2153_v19 = vadd.f32 %v4572_v2, %v2134_v7  ;;  %v2154_v30 = vadd.f32 %v4572_v2, %v2135_v5 }
 0x25d   :  { %v2155_v26 = vadd.f32 %v4572_v2, %v2136_v37  ;;  %v2156_v56 = vadd.f32 %v4572_v2, %v2137_v63  ;;  %v2157_v10 = vadd.f32 %v4572_v2, %v2138_v41  ;;  %v2158_v47 = vadd.f32 %v4572_v2, %v2139_v57 }
 0x25e   :  { %v2159_v3 = vadd.f32 %v4572_v2, %v2140_v17  ;;  %v2160_v54 = vadd.f32 %v4572_v2, %v2141_v21  ;;  %v2161_v51 = vadd.f32 %v4572_v2, %v2142_v33  ;;  %v2162_v43 = vadd.f32 %v4572_v2, %v2143_v45 }
 0x25f   :  { %v2163_v0 = vadd.f32 %v4572_v2, %v2144_v6  ;;  %v2164_v46 = vmax.f32 %v2151_v52, 0.0  ;;  %v2165_v1 = vmax.f32 %v2152_v24, 0.0  ;;  %v2166_v15 = vmax.f32 %v2153_v19, 0.0 }
 0x260   :  { %v2167_v18 = vmax.f32 %v2154_v30, 0.0  ;;  %v2168_v16 = vmax.f32 %v2155_v26, 0.0  ;;  %v2169_v44 = vmax.f32 %v2156_v56, 0.0  ;;  %v2170_v31 = vmax.f32 %v2157_v10, 0.0 }
 0x261   :  { %v2171_v12 = vmax.f32 %v2158_v47, 0.0  ;;  %v2172_v13 = vmax.f32 %v2159_v3, 0.0  ;;  %v2173_v35 = vmax.f32 %v2160_v54, 0.0  ;;  %v2174_v11 = vmax.f32 %v2161_v51, 0.0 }
 0x262   :  { %v2175_v8 = vmax.f32 %v2162_v43, 0.0  ;;  %v2176_v38 = vmax.f32 %v2163_v0, 0.0  ;;  %v2870_v7 = vpack.c.bf16 %v2164_v46, %v2164_v46  ;;  %v2871_v5 = vpack.c.bf16 %v2165_v1, %v2165_v1 }
 0x263   :  { %v2872_v37 = vpack.c.bf16 %v2166_v15, %v2166_v15  ;;  %v2873_v63 = vpack.c.bf16 %v2167_v18, %v2167_v18  ;;  %v2874_v41 = vpack.c.bf16 %v2168_v16, %v2168_v16  ;;  %v2875_v57 = vpack.c.bf16 %v2169_v44, %v2169_v44 }
 0x264   :  { %v2876_v17 = vpack.c.bf16 %v2170_v31, %v2170_v31  ;;  %v2877_v21 = vpack.c.bf16 %v2171_v12, %v2171_v12  ;;  %v2878_v33 = vpack.c.bf16 %v2172_v13, %v2172_v13  ;;  %v2879_v45 = vpack.c.bf16 %v2173_v35, %v2173_v35  ;;  %2231 = vst.msk [vmem:[%s4950_s4] sm:$0xf] %vm2230_vm4, %v2870_v7 }
 0x265   :  { %2232 = vst.msk [vmem:[%s4950_s4 + $0x8] sm:$0xf] %vm2230_vm4, %v2871_v5  ;;  %v2880_v6 = vpack.c.bf16 %v2174_v11, %v2174_v11  ;;  %v2881_v40 = vpack.c.bf16 %v2175_v8, %v2175_v8  ;;  %v2882_v52 = vpack.c.bf16 %v2176_v38, %v2176_v38  ;;  %2233 = vst.msk [vmem:[%s4950_s4 + $0x10] sm:$0xf] %vm2230_vm4, %v2872_v37  ;;  %v3367_v5 = vld [vmem:[#allocation2] sm:$0xff] }
 0x266   :  { %2234 = vst.msk [vmem:[%s4950_s4 + $0x18] sm:$0xf] %vm2230_vm4, %v2873_v63  ;;  %2235 = vst.msk [vmem:[%s4950_s4 + $0x20] sm:$0xf] %vm2230_vm4, %v2874_v41  ;;  %v2397_v24 = vadd.f32 %v4581_v28, %v4572_v2  ;;  %v2398_v28 = vadd.f32 %v4586_v42, %v4572_v2  ;;  %v2399_v19 = vadd.f32 %v4589_v53, %v4572_v2  ;;  %v3368_v63 = vld [vmem:[#allocation2 + $0x10] sm:$0xff] }
 0x267   :  { %2236 = vst.msk [vmem:[%s4950_s4 + $0x28] sm:$0xf] %vm2230_vm4, %v2875_v57  ;;  %2237 = vst.msk [vmem:[%s4950_s4 + $0x30] sm:$0xf] %vm2230_vm4, %v2876_v17  ;;  %v2400_v30 = vadd.f32 %v4592_v48, %v4572_v2  ;;  %v2401_v26 = vadd.f32 %v4595_v62, %v4572_v2  ;;  %v2402_v42 = vadd.f32 %v4598_v27, %v4572_v2  ;;  %v3369_v57 = vld [vmem:[#allocation2 + $0x20] sm:$0xff] }
 0x268   :  { %2238 = vst.msk [vmem:[%s4950_s4 + $0x38] sm:$0xf] %vm2230_vm4, %v2877_v21  ;;  %2239 = vst.msk [vmem:[%s4950_s4 + $0x40] sm:$0xf] %vm2230_vm4, %v2878_v33  ;;  %v2403_v53 = vadd.f32 %v4601_v29, %v4572_v2  ;;  %v2404_v48 = vadd.f32 %v4604_v58, %v4572_v2  ;;  %v2405_v62 = vadd.f32 %v4607_v39, %v4572_v2  ;;  %v2410_v3 = vmax.f32 %v2397_v24, 0.0  ;;  %v3370_v21 = vld [vmem:[#allocation2 + $0x30] sm:$0xff] }
 0x269   :  { %2240 = vst.msk [vmem:[%s4950_s4 + $0x48] sm:$0xf] %vm2230_vm4, %v2879_v45  ;;  %2241 = vst.msk [vmem:[%s4950_s4 + $0x50] sm:$0xf] %vm2230_vm4, %v2880_v6  ;;  %v2406_v56 = vadd.f32 %v4610_v55, %v4572_v2  ;;  %v2407_v10 = vadd.f32 %v4613_v22, %v4572_v2  ;;  %v2408_v47 = vadd.f32 %v4616_v34, %v4572_v2  ;;  %v2411_v29 = vmax.f32 %v2398_v28, 0.0  ;;  %v3371_v45 = vld [vmem:[#allocation2 + $0x40] sm:$0xff] }
 0x26a   :  { %2242 = vst.msk [vmem:[%s4950_s4 + $0x58] sm:$0xf] %vm2230_vm4, %v2881_v40  ;;  %v2409_v27 = vadd.f32 %v4618_v50, %v4572_v2  ;;  %v2412_v54 = vmax.f32 %v2399_v19, 0.0  ;;  %v2413_v51 = vmax.f32 %v2400_v30, 0.0  ;;  %v2414_v58 = vmax.f32 %v2401_v26, 0.0  ;;  %v3372_v40 = vld [vmem:[#allocation2 + $0x50] sm:$0xff] }
 0x26b   :  { %2244 = vst.msk [vmem:[%s4950_s4 + $0x60] sm:$0x1] %vm2243_vm5, %v2882_v52  ;;  %v2415_v43 = vmax.f32 %v2402_v42, 0.0  ;;  %v2416_v0 = vmax.f32 %v2403_v53, 0.0  ;;  %v2417_v39 = vmax.f32 %v2404_v48, 0.0  ;;  %v2418_v46 = vmax.f32 %v2405_v62, 0.0 }
 0x26c   :  { %v2419_v1 = vmax.f32 %v2406_v56, 0.0  ;;  %v2420_v55 = vmax.f32 %v2407_v10, 0.0  ;;  %v2421_v15 = vmax.f32 %v2408_v47, 0.0  ;;  %v2422_v18 = vmax.f32 %v2409_v27, 0.0  ;;  %v2257_v19 = vld [vmem:[#allocation2 + $0xc0] sm:$0x3] }
 0x26d   :  { %v2896_v22 = vpack.c.bf16 %v2410_v3, %v2410_v3  ;;  %v2897_v16 = vpack.c.bf16 %v2411_v29, %v2411_v29  ;;  %v2898_v44 = vpack.c.bf16 %v2412_v54, %v2412_v54  ;;  %v2899_v34 = vpack.c.bf16 %v2413_v51, %v2413_v51  ;;  %v3373_v62 = vld [vmem:[#allocation2 + $0x8] sm:$0xff]  ;;  %v3374_v10 = vld [vmem:[#allocation2 + $0x18] sm:$0xff] }
 0x26e   :  { %v2900_v31 = vpack.c.bf16 %v2414_v58, %v2414_v58  ;;  %v2901_v12 = vpack.c.bf16 %v2415_v43, %v2415_v43  ;;  %v2902_v2 = vpack.c.bf16 %v2416_v0, %v2416_v0  ;;  %v2903_v50 = vpack.c.bf16 %v2417_v39, %v2417_v39  ;;  %v3375_v27 = vld [vmem:[#allocation2 + $0x28] sm:$0xff]  ;;  %v3376_v3 = vld [vmem:[#allocation2 + $0x38] sm:$0xff] }
 0x26f   :  { %v2904_v13 = vpack.c.bf16 %v2418_v46, %v2418_v46  ;;  %v2905_v35 = vpack.c.bf16 %v2419_v1, %v2419_v1  ;;  %v2906_v11 = vpack.c.bf16 %v2420_v55, %v2420_v55  ;;  %2476 = vst.msk [vmem:[%s4950_s4 + $0x4] sm:$0xf] %vm2230_vm4, %v2896_v22  ;;  %2477 = vst.msk [vmem:[%s4950_s4 + $0xc] sm:$0xf] %vm2230_vm4, %v2897_v16  ;;  %v2501_v51 = vld [vmem:[#allocation2 + $0xc8] sm:$0x3] }
 0x270   :  { %2478 = vst.msk [vmem:[%s4950_s4 + $0x14] sm:$0xf] %vm2230_vm4, %v2898_v44  ;;  %v2907_v8 = vpack.c.bf16 %v2421_v15, %v2421_v15  ;;  %v2908_v38 = vpack.c.bf16 %v2422_v18, %v2422_v18  ;;  %2479 = vst.msk [vmem:[%s4950_s4 + $0x1c] sm:$0xf] %vm2230_vm4, %v2899_v34 }
 0x271   :  { %2480 = vst.msk [vmem:[%s4950_s4 + $0x24] sm:$0xf] %vm2230_vm4, %v2900_v31  ;;  %2481 = vst.msk [vmem:[%s4950_s4 + $0x2c] sm:$0xf] %vm2230_vm4, %v2901_v12 }
 0x272   :  { %2482 = vst.msk [vmem:[%s4950_s4 + $0x34] sm:$0xf] %vm2230_vm4, %v2902_v2  ;;  %2483 = vst.msk [vmem:[%s4950_s4 + $0x3c] sm:$0xf] %vm2230_vm4, %v2903_v50 }
 0x273   :  { %2484 = vst.msk [vmem:[%s4950_s4 + $0x44] sm:$0xf] %vm2230_vm4, %v2904_v13  ;;  %2485 = vst.msk [vmem:[%s4950_s4 + $0x4c] sm:$0xf] %vm2230_vm4, %v2905_v35 }
 0x274   :  { %2486 = vst.msk [vmem:[%s4950_s4 + $0x54] sm:$0xf] %vm2230_vm4, %v2906_v11  ;;  %2487 = vst.msk [vmem:[%s4950_s4 + $0x5c] sm:$0xf] %vm2230_vm4, %v2907_v8 }
 0x275   :  { %2488 = vst.msk [vmem:[%s4950_s4 + $0x64] sm:$0x1] %vm2243_vm5, %v2908_v38 }
 0x2c7   :  { %v2259_v7 = vpop.permute.xlu0 %2258 }
 0x2c8   :  { %v2261_v37 = vmul.f32 %v3367_v5, %v2259_v7  ;;  %v2262_v41 = vmul.f32 %v3368_v63, %v2259_v7  ;;  %v2263_v17 = vmul.f32 %v3369_v57, %v2259_v7  ;;  %v2264_v33 = vmul.f32 %v3370_v21, %v2259_v7 }
 0x2c9   :  { %v2265_v6 = vmul.f32 %v3371_v45, %v2259_v7  ;;  %v2266_v52 = vmul.f32 %v3372_v40, %v2259_v7  ;;  %v2267_v24 = vmul.f32 %v4258_v14, %v2259_v7  ;;  %v2268_v28 = vmul.f32 %v4272_v60, %v2259_v7 }
 0x2ca   :  { %v2269_v30 = vmul.f32 %v4960_v36, %v2259_v7  ;;  %v2270_v26 = vmul.f32 %v4329_v59, %v2259_v7  ;;  %v2271_v42 = vmul.f32 %v4365_v25, %v2259_v7  ;;  %v2272_v53 = vmul.f32 %v4377_v23, %v2259_v7  ;;  %v3377_v59 = vld [vmem:[#allocation2 + $0x48] sm:$0xff]  ;;  %v3378_v25 = vld [vmem:[#allocation2 + $0x58] sm:$0xff] }
 0x2cb   :  { %v2273_v48 = vmul.f32 %v2259_v7, %v2257_v19  ;;  %v4769_v56 = vmul.f32 %v3373_v62, %v2259_v7  ;;  %v4771_v47 = vmul.f32 %v3374_v10, %v2259_v7  ;;  %v4773_v14 = vmul.f32 %v3375_v27, %v2259_v7  ;;  %v4775_v60 = vpop.permute.xlu1 %2274 }
 0x2cc   :  { %v4777_v36 = vmul.f32 %v3376_v3, %v2259_v7  ;;  %v4779_v29 = vmul.f32 %v3377_v59, %v2259_v7  ;;  %v4781_v23 = vmul.f32 %v3378_v25, %v2259_v7  ;;  %v4784_v54 = vmul.f32 %v4269_v61, %v2259_v7 }
 0x2cd   :  { %v4787_v58 = vmul.f32 %v4961_v20, %v2259_v7  ;;  %v4790_v43 = vmul.f32 %v4962_v32, %v2259_v7  ;;  %v4793_v0 = vmul.f32 %v4339_v9, %v2259_v7  ;;  %v4796_v39 = vmul.f32 %v4372_v4, %v2259_v7 }
 0x2ce   :  { %v4799_v46 = vmul.f32 %v4385_v49, %v2259_v7  ;;  %v4801_v1 = vmul.f32 %v2501_v51, %v2259_v7  ;;  %v2277_v61 = vadd.f32 %v4775_v60, %v2261_v37  ;;  %v2278_v55 = vadd.f32 %v4775_v60, %v2262_v41 }
 0x2cf   :  { %v2279_v20 = vadd.f32 %v4775_v60, %v2263_v17  ;;  %v2280_v32 = vadd.f32 %v4775_v60, %v2264_v33  ;;  %v2281_v9 = vadd.f32 %v4775_v60, %v2265_v6  ;;  %v2282_v15 = vadd.f32 %v4775_v60, %v2266_v52 }
 0x2d0   :  { %v2283_v4 = vadd.f32 %v4775_v60, %v2267_v24  ;;  %v2284_v49 = vadd.f32 %v4775_v60, %v2268_v28  ;;  %v2285_v18 = vadd.f32 %v4775_v60, %v2269_v30  ;;  %v2286_v22 = vadd.f32 %v4775_v60, %v2270_v26 }
 0x2d1   :  { %v2287_v16 = vadd.f32 %v4775_v60, %v2271_v42  ;;  %v2288_v44 = vadd.f32 %v4775_v60, %v2272_v53  ;;  %v2289_v34 = vadd.f32 %v4775_v60, %v2273_v48  ;;  %v2290_v31 = vmax.f32 %v2277_v61, 0.0 }
 0x2d2   :  { %v2291_v12 = vmax.f32 %v2278_v55, 0.0  ;;  %v2292_v2 = vmax.f32 %v2279_v20, 0.0  ;;  %v2293_v50 = vmax.f32 %v2280_v32, 0.0  ;;  %v2294_v13 = vmax.f32 %v2281_v9, 0.0 }
 0x2d3   :  { %v2295_v35 = vmax.f32 %v2282_v15, 0.0  ;;  %v2296_v11 = vmax.f32 %v2283_v4, 0.0  ;;  %v2297_v8 = vmax.f32 %v2284_v49, 0.0  ;;  %v2298_v38 = vmax.f32 %v2285_v18, 0.0 }
 0x2d4   :  { %v2299_v7 = vmax.f32 %v2286_v22, 0.0  ;;  %v2300_v5 = vmax.f32 %v2287_v16, 0.0  ;;  %v2301_v37 = vmax.f32 %v2288_v44, 0.0  ;;  %v2302_v63 = vmax.f32 %v2289_v34, 0.0 }
 0x2d5   :  { %v2883_v41 = vpack.c.bf16 %v2290_v31, %v2290_v31  ;;  %v2884_v57 = vpack.c.bf16 %v2291_v12, %v2291_v12  ;;  %v2885_v17 = vpack.c.bf16 %v2292_v2, %v2292_v2  ;;  %v2886_v21 = vpack.c.bf16 %v2293_v50, %v2293_v50 }
 0x2d6   :  { %v2887_v33 = vpack.c.bf16 %v2294_v13, %v2294_v13  ;;  %v2888_v45 = vpack.c.bf16 %v2295_v35, %v2295_v35  ;;  %v2889_v6 = vpack.c.bf16 %v2296_v11, %v2296_v11  ;;  %v2890_v40 = vpack.c.bf16 %v2297_v8, %v2297_v8 }
 0x2d7   :  { %v2891_v52 = vpack.c.bf16 %v2298_v38, %v2298_v38  ;;  %v2892_v24 = vpack.c.bf16 %v2299_v7, %v2299_v7  ;;  %v2893_v28 = vpack.c.bf16 %v2300_v5, %v2300_v5  ;;  %v2894_v19 = vpack.c.bf16 %v2301_v37, %v2301_v37  ;;  %2357 = vst.msk [vmem:[%s4950_s4] sm:$0xf] %vm2356_vm6, %v2883_v41 }
 0x2d8   :  { %2358 = vst.msk [vmem:[%s4950_s4 + $0x8] sm:$0xf] %vm2356_vm6, %v2884_v57  ;;  %2359 = vst.msk [vmem:[%s4950_s4 + $0x10] sm:$0xf] %vm2356_vm6, %v2885_v17  ;;  %v2895_v30 = vpack.c.bf16 %v2302_v63, %v2302_v63  ;;  %v2515_v26 = vadd.f32 %v4769_v56, %v4775_v60  ;;  %v2516_v42 = vadd.f32 %v4771_v47, %v4775_v60 }
 0x2d9   :  { %2360 = vst.msk [vmem:[%s4950_s4 + $0x18] sm:$0xf] %vm2356_vm6, %v2886_v21  ;;  %2361 = vst.msk [vmem:[%s4950_s4 + $0x20] sm:$0xf] %vm2356_vm6, %v2887_v33  ;;  %v2517_v53 = vadd.f32 %v4773_v14, %v4775_v60  ;;  %v2518_v48 = vadd.f32 %v4777_v36, %v4775_v60  ;;  %v2519_v62 = vadd.f32 %v4779_v29, %v4775_v60 }
 0x2da   :  { %2362 = vst.msk [vmem:[%s4950_s4 + $0x28] sm:$0xf] %vm2356_vm6, %v2888_v45  ;;  %2363 = vst.msk [vmem:[%s4950_s4 + $0x30] sm:$0xf] %vm2356_vm6, %v2889_v6  ;;  %v2520_v56 = vadd.f32 %v4781_v23, %v4775_v60  ;;  %v2521_v10 = vadd.f32 %v4784_v54, %v4775_v60  ;;  %v2522_v47 = vadd.f32 %v4787_v58, %v4775_v60  ;;  %v2528_v29 = vmax.f32 %v2515_v26, 0.0 }
 0x2db   :  { %2364 = vst.msk [vmem:[%s4950_s4 + $0x38] sm:$0xf] %vm2356_vm6, %v2890_v40  ;;  %2365 = vst.msk [vmem:[%s4950_s4 + $0x40] sm:$0xf] %vm2356_vm6, %v2891_v52  ;;  %v2523_v27 = vadd.f32 %v4790_v43, %v4775_v60  ;;  %v2524_v14 = vadd.f32 %v4793_v0, %v4775_v60  ;;  %v2525_v3 = vadd.f32 %v4796_v39, %v4775_v60  ;;  %v2529_v25 = vmax.f32 %v2516_v42, 0.0 }
 0x2dc   :  { %2366 = vst.msk [vmem:[%s4950_s4 + $0x48] sm:$0xf] %vm2356_vm6, %v2892_v24  ;;  %2367 = vst.msk [vmem:[%s4950_s4 + $0x50] sm:$0xf] %vm2356_vm6, %v2893_v28  ;;  %v2526_v36 = vadd.f32 %v4799_v46, %v4775_v60  ;;  %v2527_v59 = vadd.f32 %v4801_v1, %v4775_v60  ;;  %v2530_v23 = vmax.f32 %v2517_v53, 0.0  ;;  %v2531_v54 = vmax.f32 %v2518_v48, 0.0 }
 0x2dd   :  { %2368 = vst.msk [vmem:[%s4950_s4 + $0x58] sm:$0xf] %vm2356_vm6, %v2894_v19  ;;  %v2532_v51 = vmax.f32 %v2519_v62, 0.0  ;;  %v2533_v58 = vmax.f32 %v2520_v56, 0.0  ;;  %v2534_v61 = vmax.f32 %v2521_v10, 0.0  ;;  %v2535_v43 = vmax.f32 %v2522_v47, 0.0 }
 0x2de   :  { %2370 = vst.msk [vmem:[%s4950_s4 + $0x60] sm:$0x1] %vm2369_vm7, %v2895_v30  ;;  %v2536_v55 = vmax.f32 %v2523_v27, 0.0  ;;  %v2537_v20 = vmax.f32 %v2524_v14, 0.0  ;;  %v2538_v0 = vmax.f32 %v2525_v3, 0.0  ;;  %v2539_v32 = vmax.f32 %v2526_v36, 0.0 }
 0x2df   :  { %v2540_v9 = vmax.f32 %v2527_v59, 0.0  ;;  %v2909_v39 = vpack.c.bf16 %v2528_v29, %v2528_v29  ;;  %v2910_v15 = vpack.c.bf16 %v2529_v25, %v2529_v25  ;;  %v2911_v4 = vpack.c.bf16 %v2530_v23, %v2530_v23 }
 0x2e0   :  { %v2912_v46 = vpack.c.bf16 %v2531_v54, %v2531_v54  ;;  %v2913_v49 = vpack.c.bf16 %v2532_v51, %v2532_v51  ;;  %v2914_v18 = vpack.c.bf16 %v2533_v58, %v2533_v58  ;;  %v2915_v60 = vpack.c.bf16 %v2534_v61, %v2534_v61 }
 0x2e1   :  { %v2916_v1 = vpack.c.bf16 %v2535_v43, %v2535_v43  ;;  %v2917_v22 = vpack.c.bf16 %v2536_v55, %v2536_v55  ;;  %2594 = vst.msk [vmem:[%s4950_s4 + $0x4] sm:$0xf] %vm2356_vm6, %v2909_v39  ;;  %v2918_v16 = vpack.c.bf16 %v2537_v20, %v2537_v20  ;;  %v2919_v44 = vpack.c.bf16 %v2538_v0, %v2538_v0 }
 0x2e2   :  { %v2920_v34 = vpack.c.bf16 %v2539_v32, %v2539_v32  ;;  %v2921_v31 = vpack.c.bf16 %v2540_v9, %v2540_v9  ;;  %2595 = vst.msk [vmem:[%s4950_s4 + $0xc] sm:$0xf] %vm2356_vm6, %v2910_v15  ;;  %2596 = vst.msk [vmem:[%s4950_s4 + $0x14] sm:$0xf] %vm2356_vm6, %v2911_v4 }
 0x2e3   :  { %2597 = vst.msk [vmem:[%s4950_s4 + $0x1c] sm:$0xf] %vm2356_vm6, %v2912_v46  ;;  %2598 = vst.msk [vmem:[%s4950_s4 + $0x24] sm:$0xf] %vm2356_vm6, %v2913_v49 }
 0x2e4   :  { %2599 = vst.msk [vmem:[%s4950_s4 + $0x2c] sm:$0xf] %vm2356_vm6, %v2914_v18  ;;  %2600 = vst.msk [vmem:[%s4950_s4 + $0x34] sm:$0xf] %vm2356_vm6, %v2915_v60 }
 0x2e5   :  { %2601 = vst.msk [vmem:[%s4950_s4 + $0x3c] sm:$0xf] %vm2356_vm6, %v2916_v1  ;;  %2602 = vst.msk [vmem:[%s4950_s4 + $0x44] sm:$0xf] %vm2356_vm6, %v2917_v22 }
 0x2e6   :  { %2603 = vst.msk [vmem:[%s4950_s4 + $0x4c] sm:$0xf] %vm2356_vm6, %v2918_v16  ;;  %2604 = vst.msk [vmem:[%s4950_s4 + $0x54] sm:$0xf] %vm2356_vm6, %v2919_v44 }
 0x2e7   :  { %2605 = vst.msk [vmem:[%s4950_s4 + $0x5c] sm:$0xf] %vm2356_vm6, %v2920_v34 }
 0x2e8   :  { %2606 = vst.msk [vmem:[%s4950_s4 + $0x64] sm:$0x1] %vm2369_vm7, %v2921_v31 }

// kernel: ganomaly_forward.9
= control target key start
LH: loop header
LB: loop body
LE: loop exit
PB: predicated region body
PF: predicated region fallthrough
CT: control target
= control target key end

     0   :  { %v3157_v0 = vmov 0   ;;  %v3158_v39 = vmov 0.0   ;;  %vm3159_vm0 = vmmov 0   ;;  %vm1074_vm1 = vcmask 523264   ;;  %s4181_s1 = inlined_call_operand.vmem [shape: bf16[576,4], index: 1, kind: input, shape index: {}]   ;;  %s4182_s0 = inlined_call_operand.vmem [shape: bf16[392,576], index: 0, kind: input, shape index: {}]   ;;  %s4183_s2 = inlined_call_operand.vmem [shape: f32[1,4], index: 2, kind: input, shape index: {}]   ;;  %s4184_s3 = inlined_call_operand.vmem [shape: f32[392,4], index: 3, kind: output, shape index: {}]  }
   0x1   :  { %1150 = vmatprep.subr.bf16.mxu1 %v3157_v0  ;;  %1382 = vmatprep.subr.bf16.mxu0 %v3157_v0  ;;  %v2751_v1 = vld [vmem:[%s4181_s1] sm:$0xff]   ;;  %v2753_v3 = vld [vmem:[%s4181_s1 + $0x8] sm:$0xff]   ;;  %v2755_v5 = vld [vmem:[%s4181_s1 + $0x10] sm:$0xff]   ;;  %vm2140_vm2 = vcmask 31744  }
   0x2   :  { %v3188_v2 = vld [vmem:[%s4181_s1 + $0x80] sm:$0xff]   ;;  %1151 = vmatpush1.bf16.msra.mxu1 %v2751_v1  ;;  %v3198_v4 = vld [vmem:[%s4181_s1 + $0x88] sm:$0xff]   ;;  %v3209_v6 = vld [vmem:[%s4181_s1 + $0x90] sm:$0xff]  }
   0x3   :  { %1383 = vmatpush1.bf16.msra.mxu0 %v3188_v2  ;;  %1152 = vmatprep.subr.bf16.mxu1 %v3157_v0  ;;  %v2757_v7 = vld [vmem:[%s4181_s1 + $0x18] sm:$0xff]   ;;  %v2759_v9 = vld [vmem:[%s4181_s1 + $0x20] sm:$0xff]   ;;  %v2761_v11 = vld [vmem:[%s4181_s1 + $0x28] sm:$0xff]  }
   0x4   :  { %1384 = vmatprep.subr.bf16.mxu0 %v3157_v0  ;;  %v3220_v8 = vld [vmem:[%s4181_s1 + $0x98] sm:$0xff]   ;;  %v3231_v10 = vld [vmem:[%s4181_s1 + $0xa0] sm:$0xff]   ;;  %v3242_v12 = vld [vmem:[%s4181_s1 + $0xa8] sm:$0xff]  }
   0x5   :  { %v2763_v13 = vld [vmem:[%s4181_s1 + $0x30] sm:$0xff]   ;;  %v2765_v15 = vld [vmem:[%s4181_s1 + $0x38] sm:$0xff]   ;;  %v2767_v17 = vld [vmem:[%s4181_s1 + $0x40] sm:$0xff]  }
   0x6   :  { %1153 = vmatpush1.bf16.msra.mxu1 %v2753_v3  ;;  %v3253_v14 = vld [vmem:[%s4181_s1 + $0xb0] sm:$0xff]   ;;  %v3264_v16 = vld [vmem:[%s4181_s1 + $0xb8] sm:$0xff]   ;;  %v3275_v18 = vld [vmem:[%s4181_s1 + $0xc0] sm:$0xff]  }
   0x7   :  { %1385 = vmatpush1.bf16.msra.mxu0 %v3198_v4  ;;  %1154 = vmatprep.subr.bf16.mxu1 %v3157_v0  ;;  %v2785_v19 = vld [vmem:[%s4182_s0 + $0x4] ss:$20 sps:$4 sm:$0xff]   ;;  %v2769_v20 = vld [vmem:[%s4181_s1 + $0x48] sm:$0xff]   ;;  %v2771_v23 = vld [vmem:[%s4181_s1 + $0x50] sm:$0xff]  }
   0x8   :  { %1386 = vmatprep.subr.bf16.mxu0 %v3157_v0  ;;  %v2788_v21 = vld [vmem:[%s4182_s0 + $0xc] ss:$20 sps:$4 sm:$0xff]   ;;  %1182 = vmatprep.mubr.bf16.mxu1 %v2785_v19  ;;  %v3303_v24 = vld [vmem:[%s4181_s1 + $0xd0] sm:$0xff]   ;;  %v2773_v25 = vld [vmem:[%s4181_s1 + $0x58] sm:$0xff]  }
   0x9   :  { %v3292_v22 = vld [vmem:[%s4181_s1 + $0xc8] sm:$0xff]   ;;  %1414 = vmatprep.mubr.bf16.mxu0 %v2788_v21  ;;  %v3314_v26 = vld [vmem:[%s4181_s1 + $0xd8] sm:$0xff]   ;;  %v2775_v27 = vld [vmem:[%s4181_s1 + $0x60] sm:$0xff]  }
   0xa   :  { %1155 = vmatpush1.bf16.msra.mxu1 %v2755_v5  ;;  %v3325_v28 = vld [vmem:[%s4181_s1 + $0xe0] sm:$0xff]   ;;  %v2777_v29 = vld [vmem:[%s4181_s1 + $0x68] sm:$0xff]   ;;  %v2779_v31 = vld [vmem:[%s4181_s1 + $0x70] sm:$0xff]  }
   0xb   :  { %1387 = vmatpush1.bf16.msra.mxu0 %v3209_v6  ;;  %1156 = vmatprep.subr.bf16.mxu1 %v3157_v0  ;;  %v3336_v30 = vld [vmem:[%s4181_s1 + $0xe8] sm:$0xff]   ;;  %v3347_v32 = vld [vmem:[%s4181_s1 + $0xf0] sm:$0xff]   ;;  %v2781_v33 = vld [vmem:[%s4181_s1 + $0x78] sm:$0xff]  }
   0xc   :  { %1388 = vmatprep.subr.bf16.mxu0 %v3157_v0  ;;  %v3358_v34 = vld [vmem:[%s4181_s1 + $0xf8] sm:$0xff]   ;;  %v2783_v35 = vld [vmem:[%s4182_s0] ss:$20 sps:$4 sm:$0xff]   ;;  %v2808_v41 = vld [vmem:[%s4181_s1 + $0x108] sm:$0xff]  }
   0xd   :  { %v2786_v36 = vld [vmem:[%s4182_s0 + $0x8] ss:$20 sps:$4 sm:$0xff]   ;;  %v2790_v37 = vld [vmem:[%s4182_s0 + $0x2c] ss:$20 sps:$4 sm:$0xff]   ;;  %v2795_v43 = vld [vmem:[%s4182_s0 + $0x30] ss:$20 sps:$4 sm:$0xff]  }
   0xe   :  { %1157 = vmatpush1.bf16.msra.mxu1 %v2757_v7  ;;  %v2789_v38 = vld [vmem:[%s4181_s1 + $0x100] sm:$0xff]   ;;  %v2792_v40 = vld [vmem:[%s4182_s0 + $0x34] ss:$20 sps:$4 sm:$0xff]   ;;  %v2798_v45 = vld [vmem:[%s4182_s0 + $0x5c] ss:$20 sps:$4 sm:$0xff]  }
   0xf   :  { %1389 = vmatpush1.bf16.msra.mxu0 %v3220_v8  ;;  %1158 = vmatprep.subr.bf16.mxu1 %v3157_v0  ;;  %v2794_v42 = vld [vmem:[%s4182_s0 + $0x28] ss:$20 sps:$4 sm:$0xff]   ;;  %v2827_v46 = vld [vmem:[%s4181_s1 + $0x110] sm:$0xff]   ;;  %v2801_v49 = vld [vmem:[%s4182_s0 + $0x58] ss:$20 sps:$4 sm:$0xff]  }
  0x10   :  { %1390 = vmatprep.subr.bf16.mxu0 %v3157_v0  ;;  %v2796_v44 = vld [vmem:[%s4182_s0 + $0x54] ss:$20 sps:$4 sm:$0xff]   ;;  %v2850_v47 = vld [vmem:[%s4181_s1 + $0x118] sm:$0xff]   ;;  %v2800_v48 = vld [vmem:[%s4182_s0 + $0x50] ss:$20 sps:$4 sm:$0xff]  }
  0x11   :  { %v2802_v50 = vld [vmem:[%s4182_s0 + $0x7c] ss:$20 sps:$4 sm:$0xff]   ;;  %v2804_v51 = vld [vmem:[%s4182_s0 + $0x84] ss:$20 sps:$4 sm:$0xff]   ;;  %v2807_v53 = vld [vmem:[%s4182_s0 + $0x80] ss:$20 sps:$4 sm:$0xff]  }
  0x12   :  { %1159 = vmatpush1.bf16.msra.mxu1 %v2759_v9  ;;  %v2806_v52 = vld [vmem:[%s4182_s0 + $0x78] ss:$20 sps:$4 sm:$0xff]   ;;  %v2813_v56 = vld [vmem:[%s4182_s0 + $0xa0] ss:$20 sps:$4 sm:$0xff]   ;;  %v2814_v57 = vld [vmem:[%s4182_s0 + $0xa8] ss:$20 sps:$4 sm:$0xff]  }
  0x13   :  { %1391 = vmatpush1.bf16.msra.mxu0 %v3231_v10  ;;  %1160 = vmatprep.subr.bf16.mxu1 %v3157_v0  ;;  %v2809_v54 = vld [vmem:[%s4182_s0 + $0xa4] ss:$20 sps:$4 sm:$0xff]   ;;  %v2811_v55 = vld [vmem:[%s4182_s0 + $0xac] ss:$20 sps:$4 sm:$0xff]   ;;  %v2817_v59 = vld [vmem:[%s4182_s0 + $0xd4] ss:$20 sps:$4 sm:$0xff]  }
  0x14   :  { %1392 = vmatprep.subr.bf16.mxu0 %v3157_v0  ;;  %v2815_v58 = vld [vmem:[%s4182_s0 + $0xcc] ss:$20 sps:$4 sm:$0xff]   ;;  %v2819_v60 = vld [vmem:[%s4182_s0 + $0xc8] ss:$20 sps:$4 sm:$0xff]   ;;  %v2820_v61 = vld [vmem:[%s4182_s0 + $0xd0] ss:$20 sps:$4 sm:$0xff]  }
  0x15   :  { %v2821_v62 = vld [vmem:[%s4182_s0 + $0xf4] ss:$20 sps:$4 sm:$0xff]   ;;  %v2823_v63 = vld [vmem:[%s4182_s0 + $0xfc] ss:$20 sps:$4 sm:$0xff]   ;;  %v2832_v5 = vld [vmem:[%s4182_s0 + $0x118] ss:$20 sps:$4 sm:$0xff]  }
  0x16   :  { %1161 = vmatpush1.bf16.msra.mxu1 %v2761_v11  ;;  %v2825_v1 = vld [vmem:[%s4182_s0 + $0xf0] ss:$20 sps:$4 sm:$0xff]   ;;  %v2838_v9 = vld [vmem:[%s4182_s0 + $0x140] ss:$20 sps:$4 sm:$0xff]  }
  0x17   :  { %1393 = vmatpush1.bf16.msra.mxu0 %v3242_v12  ;;  %1162 = vmatprep.subr.bf16.mxu1 %v3157_v0  ;;  %v2828_v3 = vld [vmem:[%s4182_s0 + $0x11c] ss:$20 sps:$4 sm:$0xff]   ;;  %v2834_v7 = vld [vmem:[%s4182_s0 + $0x144] ss:$20 sps:$4 sm:$0xff]   ;;  %v2840_v11 = vld [vmem:[%s4182_s0 + $0x16c] ss:$20 sps:$4 sm:$0xff]  }
  0x18   :  { %1394 = vmatprep.subr.bf16.mxu0 %v3157_v0  ;;  %v2855_v19 = vld [vmem:[%s4182_s0 + $0x1c4] ss:$20 sps:$4 sm:$0xff]   ;;  %v2858_v21 = vld [vmem:[%s4182_s0 + $0x1c0] ss:$20 sps:$4 sm:$0xff]  }
  0x1a   :  { %1163 = vmatpush1.bf16.msra.mxu1 %v2763_v13  ;;  %v2845_v13 = vld [vmem:[%s4182_s0 + $0x170] ss:$20 sps:$4 sm:$0xff]  }
  0x1b   :  { %1395 = vmatpush1.bf16.msra.mxu0 %v3253_v14  ;;  %1164 = vmatprep.subr.bf16.mxu1 %v3157_v0 }
  0x1c   :  { %1396 = vmatprep.subr.bf16.mxu0 %v3157_v0 }
  0x1e   :  { %1165 = vmatpush1.bf16.msra.mxu1 %v2765_v15  ;;  %v2848_v15 = vld [vmem:[%s4182_s0 + $0x19c] ss:$20 sps:$4 sm:$0xff]  }
  0x1f   :  { %1397 = vmatpush1.bf16.msra.mxu0 %v3264_v16  ;;  %1166 = vmatprep.subr.bf16.mxu1 %v3157_v0 }
  0x20   :  { %1398 = vmatprep.subr.bf16.mxu0 %v3157_v0 }
  0x22   :  { %1167 = vmatpush1.bf16.msra.mxu1 %v2767_v17  ;;  %v2852_v17 = vld [vmem:[%s4182_s0 + $0x198] ss:$20 sps:$4 sm:$0xff]  }
  0x23   :  { %1399 = vmatpush1.bf16.msra.mxu0 %v3275_v18  ;;  %1168 = vmatprep.subr.bf16.mxu1 %v3157_v0 }
  0x24   :  { %1400 = vmatprep.subr.bf16.mxu0 %v3157_v0 }
  0x26   :  { %1169 = vmatpush1.bf16.msra.mxu1 %v2769_v20  ;;  %v2857_v20 = vld [vmem:[%s4182_s0 + $0x1b8] ss:$20 sps:$4 sm:$0xff]  }
  0x27   :  { %1401 = vmatpush1.bf16.msra.mxu0 %v3292_v22  ;;  %1170 = vmatprep.subr.bf16.mxu1 %v3157_v0 }
  0x28   :  { %1402 = vmatprep.subr.bf16.mxu0 %v3157_v0 }
  0x2a   :  { %1171 = vmatpush1.bf16.msra.mxu1 %v2771_v23  ;;  %v2861_v23 = vld [vmem:[%s4182_s0 + $0x1ec] ss:$20 sps:$4 sm:$0xff]  }
  0x2b   :  { %1403 = vmatpush1.bf16.msra.mxu0 %v3303_v24  ;;  %1172 = vmatprep.subr.bf16.mxu1 %v3157_v0 }
  0x2c   :  { %1404 = vmatprep.subr.bf16.mxu0 %v3157_v0 }
  0x2e   :  { %1173 = vmatpush1.bf16.msra.mxu1 %v2773_v25  ;;  %v2864_v25 = vld [vmem:[%s4182_s0 + $0x1e8] ss:$20 sps:$4 sm:$0xff]  }
  0x2f   :  { %1405 = vmatpush1.bf16.msra.mxu0 %v3314_v26  ;;  %1174 = vmatprep.subr.bf16.mxu1 %v3157_v0 }
  0x30   :  { %1406 = vmatprep.subr.bf16.mxu0 %v3157_v0 }
  0x32   :  { %1175 = vmatpush1.bf16.msra.mxu1 %v2775_v27  ;;  %v2867_v27 = vld [vmem:[%s4182_s0 + $0x208] ss:$20 sps:$4 sm:$0xff]  }
  0x33   :  { %1407 = vmatpush1.bf16.msra.mxu0 %v3325_v28  ;;  %1176 = vmatprep.subr.bf16.mxu1 %v3157_v0 }
  0x34   :  { %1408 = vmatprep.subr.bf16.mxu0 %v3157_v0 }
  0x36   :  { %1177 = vmatpush1.bf16.msra.mxu1 %v2777_v29  ;;  %v2869_v29 = vld [vmem:[%s4182_s0 + $0x234] ss:$20 sps:$4 sm:$0xff]  }
  0x37   :  { %1409 = vmatpush1.bf16.msra.mxu0 %v3336_v30  ;;  %1178 = vmatprep.subr.bf16.mxu1 %v3157_v0 }
  0x38   :  { %1410 = vmatprep.subr.bf16.mxu0 %v3157_v0 }
  0x3a   :  { %1179 = vmatpush1.bf16.msra.mxu1 %v2779_v31  ;;  %v2872_v31 = vld [vmem:[%s4182_s0 + $0x38] ss:$20 sps:$4 sm:$0xff]  }
  0x3b   :  { %1411 = vmatpush1.bf16.msra.mxu0 %v3347_v32  ;;  %1180 = vmatprep.subr.bf16.mxu1 %v3157_v0 }
  0x3c   :  { %1412 = vmatprep.subr.bf16.mxu0 %v3157_v0 }
  0x3e   :  { %1181 = vmatpush1.bf16.msra.mxu1 %v2781_v33  ;;  %v2875_v33 = vld [vmem:[%s4182_s0 + $0x258] ss:$20 sps:$4 sm:$0xff]  }
  0x3f   :  { %1413 = vmatpush1.bf16.msra.mxu0 %v3358_v34  ;;  %2518 = vmatprep.subr.bf16.mxu1 %v3157_v0 }
  0x40   :  { %2410 = vmatprep.subr.bf16.mxu0 %v3158_v39 }
  0x41   :  { %1183 = vmatmul.mubr.bf16.vlgmr.msra.gmra.mrb[0].mxu1 %v2783_v35  ;;  %v2877_v35 = vld [vmem:[%s4182_s0 + $0x284] ss:$20 sps:$4 sm:$0xff]  }
  0x42   :  { %1415 = vmatmul.mubr.bf16.vlgmr.msra.gmra.mrb[0].mxu0 %v2786_v36  ;;  %1190 = vmatprep.mubr.bf16.mxu1 %v2790_v37  ;;  %v2879_v36 = vld [vmem:[%s4182_s0 + $0x280] ss:$20 sps:$4 sm:$0xff]   ;;  %v2880_v37 = vld [vmem:[%s4182_s0 + $0x88] ss:$20 sps:$4 sm:$0xff]  }
  0x43   :  { %2411 = vmatpush3.bf16.msra.mxu0 %v2789_v38  ;;  %2534 = vmatpush1.bf16.msra.mxu1 %v3188_v2  ;;  %v2826_v2 = vld [vmem:[%s4182_s0 + $0xf8] ss:$20 sps:$4 sm:$0xff]  }
  0x44   :  { %1422 = vmatprep.mubr.bf16.mxu0 %v2792_v40  ;;  %2519 = vmatprep.subr.bf16.mxu1 %v3157_v0  ;;  %v2881_v38 = vld [vmem:[%s4182_s0 + $0x2ac] ss:$20 sps:$4 sm:$0xff]   ;;  %v2883_v40 = vld [vmem:[%s4182_s0 + $0x2a8] ss:$20 sps:$4 sm:$0xff]  }
  0x45   :  { %2412 = vmatprep.subr.bf16.mxu0 %v3158_v39 }
  0x47   :  { %2535 = vmatpush1.bf16.msra.mxu1 %v3198_v4  ;;  %2413 = vmatpush3.bf16.msra.mxu0 %v2808_v41  ;;  %v2830_v4 = vld [vmem:[%s4182_s0 + $0x124] ss:$20 sps:$4 sm:$0xff]  }
  0x48   :  { %2520 = vmatprep.subr.bf16.mxu1 %v3157_v0  ;;  %2414 = vmatprep.subr.bf16.mxu0 %v3158_v39  ;;  %v2884_v41 = vld [vmem:[%s4182_s0 + $0xb0] ss:$20 sps:$4 sm:$0xff]  }
  0x49   :  { %1191 = vmatmul.mubr.bf16.gmra.mrb[4].mxu1 %v2794_v42  ;;  %v2885_v42 = vld [vmem:[%s4182_s0 + $0x2d4] ss:$20 sps:$4 sm:$0xff]  }
  0x4a   :  { %1423 = vmatmul.mubr.bf16.gmra.mrb[4].mxu0 %v2795_v43  ;;  %1198 = vmatprep.mubr.bf16.mxu1 %v2796_v44  ;;  %v2887_v43 = vld [vmem:[%s4182_s0 + $0x2d0] ss:$20 sps:$4 sm:$0xff]   ;;  %v2888_v44 = vld [vmem:[%s4182_s0 + $0xd8] ss:$20 sps:$4 sm:$0xff]  }
  0x4b   :  { %1430 = vmatprep.mubr.bf16.mxu0 %v2798_v45  ;;  %2536 = vmatpush1.bf16.msra.mxu1 %v3209_v6  ;;  %v2833_v6 = vld [vmem:[%s4182_s0 + $0x120] ss:$20 sps:$4 sm:$0xff]   ;;  %v2889_v45 = vld [vmem:[%s4182_s0 + $0x2fc] ss:$20 sps:$4 sm:$0xff]  }
  0x4c   :  { %2521 = vmatprep.subr.bf16.mxu1 %v3157_v0  ;;  %2415 = vmatpush3.bf16.msra.mxu0 %v2827_v46  ;;  %v2891_v46 = vld [vmem:[%s4182_s0 + $0x2f8] ss:$20 sps:$4 sm:$0xff]  }
  0x4d   :  { %2416 = vmatprep.subr.bf16.mxu0 %v3158_v39 }
  0x4f   :  { %2537 = vmatpush1.bf16.msra.mxu1 %v3220_v8  ;;  %v2836_v8 = vld [vmem:[%s4182_s0 + $0x14c] ss:$20 sps:$4 sm:$0xff]  }
  0x50   :  { %2522 = vmatprep.subr.bf16.mxu1 %v3157_v0  ;;  %2417 = vmatpush3.bf16.msra.mxu0 %v2850_v47  ;;  %v2892_v47 = vld [vmem:[%s4182_s0 + $0x100] ss:$20 sps:$4 sm:$0xff]  }
  0x51   :  { %1199 = vmatmul.mubr.bf16.gmra.mrb[8].mxu1 %v2800_v48  ;;  %v2893_v48 = vld [vmem:[%s4182_s0 + $0x324] ss:$20 sps:$4 sm:$0xff]  }
  0x52   :  { %1431 = vmatmul.mubr.bf16.gmra.mrb[8].mxu0 %v2801_v49  ;;  %1206 = vmatprep.mubr.bf16.mxu1 %v2802_v50  ;;  %v2895_v49 = vld [vmem:[%s4182_s0 + $0x320] ss:$20 sps:$4 sm:$0xff]   ;;  %v2896_v50 = vld [vmem:[%s4182_s0 + $0x128] ss:$20 sps:$4 sm:$0xff]  }
  0x53   :  { %1438 = vmatprep.mubr.bf16.mxu0 %v2804_v51  ;;  %2538 = vmatpush1.bf16.msra.mxu1 %v3231_v10  ;;  %v2839_v10 = vld [vmem:[%s4182_s0 + $0x148] ss:$20 sps:$4 sm:$0xff]   ;;  %v2897_v51 = vld [vmem:[%s4182_s0 + $0x34c] ss:$20 sps:$4 sm:$0xff]  }
  0x54   :  { %2523 = vmatprep.subr.bf16.mxu1 %v3157_v0 }
  0x57   :  { %2539 = vmatpush1.bf16.msra.mxu1 %v3242_v12  ;;  %v2842_v12 = vld [vmem:[%s4182_s0 + $0x174] ss:$20 sps:$4 sm:$0xff]  }
  0x58   :  { %2524 = vmatprep.subr.bf16.mxu1 %v3157_v0 }
  0x59   :  { %1207 = vmatmul.mubr.bf16.gmra.mrb[12].mxu1 %v2806_v52  ;;  %v2899_v52 = vld [vmem:[%s4182_s0 + $0x348] ss:$20 sps:$4 sm:$0xff]  }
  0x5a   :  { %1439 = vmatmul.mubr.bf16.gmra.mrb[12].mxu0 %v2807_v53  ;;  %1214 = vmatprep.mubr.bf16.mxu1 %v2809_v54  ;;  %v2900_v53 = vld [vmem:[%s4182_s0 + $0x150] ss:$20 sps:$4 sm:$0xff]   ;;  %v2901_v54 = vld [vmem:[%s4182_s0 + $0x374] ss:$20 sps:$4 sm:$0xff]  }
  0x5b   :  { %1446 = vmatprep.mubr.bf16.mxu0 %v2811_v55  ;;  %2540 = vmatpush1.bf16.msra.mxu1 %v3253_v14  ;;  %v2846_v14 = vld [vmem:[%s4182_s0 + $0x194] ss:$20 sps:$4 sm:$0xff]   ;;  %v2903_v55 = vld [vmem:[%s4182_s0 + $0x370] ss:$20 sps:$4 sm:$0xff]  }
  0x5c   :  { %2525 = vmatprep.subr.bf16.mxu1 %v3157_v0 }
  0x5f   :  { %2541 = vmatpush1.bf16.msra.mxu1 %v3264_v16  ;;  %v2851_v16 = vld [vmem:[%s4182_s0 + $0x190] ss:$20 sps:$4 sm:$0xff]  }
  0x60   :  { %2526 = vmatprep.subr.bf16.mxu1 %v3157_v0 }
  0x61   :  { %1215 = vmatmul.mubr.bf16.gmra.mrb[16].mxu1 %v2813_v56  ;;  %v2904_v56 = vld [vmem:[%s4182_s0 + $0x178] ss:$20 sps:$4 sm:$0xff]  }
  0x62   :  { %1447 = vmatmul.mubr.bf16.gmra.mrb[16].mxu0 %v2814_v57  ;;  %1222 = vmatprep.mubr.bf16.mxu1 %v2815_v58  ;;  %v2905_v57 = vld [vmem:[%s4182_s0 + $0x39c] ss:$20 sps:$4 sm:$0xff]   ;;  %v159_v58 = vld [vmem:[%s4182_s0 + $0x3c0] sm:$0xff] }
  0x63   :  { %1454 = vmatprep.mubr.bf16.mxu0 %v2817_v59  ;;  %2542 = vmatpush1.bf16.msra.mxu1 %v3275_v18  ;;  %v2853_v18 = vld [vmem:[%s4182_s0 + $0x1bc] ss:$20 sps:$4 sm:$0xff]   ;;  %v2907_v59 = vld [vmem:[%s4182_s0 + $0x398] ss:$20 sps:$4 sm:$0xff]  }
  0x64   :  { %2527 = vmatprep.subr.bf16.mxu1 %v3157_v0 }
  0x67   :  { %2543 = vmatpush1.bf16.msra.mxu1 %v3292_v22  ;;  %v2859_v22 = vld [vmem:[%s4182_s0 + $0x1e4] ss:$20 sps:$4 sm:$0xff]  }
  0x68   :  { %2528 = vmatprep.subr.bf16.mxu1 %v3157_v0 }
  0x69   :  { %1223 = vmatmul.mubr.bf16.gmra.mrb[20].mxu1 %v2819_v60  ;;  %v2908_v60 = vld [vmem:[%s4182_s0 + $0x1a0] ss:$20 sps:$4 sm:$0xff]  }
  0x6a   :  { %1455 = vmatmul.mubr.bf16.gmra.mrb[20].mxu0 %v2820_v61  ;;  %1230 = vmatprep.mubr.bf16.mxu1 %v2821_v62  ;;  %v2316_v61 = vcombine.high %v159_v58, %v159_v58  ;;  %v2315_v62 = vcombine.low %v159_v58, %v159_v58 }
  0x6b   :  { %1462 = vmatprep.mubr.bf16.mxu0 %v2823_v63  ;;  %2544 = vmatpush1.bf16.msra.mxu1 %v3303_v24  ;;  %v2863_v24 = vld [vmem:[%s4182_s0 + $0x1e0] ss:$20 sps:$4 sm:$0xff]   ;;  %v2911_v63 = vld [vmem:[%s4182_s0 + $0x1c8] ss:$20 sps:$4 sm:$0xff]  }
  0x6c   :  { %2529 = vmatprep.subr.bf16.mxu1 %v3157_v0 }
  0x6f   :  { %2545 = vmatpush1.bf16.msra.mxu1 %v3314_v26  ;;  %v2865_v26 = vld [vmem:[%s4182_s0 + $0x20c] ss:$20 sps:$4 sm:$0xff]  }
  0x70   :  { %2530 = vmatprep.subr.bf16.mxu1 %v3157_v0 }
  0x71   :  { %1231 = vmatmul.mubr.bf16.gmra.mrb[24].mxu1 %v2825_v1  ;;  %v2914_v1 = vld [vmem:[%s4182_s0 + $0x214] ss:$20 sps:$4 sm:$0xff]  }
  0x72   :  { %1463 = vmatmul.mubr.bf16.gmra.mrb[24].mxu0 %v2826_v2  ;;  %1238 = vmatprep.mubr.bf16.mxu1 %v2828_v3  ;;  %v2912_v2 = vld [vmem:[%s4182_s0 + $0x210] ss:$20 sps:$4 sm:$0xff]  }
  0x73   :  { %1470 = vmatprep.mubr.bf16.mxu0 %v2830_v4  ;;  %2546 = vmatpush1.bf16.msra.mxu1 %v3325_v28  ;;  %v2868_v28 = vld [vmem:[%s4182_s0 + $0x10] ss:$20 sps:$4 sm:$0xff]  }
  0x74   :  { %2531 = vmatprep.subr.bf16.mxu1 %v3157_v0  ;;  %v2915_v3 = vld [vmem:[%s4182_s0 + $0x1f0] ss:$20 sps:$4 sm:$0xff]  }
  0x75   :  { %v2916_v4 = vld [vmem:[%s4182_s0 + $0x23c] ss:$20 sps:$4 sm:$0xff]  }
  0x77   :  { %2547 = vmatpush1.bf16.msra.mxu1 %v3336_v30  ;;  %v2871_v30 = vld [vmem:[%s4182_s0 + $0x230] ss:$20 sps:$4 sm:$0xff]  }
  0x78   :  { %2532 = vmatprep.subr.bf16.mxu1 %v3157_v0 }
  0x79   :  { %1239 = vmatmul.mubr.bf16.gmra.mrb[28].mxu1 %v2832_v5  ;;  %v2918_v5 = vld [vmem:[%s4182_s0 + $0x238] ss:$20 sps:$4 sm:$0xff]  }
  0x7a   :  { %1471 = vmatmul.mubr.bf16.gmra.mrb[28].mxu0 %v2833_v6  ;;  %1246 = vmatprep.mubr.bf16.mxu1 %v2834_v7  ;;  %v2919_v6 = vld [vmem:[%s4182_s0 + $0x218] ss:$20 sps:$4 sm:$0xff]  }
  0x7b   :  { %1478 = vmatprep.mubr.bf16.mxu0 %v2836_v8  ;;  %2548 = vmatpush1.bf16.msra.mxu1 %v3347_v32  ;;  %v2873_v32 = vld [vmem:[%s4182_s0 + $0x25c] ss:$20 sps:$4 sm:$0xff]   ;;  %v2920_v7 = vld [vmem:[%s4182_s0 + $0x264] ss:$20 sps:$4 sm:$0xff]  }
  0x7c   :  { %2533 = vmatprep.subr.bf16.mxu1 %v3157_v0  ;;  %v2844_v0 = vld [vmem:[%s4182_s0 + $0x168] ss:$20 sps:$4 sm:$0xff]  }
  0x7f   :  { %2549 = vmatpush1.bf16.msra.mxu1 %v3358_v34  ;;  %v2876_v34 = vld [vmem:[%s4182_s0 + $0x60] ss:$20 sps:$4 sm:$0xff]  }
  0x81   :  { %1247 = vmatmul.mubr.bf16.gmra.mrb[32].mxu1 %v2838_v9 }
  0x82   :  { %1479 = vmatmul.mubr.bf16.gmra.mrb[32].mxu0 %v2839_v10  ;;  %1254 = vmatprep.mubr.bf16.mxu1 %v2840_v11  ;;  %v2922_v10 = vld [vmem:[%s4182_s0 + $0x260] ss:$20 sps:$4 sm:$0xff]  }
  0x83   :  { %1486 = vmatprep.mubr.bf16.mxu0 %v2842_v12  ;;  %v2923_v11 = vld [vmem:[%s4182_s0 + $0x240] ss:$20 sps:$4 sm:$0xff]  }
  0x89   :  { %1255 = vmatmul.mubr.bf16.gmra.mrb[36].mxu1 %v2844_v0  ;;  %v2924_v0 = vld [vmem:[%s4182_s0 + $0x28c] ss:$20 sps:$4 sm:$0xff]  }
  0x8a   :  { %1487 = vmatmul.mubr.bf16.gmra.mrb[36].mxu0 %v2845_v13  ;;  %1262 = vmatprep.mubr.bf16.mxu1 %v2846_v14 }
  0x8b   :  { %1494 = vmatprep.mubr.bf16.mxu0 %v2848_v15 }
  0x91   :  { %1263 = vmatmul.mubr.bf16.gmra.mrb[40].mxu1 %v2851_v16  ;;  %v2926_v16 = vld [vmem:[%s4182_s0 + $0x288] ss:$20 sps:$4 sm:$0xff]  }
  0x92   :  { %1495 = vmatmul.mubr.bf16.gmra.mrb[40].mxu0 %v2852_v17  ;;  %1270 = vmatprep.mubr.bf16.mxu1 %v2853_v18  ;;  %v2927_v17 = vld [vmem:[%s4182_s0 + $0x268] ss:$20 sps:$4 sm:$0xff]  }
  0x93   :  { %1502 = vmatprep.mubr.bf16.mxu0 %v2855_v19  ;;  %v2928_v19 = vld [vmem:[%s4182_s0 + $0x2b4] ss:$20 sps:$4 sm:$0xff]  }
  0x99   :  { %1271 = vmatmul.mubr.bf16.gmra.mrb[44].mxu1 %v2857_v20 }
  0x9a   :  { %1503 = vmatmul.mubr.bf16.gmra.mrb[44].mxu0 %v2858_v21  ;;  %1278 = vmatprep.mubr.bf16.mxu1 %v2859_v22 }
  0x9b   :  { %1510 = vmatprep.mubr.bf16.mxu0 %v2861_v23  ;;  %v2930_v23 = vld [vmem:[%s4182_s0 + $0x2b0] ss:$20 sps:$4 sm:$0xff]  }
  0xa1   :  { %1279 = vmatmul.mubr.bf16.gmra.mrb[48].mxu1 %v2863_v24  ;;  %v2931_v24 = vld [vmem:[%s4182_s0 + $0x290] ss:$20 sps:$4 sm:$0xff]  }
  0xa2   :  { %1511 = vmatmul.mubr.bf16.gmra.mrb[48].mxu0 %v2864_v25  ;;  %1286 = vmatprep.mubr.bf16.mxu1 %v2865_v26  ;;  %v2932_v26 = vld [vmem:[%s4182_s0 + $0x2dc] ss:$20 sps:$4 sm:$0xff]  }
  0xa3   :  { %2418 = vmatprep.mubr.msk.bf16.mxu0 %vm3159_vm0, %v3158_v39 }
  0xa9   :  { %1287 = vmatmul.mubr.bf16.gmra.mrb[52].mxu1 %v2867_v27 }
  0xaa   :  { %2419 = vmatmul.mubr.msk.bf16.vlgmr.msra.gmra.mrb[0].mxu0 %vm1074_vm1, %v2868_v28  ;;  %1294 = vmatprep.mubr.bf16.mxu1 %v2869_v29 }
  0xab   :  { %2422 = vmatprep.mubr.msk.bf16.mxu0 %vm3159_vm0, %v3158_v39 }
  0xb1   :  { %1295 = vmatmul.mubr.bf16.gmra.mrb[56].mxu1 %v2871_v30  ;;  %v2934_v30 = vld [vmem:[%s4182_s0 + $0x2d8] ss:$20 sps:$4 sm:$0xff]  }
  0xb2   :  { %2423 = vmatmul.mubr.msk.bf16.gmra.mrb[4].mxu0 %vm1074_vm1, %v2872_v31  ;;  %1302 = vmatprep.mubr.bf16.mxu1 %v2873_v32  ;;  %v2935_v31 = vld [vmem:[%s4182_s0 + $0x2b8] ss:$20 sps:$4 sm:$0xff]  }
  0xb3   :  { %2426 = vmatprep.mubr.msk.bf16.mxu0 %vm3159_vm0, %v3158_v39 }
  0xb9   :  { %1303 = vmatmul.mubr.bf16.gmra.mrb[60].mxu1 %v2875_v33  ;;  %v2936_v33 = vld [vmem:[%s4182_s0 + $0x304] ss:$20 sps:$4 sm:$0xff]  }
  0xba   :  { %2427 = vmatmul.mubr.msk.bf16.gmra.mrb[8].mxu0 %vm1074_vm1, %v2876_v34  ;;  %1310 = vmatprep.mubr.bf16.mxu1 %v2877_v35 }
  0xbb   :  { %2430 = vmatprep.mubr.msk.bf16.mxu0 %vm3159_vm0, %v3158_v39 }
  0xc1   :  { %1311 = vmatmul.mubr.bf16.gmra.mrb[64].mxu1 %v2879_v36 }
  0xc2   :  { %2431 = vmatmul.mubr.msk.bf16.gmra.mrb[12].mxu0 %vm1074_vm1, %v2880_v37  ;;  %1318 = vmatprep.mubr.bf16.mxu1 %v2881_v38  ;;  %v2938_v37 = vld [vmem:[%s4182_s0 + $0x300] ss:$20 sps:$4 sm:$0xff]  }
  0xc3   :  { %2434 = vmatprep.mubr.msk.bf16.mxu0 %vm3159_vm0, %v3158_v39  ;;  %v2939_v38 = vld [vmem:[%s4182_s0 + $0x2e0] ss:$20 sps:$4 sm:$0xff]  }
  0xc9   :  { %1319 = vmatmul.mubr.bf16.gmra.mrb[68].mxu1 %v2883_v40 }
  0xca   :  { %2435 = vmatmul.mubr.msk.bf16.gmra.mrb[16].mxu0 %vm1074_vm1, %v2884_v41  ;;  %1326 = vmatprep.mubr.bf16.mxu1 %v2885_v42  ;;  %v2940_v41 = vld [vmem:[%s4182_s0 + $0x32c] ss:$20 sps:$4 sm:$0xff]  }
  0xcb   :  { %2438 = vmatprep.mubr.msk.bf16.mxu0 %vm3159_vm0, %v3158_v39 }
  0xd1   :  { %1327 = vmatmul.mubr.bf16.gmra.mrb[72].mxu1 %v2887_v43 }
  0xd2   :  { %2439 = vmatmul.mubr.msk.bf16.gmra.mrb[20].mxu0 %vm1074_vm1, %v2888_v44  ;;  %1334 = vmatprep.mubr.bf16.mxu1 %v2889_v45  ;;  %v2942_v45 = vld [vmem:[%s4182_s0 + $0x328] ss:$20 sps:$4 sm:$0xff]  }
  0xd3   :  { %2442 = vmatprep.mubr.msk.bf16.mxu0 %vm3159_vm0, %v3158_v39 }
  0xd9   :  { %1335 = vmatmul.mubr.bf16.gmra.mrb[76].mxu1 %v2891_v46  ;;  %v2943_v46 = vld [vmem:[%s4182_s0 + $0x308] ss:$20 sps:$4 sm:$0xff]  }
  0xda   :  { %2443 = vmatmul.mubr.msk.bf16.gmra.mrb[24].mxu0 %vm1074_vm1, %v2892_v47  ;;  %1342 = vmatprep.mubr.bf16.mxu1 %v2893_v48  ;;  %v2944_v48 = vld [vmem:[%s4182_s0 + $0x354] ss:$20 sps:$4 sm:$0xff]  }
  0xdb   :  { %2446 = vmatprep.mubr.msk.bf16.mxu0 %vm3159_vm0, %v3158_v39 }
  0xe1   :  { %1343 = vmatmul.mubr.bf16.gmra.mrb[80].mxu1 %v2895_v49 }
  0xe2   :  { %2447 = vmatmul.mubr.msk.bf16.gmra.mrb[28].mxu0 %vm1074_vm1, %v2896_v50  ;;  %1350 = vmatprep.mubr.bf16.mxu1 %v2897_v51 }
  0xe3   :  { %2450 = vmatprep.mubr.msk.bf16.mxu0 %vm3159_vm0, %v3158_v39 }
  0xe9   :  { %1351 = vmatmul.mubr.bf16.gmra.mrb[84].mxu1 %v2899_v52  ;;  %v2946_v52 = vld [vmem:[%s4182_s0 + $0x350] ss:$20 sps:$4 sm:$0xff]  }
  0xea   :  { %2451 = vmatmul.mubr.msk.bf16.gmra.mrb[32].mxu0 %vm1074_vm1, %v2900_v53  ;;  %1358 = vmatprep.mubr.bf16.mxu1 %v2901_v54  ;;  %v2947_v53 = vld [vmem:[%s4182_s0 + $0x330] ss:$20 sps:$4 sm:$0xff]  }
  0xeb   :  { %2454 = vmatprep.mubr.msk.bf16.mxu0 %vm3159_vm0, %v3158_v39 }
  0xf1   :  { %1359 = vmatmul.mubr.bf16.gmra.mrb[88].mxu1 %v2903_v55  ;;  %v2948_v55 = vld [vmem:[%s4182_s0 + $0x37c] ss:$20 sps:$4 sm:$0xff]  }
  0xf2   :  { %2455 = vmatmul.mubr.msk.bf16.gmra.mrb[36].mxu0 %vm1074_vm1, %v2904_v56  ;;  %1366 = vmatprep.mubr.bf16.mxu1 %v2905_v57 }
  0xf3   :  { %2458 = vmatprep.mubr.msk.bf16.mxu0 %vm3159_vm0, %v3158_v39 }
  0xf9   :  { %1367 = vmatmul.mubr.bf16.gmra.mrb[92].mxu1 %v2907_v59  ;;  %v2950_v59 = vld [vmem:[%s4182_s0 + $0x378] ss:$20 sps:$4 sm:$0xff]  }
  0xfa   :  { %2459 = vmatmul.mubr.msk.bf16.gmra.mrb[40].mxu0 %vm1074_vm1, %v2908_v60  ;;  %1374 = vmatprep.mubr.bf16.mxu1 %v2316_v61  ;;  %v2951_v60 = vld [vmem:[%s4182_s0 + $0x358] ss:$20 sps:$4 sm:$0xff]  }
  0xfb   :  { %2462 = vmatprep.mubr.msk.bf16.mxu0 %vm3159_vm0, %v3158_v39 }
 0x101   :  { %1375 = vmatmul.mubr.bf16.gmra.mrb[96].mxu1 %v2315_v62  ;;  %v2952_v62 = vld [vmem:[%s4182_s0 + $0x3a4] ss:$20 sps:$4 sm:$0xff]  }
 0x102   :  { %2463 = vmatmul.mubr.msk.bf16.gmra.mrb[44].mxu0 %vm1074_vm1, %v2911_v63  ;;  %1518 = vmatprep.mubr.bf16.mxu1 %v2914_v1  ;;  %v160_v1 = vld [vmem:[%s4182_s0 + $0x3c8] sm:$0xff] }
 0x103   :  { %2466 = vmatprep.mubr.msk.bf16.mxu0 %vm3159_vm0, %v3158_v39 }
 0x109   :  { %1519 = vmatmul.mubr.bf16.vlgmr.msra.gmra.mrb[52].mxu1 %v2912_v2 }
 0x10a   :  { %2467 = vmatmul.mubr.msk.bf16.gmra.mrb[48].mxu0 %vm1074_vm1, %v2915_v3  ;;  %1526 = vmatprep.mubr.bf16.mxu1 %v2916_v4  ;;  %v2954_v4 = vld [vmem:[%s4182_s0 + $0x3a0] ss:$20 sps:$4 sm:$0xff]  }
 0x10b   :  { %2470 = vmatprep.mubr.msk.bf16.mxu0 %vm3159_vm0, %v3158_v39 }
 0x111   :  { %1527 = vmatmul.mubr.bf16.gmra.mrb[56].mxu1 %v2918_v5  ;;  %v2955_v5 = vld [vmem:[%s4182_s0 + $0x380] ss:$20 sps:$4 sm:$0xff]  }
 0x112   :  { %2471 = vmatmul.mubr.msk.bf16.gmra.mrb[52].mxu0 %vm1074_vm1, %v2919_v6  ;;  %1534 = vmatprep.mubr.bf16.mxu1 %v2920_v7  ;;  %v2318_v7 = vcombine.high %v160_v1, %v160_v1 }
 0x113   :  { %2474 = vmatprep.mubr.msk.bf16.mxu0 %vm3159_vm0, %v3158_v39 }
 0x114   :  { %v3730_v8 = vpop.f32.mrb[0].mxu1 }
 0x115   :  { %v1186_v9 = vpop.f32.mrb[1].mxu1 }
 0x116   :  { %v3738_v12 = vpop.f32.mrb[2].mxu1 }
 0x117   :  { %v1189_v13 = vpop.f32.mrb[3].mxu1 }
 0x118   :  { %v2958_v13 = vld [vmem:[%s4182_s0 + $0x3a8] ss:$20 sps:$4 sm:$0xff]  }
 0x119   :  { %1535 = vmatmul.mubr.bf16.gmra.mrb[60].mxu1 %v2922_v10 }
 0x11a   :  { %2475 = vmatmul.mubr.msk.bf16.gmra.mrb[56].mxu0 %vm1074_vm1, %v2923_v11  ;;  %1542 = vmatprep.mubr.bf16.mxu1 %v2924_v0  ;;  %v2317_v0 = vcombine.low %v160_v1, %v160_v1 }
 0x11b   :  { %2478 = vmatprep.mubr.msk.bf16.mxu0 %vm3159_vm0, %v3158_v39 }
 0x11c   :  { %v3746_v14 = vpop.f32.mrb[4].mxu1 }
 0x11d   :  { %v1194_v15 = vpop.f32.mrb[5].mxu1 }
 0x11e   :  { %v3754_v18 = vpop.f32.mrb[6].mxu1 }
 0x11f   :  { %v1197_v20 = vpop.f32.mrb[7].mxu1 }
 0x120   :  { %v2959_v20 = vld [vmem:[%s4182_s0 + $0x3d0] ss:$0 sps:$4 sm:$0xff]  }
 0x121   :  { %1543 = vmatmul.mubr.bf16.gmra.mrb[64].mxu1 %v2926_v16 }
 0x122   :  { %2479 = vmatmul.mubr.msk.bf16.gmra.mrb[60].mxu0 %vm1074_vm1, %v2927_v17  ;;  %1550 = vmatprep.mubr.bf16.mxu1 %v2928_v19 }
 0x123   :  { %2482 = vmatprep.mubr.msk.bf16.mxu0 %vm3159_vm0, %v3158_v39 }
 0x124   :  { %v3762_v21 = vpop.f32.mrb[8].mxu1 }
 0x125   :  { %v1202_v22 = vpop.f32.mrb[9].mxu1 }
 0x126   :  { %v3770_v25 = vpop.f32.mrb[10].mxu1 }
 0x127   :  { %v1205_v27 = vpop.f32.mrb[11].mxu1 }
 0x129   :  { %1551 = vmatmul.mubr.bf16.gmra.mrb[68].mxu1 %v2930_v23 }
 0x12a   :  { %2483 = vmatmul.mubr.msk.bf16.gmra.mrb[64].mxu0 %vm1074_vm1, %v2931_v24  ;;  %1558 = vmatprep.mubr.bf16.mxu1 %v2932_v26 }
 0x12b   :  { %2486 = vmatprep.mubr.msk.bf16.mxu0 %vm3159_vm0, %v3158_v39 }
 0x12c   :  { %v3778_v28 = vpop.f32.mrb[12].mxu1 }
 0x12d   :  { %v1210_v29 = vpop.f32.mrb[13].mxu1 }
 0x12e   :  { %v3786_v32 = vpop.f32.mrb[14].mxu1 }
 0x12f   :  { %v1213_v34 = vpop.f32.mrb[15].mxu1 }
 0x130   :  { %v3903_v34 = vld [vmem:[%s4183_s2] ss:$0 sm:$0xff] }
 0x131   :  { %1559 = vmatmul.mubr.bf16.gmra.mrb[72].mxu1 %v2934_v30 }
 0x132   :  { %2487 = vmatmul.mubr.msk.bf16.gmra.mrb[68].mxu0 %vm1074_vm1, %v2935_v31  ;;  %1566 = vmatprep.mubr.bf16.mxu1 %v2936_v33 }
 0x133   :  { %2490 = vmatprep.mubr.msk.bf16.mxu0 %vm3159_vm0, %v3158_v39 }
 0x134   :  { %v3794_v35 = vpop.f32.mrb[16].mxu1 }
 0x135   :  { %v1218_v36 = vpop.f32.mrb[17].mxu1 }
 0x136   :  { %v3802_v40 = vpop.f32.mrb[18].mxu1  ;;  %v1185_v36 = vadd.f32 %v3903_v34, %v3730_v8  ;;  %v1196_v8 = vadd.f32 %v3903_v34, %v3754_v18 }
 0x137   :  { %v1221_v42 = vpop.f32.mrb[19].mxu1 }
 0x139   :  { %1567 = vmatmul.mubr.bf16.gmra.mrb[76].mxu1 %v2938_v37 }
 0x13a   :  { %2491 = vmatmul.mubr.msk.bf16.gmra.mrb[72].mxu0 %vm1074_vm1, %v2939_v38  ;;  %1574 = vmatprep.mubr.bf16.mxu1 %v2940_v41  ;;  %v1188_v38 = vadd.f32 %v3903_v34, %v3738_v12 }
 0x13b   :  { %2494 = vmatprep.mubr.msk.bf16.mxu0 %vm3159_vm0, %v3158_v39 }
 0x13c   :  { %v3810_v43 = vpop.f32.mrb[20].mxu1 }
 0x13d   :  { %v1226_v44 = vpop.f32.mrb[21].mxu1 }
 0x13e   :  { %v3818_v47 = vpop.f32.mrb[22].mxu1 }
 0x13f   :  { %v1229_v49 = vpop.f32.mrb[23].mxu1 }
 0x141   :  { %1575 = vmatmul.mubr.bf16.gmra.mrb[80].mxu1 %v2942_v45 }
 0x142   :  { %2495 = vmatmul.mubr.msk.bf16.gmra.mrb[76].mxu0 %vm1074_vm1, %v2943_v46  ;;  %1582 = vmatprep.mubr.bf16.mxu1 %v2944_v48 }
 0x143   :  { %2498 = vmatprep.mubr.msk.bf16.mxu0 %vm3159_vm0, %v3158_v39 }
 0x144   :  { %v3826_v50 = vpop.f32.mrb[24].mxu1 }
 0x145   :  { %v1234_v51 = vpop.f32.mrb[25].mxu1 }
 0x146   :  { %v3834_v54 = vpop.f32.mrb[26].mxu1 }
 0x147   :  { %v1237_v56 = vpop.f32.mrb[27].mxu1 }
 0x149   :  { %1583 = vmatmul.mubr.bf16.gmra.mrb[84].mxu1 %v2946_v52  ;;  %v1193_v52 = vadd.f32 %v3903_v34, %v3746_v14 }
 0x14a   :  { %2499 = vmatmul.mubr.msk.bf16.gmra.mrb[80].mxu0 %vm1074_vm1, %v2947_v53  ;;  %1590 = vmatprep.mubr.bf16.mxu1 %v2948_v55 }
 0x14b   :  { %2502 = vmatprep.mubr.msk.bf16.mxu0 %vm3159_vm0, %v3158_v39 }
 0x14c   :  { %v3842_v57 = vpop.f32.mrb[28].mxu1 }
 0x14d   :  { %v1242_v58 = vpop.f32.mrb[29].mxu1 }
 0x14e   :  { %v3850_v61 = vpop.f32.mrb[30].mxu1 }
 0x14f   :  { %v1245_v63 = vpop.f32.mrb[31].mxu1 }
 0x151   :  { %1591 = vmatmul.mubr.bf16.gmra.mrb[88].mxu1 %v2950_v59 }
 0x152   :  { %2503 = vmatmul.mubr.msk.bf16.gmra.mrb[84].mxu0 %vm1074_vm1, %v2951_v60  ;;  %1598 = vmatprep.mubr.bf16.mxu1 %v2952_v62 }
 0x153   :  { %2506 = vmatprep.mubr.msk.bf16.mxu0 %vm3159_vm0, %v3158_v39 }
 0x154   :  { %v3861_v2 = vpop.f32.mrb[32].mxu1 }
 0x155   :  { %v1250_v3 = vpop.f32.mrb[33].mxu1 }
 0x156   :  { %v3869_v6 = vpop.f32.mrb[34].mxu1  ;;  %v1201_v3 = vadd.f32 %v3903_v34, %v3762_v21 }
 0x157   :  { %v1253_v9 = vpop.f32.mrb[35].mxu1 }
 0x159   :  { %1599 = vmatmul.mubr.bf16.gmra.mrb[92].mxu1 %v2954_v4 }
 0x15a   :  { %2507 = vmatmul.mubr.msk.bf16.gmra.mrb[88].mxu0 %vm1074_vm1, %v2955_v5  ;;  %1606 = vmatprep.mubr.bf16.mxu1 %v2318_v7  ;;  %v1204_v7 = vadd.f32 %v3903_v34, %v3770_v25 }
 0x15b   :  { %2510 = vmatprep.mubr.msk.bf16.mxu0 %vm3159_vm0, %v3158_v39 }
 0x15c   :  { %v3874_v10 = vpop.f32.mrb[36].mxu1 }
 0x15d   :  { %v1258_v11 = vpop.f32.mrb[37].mxu1 }
 0x15e   :  { %v3879_v15 = vpop.f32.mrb[38].mxu1 }
 0x15f   :  { %v1261_v16 = vpop.f32.mrb[39].mxu1 }
 0x161   :  { %1607 = vmatmul.mubr.bf16.gmra.mrb[96].mxu1 %v2317_v0 }
 0x162   :  { %2511 = vmatmul.mubr.msk.bf16.gmra.mrb[92].mxu0 %vm1074_vm1, %v2958_v13 }
 0x163   :  { %2514 = vmatprep.mubr.msk.bf16.mxu0 %vm3159_vm0, %v3158_v39 }
 0x164   :  { %v3884_v17 = vpop.f32.mrb[40].mxu1 }
 0x165   :  { %v1266_v19 = vpop.f32.mrb[41].mxu1 }
 0x166   :  { %v3889_v22 = vpop.f32.mrb[42].mxu1 }
 0x167   :  { %v1269_v23 = vpop.f32.mrb[43].mxu1 }
 0x16a   :  { %2515 = vmatmul.mubr.msk.bf16.gmra.mrb[96].mxu0 %vm1074_vm1, %v2959_v20 }
 0x16c   :  { %v3892_v24 = vpop.f32.mrb[44].mxu1 }
 0x16d   :  { %v1274_v26 = vpop.f32.mrb[45].mxu1 }
 0x16e   :  { %v3894_v27 = vpop.f32.mrb[46].mxu1 }
 0x16f   :  { %v1277_v29 = vpop.f32.mrb[47].mxu1 }
 0x170   :  { %v1209_v29 = vadd.f32 %v3903_v34, %v3778_v28 }
 0x174   :  { %v3896_v30 = vpop.f32.mrb[48].mxu1 }
 0x175   :  { %v1282_v39 = vpop.f32.mrb[49].mxu1 }
 0x176   :  { %v3898_v31 = vpop.f32.mrb[50].mxu1 }
 0x177   :  { %v1285_v33 = vpop.f32.mrb[51].mxu1 }
 0x17d   :  { %v1648_v37 = vpop.f32.mrb[0].mxu0 }
 0x17e   :  { %v2551_v41 = vadd.f32 %v1648_v37, %v1185_v36  ;;  %v2420_v42 = vpop.f32.mrb[1].mxu0  ;;  %v1212_v36 = vadd.f32 %v3903_v34, %v3786_v32 }
 0x17f   :  { %v1651_v44 = vpop.f32.mrb[2].mxu0 }
 0x180   :  { %v1846_v45 = vsub.f32 0.0, %v2551_v41  ;;  %v2553_v46 = vadd.f32 %v1651_v44, %v1188_v38  ;;  %v2421_v48 = vpop.f32.mrb[3].mxu0 }
 0x182   :  { %v1895_v49 = vmul.f32 1.442695, %v1846_v45  ;;  %v1847_v51 = vsub.f32 0.0, %v2553_v46 }
 0x184   :  { %2960 = vpow2.f32 %v1895_v49  ;;  %v1897_v53 = vmul.f32 1.442695, %v1847_v51 }
 0x185   :  { %v1656_v55 = vpop.f32.mrb[4].mxu0 }
 0x186   :  { %2962 = vpow2.f32 %v1897_v53  ;;  %v2555_v56 = vadd.f32 %v1656_v55, %v1193_v52  ;;  %v2424_v12 = vpop.f32.mrb[5].mxu0  ;;  %v1217_v53 = vadd.f32 %v3903_v34, %v3794_v35 }
 0x187   :  { %v1659_v58 = vpop.f32.mrb[6].mxu0  ;;  %v1220_v12 = vadd.f32 %v3903_v34, %v3802_v40  ;;  %v1225_v40 = vadd.f32 %v3903_v34, %v3810_v43 }
 0x188   :  { %v1848_v59 = vsub.f32 0.0, %v2555_v56  ;;  %v2557_v60 = vadd.f32 %v1659_v58, %v1196_v8  ;;  %v2425_v62 = vpop.f32.mrb[7].mxu0 }
 0x18a   :  { %v1899_v63 = vmul.f32 1.442695, %v1848_v59  ;;  %v1849_v1 = vsub.f32 0.0, %v2557_v60 }
 0x18c   :  { %2964 = vpow2.f32 %v1899_v63  ;;  %v1901_v14 = vmul.f32 1.442695, %v1849_v1 }
 0x18d   :  { %v1664_v4 = vpop.f32.mrb[8].mxu0 }
 0x18e   :  { %v2961_v5 = vpop.eup %2960  ;;  %2966 = vpow2.f32 %v1901_v14  ;;  %v2559_v18 = vadd.f32 %v1664_v4, %v1201_v3  ;;  %v2428_v9 = vpop.f32.mrb[9].mxu0 }
 0x18f   :  { %v1993_v11 = vadd.f32 1.0, %v2961_v5  ;;  %v1667_v0 = vpop.f32.mrb[10].mxu0 }
 0x190   :  { %v2963_v13 = vpop.eup %2962  ;;  %v1850_v16 = vsub.f32 0.0, %v2559_v18  ;;  %v2561_v19 = vadd.f32 %v1667_v0, %v1204_v7  ;;  %v2429_v20 = vpop.f32.mrb[11].mxu0 }
 0x191   :  { %2968 = vrcp.f32 %v1993_v11  ;;  %v1994_v23 = vadd.f32 1.0, %v2963_v13  ;;  %v1228_v13 = vadd.f32 %v3903_v34, %v3818_v47  ;;  %v1233_v47 = vadd.f32 %v3903_v34, %v3826_v50 }
 0x192   :  { %v1903_v26 = vmul.f32 1.442695, %v1850_v16  ;;  %v1851_v21 = vsub.f32 0.0, %v2561_v19 }
 0x193   :  { %2970 = vrcp.f32 %v1994_v23 }
 0x194   :  { %2972 = vpow2.f32 %v1903_v26  ;;  %v1905_v39 = vmul.f32 1.442695, %v1851_v21 }
 0x195   :  { %v1672_v25 = vpop.f32.mrb[12].mxu0 }
 0x196   :  { %v2965_v33 = vpop.eup %2964  ;;  %2974 = vpow2.f32 %v1905_v39  ;;  %v2563_v37 = vadd.f32 %v1672_v25, %v1209_v29  ;;  %v2432_v38 = vpop.f32.mrb[13].mxu0 }
 0x197   :  { %v1995_v41 = vadd.f32 1.0, %v2965_v33  ;;  %v1675_v42 = vpop.f32.mrb[14].mxu0 }
 0x198   :  { %v2967_v44 = vpop.eup %2966  ;;  %v1852_v45 = vsub.f32 0.0, %v2563_v37  ;;  %v2565_v46 = vadd.f32 %v1675_v42, %v1212_v36  ;;  %v2433_v48 = vpop.f32.mrb[15].mxu0 }
 0x199   :  { %2976 = vrcp.f32 %v1995_v41  ;;  %v1996_v49 = vadd.f32 1.0, %v2967_v44  ;;  %v1236_v44 = vadd.f32 %v3903_v34, %v3834_v54  ;;  %v1241_v54 = vadd.f32 %v3903_v34, %v3842_v57 }
 0x19a   :  { %v1907_v28 = vmul.f32 1.442695, %v1852_v45  ;;  %v1853_v51 = vsub.f32 0.0, %v2565_v46 }
 0x19b   :  { %v2969_v52 = vpop.eup %2968  ;;  %2978 = vrcp.f32 %v1996_v49 }
 0x19c   :  { %2141 = vst.msk [vmem:[%s4184_s3] sm:$0xff] %vm2140_vm2, %v2969_v52  ;;  %2980 = vpow2.f32 %v1907_v28  ;;  %v1909_v32 = vmul.f32 1.442695, %v1853_v51 }
 0x19d   :  { %v2971_v55 = vpop.eup %2970  ;;  %v1680_v8 = vpop.f32.mrb[16].mxu0 }
 0x19e   :  { %v2973_v56 = vpop.eup %2972  ;;  %2142 = vst.msk [vmem:[%s4184_s3 + $0x8] sm:$0xff] %vm2140_vm2, %v2971_v55  ;;  %2982 = vpow2.f32 %v1909_v32  ;;  %v2567_v35 = vadd.f32 %v1680_v8, %v1217_v53  ;;  %v2436_v58 = vpop.f32.mrb[17].mxu0 }
 0x19f   :  { %v1997_v59 = vadd.f32 1.0, %v2973_v56  ;;  %v1683_v60 = vpop.f32.mrb[18].mxu0 }
 0x1a0   :  { %v2975_v62 = vpop.eup %2974  ;;  %v1854_v63 = vsub.f32 0.0, %v2567_v35  ;;  %v2569_v1 = vadd.f32 %v1683_v60, %v1220_v12  ;;  %v2437_v3 = vpop.f32.mrb[19].mxu0 }
 0x1a1   :  { %2984 = vrcp.f32 %v1997_v59  ;;  %v1998_v14 = vadd.f32 1.0, %v2975_v62  ;;  %v1244_v59 = vadd.f32 %v3903_v34, %v3850_v61  ;;  %v1249_v61 = vadd.f32 %v3903_v34, %v3861_v2 }
 0x1a2   :  { %v1911_v4 = vmul.f32 1.442695, %v1854_v63  ;;  %v1855_v5 = vsub.f32 0.0, %v2569_v1 }
 0x1a3   :  { %v2977_v7 = vpop.eup %2976  ;;  %2986 = vrcp.f32 %v1998_v14 }
 0x1a4   :  { %2143 = vst.msk [vmem:[%s4184_s3 + $0x10] sm:$0xff] %vm2140_vm2, %v2977_v7  ;;  %2988 = vpow2.f32 %v1911_v4  ;;  %v1913_v18 = vmul.f32 1.442695, %v1855_v5 }
 0x1a5   :  { %v2979_v9 = vpop.eup %2978  ;;  %v1688_v11 = vpop.f32.mrb[20].mxu0 }
 0x1a6   :  { %v2981_v0 = vpop.eup %2980  ;;  %2144 = vst.msk [vmem:[%s4184_s3 + $0x18] sm:$0xff] %vm2140_vm2, %v2979_v9  ;;  %2990 = vpow2.f32 %v1913_v18  ;;  %v2571_v43 = vadd.f32 %v1688_v11, %v1225_v40  ;;  %v2440_v16 = vpop.f32.mrb[21].mxu0 }
 0x1a7   :  { %v1999_v19 = vadd.f32 1.0, %v2981_v0  ;;  %v1691_v20 = vpop.f32.mrb[22].mxu0 }
 0x1a8   :  { %v2983_v23 = vpop.eup %2982  ;;  %v1856_v26 = vsub.f32 0.0, %v2571_v43  ;;  %v2573_v21 = vadd.f32 %v1691_v20, %v1228_v13  ;;  %v2441_v29 = vpop.f32.mrb[23].mxu0  ;;  %v1252_v43 = vadd.f32 %v3903_v34, %v3869_v6  ;;  %v1257_v6 = vadd.f32 %v3903_v34, %v3874_v10 }
 0x1a9   :  { %2992 = vrcp.f32 %v1999_v19  ;;  %v2000_v39 = vadd.f32 1.0, %v2983_v23 }
 0x1aa   :  { %v1915_v25 = vmul.f32 1.442695, %v1856_v26  ;;  %v1857_v33 = vsub.f32 0.0, %v2573_v21 }
 0x1ab   :  { %v2985_v36 = vpop.eup %2984  ;;  %2994 = vrcp.f32 %v2000_v39 }
 0x1ac   :  { %2145 = vst.msk [vmem:[%s4184_s3 + $0x20] sm:$0xff] %vm2140_vm2, %v2985_v36  ;;  %2996 = vpow2.f32 %v1915_v25  ;;  %v1917_v37 = vmul.f32 1.442695, %v1857_v33 }
 0x1ad   :  { %v2987_v38 = vpop.eup %2986  ;;  %v1696_v41 = vpop.f32.mrb[24].mxu0 }
 0x1ae   :  { %v2989_v42 = vpop.eup %2988  ;;  %2146 = vst.msk [vmem:[%s4184_s3 + $0x28] sm:$0xff] %vm2140_vm2, %v2987_v38  ;;  %2998 = vpow2.f32 %v1917_v37  ;;  %v2575_v50 = vadd.f32 %v1696_v41, %v1233_v47  ;;  %v2444_v45 = vpop.f32.mrb[25].mxu0 }
 0x1af   :  { %v2001_v46 = vadd.f32 1.0, %v2989_v42  ;;  %v1699_v48 = vpop.f32.mrb[26].mxu0  ;;  %v1260_v42 = vadd.f32 %v3903_v34, %v3879_v15  ;;  %v1265_v15 = vadd.f32 %v3903_v34, %v3884_v17 }
 0x1b0   :  { %v2991_v49 = vpop.eup %2990  ;;  %v1858_v28 = vsub.f32 0.0, %v2575_v50  ;;  %v2577_v51 = vadd.f32 %v1699_v48, %v1236_v44  ;;  %v2445_v52 = vpop.f32.mrb[27].mxu0 }
 0x1b1   :  { %3000 = vrcp.f32 %v2001_v46  ;;  %v2002_v53 = vadd.f32 1.0, %v2991_v49 }
 0x1b2   :  { %v1919_v32 = vmul.f32 1.442695, %v1858_v28  ;;  %v1859_v55 = vsub.f32 0.0, %v2577_v51 }
 0x1b3   :  { %v2993_v8 = vpop.eup %2992  ;;  %3002 = vrcp.f32 %v2002_v53 }
 0x1b4   :  { %2147 = vst.msk [vmem:[%s4184_s3 + $0x30] sm:$0xff] %vm2140_vm2, %v2993_v8  ;;  %3004 = vpow2.f32 %v1919_v32  ;;  %v1921_v56 = vmul.f32 1.442695, %v1859_v55 }
 0x1b5   :  { %v2995_v12 = vpop.eup %2994  ;;  %v1704_v35 = vpop.f32.mrb[28].mxu0 }
 0x1b6   :  { %v2997_v58 = vpop.eup %2996  ;;  %2148 = vst.msk [vmem:[%s4184_s3 + $0x38] sm:$0xff] %vm2140_vm2, %v2995_v12  ;;  %3006 = vpow2.f32 %v1921_v56  ;;  %v2579_v57 = vadd.f32 %v1704_v35, %v1241_v54  ;;  %v2448_v60 = vpop.f32.mrb[29].mxu0  ;;  %v1268_v12 = vadd.f32 %v3903_v34, %v3889_v22  ;;  %v1273_v22 = vadd.f32 %v3903_v34, %v3892_v24 }
 0x1b7   :  { %v2003_v62 = vadd.f32 1.0, %v2997_v58  ;;  %v1707_v63 = vpop.f32.mrb[30].mxu0 }
 0x1b8   :  { %v2999_v1 = vpop.eup %2998  ;;  %v1860_v3 = vsub.f32 0.0, %v2579_v57  ;;  %v2581_v14 = vadd.f32 %v1707_v63, %v1244_v59  ;;  %v2449_v4 = vpop.f32.mrb[31].mxu0 }
 0x1b9   :  { %3008 = vrcp.f32 %v2003_v62  ;;  %v2004_v5 = vadd.f32 1.0, %v2999_v1 }
 0x1ba   :  { %v1923_v7 = vmul.f32 1.442695, %v1860_v3  ;;  %v1861_v40 = vsub.f32 0.0, %v2581_v14 }
 0x1bb   :  { %v3001_v18 = vpop.eup %3000  ;;  %3010 = vrcp.f32 %v2004_v5 }
 0x1bc   :  { %2149 = vst.msk [vmem:[%s4184_s3 + $0x40] sm:$0xff] %vm2140_vm2, %v3001_v18  ;;  %3012 = vpow2.f32 %v1923_v7  ;;  %v1925_v9 = vmul.f32 1.442695, %v1861_v40 }
 0x1bd   :  { %v3003_v11 = vpop.eup %3002  ;;  %v1712_v0 = vpop.f32.mrb[32].mxu0 }
 0x1be   :  { %v3005_v13 = vpop.eup %3004  ;;  %2150 = vst.msk [vmem:[%s4184_s3 + $0x48] sm:$0xff] %vm2140_vm2, %v3003_v11  ;;  %3014 = vpow2.f32 %v1925_v9  ;;  %v2583_v2 = vadd.f32 %v1712_v0, %v1249_v61  ;;  %v2452_v16 = vpop.f32.mrb[33].mxu0  ;;  %v1276_v61 = vadd.f32 %v3903_v34, %v3894_v27  ;;  %v1281_v27 = vadd.f32 %v3903_v34, %v3896_v30 }
 0x1bf   :  { %v2005_v19 = vadd.f32 1.0, %v3005_v13  ;;  %v1715_v20 = vpop.f32.mrb[34].mxu0 }
 0x1c0   :  { %v3007_v23 = vpop.eup %3006  ;;  %v1862_v26 = vsub.f32 0.0, %v2583_v2  ;;  %v2585_v21 = vadd.f32 %v1715_v20, %v1252_v43  ;;  %v2453_v29 = vpop.f32.mrb[35].mxu0 }
 0x1c1   :  { %3016 = vrcp.f32 %v2005_v19  ;;  %v2006_v39 = vadd.f32 1.0, %v3007_v23 }
 0x1c2   :  { %v1927_v25 = vmul.f32 1.442695, %v1862_v26  ;;  %v1863_v33 = vsub.f32 0.0, %v2585_v21 }
 0x1c3   :  { %v3009_v36 = vpop.eup %3008  ;;  %3018 = vrcp.f32 %v2006_v39 }
 0x1c4   :  { %2151 = vst.msk [vmem:[%s4184_s3 + $0x50] sm:$0xff] %vm2140_vm2, %v3009_v36  ;;  %3020 = vpow2.f32 %v1927_v25  ;;  %v1929_v47 = vmul.f32 1.442695, %v1863_v33 }
 0x1c5   :  { %v3011_v37 = vpop.eup %3010  ;;  %v1720_v38 = vpop.f32.mrb[36].mxu0 }
 0x1c6   :  { %v3013_v41 = vpop.eup %3012  ;;  %2152 = vst.msk [vmem:[%s4184_s3 + $0x58] sm:$0xff] %vm2140_vm2, %v3011_v37  ;;  %3022 = vpow2.f32 %v1929_v47  ;;  %v2587_v10 = vadd.f32 %v1720_v38, %v1257_v6  ;;  %v2456_v44 = vpop.f32.mrb[37].mxu0  ;;  %v1284_v6 = vadd.f32 %v3903_v34, %v3898_v31 }
 0x1c7   :  { %v2007_v50 = vadd.f32 1.0, %v3013_v41  ;;  %v1723_v45 = vpop.f32.mrb[38].mxu0 }
 0x1c8   :  { %v3015_v46 = vpop.eup %3014  ;;  %v1864_v48 = vsub.f32 0.0, %v2587_v10  ;;  %v2589_v49 = vadd.f32 %v1723_v45, %v1260_v42  ;;  %v2457_v28 = vpop.f32.mrb[39].mxu0 }
 0x1c9   :  { %3024 = vrcp.f32 %v2007_v50  ;;  %v2008_v51 = vadd.f32 1.0, %v3015_v46 }
 0x1ca   :  { %v1931_v52 = vmul.f32 1.442695, %v1864_v48  ;;  %v1865_v53 = vsub.f32 0.0, %v2589_v49 }
 0x1cb   :  { %v3017_v32 = vpop.eup %3016  ;;  %3026 = vrcp.f32 %v2008_v51 }
 0x1cc   :  { %2153 = vst.msk [vmem:[%s4184_s3 + $0x60] sm:$0xff] %vm2140_vm2, %v3017_v32  ;;  %3028 = vpow2.f32 %v1931_v52  ;;  %v1933_v55 = vmul.f32 1.442695, %v1865_v53 }
 0x1cd   :  { %v3019_v8 = vpop.eup %3018  ;;  %v1728_v54 = vpop.f32.mrb[40].mxu0 }
 0x1ce   :  { %v3021_v56 = vpop.eup %3020  ;;  %2154 = vst.msk [vmem:[%s4184_s3 + $0x68] sm:$0xff] %vm2140_vm2, %v3019_v8  ;;  %3030 = vpow2.f32 %v1933_v55  ;;  %v2591_v17 = vadd.f32 %v1728_v54, %v1265_v15  ;;  %v2460_v35 = vpop.f32.mrb[41].mxu0 }
 0x1cf   :  { %v2009_v58 = vadd.f32 1.0, %v3021_v56  ;;  %v1731_v59 = vpop.f32.mrb[42].mxu0 }
 0x1d0   :  { %v3023_v57 = vpop.eup %3022  ;;  %v1866_v60 = vsub.f32 0.0, %v2591_v17  ;;  %v2593_v62 = vadd.f32 %v1731_v59, %v1268_v12  ;;  %v2461_v63 = vpop.f32.mrb[43].mxu0 }
 0x1d1   :  { %3032 = vrcp.f32 %v2009_v58  ;;  %v2010_v1 = vadd.f32 1.0, %v3023_v57 }
 0x1d2   :  { %v1935_v3 = vmul.f32 1.442695, %v1866_v60  ;;  %v1867_v14 = vsub.f32 0.0, %v2593_v62 }
 0x1d3   :  { %v3025_v4 = vpop.eup %3024  ;;  %3034 = vrcp.f32 %v2010_v1 }
 0x1d4   :  { %2155 = vst.msk [vmem:[%s4184_s3 + $0x70] sm:$0xff] %vm2140_vm2, %v3025_v4  ;;  %3036 = vpow2.f32 %v1935_v3  ;;  %v1937_v5 = vmul.f32 1.442695, %v1867_v14 }
 0x1d5   :  { %v3027_v7 = vpop.eup %3026  ;;  %v1736_v40 = vpop.f32.mrb[44].mxu0 }
 0x1d6   :  { %v3029_v18 = vpop.eup %3028  ;;  %2156 = vst.msk [vmem:[%s4184_s3 + $0x78] sm:$0xff] %vm2140_vm2, %v3027_v7  ;;  %3038 = vpow2.f32 %v1937_v5  ;;  %v2595_v24 = vadd.f32 %v1736_v40, %v1273_v22  ;;  %v2464_v9 = vpop.f32.mrb[45].mxu0 }
 0x1d7   :  { %v2011_v11 = vadd.f32 1.0, %v3029_v18  ;;  %v1739_v0 = vpop.f32.mrb[46].mxu0 }
 0x1d8   :  { %v3031_v13 = vpop.eup %3030  ;;  %v1868_v43 = vsub.f32 0.0, %v2595_v24  ;;  %v2597_v2 = vadd.f32 %v1739_v0, %v1276_v61  ;;  %v2465_v16 = vpop.f32.mrb[47].mxu0 }
 0x1d9   :  { %3040 = vrcp.f32 %v2011_v11  ;;  %v2012_v19 = vadd.f32 1.0, %v3031_v13 }
 0x1da   :  { %v1939_v20 = vmul.f32 1.442695, %v1868_v43  ;;  %v1869_v23 = vsub.f32 0.0, %v2597_v2 }
 0x1db   :  { %v3033_v26 = vpop.eup %3032  ;;  %3042 = vrcp.f32 %v2012_v19 }
 0x1dc   :  { %2157 = vst.msk [vmem:[%s4184_s3 + $0x80] sm:$0xff] %vm2140_vm2, %v3033_v26  ;;  %3044 = vpow2.f32 %v1939_v20  ;;  %v1941_v21 = vmul.f32 1.442695, %v1869_v23  ;;  %v1520_v29 = vpop.f32.mrb[52].mxu1 }
 0x1dd   :  { %v3035_v39 = vpop.eup %3034  ;;  %v1744_v25 = vpop.f32.mrb[48].mxu0  ;;  %v2602_v28 = vadd.f32 %v3903_v34, %v1520_v29 }
 0x1de   :  { %v1522_v33 = vpop.f32.mrb[53].mxu1  ;;  %v3037_v36 = vpop.eup %3036  ;;  %2158 = vst.msk [vmem:[%s4184_s3 + $0x88] sm:$0xff] %vm2140_vm2, %v3035_v39  ;;  %3046 = vpow2.f32 %v1941_v21  ;;  %v2599_v30 = vadd.f32 %v1744_v25, %v1281_v27 }
 0x1df   :  { %v2468_v47 = vpop.f32.mrb[49].mxu0  ;;  %v1523_v37 = vpop.f32.mrb[54].mxu1  ;;  %v2013_v38 = vadd.f32 1.0, %v3037_v36 }
 0x1e0   :  { %v1747_v41 = vpop.f32.mrb[50].mxu0  ;;  %v1525_v42 = vpop.f32.mrb[55].mxu1  ;;  %v1870_v44 = vsub.f32 0.0, %v2599_v30  ;;  %v2604_v8 = vadd.f32 %v3903_v34, %v1523_v37 }
 0x1e1   :  { %v3039_v10 = vpop.eup %3038  ;;  %v2601_v50 = vadd.f32 %v1747_v41, %v1284_v6  ;;  %v2469_v45 = vpop.f32.mrb[51].mxu0  ;;  %3048 = vrcp.f32 %v2013_v38 }
 0x1e2   :  { %v2014_v46 = vadd.f32 1.0, %v3039_v10  ;;  %v1943_v48 = vmul.f32 1.442695, %v1870_v44 }
 0x1e3   :  { %v1871_v31 = vsub.f32 0.0, %v2601_v50  ;;  %v3041_v49 = vpop.eup %3040 }
 0x1e4   :  { %3050 = vrcp.f32 %v2014_v46  ;;  %2159 = vst.msk [vmem:[%s4184_s3 + $0x90] sm:$0xff] %vm2140_vm2, %v3041_v49  ;;  %v1528_v52 = vpop.f32.mrb[56].mxu1 }
 0x1e5   :  { %3052 = vpow2.f32 %v1943_v48  ;;  %v1945_v51 = vmul.f32 1.442695, %v1871_v31  ;;  %v3043_v53 = vpop.eup %3042  ;;  %v1752_v32 = vpop.f32.mrb[52].mxu0  ;;  %v2606_v4 = vadd.f32 %v3903_v34, %v1528_v52 }
 0x1e6   :  { %v1530_v15 = vpop.f32.mrb[57].mxu1  ;;  %v3045_v55 = vpop.eup %3044  ;;  %2160 = vst.msk [vmem:[%s4184_s3 + $0x98] sm:$0xff] %vm2140_vm2, %v3043_v53  ;;  %v2603_v54 = vadd.f32 %v2602_v28, %v1752_v32 }
 0x1e7   :  { %3054 = vpow2.f32 %v1945_v51  ;;  %v2472_v56 = vpop.f32.mrb[53].mxu0  ;;  %v1531_v12 = vpop.f32.mrb[58].mxu1  ;;  %v2015_v17 = vadd.f32 1.0, %v3045_v55 }
 0x1e8   :  { %v1755_v35 = vpop.f32.mrb[54].mxu0  ;;  %v1533_v58 = vpop.f32.mrb[59].mxu1  ;;  %v1872_v57 = vsub.f32 0.0, %v2603_v54  ;;  %v2608_v24 = vadd.f32 %v3903_v34, %v1531_v12 }
 0x1e9   :  { %v3047_v59 = vpop.eup %3046  ;;  %v2605_v60 = vadd.f32 %v2604_v8, %v1755_v35  ;;  %v2473_v62 = vpop.f32.mrb[55].mxu0  ;;  %3056 = vrcp.f32 %v2015_v17 }
 0x1ea   :  { %v2016_v63 = vadd.f32 1.0, %v3047_v59  ;;  %v1947_v1 = vmul.f32 1.442695, %v1872_v57 }
 0x1eb   :  { %v1873_v3 = vsub.f32 0.0, %v2605_v60  ;;  %v3049_v14 = vpop.eup %3048 }
 0x1ec   :  { %3058 = vrcp.f32 %v2016_v63  ;;  %2161 = vst.msk [vmem:[%s4184_s3 + $0xa0] sm:$0xff] %vm2140_vm2, %v3049_v14  ;;  %v1536_v5 = vpop.f32.mrb[60].mxu1 }
 0x1ed   :  { %3060 = vpow2.f32 %v1947_v1  ;;  %v1949_v22 = vmul.f32 1.442695, %v1873_v3  ;;  %v1760_v40 = vpop.f32.mrb[56].mxu0  ;;  %v1538_v18 = vpop.f32.mrb[61].mxu1  ;;  %v2610_v39 = vadd.f32 %v3903_v34, %v1536_v5 }
 0x1ee   :  { %v3051_v7 = vpop.eup %3050  ;;  %v2607_v9 = vadd.f32 %v2606_v4, %v1760_v40  ;;  %v2476_v11 = vpop.f32.mrb[57].mxu0 }
 0x1ef   :  { %v3053_v61 = vpop.eup %3052  ;;  %2162 = vst.msk [vmem:[%s4184_s3 + $0xa8] sm:$0xff] %vm2140_vm2, %v3051_v7  ;;  %3062 = vpow2.f32 %v1949_v22  ;;  %v1539_v0 = vpop.f32.mrb[62].mxu1 }
 0x1f0   :  { %v2017_v13 = vadd.f32 1.0, %v3053_v61  ;;  %v1763_v43 = vpop.f32.mrb[58].mxu0  ;;  %v1541_v2 = vpop.f32.mrb[63].mxu1  ;;  %v1874_v19 = vsub.f32 0.0, %v2607_v9  ;;  %v2612_v37 = vadd.f32 %v3903_v34, %v1539_v0 }
 0x1f1   :  { %v3055_v16 = vpop.eup %3054  ;;  %v2609_v20 = vadd.f32 %v2608_v24, %v1763_v43  ;;  %v2477_v23 = vpop.f32.mrb[59].mxu0 }
 0x1f2   :  { %3064 = vrcp.f32 %v2017_v13  ;;  %v2018_v26 = vadd.f32 1.0, %v3055_v16  ;;  %v1951_v27 = vmul.f32 1.442695, %v1874_v19 }
 0x1f3   :  { %v1875_v21 = vsub.f32 0.0, %v2609_v20  ;;  %v3057_v29 = vpop.eup %3056 }
 0x1f4   :  { %3066 = vrcp.f32 %v2018_v26  ;;  %2163 = vst.msk [vmem:[%s4184_s3 + $0xb0] sm:$0xff] %vm2140_vm2, %v3057_v29  ;;  %v1544_v33 = vpop.f32.mrb[64].mxu1 }
 0x1f5   :  { %3068 = vpow2.f32 %v1951_v27  ;;  %v1953_v25 = vmul.f32 1.442695, %v1875_v21  ;;  %v1768_v6 = vpop.f32.mrb[60].mxu0  ;;  %v1546_v30 = vpop.f32.mrb[65].mxu1  ;;  %v2614_v53 = vadd.f32 %v3903_v34, %v1544_v33 }
 0x1f6   :  { %v3059_v36 = vpop.eup %3058  ;;  %v2611_v38 = vadd.f32 %v2610_v39, %v1768_v6  ;;  %v2480_v41 = vpop.f32.mrb[61].mxu0 }
 0x1f7   :  { %v3061_v47 = vpop.eup %3060  ;;  %2164 = vst.msk [vmem:[%s4184_s3 + $0xb8] sm:$0xff] %vm2140_vm2, %v3059_v36  ;;  %3070 = vpow2.f32 %v1953_v25  ;;  %v1547_v42 = vpop.f32.mrb[66].mxu1 }
 0x1f8   :  { %v2019_v10 = vadd.f32 1.0, %v3061_v47  ;;  %v1771_v44 = vpop.f32.mrb[62].mxu0  ;;  %v1549_v50 = vpop.f32.mrb[67].mxu1  ;;  %v1876_v46 = vsub.f32 0.0, %v2611_v38  ;;  %v2616_v12 = vadd.f32 %v3903_v34, %v1547_v42 }
 0x1f9   :  { %v3063_v45 = vpop.eup %3062  ;;  %v2613_v48 = vadd.f32 %v2612_v37, %v1771_v44  ;;  %v2481_v31 = vpop.f32.mrb[63].mxu0 }
 0x1fa   :  { %3072 = vrcp.f32 %v2019_v10  ;;  %v2020_v49 = vadd.f32 1.0, %v3063_v45  ;;  %v1955_v28 = vmul.f32 1.442695, %v1876_v46 }
 0x1fb   :  { %v1877_v51 = vsub.f32 0.0, %v2613_v48 }
 0x1fc   :  { %v3065_v52 = vpop.eup %3064  ;;  %3074 = vrcp.f32 %v2020_v49  ;;  %v1552_v15 = vpop.f32.mrb[68].mxu1 }
 0x1fd   :  { %2165 = vst.msk [vmem:[%s4184_s3 + $0xc0] sm:$0xff] %vm2140_vm2, %v3065_v52  ;;  %3076 = vpow2.f32 %v1955_v28  ;;  %v1957_v32 = vmul.f32 1.442695, %v1877_v51  ;;  %v1776_v8 = vpop.f32.mrb[64].mxu0  ;;  %v1554_v54 = vpop.f32.mrb[69].mxu1  ;;  %v2618_v7 = vadd.f32 %v3903_v34, %v1552_v15 }
 0x1fe   :  { %v3067_v55 = vpop.eup %3066  ;;  %v2615_v17 = vadd.f32 %v2614_v53, %v1776_v8  ;;  %v2484_v35 = vpop.f32.mrb[65].mxu0 }
 0x1ff   :  { %v3069_v56 = vpop.eup %3068  ;;  %2166 = vst.msk [vmem:[%s4184_s3 + $0xc8] sm:$0xff] %vm2140_vm2, %v3067_v55  ;;  %3078 = vpow2.f32 %v1957_v32  ;;  %v1555_v58 = vpop.f32.mrb[70].mxu1 }
 0x200   :  { %v2021_v59 = vadd.f32 1.0, %v3069_v56  ;;  %v1779_v57 = vpop.f32.mrb[66].mxu0  ;;  %v1557_v60 = vpop.f32.mrb[71].mxu1  ;;  %v1878_v63 = vsub.f32 0.0, %v2615_v17  ;;  %v2620_v0 = vadd.f32 %v3903_v34, %v1555_v58 }
 0x201   :  { %v3071_v62 = vpop.eup %3070  ;;  %v2617_v1 = vadd.f32 %v2616_v12, %v1779_v57  ;;  %v2485_v3 = vpop.f32.mrb[67].mxu0 }
 0x202   :  { %3080 = vrcp.f32 %v2021_v59  ;;  %v2022_v14 = vadd.f32 1.0, %v3071_v62  ;;  %v1959_v4 = vmul.f32 1.442695, %v1878_v63 }
 0x203   :  { %v1879_v22 = vsub.f32 0.0, %v2617_v1 }
 0x204   :  { %v3073_v5 = vpop.eup %3072  ;;  %3082 = vrcp.f32 %v2022_v14  ;;  %v1560_v18 = vpop.f32.mrb[72].mxu1 }
 0x205   :  { %2167 = vst.msk [vmem:[%s4184_s3 + $0xd0] sm:$0xff] %vm2140_vm2, %v3073_v5  ;;  %3084 = vpow2.f32 %v1959_v4  ;;  %v1961_v40 = vmul.f32 1.442695, %v1879_v22  ;;  %v1784_v24 = vpop.f32.mrb[68].mxu0  ;;  %v1562_v9 = vpop.f32.mrb[73].mxu1  ;;  %v2622_v36 = vadd.f32 %v3903_v34, %v1560_v18 }
 0x206   :  { %v3075_v61 = vpop.eup %3074  ;;  %v2619_v13 = vadd.f32 %v2618_v7, %v1784_v24  ;;  %v2488_v43 = vpop.f32.mrb[69].mxu0 }
 0x207   :  { %v3077_v11 = vpop.eup %3076  ;;  %2168 = vst.msk [vmem:[%s4184_s3 + $0xd8] sm:$0xff] %vm2140_vm2, %v3075_v61  ;;  %3086 = vpow2.f32 %v1961_v40  ;;  %v1563_v2 = vpop.f32.mrb[74].mxu1 }
 0x208   :  { %v2023_v16 = vadd.f32 1.0, %v3077_v11  ;;  %v1787_v19 = vpop.f32.mrb[70].mxu0  ;;  %v1565_v20 = vpop.f32.mrb[75].mxu1  ;;  %v1880_v26 = vsub.f32 0.0, %v2619_v13  ;;  %v2624_v42 = vadd.f32 %v3903_v34, %v1563_v2 }
 0x209   :  { %v3079_v23 = vpop.eup %3078  ;;  %v2621_v27 = vadd.f32 %v2620_v0, %v1787_v19  ;;  %v2489_v21 = vpop.f32.mrb[71].mxu0 }
 0x20a   :  { %3088 = vrcp.f32 %v2023_v16  ;;  %v2024_v29 = vadd.f32 1.0, %v3079_v23  ;;  %v1963_v39 = vmul.f32 1.442695, %v1880_v26 }
 0x20b   :  { %v1881_v25 = vsub.f32 0.0, %v2621_v27 }
 0x20c   :  { %v3081_v33 = vpop.eup %3080  ;;  %3090 = vrcp.f32 %v2024_v29  ;;  %v1568_v30 = vpop.f32.mrb[76].mxu1 }
 0x20d   :  { %2169 = vst.msk [vmem:[%s4184_s3 + $0xe0] sm:$0xff] %vm2140_vm2, %v3081_v33  ;;  %3092 = vpow2.f32 %v1963_v39  ;;  %v1965_v6 = vmul.f32 1.442695, %v1881_v25  ;;  %v1792_v37 = vpop.f32.mrb[72].mxu0  ;;  %v1570_v38 = vpop.f32.mrb[77].mxu1  ;;  %v2626_v55 = vadd.f32 %v3903_v34, %v1568_v30 }
 0x20e   :  { %v3083_v47 = vpop.eup %3082  ;;  %v2623_v10 = vadd.f32 %v2622_v36, %v1792_v37  ;;  %v2492_v44 = vpop.f32.mrb[73].mxu0 }
 0x20f   :  { %v3085_v41 = vpop.eup %3084  ;;  %2170 = vst.msk [vmem:[%s4184_s3 + $0xe8] sm:$0xff] %vm2140_vm2, %v3083_v47  ;;  %3094 = vpow2.f32 %v1965_v6  ;;  %v1571_v50 = vpop.f32.mrb[78].mxu1 }
 0x210   :  { %v2025_v45 = vadd.f32 1.0, %v3085_v41  ;;  %v1795_v46 = vpop.f32.mrb[74].mxu0  ;;  %v1573_v48 = vpop.f32.mrb[79].mxu1  ;;  %v1882_v49 = vsub.f32 0.0, %v2623_v10  ;;  %v2628_v58 = vadd.f32 %v3903_v34, %v1571_v50 }
 0x211   :  { %v3087_v31 = vpop.eup %3086  ;;  %v2625_v28 = vadd.f32 %v2624_v42, %v1795_v46  ;;  %v2493_v51 = vpop.f32.mrb[75].mxu0 }
 0x212   :  { %3096 = vrcp.f32 %v2025_v45  ;;  %v2026_v52 = vadd.f32 1.0, %v3087_v31  ;;  %v1967_v53 = vmul.f32 1.442695, %v1882_v49 }
 0x213   :  { %v1883_v32 = vsub.f32 0.0, %v2625_v28 }
 0x214   :  { %v3089_v15 = vpop.eup %3088  ;;  %3098 = vrcp.f32 %v2026_v52  ;;  %v1576_v54 = vpop.f32.mrb[80].mxu1 }
 0x215   :  { %2171 = vst.msk [vmem:[%s4184_s3 + $0xf0] sm:$0xff] %vm2140_vm2, %v3089_v15  ;;  %3100 = vpow2.f32 %v1967_v53  ;;  %v1969_v8 = vmul.f32 1.442695, %v1883_v32  ;;  %v1800_v12 = vpop.f32.mrb[76].mxu0  ;;  %v1578_v17 = vpop.f32.mrb[81].mxu1  ;;  %v2630_v61 = vadd.f32 %v3903_v34, %v1576_v54 }
 0x216   :  { %v3091_v56 = vpop.eup %3090  ;;  %v2627_v59 = vadd.f32 %v2626_v55, %v1800_v12  ;;  %v2496_v57 = vpop.f32.mrb[77].mxu0 }
 0x217   :  { %v3093_v35 = vpop.eup %3092  ;;  %2172 = vst.msk [vmem:[%s4184_s3 + $0xf8] sm:$0xff] %vm2140_vm2, %v3091_v56  ;;  %3102 = vpow2.f32 %v1969_v8  ;;  %v1579_v60 = vpop.f32.mrb[82].mxu1 }
 0x218   :  { %v2027_v62 = vadd.f32 1.0, %v3093_v35  ;;  %v1803_v63 = vpop.f32.mrb[78].mxu0  ;;  %v1581_v1 = vpop.f32.mrb[83].mxu1  ;;  %v1884_v14 = vsub.f32 0.0, %v2627_v59  ;;  %v2632_v2 = vadd.f32 %v3903_v34, %v1579_v60  ;;  %v4116_v34 = vld [vmem:[%s4183_s2] ss:$0 sm:$0xff] }
 0x219   :  { %v3095_v3 = vpop.eup %3094  ;;  %v2629_v4 = vadd.f32 %v2628_v58, %v1803_v63  ;;  %v2497_v22 = vpop.f32.mrb[79].mxu0 }
 0x21a   :  { %3104 = vrcp.f32 %v2027_v62  ;;  %v2028_v5 = vadd.f32 1.0, %v3095_v3  ;;  %v1971_v7 = vmul.f32 1.442695, %v1884_v14 }
 0x21b   :  { %v1885_v40 = vsub.f32 0.0, %v2629_v4 }
 0x21c   :  { %v3097_v18 = vpop.eup %3096  ;;  %3106 = vrcp.f32 %v2028_v5  ;;  %v1584_v9 = vpop.f32.mrb[84].mxu1 }
 0x21d   :  { %2173 = vst.msk [vmem:[%s4184_s3 + $0x100] sm:$0xff] %vm2140_vm2, %v3097_v18  ;;  %3108 = vpow2.f32 %v1971_v7  ;;  %v1973_v24 = vmul.f32 1.442695, %v1885_v40  ;;  %v1808_v0 = vpop.f32.mrb[80].mxu0  ;;  %v1586_v13 = vpop.f32.mrb[85].mxu1  ;;  %v2634_v47 = vadd.f32 %v4116_v34, %v1584_v9 }
 0x21e   :  { %v3099_v11 = vpop.eup %3098  ;;  %v2631_v16 = vadd.f32 %v2630_v61, %v1808_v0  ;;  %v2500_v19 = vpop.f32.mrb[81].mxu0 }
 0x21f   :  { %v3101_v43 = vpop.eup %3100  ;;  %2174 = vst.msk [vmem:[%s4184_s3 + $0x108] sm:$0xff] %vm2140_vm2, %v3099_v11  ;;  %3110 = vpow2.f32 %v1973_v24  ;;  %v1587_v20 = vpop.f32.mrb[86].mxu1 }
 0x220   :  { %v2029_v23 = vadd.f32 1.0, %v3101_v43  ;;  %v1811_v26 = vpop.f32.mrb[82].mxu0  ;;  %v1589_v27 = vpop.f32.mrb[87].mxu1  ;;  %v1886_v29 = vsub.f32 0.0, %v2631_v16  ;;  %v2636_v50 = vadd.f32 %v4116_v34, %v1587_v20 }
 0x221   :  { %v3103_v21 = vpop.eup %3102  ;;  %v2633_v39 = vadd.f32 %v2632_v2, %v1811_v26  ;;  %v2501_v25 = vpop.f32.mrb[83].mxu0 }
 0x222   :  { %3112 = vrcp.f32 %v2029_v23  ;;  %v2030_v33 = vadd.f32 1.0, %v3103_v21  ;;  %v1975_v36 = vmul.f32 1.442695, %v1886_v29 }
 0x223   :  { %v1887_v6 = vsub.f32 0.0, %v2633_v39 }
 0x224   :  { %v3105_v30 = vpop.eup %3104  ;;  %3114 = vrcp.f32 %v2030_v33  ;;  %v1592_v38 = vpop.f32.mrb[88].mxu1 }
 0x225   :  { %2175 = vst.msk [vmem:[%s4184_s3 + $0x110] sm:$0xff] %vm2140_vm2, %v3105_v30  ;;  %3116 = vpow2.f32 %v1975_v36  ;;  %v1977_v37 = vmul.f32 1.442695, %v1887_v6  ;;  %v1816_v42 = vpop.f32.mrb[84].mxu0  ;;  %v1594_v10 = vpop.f32.mrb[89].mxu1  ;;  %v2638_v56 = vadd.f32 %v4116_v34, %v1592_v38 }
 0x226   :  { %v3107_v41 = vpop.eup %3106  ;;  %v2635_v45 = vadd.f32 %v2634_v47, %v1816_v42  ;;  %v2504_v46 = vpop.f32.mrb[85].mxu0 }
 0x227   :  { %v3109_v44 = vpop.eup %3108  ;;  %2176 = vst.msk [vmem:[%s4184_s3 + $0x118] sm:$0xff] %vm2140_vm2, %v3107_v41  ;;  %3118 = vpow2.f32 %v1977_v37  ;;  %v1595_v48 = vpop.f32.mrb[90].mxu1 }
 0x228   :  { %v2031_v31 = vadd.f32 1.0, %v3109_v44  ;;  %v1819_v49 = vpop.f32.mrb[86].mxu0  ;;  %v1597_v28 = vpop.f32.mrb[91].mxu1  ;;  %v1888_v52 = vsub.f32 0.0, %v2635_v45  ;;  %v2640_v60 = vadd.f32 %v4116_v34, %v1595_v48 }
 0x229   :  { %v3111_v51 = vpop.eup %3110  ;;  %v2637_v53 = vadd.f32 %v2636_v50, %v1819_v49  ;;  %v2505_v32 = vpop.f32.mrb[87].mxu0 }
 0x22a   :  { %3120 = vrcp.f32 %v2031_v31  ;;  %v2032_v15 = vadd.f32 1.0, %v3111_v51  ;;  %v1979_v55 = vmul.f32 1.442695, %v1888_v52 }
 0x22b   :  { %v1889_v8 = vsub.f32 0.0, %v2637_v53 }
 0x22c   :  { %v3113_v54 = vpop.eup %3112  ;;  %3122 = vrcp.f32 %v2032_v15  ;;  %v1600_v17 = vpop.f32.mrb[92].mxu1 }
 0x22d   :  { %2177 = vst.msk [vmem:[%s4184_s3 + $0x120] sm:$0xff] %vm2140_vm2, %v3113_v54  ;;  %3124 = vpow2.f32 %v1979_v55  ;;  %v1981_v12 = vmul.f32 1.442695, %v1889_v8  ;;  %v1824_v58 = vpop.f32.mrb[88].mxu0  ;;  %v1602_v59 = vpop.f32.mrb[93].mxu1  ;;  %v2642_v11 = vadd.f32 %v4116_v34, %v1600_v17 }
 0x22e   :  { %v3115_v35 = vpop.eup %3114  ;;  %v2639_v62 = vadd.f32 %v2638_v56, %v1824_v58  ;;  %v2508_v63 = vpop.f32.mrb[89].mxu0 }
 0x22f   :  { %v3117_v57 = vpop.eup %3116  ;;  %2178 = vst.msk [vmem:[%s4184_s3 + $0x128] sm:$0xff] %vm2140_vm2, %v3115_v35  ;;  %3126 = vpow2.f32 %v1981_v12  ;;  %v1603_v1 = vpop.f32.mrb[94].mxu1 }
 0x230   :  { %v2033_v3 = vadd.f32 1.0, %v3117_v57  ;;  %v1827_v14 = vpop.f32.mrb[90].mxu0  ;;  %v1605_v4 = vpop.f32.mrb[95].mxu1  ;;  %v1890_v5 = vsub.f32 0.0, %v2639_v62  ;;  %v2644_v20 = vadd.f32 %v4116_v34, %v1603_v1 }
 0x231   :  { %v3119_v22 = vpop.eup %3118  ;;  %v2641_v7 = vadd.f32 %v2640_v60, %v1827_v14  ;;  %v2509_v40 = vpop.f32.mrb[91].mxu0 }
 0x232   :  { %3128 = vrcp.f32 %v2033_v3  ;;  %v2034_v18 = vadd.f32 1.0, %v3119_v22  ;;  %v1983_v61 = vmul.f32 1.442695, %v1890_v5 }
 0x233   :  { %v1891_v24 = vsub.f32 0.0, %v2641_v7 }
 0x234   :  { %v3121_v9 = vpop.eup %3120  ;;  %3130 = vrcp.f32 %v2034_v18  ;;  %v1608_v13 = vpop.f32.mrb[96].mxu1 }
 0x235   :  { %2179 = vst.msk [vmem:[%s4184_s3 + $0x130] sm:$0xff] %vm2140_vm2, %v3121_v9  ;;  %3132 = vpow2.f32 %v1983_v61  ;;  %v1985_v0 = vmul.f32 1.442695, %v1891_v24  ;;  %v1832_v2 = vpop.f32.mrb[92].mxu0  ;;  %v1610_v16 = vpop.f32.mrb[97].mxu1  ;;  %v2646_v41 = vadd.f32 %v4116_v34, %v1608_v13 }
 0x236   :  { %v3123_v43 = vpop.eup %3122  ;;  %v2643_v23 = vadd.f32 %v2642_v11, %v1832_v2  ;;  %v2512_v26 = vpop.f32.mrb[93].mxu0 }
 0x237   :  { %v3125_v19 = vpop.eup %3124  ;;  %2180 = vst.msk [vmem:[%s4184_s3 + $0x138] sm:$0xff] %vm2140_vm2, %v3123_v43  ;;  %3134 = vpow2.f32 %v1985_v0  ;;  %v1611_v27 = vpop.f32.mrb[98].mxu1 }
 0x238   :  { %v2035_v21 = vadd.f32 1.0, %v3125_v19  ;;  %v1835_v29 = vpop.f32.mrb[94].mxu0  ;;  %v1612_v39 = vpop.f32.mrb[99].mxu1  ;;  %v1892_v33 = vsub.f32 0.0, %v2643_v23 }
 0x239   :  { %v3127_v25 = vpop.eup %3126  ;;  %v2645_v36 = vadd.f32 %v2644_v20, %v1835_v29  ;;  %v2513_v6 = vpop.f32.mrb[95].mxu0 }
 0x23a   :  { %3136 = vrcp.f32 %v2035_v21  ;;  %v2036_v30 = vadd.f32 1.0, %v3127_v25  ;;  %v1987_v47 = vmul.f32 1.442695, %v1892_v33 }
 0x23b   :  { %v1893_v37 = vsub.f32 0.0, %v2645_v36 }
 0x23c   :  { %v3129_v38 = vpop.eup %3128  ;;  %3138 = vrcp.f32 %v2036_v30 }
 0x23d   :  { %2181 = vst.msk [vmem:[%s4184_s3 + $0x140] sm:$0xff] %vm2140_vm2, %v3129_v38  ;;  %3140 = vpow2.f32 %v1987_v47  ;;  %v1989_v42 = vmul.f32 1.442695, %v1893_v37  ;;  %v1840_v44 = vpop.f32.mrb[96].mxu0 }
 0x23e   :  { %v3131_v10 = vpop.eup %3130  ;;  %v2647_v45 = vadd.f32 %v2646_v41, %v1840_v44  ;;  %v2516_v46 = vpop.f32.mrb[97].mxu0 }
 0x23f   :  { %v3133_v50 = vpop.eup %3132  ;;  %2182 = vst.msk [vmem:[%s4184_s3 + $0x148] sm:$0xff] %vm2140_vm2, %v3131_v10  ;;  %3142 = vpow2.f32 %v1989_v42  ;;  %v1843_v31 = vpop.f32.mrb[98].mxu0 }
 0x240   :  { %v2037_v48 = vadd.f32 1.0, %v3133_v50  ;;  %v1894_v28 = vsub.f32 0.0, %v2647_v45  ;;  %v2517_v51 = vpop.f32.mrb[99].mxu0 }
 0x241   :  { %v3135_v49 = vpop.eup %3134 }
 0x242   :  { %3144 = vrcp.f32 %v2037_v48  ;;  %v2038_v34 = vadd.f32 1.0, %v3135_v49  ;;  %v1991_v52 = vmul.f32 1.442695, %v1894_v28 }
 0x244   :  { %v3137_v53 = vpop.eup %3136  ;;  %3146 = vrcp.f32 %v2038_v34 }
 0x245   :  { %2183 = vst.msk [vmem:[%s4184_s3 + $0x150] sm:$0xff] %vm2140_vm2, %v3137_v53  ;;  %3148 = vpow2.f32 %v1991_v52 }
 0x246   :  { %v3139_v32 = vpop.eup %3138 }
 0x247   :  { %v3141_v15 = vpop.eup %3140  ;;  %2184 = vst.msk [vmem:[%s4184_s3 + $0x158] sm:$0xff] %vm2140_vm2, %v3139_v32 }
 0x248   :  { %v2039_v55 = vadd.f32 1.0, %v3141_v15 }
 0x249   :  { %v3143_v8 = vpop.eup %3142 }
 0x24a   :  { %3150 = vrcp.f32 %v2039_v55  ;;  %v2040_v54 = vadd.f32 1.0, %v3143_v8 }
 0x24c   :  { %v3145_v56 = vpop.eup %3144  ;;  %3152 = vrcp.f32 %v2040_v54 }
 0x24d   :  { %2185 = vst.msk [vmem:[%s4184_s3 + $0x160] sm:$0xff] %vm2140_vm2, %v3145_v56 }
 0x24e   :  { %v3147_v12 = vpop.eup %3146 }
 0x24f   :  { %v3149_v17 = vpop.eup %3148  ;;  %2186 = vst.msk [vmem:[%s4184_s3 + $0x168] sm:$0xff] %vm2140_vm2, %v3147_v12 }
 0x250   :  { %v2041_v35 = vadd.f32 1.0, %v3149_v17 }
 0x252   :  { %3154 = vrcp.f32 %v2041_v35 }
 0x254   :  { %v3151_v58 = vpop.eup %3150 }
 0x255   :  { %2187 = vst.msk [vmem:[%s4184_s3 + $0x170] sm:$0xff] %vm2140_vm2, %v3151_v58 }
 0x256   :  { %v3153_v59 = vpop.eup %3152 }
 0x257   :  { %2188 = vst.msk [vmem:[%s4184_s3 + $0x178] sm:$0xff] %vm2140_vm2, %v3153_v59 }
 0x25c   :  { %v3155_v57 = vpop.eup %3154 }
 0x25d   :  { %2189 = vst.msk [vmem:[%s4184_s3 + $0x180] sm:$0xff] %vm2140_vm2, %v3155_v57 }

// kernel: ganomaly_forward.10
= control target key start
LH: loop header
LB: loop body
LE: loop exit
PB: predicated region body
PF: predicated region fallthrough
CT: control target
= control target key end

     0   :  { %v1216_v0 = vmov 0.0   ;;  %vm1217_vm0 = vmmov 0   ;;  %vm202_vm1 = vcmask 130048   ;;  %vm854_vm4 = vcmask 519168   ;;  %s1643_s1 = inlined_call_operand.vmem [shape: bf16[16,64], index: 1, kind: input, shape index: {}]   ;;  %s1644_s0 = inlined_call_operand.vmem [shape: bf16[392,16], index: 0, kind: input, shape index: {}]   ;;  %s1645_s2 = inlined_call_operand.vmem [shape: f32[1,64], index: 2, kind: input, shape index: {}]   ;;  %s1646_s3 = inlined_call_operand.vmem [shape: bf16[392,64], index: 3, kind: output, shape index: {}]  }
   0x1   :  { %1084 = vmatprep.subr.bf16.mxu0 %v1216_v0  ;;  %v1190_v1 = vld [vmem:[%s1643_s1] sm:$0xff]   ;;  %1086 = vmatprep.mubr.msk.bf16.mxu0 %vm1217_vm0, %v1216_v0  ;;  %v1192_v3 = vld [vmem:[%s1644_s0 + $0x68] sm:$0xff]   ;;  %v1194_v5 = vld [vmem:[%s1644_s0 + $0x70] sm:$0xff]  }
   0x2   :  { %v1191_v2 = vld [vmem:[%s1644_s0] sm:$0xff]   ;;  %1186 = vmatprep.subr.bf16.mxu1 %v1216_v0  ;;  %1138 = vmatprep.mubr.msk.bf16.mxu1 %vm1217_vm0, %v1216_v0  ;;  %v1193_v4 = vld [vmem:[%s1644_s0 + $0x8] sm:$0xff]   ;;  %v1195_v6 = vld [vmem:[%s1644_s0 + $0x10] sm:$0xff]  }
   0x3   :  { %1085 = vmatpush3.bf16.msra.mxu0 %v1190_v1  ;;  %1187 = vmatpush3.bf16.msra.mxu1 %v1190_v1  ;;  %v1196_v7 = vld [vmem:[%s1644_s0 + $0x78] sm:$0xff]   ;;  %v1198_v9 = vld [vmem:[%s1644_s0 + $0x80] sm:$0xff]   ;;  %v1200_v11 = vld [vmem:[%s1644_s0 + $0x88] sm:$0xff]  }
   0x4   :  { %v1197_v8 = vld [vmem:[%s1644_s0 + $0x18] sm:$0xff]   ;;  %v1199_v10 = vld [vmem:[%s1644_s0 + $0x20] sm:$0xff]   ;;  %v1201_v12 = vld [vmem:[%s1644_s0 + $0x28] sm:$0xff]  }
   0x5   :  { %v1202_v13 = vld [vmem:[%s1644_s0 + $0x90] sm:$0xff]   ;;  %v1204_v15 = vld [vmem:[%s1644_s0 + $0x98] sm:$0xff]   ;;  %v1206_v17 = vld [vmem:[%s1644_s0 + $0xa0] sm:$0xff]  }
   0x6   :  { %1087 = vmatmul.mubr.msk.bf16.vlgmr.msra.gmra.mrb[0].mxu0 %vm202_vm1, %v1191_v2  ;;  %1139 = vmatmul.mubr.msk.bf16.vlgmr.msra.gmra.mrb[0].mxu1 %vm202_vm1, %v1192_v3  ;;  %v1203_v14 = vld [vmem:[%s1644_s0 + $0x30] sm:$0xff]   ;;  %v1205_v16 = vld [vmem:[%s1644_s0 + $0x38] sm:$0xff]   ;;  %v1207_v18 = vld [vmem:[%s1644_s0 + $0x40] sm:$0xff]  }
   0x7   :  { %1090 = vmatprep.mubr.msk.bf16.mxu0 %vm1217_vm0, %v1216_v0  ;;  %1142 = vmatprep.mubr.msk.bf16.mxu1 %vm1217_vm0, %v1216_v0  ;;  %v1208_v19 = vld [vmem:[%s1644_s0 + $0xa8] sm:$0xff]   ;;  %v1210_v21 = vld [vmem:[%s1644_s0 + $0xb0] sm:$0xff]   ;;  %v1212_v23 = vld [vmem:[%s1644_s0 + $0xb8] sm:$0xff]  }
   0x8   :  { %v1209_v20 = vld [vmem:[%s1644_s0 + $0x48] sm:$0xff]   ;;  %v1211_v22 = vld [vmem:[%s1644_s0 + $0x50] sm:$0xff]   ;;  %v1213_v24 = vld [vmem:[%s1644_s0 + $0x58] sm:$0xff]  }
   0x9   :  { %v1214_v25 = vld [vmem:[%s1644_s0 + $0xc0] ss:$0 sps:$4 sm:$0xff]  }
   0xa   :  { %v1215_v26 = vld [vmem:[%s1644_s0 + $0x60] sm:$0xff]  }
   0xb   :  { %v1396_v27 = vld [vmem:[%s1645_s2] ss:$0 sm:$0xff] }
   0xe   :  { %1091 = vmatmul.mubr.msk.bf16.gmra.mrb[4].mxu0 %vm202_vm1, %v1193_v4  ;;  %1143 = vmatmul.mubr.msk.bf16.gmra.mrb[4].mxu1 %vm202_vm1, %v1194_v5 }
   0xf   :  { %1094 = vmatprep.mubr.msk.bf16.mxu0 %vm1217_vm0, %v1216_v0  ;;  %1146 = vmatprep.mubr.msk.bf16.mxu1 %vm1217_vm0, %v1216_v0 }
  0x16   :  { %1095 = vmatmul.mubr.msk.bf16.gmra.mrb[8].mxu0 %vm202_vm1, %v1195_v6  ;;  %1147 = vmatmul.mubr.msk.bf16.gmra.mrb[8].mxu1 %vm202_vm1, %v1196_v7 }
  0x17   :  { %1098 = vmatprep.mubr.msk.bf16.mxu0 %vm1217_vm0, %v1216_v0  ;;  %1150 = vmatprep.mubr.msk.bf16.mxu1 %vm1217_vm0, %v1216_v0 }
  0x1e   :  { %1099 = vmatmul.mubr.msk.bf16.gmra.mrb[12].mxu0 %vm202_vm1, %v1197_v8  ;;  %1151 = vmatmul.mubr.msk.bf16.gmra.mrb[12].mxu1 %vm202_vm1, %v1198_v9 }
  0x1f   :  { %1102 = vmatprep.mubr.msk.bf16.mxu0 %vm1217_vm0, %v1216_v0  ;;  %1154 = vmatprep.mubr.msk.bf16.mxu1 %vm1217_vm0, %v1216_v0 }
  0x26   :  { %1103 = vmatmul.mubr.msk.bf16.gmra.mrb[16].mxu0 %vm202_vm1, %v1199_v10  ;;  %1155 = vmatmul.mubr.msk.bf16.gmra.mrb[16].mxu1 %vm202_vm1, %v1200_v11 }
  0x27   :  { %1106 = vmatprep.mubr.msk.bf16.mxu0 %vm1217_vm0, %v1216_v0  ;;  %1158 = vmatprep.mubr.msk.bf16.mxu1 %vm1217_vm0, %v1216_v0 }
  0x2e   :  { %1107 = vmatmul.mubr.msk.bf16.gmra.mrb[20].mxu0 %vm202_vm1, %v1201_v12  ;;  %1159 = vmatmul.mubr.msk.bf16.gmra.mrb[20].mxu1 %vm202_vm1, %v1202_v13 }
  0x2f   :  { %1110 = vmatprep.mubr.msk.bf16.mxu0 %vm1217_vm0, %v1216_v0  ;;  %1162 = vmatprep.mubr.msk.bf16.mxu1 %vm1217_vm0, %v1216_v0 }
  0x36   :  { %1111 = vmatmul.mubr.msk.bf16.gmra.mrb[24].mxu0 %vm202_vm1, %v1203_v14  ;;  %1163 = vmatmul.mubr.msk.bf16.gmra.mrb[24].mxu1 %vm202_vm1, %v1204_v15 }
  0x37   :  { %1114 = vmatprep.mubr.msk.bf16.mxu0 %vm1217_vm0, %v1216_v0  ;;  %1166 = vmatprep.mubr.msk.bf16.mxu1 %vm1217_vm0, %v1216_v0 }
  0x3e   :  { %1115 = vmatmul.mubr.msk.bf16.gmra.mrb[28].mxu0 %vm202_vm1, %v1205_v16  ;;  %1167 = vmatmul.mubr.msk.bf16.gmra.mrb[28].mxu1 %vm202_vm1, %v1206_v17 }
  0x3f   :  { %1118 = vmatprep.mubr.msk.bf16.mxu0 %vm1217_vm0, %v1216_v0  ;;  %1170 = vmatprep.mubr.msk.bf16.mxu1 %vm1217_vm0, %v1216_v0 }
  0x46   :  { %1119 = vmatmul.mubr.msk.bf16.gmra.mrb[32].mxu0 %vm202_vm1, %v1207_v18  ;;  %1171 = vmatmul.mubr.msk.bf16.gmra.mrb[32].mxu1 %vm202_vm1, %v1208_v19 }
  0x47   :  { %1122 = vmatprep.mubr.msk.bf16.mxu0 %vm1217_vm0, %v1216_v0  ;;  %1174 = vmatprep.mubr.msk.bf16.mxu1 %vm1217_vm0, %v1216_v0 }
  0x4e   :  { %1123 = vmatmul.mubr.msk.bf16.gmra.mrb[36].mxu0 %vm202_vm1, %v1209_v20  ;;  %1175 = vmatmul.mubr.msk.bf16.gmra.mrb[36].mxu1 %vm202_vm1, %v1210_v21 }
  0x4f   :  { %1126 = vmatprep.mubr.msk.bf16.mxu0 %vm1217_vm0, %v1216_v0  ;;  %1178 = vmatprep.mubr.msk.bf16.mxu1 %vm1217_vm0, %v1216_v0 }
  0x56   :  { %1127 = vmatmul.mubr.msk.bf16.gmra.mrb[40].mxu0 %vm202_vm1, %v1211_v22  ;;  %1179 = vmatmul.mubr.msk.bf16.gmra.mrb[40].mxu1 %vm202_vm1, %v1212_v23 }
  0x57   :  { %1130 = vmatprep.mubr.msk.bf16.mxu0 %vm1217_vm0, %v1216_v0  ;;  %1182 = vmatprep.mubr.msk.bf16.mxu1 %vm1217_vm0, %v1216_v0 }
  0x5e   :  { %1131 = vmatmul.mubr.msk.bf16.gmra.mrb[44].mxu0 %vm202_vm1, %v1213_v24  ;;  %1183 = vmatmul.mubr.msk.bf16.gmra.mrb[44].mxu1 %vm202_vm1, %v1214_v25 }
  0x5f   :  { %1134 = vmatprep.mubr.msk.bf16.mxu0 %vm1217_vm0, %v1216_v0 }
  0x66   :  { %1135 = vmatmul.mubr.msk.bf16.gmra.mrb[48].mxu0 %vm202_vm1, %v1215_v26 }
  0xd9   :  { %v312_v28 = vpop.f32.mrb[0].mxu0  ;;  %v416_v29 = vpop.f32.mrb[0].mxu1 }
  0xda   :  { %v313_v30 = vadd.f32 %v1396_v27, %v312_v28  ;;  %v1088_v31 = vpop.f32.mrb[1].mxu0  ;;  %v417_v32 = vadd.f32 %v1396_v27, %v416_v29  ;;  %v1140_v33 = vpop.f32.mrb[1].mxu1 }
  0xdb   :  { %v315_v34 = vpop.f32.mrb[2].mxu0  ;;  %v419_v35 = vpop.f32.mrb[2].mxu1 }
  0xdc   :  { %vm510_vm2 = vcmp.ge.f32.partialorder %v313_v30, 0.0  ;;  %v559_v36 = vmul.f32 0.2, %v313_v30  ;;  %v316_v37 = vadd.f32 %v1396_v27, %v315_v34  ;;  %v1089_v38 = vpop.f32.mrb[3].mxu0  ;;  %vm536_vm3 = vcmp.ge.f32.partialorder %v417_v32, 0.0  ;;  %v1141_v39 = vpop.f32.mrb[3].mxu1 }
  0xdd   :  { %v585_v40 = vmul.f32 0.2, %v417_v32  ;;  %v420_v41 = vadd.f32 %v1396_v27, %v419_v35 }
  0xde   :  { %v608_v42 = vsel %vm510_vm2, %v313_v30, %v559_v36  ;;  %vm511_vm5 = vcmp.ge.f32.partialorder %v316_v37, 0.0  ;;  %v560_v43 = vmul.f32 0.2, %v316_v37 }
  0xdf   :  { %v1009_v44 = vpack.c.bf16 %v608_v42, %v608_v42  ;;  %v634_v45 = vsel %vm536_vm3, %v417_v32, %v585_v40  ;;  %vm537_vm6 = vcmp.ge.f32.partialorder %v420_v41, 0.0  ;;  %v586_v46 = vmul.f32 0.2, %v420_v41 }
  0xe0   :  { %v609_v47 = vsel %vm511_vm5, %v316_v37, %v560_v43  ;;  %v1035_v48 = vpack.c.bf16 %v634_v45, %v634_v45 }
  0xe1   :  { %855 = vst.msk [vmem:[%s1646_s3] sm:$0xf] %vm854_vm4, %v1009_v44  ;;  %v1010_v49 = vpack.c.bf16 %v609_v47, %v609_v47  ;;  %v320_v50 = vpop.f32.mrb[4].mxu0  ;;  %v635_v51 = vsel %vm537_vm6, %v420_v41, %v586_v46  ;;  %v424_v52 = vpop.f32.mrb[4].mxu1 }
  0xe2   :  { %881 = vst.msk [vmem:[%s1646_s3 + $0x68] sm:$0xf] %vm854_vm4, %v1035_v48  ;;  %v321_v53 = vadd.f32 %v1396_v27, %v320_v50  ;;  %v1036_v54 = vpack.c.bf16 %v635_v51, %v635_v51  ;;  %v1092_v55 = vpop.f32.mrb[5].mxu0  ;;  %v425_v56 = vadd.f32 %v1396_v27, %v424_v52  ;;  %v1144_v57 = vpop.f32.mrb[5].mxu1 }
  0xe3   :  { %856 = vst.msk [vmem:[%s1646_s3 + $0x4] sm:$0xf] %vm854_vm4, %v1010_v49  ;;  %v323_v58 = vpop.f32.mrb[6].mxu0  ;;  %v427_v59 = vpop.f32.mrb[6].mxu1 }
  0xe4   :  { %vm512_vm7 = vcmp.ge.f32.partialorder %v321_v53, 0.0  ;;  %v561_v60 = vmul.f32 0.2, %v321_v53  ;;  %882 = vst.msk [vmem:[%s1646_s3 + $0x6c] sm:$0xf] %vm854_vm4, %v1036_v54  ;;  %v324_v61 = vadd.f32 %v1396_v27, %v323_v58  ;;  %v1093_v62 = vpop.f32.mrb[7].mxu0  ;;  %v428_v1 = vadd.f32 %v1396_v27, %v427_v59 }
  0xe5   :  { %vm538_vm8 = vcmp.ge.f32.partialorder %v425_v56, 0.0  ;;  %v1145_v63 = vpop.f32.mrb[7].mxu1  ;;  %v587_v0 = vmul.f32 0.2, %v425_v56 }
  0xe6   :  { %v610_v2 = vsel %vm512_vm7, %v321_v53, %v561_v60  ;;  %vm513_vm9 = vcmp.ge.f32.partialorder %v324_v61, 0.0  ;;  %v562_v3 = vmul.f32 0.2, %v324_v61  ;;  %vm539_vm10 = vcmp.ge.f32.partialorder %v428_v1, 0.0 }
  0xe7   :  { %v1011_v4 = vpack.c.bf16 %v610_v2, %v610_v2  ;;  %v636_v5 = vsel %vm538_vm8, %v425_v56, %v587_v0  ;;  %v588_v6 = vmul.f32 0.2, %v428_v1 }
  0xe8   :  { %v611_v7 = vsel %vm513_vm9, %v324_v61, %v562_v3  ;;  %v1037_v8 = vpack.c.bf16 %v636_v5, %v636_v5 }
  0xe9   :  { %857 = vst.msk [vmem:[%s1646_s3 + $0x8] sm:$0xf] %vm854_vm4, %v1011_v4  ;;  %v1012_v9 = vpack.c.bf16 %v611_v7, %v611_v7  ;;  %v328_v10 = vpop.f32.mrb[8].mxu0  ;;  %v637_v11 = vsel %vm539_vm10, %v428_v1, %v588_v6  ;;  %v432_v12 = vpop.f32.mrb[8].mxu1 }
  0xea   :  { %883 = vst.msk [vmem:[%s1646_s3 + $0x70] sm:$0xf] %vm854_vm4, %v1037_v8  ;;  %v329_v13 = vadd.f32 %v1396_v27, %v328_v10  ;;  %v1038_v14 = vpack.c.bf16 %v637_v11, %v637_v11  ;;  %v1096_v15 = vpop.f32.mrb[9].mxu0  ;;  %v433_v16 = vadd.f32 %v1396_v27, %v432_v12  ;;  %v1148_v17 = vpop.f32.mrb[9].mxu1 }
  0xeb   :  { %858 = vst.msk [vmem:[%s1646_s3 + $0xc] sm:$0xf] %vm854_vm4, %v1012_v9  ;;  %v331_v18 = vpop.f32.mrb[10].mxu0  ;;  %v435_v19 = vpop.f32.mrb[10].mxu1 }
  0xec   :  { %vm514_vm11 = vcmp.ge.f32.partialorder %v329_v13, 0.0  ;;  %v563_v20 = vmul.f32 0.2, %v329_v13  ;;  %884 = vst.msk [vmem:[%s1646_s3 + $0x74] sm:$0xf] %vm854_vm4, %v1038_v14  ;;  %v332_v21 = vadd.f32 %v1396_v27, %v331_v18  ;;  %v1097_v22 = vpop.f32.mrb[11].mxu0  ;;  %v436_v25 = vadd.f32 %v1396_v27, %v435_v19 }
  0xed   :  { %vm540_vm12 = vcmp.ge.f32.partialorder %v433_v16, 0.0  ;;  %v1149_v23 = vpop.f32.mrb[11].mxu1  ;;  %v589_v24 = vmul.f32 0.2, %v433_v16 }
  0xee   :  { %v612_v26 = vsel %vm514_vm11, %v329_v13, %v563_v20  ;;  %vm515_vm13 = vcmp.ge.f32.partialorder %v332_v21, 0.0  ;;  %v564_v28 = vmul.f32 0.2, %v332_v21  ;;  %vm541_vm14 = vcmp.ge.f32.partialorder %v436_v25, 0.0 }
  0xef   :  { %v1013_v29 = vpack.c.bf16 %v612_v26, %v612_v26  ;;  %v638_v30 = vsel %vm540_vm12, %v433_v16, %v589_v24  ;;  %v590_v31 = vmul.f32 0.2, %v436_v25 }
  0xf0   :  { %v613_v32 = vsel %vm515_vm13, %v332_v21, %v564_v28  ;;  %v1039_v33 = vpack.c.bf16 %v638_v30, %v638_v30 }
  0xf1   :  { %859 = vst.msk [vmem:[%s1646_s3 + $0x10] sm:$0xf] %vm854_vm4, %v1013_v29  ;;  %v1014_v34 = vpack.c.bf16 %v613_v32, %v613_v32  ;;  %v336_v35 = vpop.f32.mrb[12].mxu0  ;;  %v639_v36 = vsel %vm541_vm14, %v436_v25, %v590_v31  ;;  %v440_v37 = vpop.f32.mrb[12].mxu1 }
  0xf2   :  { %885 = vst.msk [vmem:[%s1646_s3 + $0x78] sm:$0xf] %vm854_vm4, %v1039_v33  ;;  %v337_v38 = vadd.f32 %v1396_v27, %v336_v35  ;;  %v1040_v39 = vpack.c.bf16 %v639_v36, %v639_v36  ;;  %v1100_v40 = vpop.f32.mrb[13].mxu0  ;;  %v441_v41 = vadd.f32 %v1396_v27, %v440_v37  ;;  %v1152_v42 = vpop.f32.mrb[13].mxu1 }
  0xf3   :  { %860 = vst.msk [vmem:[%s1646_s3 + $0x14] sm:$0xf] %vm854_vm4, %v1014_v34  ;;  %v339_v43 = vpop.f32.mrb[14].mxu0  ;;  %v443_v44 = vpop.f32.mrb[14].mxu1 }
  0xf4   :  { %vm516_vm15 = vcmp.ge.f32.partialorder %v337_v38, 0.0  ;;  %v565_v45 = vmul.f32 0.2, %v337_v38  ;;  %886 = vst.msk [vmem:[%s1646_s3 + $0x7c] sm:$0xf] %vm854_vm4, %v1040_v39  ;;  %v340_v46 = vadd.f32 %v1396_v27, %v339_v43  ;;  %v1101_v47 = vpop.f32.mrb[15].mxu0  ;;  %v444_v50 = vadd.f32 %v1396_v27, %v443_v44 }
  0xf5   :  { %vm542_vm0 = vcmp.ge.f32.partialorder %v441_v41, 0.0  ;;  %v1153_v48 = vpop.f32.mrb[15].mxu1  ;;  %v591_v49 = vmul.f32 0.2, %v441_v41 }
  0xf6   :  { %v614_v51 = vsel %vm516_vm15, %v337_v38, %v565_v45  ;;  %vm517_vm1 = vcmp.ge.f32.partialorder %v340_v46, 0.0  ;;  %v566_v52 = vmul.f32 0.2, %v340_v46  ;;  %vm543_vm2 = vcmp.ge.f32.partialorder %v444_v50, 0.0 }
  0xf7   :  { %v1015_v53 = vpack.c.bf16 %v614_v51, %v614_v51  ;;  %v640_v54 = vsel %vm542_vm0, %v441_v41, %v591_v49  ;;  %v592_v55 = vmul.f32 0.2, %v444_v50 }
  0xf8   :  { %v615_v56 = vsel %vm517_vm1, %v340_v46, %v566_v52  ;;  %v1041_v57 = vpack.c.bf16 %v640_v54, %v640_v54 }
  0xf9   :  { %861 = vst.msk [vmem:[%s1646_s3 + $0x18] sm:$0xf] %vm854_vm4, %v1015_v53  ;;  %v1016_v58 = vpack.c.bf16 %v615_v56, %v615_v56  ;;  %v344_v59 = vpop.f32.mrb[16].mxu0  ;;  %v641_v60 = vsel %vm543_vm2, %v444_v50, %v592_v55  ;;  %v448_v61 = vpop.f32.mrb[16].mxu1 }
  0xfa   :  { %887 = vst.msk [vmem:[%s1646_s3 + $0x80] sm:$0xf] %vm854_vm4, %v1041_v57  ;;  %v345_v62 = vadd.f32 %v1396_v27, %v344_v59  ;;  %v1042_v63 = vpack.c.bf16 %v641_v60, %v641_v60  ;;  %v1104_v0 = vpop.f32.mrb[17].mxu0  ;;  %v449_v1 = vadd.f32 %v1396_v27, %v448_v61  ;;  %v1156_v2 = vpop.f32.mrb[17].mxu1 }
  0xfb   :  { %862 = vst.msk [vmem:[%s1646_s3 + $0x1c] sm:$0xf] %vm854_vm4, %v1016_v58  ;;  %v347_v3 = vpop.f32.mrb[18].mxu0  ;;  %v451_v4 = vpop.f32.mrb[18].mxu1 }
  0xfc   :  { %vm518_vm3 = vcmp.ge.f32.partialorder %v345_v62, 0.0  ;;  %v567_v5 = vmul.f32 0.2, %v345_v62  ;;  %888 = vst.msk [vmem:[%s1646_s3 + $0x84] sm:$0xf] %vm854_vm4, %v1042_v63  ;;  %v348_v6 = vadd.f32 %v1396_v27, %v347_v3  ;;  %v1105_v7 = vpop.f32.mrb[19].mxu0  ;;  %v452_v10 = vadd.f32 %v1396_v27, %v451_v4 }
  0xfd   :  { %vm544_vm5 = vcmp.ge.f32.partialorder %v449_v1, 0.0  ;;  %v1157_v8 = vpop.f32.mrb[19].mxu1  ;;  %v593_v9 = vmul.f32 0.2, %v449_v1 }
  0xfe   :  { %v616_v11 = vsel %vm518_vm3, %v345_v62, %v567_v5  ;;  %vm519_vm6 = vcmp.ge.f32.partialorder %v348_v6, 0.0  ;;  %v568_v12 = vmul.f32 0.2, %v348_v6  ;;  %vm545_vm7 = vcmp.ge.f32.partialorder %v452_v10, 0.0 }
  0xff   :  { %v1017_v13 = vpack.c.bf16 %v616_v11, %v616_v11  ;;  %v642_v14 = vsel %vm544_vm5, %v449_v1, %v593_v9  ;;  %v594_v15 = vmul.f32 0.2, %v452_v10 }
 0x100   :  { %v617_v16 = vsel %vm519_vm6, %v348_v6, %v568_v12  ;;  %v1043_v17 = vpack.c.bf16 %v642_v14, %v642_v14 }
 0x101   :  { %863 = vst.msk [vmem:[%s1646_s3 + $0x20] sm:$0xf] %vm854_vm4, %v1017_v13  ;;  %v1018_v18 = vpack.c.bf16 %v617_v16, %v617_v16  ;;  %v352_v19 = vpop.f32.mrb[20].mxu0  ;;  %v643_v20 = vsel %vm545_vm7, %v452_v10, %v594_v15  ;;  %v456_v21 = vpop.f32.mrb[20].mxu1 }
 0x102   :  { %889 = vst.msk [vmem:[%s1646_s3 + $0x88] sm:$0xf] %vm854_vm4, %v1043_v17  ;;  %v353_v22 = vadd.f32 %v1396_v27, %v352_v19  ;;  %v1044_v23 = vpack.c.bf16 %v643_v20, %v643_v20  ;;  %v1108_v24 = vpop.f32.mrb[21].mxu0  ;;  %v457_v25 = vadd.f32 %v1396_v27, %v456_v21  ;;  %v1160_v26 = vpop.f32.mrb[21].mxu1 }
 0x103   :  { %864 = vst.msk [vmem:[%s1646_s3 + $0x24] sm:$0xf] %vm854_vm4, %v1018_v18  ;;  %v355_v28 = vpop.f32.mrb[22].mxu0  ;;  %v459_v29 = vpop.f32.mrb[22].mxu1 }
 0x104   :  { %vm520_vm8 = vcmp.ge.f32.partialorder %v353_v22, 0.0  ;;  %v569_v30 = vmul.f32 0.2, %v353_v22  ;;  %890 = vst.msk [vmem:[%s1646_s3 + $0x8c] sm:$0xf] %vm854_vm4, %v1044_v23  ;;  %v356_v31 = vadd.f32 %v1396_v27, %v355_v28  ;;  %v1109_v32 = vpop.f32.mrb[23].mxu0  ;;  %v460_v35 = vadd.f32 %v1396_v27, %v459_v29 }
 0x105   :  { %vm546_vm9 = vcmp.ge.f32.partialorder %v457_v25, 0.0  ;;  %v1161_v33 = vpop.f32.mrb[23].mxu1  ;;  %v595_v34 = vmul.f32 0.2, %v457_v25 }
 0x106   :  { %v618_v36 = vsel %vm520_vm8, %v353_v22, %v569_v30  ;;  %vm521_vm10 = vcmp.ge.f32.partialorder %v356_v31, 0.0  ;;  %v570_v37 = vmul.f32 0.2, %v356_v31  ;;  %vm547_vm11 = vcmp.ge.f32.partialorder %v460_v35, 0.0 }
 0x107   :  { %v1019_v38 = vpack.c.bf16 %v618_v36, %v618_v36  ;;  %v644_v39 = vsel %vm546_vm9, %v457_v25, %v595_v34  ;;  %v596_v40 = vmul.f32 0.2, %v460_v35 }
 0x108   :  { %v619_v41 = vsel %vm521_vm10, %v356_v31, %v570_v37  ;;  %v1045_v42 = vpack.c.bf16 %v644_v39, %v644_v39 }
 0x109   :  { %865 = vst.msk [vmem:[%s1646_s3 + $0x28] sm:$0xf] %vm854_vm4, %v1019_v38  ;;  %v1020_v43 = vpack.c.bf16 %v619_v41, %v619_v41  ;;  %v360_v44 = vpop.f32.mrb[24].mxu0  ;;  %v645_v45 = vsel %vm547_vm11, %v460_v35, %v596_v40  ;;  %v464_v46 = vpop.f32.mrb[24].mxu1 }
 0x10a   :  { %891 = vst.msk [vmem:[%s1646_s3 + $0x90] sm:$0xf] %vm854_vm4, %v1045_v42  ;;  %v361_v47 = vadd.f32 %v1396_v27, %v360_v44  ;;  %v1046_v48 = vpack.c.bf16 %v645_v45, %v645_v45  ;;  %v1112_v49 = vpop.f32.mrb[25].mxu0  ;;  %v465_v50 = vadd.f32 %v1396_v27, %v464_v46  ;;  %v1164_v51 = vpop.f32.mrb[25].mxu1 }
 0x10b   :  { %866 = vst.msk [vmem:[%s1646_s3 + $0x2c] sm:$0xf] %vm854_vm4, %v1020_v43  ;;  %v363_v52 = vpop.f32.mrb[26].mxu0  ;;  %v467_v53 = vpop.f32.mrb[26].mxu1 }
 0x10c   :  { %vm522_vm12 = vcmp.ge.f32.partialorder %v361_v47, 0.0  ;;  %v571_v54 = vmul.f32 0.2, %v361_v47  ;;  %892 = vst.msk [vmem:[%s1646_s3 + $0x94] sm:$0xf] %vm854_vm4, %v1046_v48  ;;  %v364_v55 = vadd.f32 %v1396_v27, %v363_v52  ;;  %v1113_v56 = vpop.f32.mrb[27].mxu0  ;;  %v468_v59 = vadd.f32 %v1396_v27, %v467_v53 }
 0x10d   :  { %vm548_vm13 = vcmp.ge.f32.partialorder %v465_v50, 0.0  ;;  %v1165_v57 = vpop.f32.mrb[27].mxu1  ;;  %v597_v58 = vmul.f32 0.2, %v465_v50 }
 0x10e   :  { %v620_v60 = vsel %vm522_vm12, %v361_v47, %v571_v54  ;;  %vm523_vm14 = vcmp.ge.f32.partialorder %v364_v55, 0.0  ;;  %v572_v61 = vmul.f32 0.2, %v364_v55  ;;  %vm549_vm15 = vcmp.ge.f32.partialorder %v468_v59, 0.0 }
 0x10f   :  { %v1021_v62 = vpack.c.bf16 %v620_v60, %v620_v60  ;;  %v646_v63 = vsel %vm548_vm13, %v465_v50, %v597_v58  ;;  %v598_v0 = vmul.f32 0.2, %v468_v59 }
 0x110   :  { %v621_v1 = vsel %vm523_vm14, %v364_v55, %v572_v61  ;;  %v1047_v2 = vpack.c.bf16 %v646_v63, %v646_v63 }
 0x111   :  { %867 = vst.msk [vmem:[%s1646_s3 + $0x30] sm:$0xf] %vm854_vm4, %v1021_v62  ;;  %v1022_v3 = vpack.c.bf16 %v621_v1, %v621_v1  ;;  %v368_v4 = vpop.f32.mrb[28].mxu0  ;;  %v647_v5 = vsel %vm549_vm15, %v468_v59, %v598_v0  ;;  %v472_v6 = vpop.f32.mrb[28].mxu1 }
 0x112   :  { %893 = vst.msk [vmem:[%s1646_s3 + $0x98] sm:$0xf] %vm854_vm4, %v1047_v2  ;;  %v369_v7 = vadd.f32 %v1396_v27, %v368_v4  ;;  %v1048_v8 = vpack.c.bf16 %v647_v5, %v647_v5  ;;  %v1116_v9 = vpop.f32.mrb[29].mxu0  ;;  %v473_v10 = vadd.f32 %v1396_v27, %v472_v6  ;;  %v1168_v11 = vpop.f32.mrb[29].mxu1 }
 0x113   :  { %868 = vst.msk [vmem:[%s1646_s3 + $0x34] sm:$0xf] %vm854_vm4, %v1022_v3  ;;  %v371_v12 = vpop.f32.mrb[30].mxu0  ;;  %v475_v13 = vpop.f32.mrb[30].mxu1 }
 0x114   :  { %vm524_vm0 = vcmp.ge.f32.partialorder %v369_v7, 0.0  ;;  %v573_v14 = vmul.f32 0.2, %v369_v7  ;;  %894 = vst.msk [vmem:[%s1646_s3 + $0x9c] sm:$0xf] %vm854_vm4, %v1048_v8  ;;  %v372_v15 = vadd.f32 %v1396_v27, %v371_v12  ;;  %v1117_v16 = vpop.f32.mrb[31].mxu0  ;;  %v476_v19 = vadd.f32 %v1396_v27, %v475_v13 }
 0x115   :  { %vm550_vm1 = vcmp.ge.f32.partialorder %v473_v10, 0.0  ;;  %v1169_v17 = vpop.f32.mrb[31].mxu1  ;;  %v599_v18 = vmul.f32 0.2, %v473_v10 }
 0x116   :  { %v622_v20 = vsel %vm524_vm0, %v369_v7, %v573_v14  ;;  %vm525_vm2 = vcmp.ge.f32.partialorder %v372_v15, 0.0  ;;  %v574_v21 = vmul.f32 0.2, %v372_v15  ;;  %vm551_vm3 = vcmp.ge.f32.partialorder %v476_v19, 0.0 }
 0x117   :  { %v1023_v22 = vpack.c.bf16 %v622_v20, %v622_v20  ;;  %v648_v23 = vsel %vm550_vm1, %v473_v10, %v599_v18  ;;  %v600_v24 = vmul.f32 0.2, %v476_v19 }
 0x118   :  { %v623_v25 = vsel %vm525_vm2, %v372_v15, %v574_v21  ;;  %v1049_v26 = vpack.c.bf16 %v648_v23, %v648_v23 }
 0x119   :  { %869 = vst.msk [vmem:[%s1646_s3 + $0x38] sm:$0xf] %vm854_vm4, %v1023_v22  ;;  %v1024_v28 = vpack.c.bf16 %v623_v25, %v623_v25  ;;  %v376_v29 = vpop.f32.mrb[32].mxu0  ;;  %v649_v30 = vsel %vm551_vm3, %v476_v19, %v600_v24  ;;  %v480_v31 = vpop.f32.mrb[32].mxu1 }
 0x11a   :  { %895 = vst.msk [vmem:[%s1646_s3 + $0xa0] sm:$0xf] %vm854_vm4, %v1049_v26  ;;  %v377_v32 = vadd.f32 %v1396_v27, %v376_v29  ;;  %v1050_v33 = vpack.c.bf16 %v649_v30, %v649_v30  ;;  %v1120_v34 = vpop.f32.mrb[33].mxu0  ;;  %v481_v35 = vadd.f32 %v1396_v27, %v480_v31  ;;  %v1172_v36 = vpop.f32.mrb[33].mxu1 }
 0x11b   :  { %870 = vst.msk [vmem:[%s1646_s3 + $0x3c] sm:$0xf] %vm854_vm4, %v1024_v28  ;;  %v379_v37 = vpop.f32.mrb[34].mxu0  ;;  %v483_v38 = vpop.f32.mrb[34].mxu1 }
 0x11c   :  { %vm526_vm5 = vcmp.ge.f32.partialorder %v377_v32, 0.0  ;;  %v575_v39 = vmul.f32 0.2, %v377_v32  ;;  %896 = vst.msk [vmem:[%s1646_s3 + $0xa4] sm:$0xf] %vm854_vm4, %v1050_v33  ;;  %v380_v40 = vadd.f32 %v1396_v27, %v379_v37  ;;  %v1121_v41 = vpop.f32.mrb[35].mxu0  ;;  %v484_v44 = vadd.f32 %v1396_v27, %v483_v38 }
 0x11d   :  { %vm552_vm6 = vcmp.ge.f32.partialorder %v481_v35, 0.0  ;;  %v1173_v42 = vpop.f32.mrb[35].mxu1  ;;  %v601_v43 = vmul.f32 0.2, %v481_v35 }
 0x11e   :  { %v624_v45 = vsel %vm526_vm5, %v377_v32, %v575_v39  ;;  %vm527_vm7 = vcmp.ge.f32.partialorder %v380_v40, 0.0  ;;  %v576_v46 = vmul.f32 0.2, %v380_v40  ;;  %vm553_vm8 = vcmp.ge.f32.partialorder %v484_v44, 0.0 }
 0x11f   :  { %v1025_v47 = vpack.c.bf16 %v624_v45, %v624_v45  ;;  %v650_v48 = vsel %vm552_vm6, %v481_v35, %v601_v43  ;;  %v602_v49 = vmul.f32 0.2, %v484_v44 }
 0x120   :  { %v625_v50 = vsel %vm527_vm7, %v380_v40, %v576_v46  ;;  %v1051_v51 = vpack.c.bf16 %v650_v48, %v650_v48 }
 0x121   :  { %871 = vst.msk [vmem:[%s1646_s3 + $0x40] sm:$0xf] %vm854_vm4, %v1025_v47  ;;  %v1026_v52 = vpack.c.bf16 %v625_v50, %v625_v50  ;;  %v384_v53 = vpop.f32.mrb[36].mxu0  ;;  %v651_v54 = vsel %vm553_vm8, %v484_v44, %v602_v49  ;;  %v488_v55 = vpop.f32.mrb[36].mxu1 }
 0x122   :  { %897 = vst.msk [vmem:[%s1646_s3 + $0xa8] sm:$0xf] %vm854_vm4, %v1051_v51  ;;  %v385_v56 = vadd.f32 %v1396_v27, %v384_v53  ;;  %v1052_v57 = vpack.c.bf16 %v651_v54, %v651_v54  ;;  %v1124_v58 = vpop.f32.mrb[37].mxu0  ;;  %v489_v59 = vadd.f32 %v1396_v27, %v488_v55  ;;  %v1176_v60 = vpop.f32.mrb[37].mxu1 }
 0x123   :  { %872 = vst.msk [vmem:[%s1646_s3 + $0x44] sm:$0xf] %vm854_vm4, %v1026_v52  ;;  %v387_v61 = vpop.f32.mrb[38].mxu0  ;;  %v491_v62 = vpop.f32.mrb[38].mxu1 }
 0x124   :  { %vm528_vm9 = vcmp.ge.f32.partialorder %v385_v56, 0.0  ;;  %v577_v63 = vmul.f32 0.2, %v385_v56  ;;  %898 = vst.msk [vmem:[%s1646_s3 + $0xac] sm:$0xf] %vm854_vm4, %v1052_v57  ;;  %v388_v0 = vadd.f32 %v1396_v27, %v387_v61  ;;  %v1125_v1 = vpop.f32.mrb[39].mxu0  ;;  %v492_v4 = vadd.f32 %v1396_v27, %v491_v62 }
 0x125   :  { %vm554_vm10 = vcmp.ge.f32.partialorder %v489_v59, 0.0  ;;  %v1177_v2 = vpop.f32.mrb[39].mxu1  ;;  %v603_v3 = vmul.f32 0.2, %v489_v59 }
 0x126   :  { %v626_v5 = vsel %vm528_vm9, %v385_v56, %v577_v63  ;;  %vm529_vm11 = vcmp.ge.f32.partialorder %v388_v0, 0.0  ;;  %v578_v6 = vmul.f32 0.2, %v388_v0  ;;  %vm555_vm12 = vcmp.ge.f32.partialorder %v492_v4, 0.0 }
 0x127   :  { %v1027_v7 = vpack.c.bf16 %v626_v5, %v626_v5  ;;  %v652_v8 = vsel %vm554_vm10, %v489_v59, %v603_v3  ;;  %v604_v9 = vmul.f32 0.2, %v492_v4 }
 0x128   :  { %v627_v10 = vsel %vm529_vm11, %v388_v0, %v578_v6  ;;  %v1053_v11 = vpack.c.bf16 %v652_v8, %v652_v8 }
 0x129   :  { %873 = vst.msk [vmem:[%s1646_s3 + $0x48] sm:$0xf] %vm854_vm4, %v1027_v7  ;;  %v1028_v12 = vpack.c.bf16 %v627_v10, %v627_v10  ;;  %v392_v13 = vpop.f32.mrb[40].mxu0  ;;  %v653_v14 = vsel %vm555_vm12, %v492_v4, %v604_v9  ;;  %v496_v15 = vpop.f32.mrb[40].mxu1 }
 0x12a   :  { %899 = vst.msk [vmem:[%s1646_s3 + $0xb0] sm:$0xf] %vm854_vm4, %v1053_v11  ;;  %v393_v16 = vadd.f32 %v1396_v27, %v392_v13  ;;  %v1054_v17 = vpack.c.bf16 %v653_v14, %v653_v14  ;;  %v1128_v18 = vpop.f32.mrb[41].mxu0  ;;  %v497_v19 = vadd.f32 %v1396_v27, %v496_v15  ;;  %v1180_v20 = vpop.f32.mrb[41].mxu1 }
 0x12b   :  { %874 = vst.msk [vmem:[%s1646_s3 + $0x4c] sm:$0xf] %vm854_vm4, %v1028_v12  ;;  %v395_v21 = vpop.f32.mrb[42].mxu0  ;;  %v499_v22 = vpop.f32.mrb[42].mxu1 }
 0x12c   :  { %vm530_vm13 = vcmp.ge.f32.partialorder %v393_v16, 0.0  ;;  %v579_v23 = vmul.f32 0.2, %v393_v16  ;;  %900 = vst.msk [vmem:[%s1646_s3 + $0xb4] sm:$0xf] %vm854_vm4, %v1054_v17  ;;  %v396_v24 = vadd.f32 %v1396_v27, %v395_v21  ;;  %v1129_v25 = vpop.f32.mrb[43].mxu0  ;;  %v500_v29 = vadd.f32 %v1396_v27, %v499_v22 }
 0x12d   :  { %vm556_vm14 = vcmp.ge.f32.partialorder %v497_v19, 0.0  ;;  %v1181_v26 = vpop.f32.mrb[43].mxu1  ;;  %v605_v28 = vmul.f32 0.2, %v497_v19 }
 0x12e   :  { %v628_v30 = vsel %vm530_vm13, %v393_v16, %v579_v23  ;;  %vm531_vm15 = vcmp.ge.f32.partialorder %v396_v24, 0.0  ;;  %v580_v31 = vmul.f32 0.2, %v396_v24  ;;  %vm557_vm0 = vcmp.ge.f32.partialorder %v500_v29, 0.0 }
 0x12f   :  { %v1029_v32 = vpack.c.bf16 %v628_v30, %v628_v30  ;;  %v654_v33 = vsel %vm556_vm14, %v497_v19, %v605_v28  ;;  %v606_v34 = vmul.f32 0.2, %v500_v29 }
 0x130   :  { %v629_v35 = vsel %vm531_vm15, %v396_v24, %v580_v31  ;;  %v1055_v36 = vpack.c.bf16 %v654_v33, %v654_v33 }
 0x131   :  { %875 = vst.msk [vmem:[%s1646_s3 + $0x50] sm:$0xf] %vm854_vm4, %v1029_v32  ;;  %v1030_v37 = vpack.c.bf16 %v629_v35, %v629_v35  ;;  %v400_v38 = vpop.f32.mrb[44].mxu0  ;;  %v655_v39 = vsel %vm557_vm0, %v500_v29, %v606_v34  ;;  %v504_v40 = vpop.f32.mrb[44].mxu1 }
 0x132   :  { %901 = vst.msk [vmem:[%s1646_s3 + $0xb8] sm:$0xf] %vm854_vm4, %v1055_v36  ;;  %v401_v41 = vadd.f32 %v1396_v27, %v400_v38  ;;  %v1056_v42 = vpack.c.bf16 %v655_v39, %v655_v39  ;;  %v1132_v43 = vpop.f32.mrb[45].mxu0  ;;  %v505_v44 = vadd.f32 %v1396_v27, %v504_v40  ;;  %v1184_v45 = vpop.f32.mrb[45].mxu1 }
 0x133   :  { %876 = vst.msk [vmem:[%s1646_s3 + $0x54] sm:$0xf] %vm854_vm4, %v1030_v37  ;;  %v403_v46 = vpop.f32.mrb[46].mxu0  ;;  %v507_v47 = vpop.f32.mrb[46].mxu1 }
 0x134   :  { %vm532_vm1 = vcmp.ge.f32.partialorder %v401_v41, 0.0  ;;  %v581_v48 = vmul.f32 0.2, %v401_v41  ;;  %902 = vst.msk [vmem:[%s1646_s3 + $0xbc] sm:$0xf] %vm854_vm4, %v1056_v42  ;;  %v404_v49 = vadd.f32 %v1396_v27, %v403_v46  ;;  %v1133_v50 = vpop.f32.mrb[47].mxu0 }
 0x135   :  { %vm558_vm2 = vcmp.ge.f32.partialorder %v505_v44, 0.0  ;;  %v1185_v51 = vpop.f32.mrb[47].mxu1  ;;  %v607_v52 = vmul.f32 0.2, %v505_v44 }
 0x136   :  { %v630_v53 = vsel %vm532_vm1, %v401_v41, %v581_v48  ;;  %vm533_vm3 = vcmp.ge.f32.partialorder %v404_v49, 0.0  ;;  %v582_v54 = vmul.f32 0.2, %v404_v49 }
 0x137   :  { %v1031_v55 = vpack.c.bf16 %v630_v53, %v630_v53  ;;  %v656_v56 = vsel %vm558_vm2, %v505_v44, %v607_v52 }
 0x138   :  { %v631_v57 = vsel %vm533_vm3, %v404_v49, %v582_v54  ;;  %v1057_v58 = vpack.c.bf16 %v656_v56, %v656_v56 }
 0x139   :  { %877 = vst.msk [vmem:[%s1646_s3 + $0x58] sm:$0xf] %vm854_vm4, %v1031_v55  ;;  %v1032_v59 = vpack.c.bf16 %v631_v57, %v631_v57  ;;  %v408_v60 = vpop.f32.mrb[48].mxu0 }
 0x13a   :  { %903 = vst.msk [vmem:[%s1646_s3 + $0xc0] sm:$0xf] %vm854_vm4, %v1057_v58  ;;  %v409_v61 = vadd.f32 %v1396_v27, %v408_v60  ;;  %v1136_v62 = vpop.f32.mrb[49].mxu0 }
 0x13b   :  { %878 = vst.msk [vmem:[%s1646_s3 + $0x5c] sm:$0xf] %vm854_vm4, %v1032_v59  ;;  %v411_v63 = vpop.f32.mrb[50].mxu0 }
 0x13c   :  { %vm534_vm5 = vcmp.ge.f32.partialorder %v409_v61, 0.0  ;;  %v583_v0 = vmul.f32 0.2, %v409_v61  ;;  %v412_v1 = vadd.f32 %v1396_v27, %v411_v63  ;;  %v1137_v2 = vpop.f32.mrb[51].mxu0 }
 0x13e   :  { %v632_v3 = vsel %vm534_vm5, %v409_v61, %v583_v0  ;;  %vm535_vm6 = vcmp.ge.f32.partialorder %v412_v1, 0.0  ;;  %v584_v4 = vmul.f32 0.2, %v412_v1 }
 0x13f   :  { %v1033_v5 = vpack.c.bf16 %v632_v3, %v632_v3 }
 0x140   :  { %v633_v6 = vsel %vm535_vm6, %v412_v1, %v584_v4 }
 0x141   :  { %879 = vst.msk [vmem:[%s1646_s3 + $0x60] sm:$0xf] %vm854_vm4, %v1033_v5  ;;  %v1034_v7 = vpack.c.bf16 %v633_v6, %v633_v6 }
 0x143   :  { %880 = vst.msk [vmem:[%s1646_s3 + $0x64] sm:$0xf] %vm854_vm4, %v1034_v7 }

// kernel: ganomaly_forward.11
= control target key start
LH: loop header
LB: loop body
LE: loop exit
PB: predicated region body
PF: predicated region fallthrough
CT: control target
= control target key end

     0   :  { %vm1995_vm0 = vmmov 0   ;;  %vm1250_vm1 = vcmask 1041408   ;;  %vm1407_vm15 = vcmask 801792   ;;  %s2585_s1 = inlined_call_operand.vmem [shape: bf16[1024,128], index: 1, kind: input, shape index: {}]   ;;  %s2586_s0 = inlined_call_operand.vmem [shape: bf16[98,1024], index: 0, kind: input, shape index: {}]   ;;  %s2587_s2 = inlined_call_operand.vmem [shape: f32[1,128], index: 2, kind: input, shape index: {}]   ;;  %s2588_s3 = inlined_call_operand.vmem [shape: f32[1,128], index: 3, kind: input, shape index: {}]   ;;  %s2589_s4 = inlined_call_operand.vmem [shape: f32[98,128], index: 4, kind: input, shape index: {}]   ;;  %s2590_s6 = inlined_call_operand.vmem [shape: f32[2,98], index: 6, kind: input, shape index: {}]   ;;  %s2591_s5 = inlined_call_operand.<no memory space> [shape: f32[1,1], index: 5, kind: input, shape index: {}]   ;;  %s2592_s7 = inlined_call_operand.vmem [shape: f32[2,1], index: 7, kind: output, shape index: {}]  }
   0x1   :  { %v1920_v0 = vld [vmem:[%s2585_s1 + $0x40] sm:$0xff]   ;;  %v1924_v4 = vld [vmem:[%s2585_s1 + $0x48] sm:$0xff]   ;;  %v1928_v8 = vld [vmem:[%s2585_s1 + $0x50] sm:$0xff]  }
   0x2   :  { %v1921_v1 = vld [vmem:[%s2585_s1 + $0xc0] sm:$0xff]   ;;  %1624 = vmatprep.subr.bf16.mxu0 %v1920_v0  ;;  %v1925_v5 = vld [vmem:[%s2585_s1 + $0xc8] sm:$0xff]   ;;  %v1929_v9 = vld [vmem:[%s2585_s1 + $0xd0] sm:$0xff]  }
   0x3   :  { %v1922_v2 = vld [vmem:[%s2585_s1] sm:$0xff]   ;;  %1682 = vmatprep.subr.bf16.mxu1 %v1921_v1  ;;  %v1926_v6 = vld [vmem:[%s2585_s1 + $0x8] sm:$0xff]   ;;  %v1930_v10 = vld [vmem:[%s2585_s1 + $0x10] sm:$0xff]  }
   0x4   :  { %v1923_v3 = vld [vmem:[%s2585_s1 + $0x80] sm:$0xff]   ;;  %1625 = vmatpush3.bf16.msra.mxu0 %v1922_v2  ;;  %v1927_v7 = vld [vmem:[%s2585_s1 + $0x88] sm:$0xff]   ;;  %v1931_v11 = vld [vmem:[%s2585_s1 + $0x90] sm:$0xff]  }
   0x5   :  { %1683 = vmatpush3.bf16.msra.mxu1 %v1923_v3  ;;  %1626 = vmatprep.subr.bf16.mxu0 %v1924_v4  ;;  %v1932_v12 = vld [vmem:[%s2585_s1 + $0x58] sm:$0xff]   ;;  %v1936_v16 = vld [vmem:[%s2585_s1 + $0x60] sm:$0xff]   ;;  %v1940_v20 = vld [vmem:[%s2585_s1 + $0x68] sm:$0xff]  }
   0x6   :  { %1684 = vmatprep.subr.bf16.mxu1 %v1925_v5  ;;  %v1933_v13 = vld [vmem:[%s2585_s1 + $0xd8] sm:$0xff]   ;;  %v1937_v17 = vld [vmem:[%s2585_s1 + $0xe0] sm:$0xff]   ;;  %v1941_v21 = vld [vmem:[%s2585_s1 + $0xe8] sm:$0xff]  }
   0x7   :  { %v1934_v14 = vld [vmem:[%s2585_s1 + $0x18] sm:$0xff]   ;;  %v1938_v18 = vld [vmem:[%s2585_s1 + $0x20] sm:$0xff]   ;;  %v1942_v22 = vld [vmem:[%s2585_s1 + $0x28] sm:$0xff]  }
   0x8   :  { %1627 = vmatpush3.bf16.msra.mxu0 %v1926_v6  ;;  %v1935_v15 = vld [vmem:[%s2585_s1 + $0x98] sm:$0xff]   ;;  %v1939_v19 = vld [vmem:[%s2585_s1 + $0xa0] sm:$0xff]   ;;  %v1943_v23 = vld [vmem:[%s2585_s1 + $0xa8] sm:$0xff]  }
   0x9   :  { %1685 = vmatpush3.bf16.msra.mxu1 %v1927_v7  ;;  %1628 = vmatprep.subr.bf16.mxu0 %v1928_v8  ;;  %v1944_v24 = vld [vmem:[%s2585_s1 + $0x70] sm:$0xff]   ;;  %v1948_v28 = vld [vmem:[%s2585_s1 + $0x78] sm:$0xff]   ;;  %v29_v32 = vld [vmem:[%s2586_s0] sm:$0xff] }
   0xa   :  { %1686 = vmatprep.subr.bf16.mxu1 %v1929_v9  ;;  %v1945_v25 = vld [vmem:[%s2585_s1 + $0xf0] sm:$0xff]   ;;  %v1949_v29 = vld [vmem:[%s2585_s1 + $0xf8] sm:$0xff]   ;;  %v33_v33 = vld [vmem:[%s2586_s0 + $0x20] sm:$0xff] }
   0xb   :  { %v1946_v26 = vld [vmem:[%s2585_s1 + $0x30] sm:$0xff]   ;;  %v1950_v30 = vld [vmem:[%s2585_s1 + $0x38] sm:$0xff]   ;;  %v30_v34 = vld [vmem:[%s2586_s0 + $0x8] sm:$0xff]  ;;  %v1501_v35 = vcombine.low %v29_v32, %v33_v33  ;;  %v1502_v36 = vcombine.high %v29_v32, %v33_v33 }
   0xc   :  { %1629 = vmatpush3.bf16.msra.mxu0 %v1930_v10  ;;  %v1947_v27 = vld [vmem:[%s2585_s1 + $0xb0] sm:$0xff]   ;;  %v1951_v31 = vld [vmem:[%s2585_s1 + $0xb8] sm:$0xff]   ;;  %v34_v37 = vld [vmem:[%s2586_s0 + $0x28] sm:$0xff] }
   0xd   :  { %1687 = vmatpush3.bf16.msra.mxu1 %v1931_v11  ;;  %1630 = vmatprep.subr.bf16.mxu0 %v1932_v12  ;;  %v37_v38 = vld [vmem:[%s2586_s0 + $0x40] sm:$0xff]  ;;  %v1503_v40 = vcombine.low %v30_v34, %v34_v37  ;;  %v1504_v41 = vcombine.high %v30_v34, %v34_v37  ;;  %v38_v43 = vld [vmem:[%s2586_s0 + $0x48] sm:$0xff]  ;;  %v1960_v2 = vld [vmem:[%s2585_s1 + $0x150] sm:$0xff]  }
   0xe   :  { %1688 = vmatprep.subr.bf16.mxu1 %v1933_v13  ;;  %v41_v39 = vld [vmem:[%s2586_s0 + $0x60] sm:$0xff]  ;;  %v42_v44 = vld [vmem:[%s2586_s0 + $0x68] sm:$0xff]  ;;  %893 = vmatprep.mubr.bf16.mxu0 %v1502_v36  ;;  %v1961_v4 = vld [vmem:[%s2585_s1 + $0x1d0] sm:$0xff]  }
   0xf   :  { %v1510_v42 = vcombine.high %v37_v38, %v41_v39  ;;  %v1512_v45 = vcombine.high %v38_v43, %v42_v44  ;;  %981 = vmatprep.mubr.bf16.mxu1 %v1504_v41  ;;  %v45_v46 = vld [vmem:[%s2586_s0 + $0x80] sm:$0xff]  ;;  %v46_v48 = vld [vmem:[%s2586_s0 + $0x88] sm:$0xff]  ;;  %v1509_v52 = vcombine.low %v37_v38, %v41_v39  ;;  %v1511_v54 = vcombine.low %v38_v43, %v42_v44  ;;  %v1962_v7 = vld [vmem:[%s2585_s1 + $0x110] sm:$0xff]  }
  0x10   :  { %1631 = vmatpush3.bf16.msra.mxu0 %v1934_v14  ;;  %v49_v47 = vld [vmem:[%s2586_s0 + $0xa0] sm:$0xff]  ;;  %v50_v49 = vld [vmem:[%s2586_s0 + $0xa8] sm:$0xff]  ;;  %v1963_v9 = vld [vmem:[%s2585_s1 + $0x190] sm:$0xff]  }
  0x11   :  { %1689 = vmatpush3.bf16.msra.mxu1 %v1935_v15  ;;  %1632 = vmatprep.subr.bf16.mxu0 %v1936_v16  ;;  %v1952_v50 = vld [vmem:[%s2585_s1 + $0x140] sm:$0xff]   ;;  %v1518_v55 = vcombine.high %v45_v46, %v49_v47  ;;  %v1520_v57 = vcombine.high %v46_v48, %v50_v49  ;;  %v1956_v58 = vld [vmem:[%s2585_s1 + $0x148] sm:$0xff]   ;;  %v1517_v3 = vcombine.low %v45_v46, %v49_v47  ;;  %v1964_v10 = vld [vmem:[%s2585_s1 + $0x158] sm:$0xff]  }
  0x12   :  { %1690 = vmatprep.subr.bf16.mxu1 %v1937_v17  ;;  %v1953_v51 = vld [vmem:[%s2585_s1 + $0x1c0] sm:$0xff]   ;;  %v1957_v59 = vld [vmem:[%s2585_s1 + $0x1c8] sm:$0xff]   ;;  %v1519_v5 = vcombine.low %v46_v48, %v50_v49  ;;  %v1965_v12 = vld [vmem:[%s2585_s1 + $0x1d8] sm:$0xff]  }
  0x13   :  { %v1954_v53 = vld [vmem:[%s2585_s1 + $0x100] sm:$0xff]   ;;  %v1958_v60 = vld [vmem:[%s2585_s1 + $0x108] sm:$0xff]   ;;  %v1966_v13 = vld [vmem:[%s2585_s1 + $0x118] sm:$0xff]  }
  0x14   :  { %1633 = vmatpush3.bf16.msra.mxu0 %v1938_v18  ;;  %v1955_v56 = vld [vmem:[%s2585_s1 + $0x180] sm:$0xff]   ;;  %v1959_v63 = vld [vmem:[%s2585_s1 + $0x188] sm:$0xff]   ;;  %v1967_v15 = vld [vmem:[%s2585_s1 + $0x198] sm:$0xff]  }
  0x15   :  { %1691 = vmatpush3.bf16.msra.mxu1 %v1939_v19  ;;  %1634 = vmatprep.subr.bf16.mxu0 %v1940_v20  ;;  %v53_v61 = vld [vmem:[%s2586_s0 + $0xc0] sm:$0xff]  ;;  %v54_v0 = vld [vmem:[%s2586_s0 + $0xc8] sm:$0xff]  ;;  %v1980_v37 = vld [vmem:[%s2585_s1 + $0x170] sm:$0xff]  }
  0x16   :  { %1692 = vmatprep.subr.bf16.mxu1 %v1941_v21  ;;  %v57_v62 = vld [vmem:[%s2586_s0 + $0xe0] sm:$0xff]  ;;  %v58_v1 = vld [vmem:[%s2586_s0 + $0xe8] sm:$0xff]  ;;  %v1981_v39 = vld [vmem:[%s2585_s1 + $0x1f0] sm:$0xff]  }
  0x17   :  { %v1526_v6 = vcombine.high %v53_v61, %v57_v62  ;;  %v1528_v8 = vcombine.high %v54_v0, %v58_v1  ;;  %v61_v11 = vld [vmem:[%s2586_s0 + $0x100] sm:$0xff]  ;;  %v62_v16 = vld [vmem:[%s2586_s0 + $0x108] sm:$0xff]  ;;  %v1525_v18 = vcombine.low %v53_v61, %v57_v62  ;;  %v1527_v20 = vcombine.low %v54_v0, %v58_v1  ;;  %v1984_v44 = vld [vmem:[%s2585_s1 + $0x178] sm:$0xff]  }
  0x18   :  { %1635 = vmatpush3.bf16.msra.mxu0 %v1942_v22  ;;  %v65_v14 = vld [vmem:[%s2586_s0 + $0x120] sm:$0xff]  ;;  %v66_v17 = vld [vmem:[%s2586_s0 + $0x128] sm:$0xff]  ;;  %v1986_v46 = vld [vmem:[%s2585_s1 + $0x138] sm:$0xff]  }
  0x19   :  { %1693 = vmatpush3.bf16.msra.mxu1 %v1943_v23  ;;  %1636 = vmatprep.subr.bf16.mxu0 %v1944_v24  ;;  %v1968_v19 = vld [vmem:[%s2585_s1 + $0x160] sm:$0xff]   ;;  %v1534_v21 = vcombine.high %v61_v11, %v65_v14  ;;  %v1536_v23 = vcombine.high %v62_v16, %v66_v17  ;;  %v1974_v32 = vld [vmem:[%s2585_s1 + $0x128] sm:$0xff]   ;;  %v1533_v34 = vcombine.low %v61_v11, %v65_v14  ;;  %v1987_v48 = vld [vmem:[%s2585_s1 + $0x1b8] sm:$0xff]  }
  0x1a   :  { %1694 = vmatprep.subr.bf16.mxu1 %v1945_v25  ;;  %v1969_v22 = vld [vmem:[%s2585_s1 + $0x1e0] sm:$0xff]   ;;  %v1975_v33 = vld [vmem:[%s2585_s1 + $0x1a8] sm:$0xff]   ;;  %v43_v61 = vld [vmem:[%s2586_s0 + $0x70] sm:$0xff] }
  0x1b   :  { %v1970_v24 = vld [vmem:[%s2585_s1 + $0x120] sm:$0xff]   ;;  %v78_v43 = vld [vmem:[%s2586_s0 + $0x188] sm:$0x11]  ;;  %v40_v62 = vld [vmem:[%s2586_s0 + $0x58] sm:$0xff] }
  0x1c   :  { %1637 = vmatpush3.bf16.msra.mxu0 %v1946_v26  ;;  %v1971_v25 = vld [vmem:[%s2585_s1 + $0x1a0] sm:$0xff]   ;;  %v56_v14 = vld [vmem:[%s2586_s0 + $0xd8] sm:$0xff] }
  0x1d   :  { %1695 = vmatpush3.bf16.msra.mxu1 %v1947_v27  ;;  %1638 = vmatprep.subr.bf16.mxu0 %v1948_v28  ;;  %v69_v26 = vld [vmem:[%s2586_s0 + $0x140] sm:$0xff]  ;;  %v1972_v28 = vld [vmem:[%s2585_s1 + $0x168] sm:$0xff]  }
  0x1e   :  { %1696 = vmatprep.subr.bf16.mxu1 %v1949_v29  ;;  %v73_v27 = vld [vmem:[%s2586_s0 + $0x160] sm:$0xff]  ;;  %v70_v29 = vld [vmem:[%s2586_s0 + $0x148] sm:$0xff] }
  0x1f   :  { %v1542_v36 = vcombine.high %v69_v26, %v73_v27  ;;  %v77_v41 = vld [vmem:[%s2586_s0 + $0x180] sm:$0x11]  ;;  %v1541_v47 = vcombine.low %v69_v26, %v73_v27 }
  0x20   :  { %1639 = vmatpush3.bf16.msra.mxu0 %v1950_v30  ;;  %v74_v30 = vld [vmem:[%s2586_s0 + $0x168] sm:$0xff] }
  0x21   :  { %1697 = vmatpush3.bf16.msra.mxu1 %v1951_v31  ;;  %1740 = vmatprep.subr.bf16.mxu0 %v1952_v50  ;;  %v1973_v31 = vld [vmem:[%s2585_s1 + $0x1e8] sm:$0xff]   ;;  %v1544_v38 = vcombine.high %v70_v29, %v74_v30  ;;  %v1543_v49 = vcombine.low %v70_v29, %v74_v30  ;;  %v1550_v50 = vcombine.high %v77_v41, %v77_v41  ;;  %v75_v29 = vld [vmem:[%s2586_s0 + $0x170] sm:$0xff]  ;;  %v72_v30 = vld [vmem:[%s2586_s0 + $0x158] sm:$0xff] }
  0x22   :  { %1798 = vmatprep.subr.bf16.mxu1 %v1953_v51  ;;  %v1552_v51 = vcombine.high %v78_v43, %v78_v43 }
  0x23   :  { %894 = vmatmul.mubr.bf16.vlgmr.msra.gmra.mrb[0].mxu0 %v1501_v35  ;;  %v1535_v35 = vcombine.low %v62_v16, %v66_v17 }
  0x24   :  { %982 = vmatmul.mubr.bf16.vlgmr.msra.gmra.mrb[0].mxu1 %v1503_v40  ;;  %901 = vmatprep.mubr.bf16.mxu0 %v1510_v42  ;;  %v1982_v40 = vld [vmem:[%s2585_s1 + $0x130] sm:$0xff]  }
  0x25   :  { %989 = vmatprep.mubr.bf16.mxu1 %v1512_v45  ;;  %1741 = vmatpush3.bf16.msra.mxu0 %v1954_v53  ;;  %v1983_v42 = vld [vmem:[%s2585_s1 + $0x1b0] sm:$0xff]   ;;  %v1985_v45 = vld [vmem:[%s2585_s1 + $0x1f8] sm:$0xff]  }
  0x26   :  { %1799 = vmatpush3.bf16.msra.mxu1 %v1955_v56  ;;  %1742 = vmatprep.subr.bf16.mxu0 %v1956_v58  ;;  %v35_v53 = vld [vmem:[%s2586_s0 + $0x30] sm:$0xff]  ;;  %v1549_v56 = vcombine.low %v77_v41, %v77_v41 }
  0x27   :  { %1800 = vmatprep.subr.bf16.mxu1 %v1957_v59 }
  0x29   :  { %1743 = vmatpush3.bf16.msra.mxu0 %v1958_v60  ;;  %v39_v60 = vld [vmem:[%s2586_s0 + $0x50] sm:$0xff] }
  0x2a   :  { %1801 = vmatpush3.bf16.msra.mxu1 %v1959_v63  ;;  %1744 = vmatprep.subr.bf16.mxu0 %v1960_v2  ;;  %v44_v63 = vld [vmem:[%s2586_s0 + $0x78] sm:$0xff]  ;;  %v1514_v2 = vcombine.high %v39_v60, %v43_v61 }
  0x2b   :  { %902 = vmatmul.mubr.bf16.gmra.mrb[4].mxu0 %v1509_v52  ;;  %1802 = vmatprep.subr.bf16.mxu1 %v1961_v4  ;;  %v31_v52 = vld [vmem:[%s2586_s0 + $0x10] sm:$0xff] }
  0x2c   :  { %990 = vmatmul.mubr.bf16.gmra.mrb[4].mxu1 %v1511_v54  ;;  %909 = vmatprep.mubr.bf16.mxu0 %v1518_v55  ;;  %v32_v54 = vld [vmem:[%s2586_s0 + $0x18] sm:$0xff]  ;;  %v1506_v58 = vcombine.high %v31_v52, %v35_v53  ;;  %v1505_v0 = vcombine.low %v31_v52, %v35_v53  ;;  %v47_v4 = vld [vmem:[%s2586_s0 + $0x90] sm:$0xff] }
  0x2d   :  { %997 = vmatprep.mubr.bf16.mxu1 %v1520_v57  ;;  %1745 = vmatpush3.bf16.msra.mxu0 %v1962_v7  ;;  %v36_v55 = vld [vmem:[%s2586_s0 + $0x38] sm:$0xff]  ;;  %v1551_v57 = vcombine.low %v78_v43, %v78_v43 }
  0x2e   :  { %1803 = vmatpush3.bf16.msra.mxu1 %v1963_v9  ;;  %1746 = vmatprep.subr.bf16.mxu0 %v1964_v10  ;;  %v1508_v59 = vcombine.high %v32_v54, %v36_v55  ;;  %v1507_v1 = vcombine.low %v32_v54, %v36_v55  ;;  %v52_v7 = vld [vmem:[%s2586_s0 + $0xb8] sm:$0xff]  ;;  %v1515_v9 = vcombine.low %v40_v62, %v44_v63 }
  0x2f   :  { %1804 = vmatprep.subr.bf16.mxu1 %v1965_v12  ;;  %v55_v12 = vld [vmem:[%s2586_s0 + $0xd0] sm:$0xff] }
  0x31   :  { %1747 = vmatpush3.bf16.msra.mxu0 %v1966_v13  ;;  %v59_v13 = vld [vmem:[%s2586_s0 + $0xf0] sm:$0xff] }
  0x32   :  { %1805 = vmatpush3.bf16.msra.mxu1 %v1967_v15  ;;  %1748 = vmatprep.subr.bf16.mxu0 %v1968_v19  ;;  %v60_v15 = vld [vmem:[%s2586_s0 + $0xf8] sm:$0xff] }
  0x33   :  { %910 = vmatmul.mubr.bf16.gmra.mrb[8].mxu0 %v1517_v3  ;;  %1806 = vmatprep.subr.bf16.mxu1 %v1969_v22  ;;  %v1516_v3 = vcombine.high %v40_v62, %v44_v63  ;;  %v1532_v19 = vcombine.high %v56_v14, %v60_v15  ;;  %v64_v22 = vld [vmem:[%s2586_s0 + $0x118] sm:$0xff] }
  0x34   :  { %998 = vmatmul.mubr.bf16.gmra.mrb[8].mxu1 %v1519_v5  ;;  %917 = vmatprep.mubr.bf16.mxu0 %v1526_v6  ;;  %v51_v5 = vld [vmem:[%s2586_s0 + $0xb0] sm:$0xff]  ;;  %v48_v6 = vld [vmem:[%s2586_s0 + $0x98] sm:$0xff] }
  0x35   :  { %1005 = vmatprep.mubr.bf16.mxu1 %v1528_v8  ;;  %1749 = vmatpush3.bf16.msra.mxu0 %v1970_v24  ;;  %v1513_v8 = vcombine.low %v39_v60, %v43_v61  ;;  %v1522_v10 = vcombine.high %v47_v4, %v51_v5  ;;  %v1524_v11 = vcombine.high %v48_v6, %v52_v7 }
  0x36   :  { %1807 = vmatpush3.bf16.msra.mxu1 %v1971_v25  ;;  %1750 = vmatprep.subr.bf16.mxu0 %v1972_v28  ;;  %v1521_v16 = vcombine.low %v47_v4, %v51_v5  ;;  %v1523_v17 = vcombine.low %v48_v6, %v52_v7  ;;  %v1529_v24 = vcombine.low %v55_v12, %v59_v13  ;;  %v71_v28 = vld [vmem:[%s2586_s0 + $0x150] sm:$0xff] }
  0x37   :  { %1808 = vmatprep.subr.bf16.mxu1 %v1973_v31  ;;  %v1531_v25 = vcombine.low %v56_v14, %v60_v15  ;;  %v76_v31 = vld [vmem:[%s2586_s0 + $0x178] sm:$0xff] }
  0x39   :  { %1751 = vmatpush3.bf16.msra.mxu0 %v1974_v32 }
  0x3a   :  { %1809 = vmatpush3.bf16.msra.mxu1 %v1975_v33  ;;  %1752 = vmatprep.subr.bf16.mxu0 %v1980_v37  ;;  %v80_v37 = vld [vmem:[%s2586_s0 + $0x198] sm:$0x11] }
  0x3b   :  { %918 = vmatmul.mubr.bf16.gmra.mrb[12].mxu0 %v1525_v18  ;;  %1810 = vmatprep.subr.bf16.mxu1 %v1981_v39  ;;  %v1530_v18 = vcombine.high %v55_v12, %v59_v13  ;;  %v1547_v39 = vcombine.low %v72_v30, %v76_v31  ;;  %v1556_v41 = vcombine.high %v80_v37, %v80_v37 }
  0x3c   :  { %1006 = vmatmul.mubr.bf16.gmra.mrb[12].mxu1 %v1527_v20  ;;  %925 = vmatprep.mubr.bf16.mxu0 %v1534_v21  ;;  %v63_v20 = vld [vmem:[%s2586_s0 + $0x110] sm:$0xff]  ;;  %v1555_v43 = vcombine.low %v80_v37, %v80_v37 }
  0x3d   :  { %1013 = vmatprep.mubr.bf16.mxu1 %v1536_v23  ;;  %1753 = vmatpush3.bf16.msra.mxu0 %v1982_v40  ;;  %v67_v21 = vld [vmem:[%s2586_s0 + $0x130] sm:$0xff]  ;;  %v68_v23 = vld [vmem:[%s2586_s0 + $0x138] sm:$0xff] }
  0x3e   :  { %1811 = vmatpush3.bf16.msra.mxu1 %v1983_v42  ;;  %1754 = vmatprep.subr.bf16.mxu0 %v1984_v44  ;;  %v1538_v26 = vcombine.high %v63_v20, %v67_v21  ;;  %v1540_v27 = vcombine.high %v64_v22, %v68_v23  ;;  %v1537_v32 = vcombine.low %v63_v20, %v67_v21  ;;  %v1994_v44 = vmov 0.0|0.0  }
  0x3f   :  { %1812 = vmatprep.subr.bf16.mxu1 %v1985_v45  ;;  %v1539_v33 = vcombine.low %v64_v22, %v68_v23 }
  0x41   :  { %1755 = vmatpush3.bf16.msra.mxu0 %v1986_v46 }
  0x42   :  { %1813 = vmatpush3.bf16.msra.mxu1 %v1987_v48  ;;  %1899 = vmatprep.subr.bf16.mxu0 %v1994_v44 }
  0x43   :  { %926 = vmatmul.mubr.bf16.gmra.mrb[16].mxu0 %v1533_v34  ;;  %v1546_v34 = vcombine.high %v71_v28, %v75_v29 }
  0x44   :  { %1014 = vmatmul.mubr.bf16.gmra.mrb[16].mxu1 %v1535_v35  ;;  %933 = vmatprep.mubr.bf16.mxu0 %v1542_v36  ;;  %v1548_v35 = vcombine.high %v72_v30, %v76_v31  ;;  %v79_v36 = vld [vmem:[%s2586_s0 + $0x190] sm:$0x11] }
  0x45   :  { %1021 = vmatprep.mubr.bf16.mxu1 %v1544_v38  ;;  %v1545_v38 = vcombine.low %v71_v28, %v75_v29  ;;  %v1554_v40 = vcombine.high %v79_v36, %v79_v36  ;;  %v1553_v42 = vcombine.low %v79_v36, %v79_v36 }
  0x4b   :  { %934 = vmatmul.mubr.bf16.gmra.mrb[20].mxu0 %v1541_v47 }
  0x4c   :  { %1022 = vmatmul.mubr.bf16.gmra.mrb[20].mxu1 %v1543_v49  ;;  %941 = vmatprep.mubr.bf16.mxu0 %v1550_v50 }
  0x4d   :  { %1029 = vmatprep.mubr.bf16.mxu1 %v1552_v51 }
  0x53   :  { %942 = vmatmul.mubr.bf16.gmra.mrb[24].mxu0 %v1549_v56 }
  0x54   :  { %1030 = vmatmul.mubr.bf16.gmra.mrb[24].mxu1 %v1551_v57  ;;  %1069 = vmatprep.mubr.bf16.mxu0 %v1506_v58 }
  0x55   :  { %1157 = vmatprep.mubr.bf16.mxu1 %v1508_v59 }
  0x5b   :  { %1070 = vmatmul.mubr.bf16.vlgmr.msra.gmra.mrb[28].mxu0 %v1505_v0 }
  0x5c   :  { %1158 = vmatmul.mubr.bf16.vlgmr.msra.gmra.mrb[28].mxu1 %v1507_v1  ;;  %1077 = vmatprep.mubr.bf16.mxu0 %v1514_v2 }
  0x5d   :  { %1165 = vmatprep.mubr.bf16.mxu1 %v1516_v3 }
  0x63   :  { %1078 = vmatmul.mubr.bf16.gmra.mrb[32].mxu0 %v1513_v8 }
  0x64   :  { %1166 = vmatmul.mubr.bf16.gmra.mrb[32].mxu1 %v1515_v9  ;;  %1085 = vmatprep.mubr.bf16.mxu0 %v1522_v10 }
  0x65   :  { %1173 = vmatprep.mubr.bf16.mxu1 %v1524_v11 }
  0x6b   :  { %1086 = vmatmul.mubr.bf16.gmra.mrb[36].mxu0 %v1521_v16 }
  0x6c   :  { %1174 = vmatmul.mubr.bf16.gmra.mrb[36].mxu1 %v1523_v17  ;;  %1093 = vmatprep.mubr.bf16.mxu0 %v1530_v18 }
  0x6d   :  { %1181 = vmatprep.mubr.bf16.mxu1 %v1532_v19 }
  0x73   :  { %1094 = vmatmul.mubr.bf16.gmra.mrb[40].mxu0 %v1529_v24 }
  0x74   :  { %1182 = vmatmul.mubr.bf16.gmra.mrb[40].mxu1 %v1531_v25  ;;  %1101 = vmatprep.mubr.bf16.mxu0 %v1538_v26 }
  0x75   :  { %1189 = vmatprep.mubr.bf16.mxu1 %v1540_v27 }
  0x7b   :  { %1102 = vmatmul.mubr.bf16.gmra.mrb[44].mxu0 %v1537_v32 }
  0x7c   :  { %1190 = vmatmul.mubr.bf16.gmra.mrb[44].mxu1 %v1539_v33  ;;  %1109 = vmatprep.mubr.bf16.mxu0 %v1546_v34 }
  0x7d   :  { %1197 = vmatprep.mubr.bf16.mxu1 %v1548_v35 }
  0x83   :  { %1110 = vmatmul.mubr.bf16.gmra.mrb[48].mxu0 %v1545_v38 }
  0x84   :  { %1198 = vmatmul.mubr.bf16.gmra.mrb[48].mxu1 %v1547_v39  ;;  %1117 = vmatprep.mubr.bf16.mxu0 %v1554_v40 }
  0x85   :  { %1205 = vmatprep.mubr.bf16.mxu1 %v1556_v41 }
  0x8b   :  { %1118 = vmatmul.mubr.bf16.gmra.mrb[52].mxu0 %v1553_v42 }
  0x8c   :  { %1206 = vmatmul.mubr.bf16.gmra.mrb[52].mxu1 %v1555_v43 }
  0xf6   :  { %v1640_v45 = vpop.f32.mrb[0].mxu0 }
  0xf7   :  { %v1698_v46 = vpop.f32.mrb[0].mxu1  ;;  %v1641_v47 = vpop.f32.mrb[1].mxu0 }
  0xf8   :  { %v1642_v48 = vadd.f32 %v1641_v47, %v1640_v45  ;;  %v1699_v49 = vpop.f32.mrb[1].mxu1  ;;  %v1643_v50 = vpop.f32.mrb[2].mxu0 }
  0xf9   :  { %v1700_v51 = vadd.f32 %v1699_v49, %v1698_v46  ;;  %v1701_v52 = vpop.f32.mrb[2].mxu1  ;;  %v1644_v53 = vpop.f32.mrb[3].mxu0 }
  0xfa   :  { %v1645_v54 = vadd.f32 %v1644_v53, %v1643_v50  ;;  %v1702_v55 = vpop.f32.mrb[3].mxu1 }
  0xfb   :  { %v2386_v56 = vadd.f32 %v1700_v51, %v1642_v48  ;;  %v1703_v57 = vadd.f32 %v1702_v55, %v1701_v52 }
  0xfd   :  { %v2388_v58 = vadd.f32 %v1703_v57, %v1645_v54 }
  0xfe   :  { %v1646_v59 = vpop.f32.mrb[4].mxu0 }
  0xff   :  { %v1704_v60 = vpop.f32.mrb[4].mxu1  ;;  %v1647_v61 = vpop.f32.mrb[5].mxu0 }
 0x100   :  { %v1648_v62 = vadd.f32 %v1647_v61, %v1646_v59  ;;  %v1705_v63 = vpop.f32.mrb[5].mxu1  ;;  %v1649_v0 = vpop.f32.mrb[6].mxu0 }
 0x101   :  { %v1706_v1 = vadd.f32 %v1705_v63, %v1704_v60  ;;  %v1707_v2 = vpop.f32.mrb[6].mxu1  ;;  %v1650_v3 = vpop.f32.mrb[7].mxu0 }
 0x102   :  { %v1651_v4 = vadd.f32 %v1650_v3, %v1649_v0  ;;  %v1708_v5 = vpop.f32.mrb[7].mxu1 }
 0x103   :  { %v2390_v6 = vadd.f32 %v1706_v1, %v1648_v62  ;;  %v1709_v7 = vadd.f32 %v1708_v5, %v1707_v2 }
 0x105   :  { %v2392_v8 = vadd.f32 %v1709_v7, %v1651_v4 }
 0x106   :  { %v1652_v9 = vpop.f32.mrb[8].mxu0 }
 0x107   :  { %v1710_v10 = vpop.f32.mrb[8].mxu1  ;;  %v1653_v11 = vpop.f32.mrb[9].mxu0 }
 0x108   :  { %v1654_v12 = vadd.f32 %v1653_v11, %v1652_v9  ;;  %v1711_v13 = vpop.f32.mrb[9].mxu1  ;;  %v1655_v14 = vpop.f32.mrb[10].mxu0 }
 0x109   :  { %v1712_v15 = vadd.f32 %v1711_v13, %v1710_v10  ;;  %v1713_v16 = vpop.f32.mrb[10].mxu1  ;;  %v1656_v17 = vpop.f32.mrb[11].mxu0 }
 0x10a   :  { %v1657_v18 = vadd.f32 %v1656_v17, %v1655_v14  ;;  %v1714_v19 = vpop.f32.mrb[11].mxu1 }
 0x10b   :  { %v2394_v20 = vadd.f32 %v1712_v15, %v1654_v12  ;;  %v1715_v21 = vadd.f32 %v1714_v19, %v1713_v16 }
 0x10d   :  { %v2396_v22 = vadd.f32 %v1715_v21, %v1657_v18 }
 0x10e   :  { %v1658_v23 = vpop.f32.mrb[12].mxu0 }
 0x10f   :  { %v1716_v24 = vpop.f32.mrb[12].mxu1  ;;  %v1659_v25 = vpop.f32.mrb[13].mxu0 }
 0x110   :  { %v1660_v26 = vadd.f32 %v1659_v25, %v1658_v23  ;;  %v1717_v27 = vpop.f32.mrb[13].mxu1  ;;  %v1661_v28 = vpop.f32.mrb[14].mxu0 }
 0x111   :  { %v1718_v29 = vadd.f32 %v1717_v27, %v1716_v24  ;;  %v1719_v30 = vpop.f32.mrb[14].mxu1  ;;  %v1662_v31 = vpop.f32.mrb[15].mxu0 }
 0x112   :  { %v1663_v32 = vadd.f32 %v1662_v31, %v1661_v28  ;;  %v1720_v33 = vpop.f32.mrb[15].mxu1 }
 0x113   :  { %v2398_v34 = vadd.f32 %v1718_v29, %v1660_v26  ;;  %v1721_v35 = vadd.f32 %v1720_v33, %v1719_v30 }
 0x115   :  { %v2400_v36 = vadd.f32 %v1721_v35, %v1663_v32 }
 0x116   :  { %v1664_v37 = vpop.f32.mrb[16].mxu0 }
 0x117   :  { %v1722_v38 = vpop.f32.mrb[16].mxu1  ;;  %v1665_v39 = vpop.f32.mrb[17].mxu0 }
 0x118   :  { %v1666_v40 = vadd.f32 %v1665_v39, %v1664_v37  ;;  %v1723_v41 = vpop.f32.mrb[17].mxu1  ;;  %v1667_v42 = vpop.f32.mrb[18].mxu0 }
 0x119   :  { %v1724_v43 = vadd.f32 %v1723_v41, %v1722_v38  ;;  %v1725_v45 = vpop.f32.mrb[18].mxu1  ;;  %v1668_v46 = vpop.f32.mrb[19].mxu0 }
 0x11a   :  { %v1669_v47 = vadd.f32 %v1668_v46, %v1667_v42  ;;  %v1726_v48 = vpop.f32.mrb[19].mxu1 }
 0x11b   :  { %v2402_v49 = vadd.f32 %v1724_v43, %v1666_v40  ;;  %v1727_v50 = vadd.f32 %v1726_v48, %v1725_v45 }
 0x11d   :  { %v2404_v51 = vadd.f32 %v1727_v50, %v1669_v47 }
 0x11e   :  { %v1670_v52 = vpop.f32.mrb[20].mxu0 }
 0x11f   :  { %v1728_v53 = vpop.f32.mrb[20].mxu1  ;;  %v1671_v54 = vpop.f32.mrb[21].mxu0 }
 0x120   :  { %v1672_v55 = vadd.f32 %v1671_v54, %v1670_v52  ;;  %v1729_v57 = vpop.f32.mrb[21].mxu1  ;;  %v1673_v59 = vpop.f32.mrb[22].mxu0 }
 0x121   :  { %v1730_v60 = vadd.f32 %v1729_v57, %v1728_v53  ;;  %v1731_v61 = vpop.f32.mrb[22].mxu1  ;;  %v1674_v62 = vpop.f32.mrb[23].mxu0  ;;  %v1996_v53 = vmov 0.0  }
 0x122   :  { %v1675_v63 = vadd.f32 %v1674_v62, %v1673_v59  ;;  %v1732_v0 = vpop.f32.mrb[23].mxu1  ;;  %1896 = vmatprep.mubr.msk.f32.mxu0 %vm1995_vm0, %v1996_v53  ;;  %vm1495_vm0 = vcmask 1024  }
 0x123   :  { %v2406_v1 = vadd.f32 %v1730_v60, %v1672_v55  ;;  %v1733_v2 = vadd.f32 %v1732_v0, %v1731_v61 }
 0x125   :  { %v2408_v3 = vadd.f32 %v1733_v2, %v1675_v63 }
 0x126   :  { %v1676_v4 = vpop.f32.mrb[24].mxu0 }
 0x127   :  { %v1734_v5 = vpop.f32.mrb[24].mxu1  ;;  %v1677_v7 = vpop.f32.mrb[25].mxu0 }
 0x128   :  { %v1678_v9 = vadd.f32 %v1677_v7, %v1676_v4  ;;  %v1735_v10 = vpop.f32.mrb[25].mxu1  ;;  %v1679_v11 = vpop.f32.mrb[26].mxu0 }
 0x129   :  { %v1736_v12 = vadd.f32 %v1735_v10, %v1734_v5  ;;  %v1737_v13 = vpop.f32.mrb[26].mxu1  ;;  %v1680_v14 = vpop.f32.mrb[27].mxu0 }
 0x12a   :  { %v1738_v15 = vpop.f32.mrb[27].mxu1 }
 0x12b   :  { %v2410_v16 = vadd.f32 %v1736_v12, %v1678_v9 }
 0x12e   :  { %v1756_v17 = vpop.f32.mrb[28].mxu0 }
 0x12f   :  { %v1814_v18 = vpop.f32.mrb[28].mxu1  ;;  %v1757_v19 = vpop.f32.mrb[29].mxu0 }
 0x130   :  { %v1758_v21 = vadd.f32 %v1757_v19, %v1756_v17  ;;  %v1815_v23 = vpop.f32.mrb[29].mxu1  ;;  %v1759_v24 = vpop.f32.mrb[30].mxu0 }
 0x131   :  { %v1816_v25 = vadd.f32 %v1815_v23, %v1814_v18  ;;  %v1817_v26 = vpop.f32.mrb[30].mxu1  ;;  %v1760_v27 = vpop.f32.mrb[31].mxu0 }
 0x132   :  { %v1072_v28 = vadd.f32 %v1758_v21, %v2386_v56  ;;  %v1761_v29 = vadd.f32 %v1760_v27, %v1759_v24  ;;  %v1818_v30 = vpop.f32.mrb[31].mxu1 }
 0x133   :  { %v1819_v31 = vadd.f32 %v1818_v30, %v1817_v26 }
 0x134   :  { %v2413_v32 = vadd.f32 %v1816_v25, %v1072_v28  ;;  %v1075_v33 = vadd.f32 %v1761_v29, %v2388_v58 }
 0x136   :  { %v2416_v35 = vadd.f32 %v1819_v31, %v1075_v33  ;;  %v1762_v37 = vpop.f32.mrb[32].mxu0  ;;  %v1259_v9 = vmul.f32 %v2413_v32, %v2413_v32 }
 0x137   :  { %v1820_v38 = vpop.f32.mrb[32].mxu1  ;;  %v1763_v39 = vpop.f32.mrb[33].mxu0 }
 0x138   :  { %v1764_v40 = vadd.f32 %v1763_v39, %v1762_v37  ;;  %v1821_v41 = vpop.f32.mrb[33].mxu1  ;;  %v1765_v42 = vpop.f32.mrb[34].mxu0  ;;  %v1239_v12 = vadd.f32 %v2416_v35, %v2413_v32 }
 0x139   :  { %v1822_v43 = vadd.f32 %v1821_v41, %v1820_v38  ;;  %v1823_v45 = vpop.f32.mrb[34].mxu1  ;;  %v1766_v46 = vpop.f32.mrb[35].mxu0 }
 0x13a   :  { %v1080_v56 = vadd.f32 %v1764_v40, %v2390_v6  ;;  %v1767_v47 = vadd.f32 %v1766_v46, %v1765_v42  ;;  %v1824_v48 = vpop.f32.mrb[35].mxu1 }
 0x13b   :  { %v1825_v50 = vadd.f32 %v1824_v48, %v1823_v45 }
 0x13c   :  { %v2419_v52 = vadd.f32 %v1822_v43, %v1080_v56  ;;  %v1083_v58 = vadd.f32 %v1767_v47, %v2392_v8  ;;  %v1260_v8 = vmul.f32 %v2416_v35, %v2416_v35 }
 0x13e   :  { %v2423_v54 = vadd.f32 %v1825_v50, %v1083_v58  ;;  %v1768_v55 = vpop.f32.mrb[36].mxu0  ;;  %v1261_v13 = vmul.f32 %v2419_v52, %v2419_v52  ;;  %v1240_v15 = vadd.f32 %v1239_v12, %v2419_v52  ;;  %v1272_v17 = vadd.f32 %v1260_v8, %v1259_v9 }
 0x13f   :  { %v1826_v57 = vpop.f32.mrb[36].mxu1  ;;  %v1769_v59 = vpop.f32.mrb[37].mxu0 }
 0x140   :  { %v1770_v60 = vadd.f32 %v1769_v59, %v1768_v55  ;;  %v1827_v61 = vpop.f32.mrb[37].mxu1  ;;  %v1771_v62 = vpop.f32.mrb[38].mxu0  ;;  %v1273_v25 = vadd.f32 %v1272_v17, %v1261_v13  ;;  %v1241_v33 = vadd.f32 %v1240_v15, %v2423_v54 }
 0x141   :  { %v1828_v6 = vadd.f32 %v1827_v61, %v1826_v57  ;;  %v1829_v63 = vpop.f32.mrb[38].mxu1  ;;  %v1772_v0 = vpop.f32.mrb[39].mxu0 }
 0x142   :  { %v1088_v2 = vadd.f32 %v1770_v60, %v2394_v20  ;;  %v1773_v4 = vadd.f32 %v1772_v0, %v1771_v62  ;;  %v1830_v5 = vpop.f32.mrb[39].mxu1 }
 0x143   :  { %v1831_v7 = vadd.f32 %v1830_v5, %v1829_v63 }
 0x144   :  { %v2430_v10 = vadd.f32 %v1828_v6, %v1088_v2  ;;  %v1091_v11 = vadd.f32 %v1773_v4, %v2396_v22  ;;  %v1262_v22 = vmul.f32 %v2423_v54, %v2423_v54 }
 0x146   :  { %v2437_v20 = vadd.f32 %v1831_v7, %v1091_v11  ;;  %v1774_v14 = vpop.f32.mrb[40].mxu0  ;;  %v1263_v37 = vmul.f32 %v2430_v10, %v2430_v10  ;;  %v1242_v41 = vadd.f32 %v1241_v33, %v2430_v10  ;;  %v1274_v42 = vadd.f32 %v1273_v25, %v1262_v22 }
 0x147   :  { %v1832_v18 = vpop.f32.mrb[40].mxu1  ;;  %v1775_v19 = vpop.f32.mrb[41].mxu0 }
 0x148   :  { %v1776_v21 = vadd.f32 %v1775_v19, %v1774_v14  ;;  %v1833_v23 = vpop.f32.mrb[41].mxu1  ;;  %v1777_v24 = vpop.f32.mrb[42].mxu0  ;;  %v1275_v46 = vadd.f32 %v1274_v42, %v1263_v37  ;;  %v1243_v55 = vadd.f32 %v1242_v41, %v2437_v20 }
 0x149   :  { %v1834_v26 = vadd.f32 %v1833_v23, %v1832_v18  ;;  %v1835_v27 = vpop.f32.mrb[42].mxu1  ;;  %v1778_v28 = vpop.f32.mrb[43].mxu0 }
 0x14a   :  { %v1096_v29 = vadd.f32 %v1776_v21, %v2398_v34  ;;  %v1779_v30 = vadd.f32 %v1778_v28, %v1777_v24  ;;  %v1836_v31 = vpop.f32.mrb[43].mxu1  ;;  %v1264_v34 = vmul.f32 %v2437_v20, %v2437_v20 }
 0x14b   :  { %v1837_v38 = vadd.f32 %v1836_v31, %v1835_v27 }
 0x14c   :  { %v2446_v39 = vadd.f32 %v1834_v26, %v1096_v29  ;;  %v1099_v40 = vadd.f32 %v1779_v30, %v2400_v36  ;;  %v1276_v0 = vadd.f32 %v1275_v46, %v1264_v34 }
 0x14e   :  { %v2450_v43 = vadd.f32 %v1837_v38, %v1099_v40  ;;  %v1780_v45 = vpop.f32.mrb[44].mxu0  ;;  %v1265_v36 = vmul.f32 %v2446_v39, %v2446_v39  ;;  %v1244_v63 = vadd.f32 %v1243_v55, %v2446_v39 }
 0x14f   :  { %v1838_v56 = vpop.f32.mrb[44].mxu1  ;;  %v1781_v47 = vpop.f32.mrb[45].mxu0 }
 0x150   :  { %v1782_v48 = vadd.f32 %v1781_v47, %v1780_v45  ;;  %v1839_v50 = vpop.f32.mrb[45].mxu1  ;;  %v1783_v58 = vpop.f32.mrb[46].mxu0  ;;  %v1266_v4 = vmul.f32 %v2450_v43, %v2450_v43  ;;  %v1277_v7 = vadd.f32 %v1276_v0, %v1265_v36  ;;  %v1245_v12 = vadd.f32 %v1244_v63, %v2450_v43 }
 0x151   :  { %v1840_v57 = vadd.f32 %v1839_v50, %v1838_v56  ;;  %v1841_v59 = vpop.f32.mrb[46].mxu1  ;;  %v1784_v60 = vpop.f32.mrb[47].mxu0 }
 0x152   :  { %v1104_v61 = vadd.f32 %v1782_v48, %v2402_v49  ;;  %v1785_v62 = vadd.f32 %v1784_v60, %v1783_v58  ;;  %v1842_v6 = vpop.f32.mrb[47].mxu1  ;;  %v1278_v21 = vadd.f32 %v1277_v7, %v1266_v4 }
 0x153   :  { %v1843_v2 = vadd.f32 %v1842_v6, %v1841_v59 }
 0x154   :  { %v2461_v5 = vadd.f32 %v1840_v57, %v1104_v61  ;;  %v1107_v8 = vadd.f32 %v1785_v62, %v2404_v51 }
 0x156   :  { %v1267_v9 = vmul.f32 %v2461_v5, %v2461_v5  ;;  %v2466_v11 = vadd.f32 %v1843_v2, %v1107_v8  ;;  %v1786_v49 = vpop.f32.mrb[48].mxu0  ;;  %v1246_v19 = vadd.f32 %v1245_v12, %v2461_v5 }
 0x157   :  { %v1844_v13 = vpop.f32.mrb[48].mxu1  ;;  %v1787_v14 = vpop.f32.mrb[49].mxu0 }
 0x158   :  { %v1788_v15 = vadd.f32 %v1787_v14, %v1786_v49  ;;  %v1845_v17 = vpop.f32.mrb[49].mxu1  ;;  %v1789_v18 = vpop.f32.mrb[50].mxu0  ;;  %v1268_v22 = vmul.f32 %v2466_v11, %v2466_v11  ;;  %v1279_v28 = vadd.f32 %v1278_v21, %v1267_v9  ;;  %v1247_v33 = vadd.f32 %v1246_v19, %v2466_v11 }
 0x159   :  { %v1846_v23 = vadd.f32 %v1845_v17, %v1844_v13  ;;  %v1847_v24 = vpop.f32.mrb[50].mxu1  ;;  %v1790_v51 = vpop.f32.mrb[51].mxu0 }
 0x15a   :  { %v1112_v25 = vadd.f32 %v1788_v15, %v2406_v1  ;;  %v1791_v26 = vadd.f32 %v1790_v51, %v1789_v18  ;;  %v1848_v27 = vpop.f32.mrb[51].mxu1  ;;  %v1280_v42 = vadd.f32 %v1279_v28, %v1268_v22 }
 0x15b   :  { %v1849_v29 = vadd.f32 %v1848_v27, %v1847_v24  ;;  %v1296_v27 = vld [vmem:[%s2587_s2] sm:$0x1] }
 0x15c   :  { %v2473_v30 = vadd.f32 %v1846_v23, %v1112_v25  ;;  %v1115_v31 = vadd.f32 %v1791_v26, %v2408_v3  ;;  %v1304_v25 = vlaneseq }
 0x15e   :  { %v1269_v37 = vmul.f32 %v2473_v30, %v2473_v30  ;;  %v2479_v38 = vadd.f32 %v1849_v29, %v1115_v31  ;;  %v1792_v40 = vpop.f32.mrb[52].mxu0  ;;  %v1248_v41 = vadd.f32 %v1247_v33, %v2473_v30  ;;  %v1305_v26 = vshrl.u32 %v1304_v25, 7  ;;  %v1300_v33 = vld [vmem:[%s2588_s3] sm:$0x1] }
 0x15f   :  { %v1850_v1 = vpop.f32.mrb[52].mxu1  ;;  %v1793_v45 = vpop.f32.mrb[53].mxu0 }
 0x160   :  { %v1270_v34 = vmul.f32 %v2479_v38, %v2479_v38  ;;  %v1794_v46 = vadd.f32 %v1793_v45, %v1792_v40  ;;  %v1851_v56 = vpop.f32.mrb[53].mxu1  ;;  %v1795_v47 = vpop.f32.mrb[54].mxu0  ;;  %v1249_v3 = vadd.f32 %v1248_v41, %v2479_v38  ;;  %v1281_v48 = vadd.f32 %v1280_v42, %v1269_v37 }
 0x161   :  { %v1852_v50 = vadd.f32 %v1851_v56, %v1850_v1  ;;  %v1853_v58 = vpop.f32.mrb[54].mxu1  ;;  %v1796_v55 = vpop.f32.mrb[55].mxu0  ;;  %v1306_v28 = vsub.s32 0, %v1305_v26 }
 0x162   :  { %v1120_v36 = vadd.f32 %v1794_v46, %v2410_v16  ;;  %v1854_v57 = vpop.f32.mrb[55].mxu1  ;;  %v1282_v59 = vadd.f32 %v1281_v48, %v1270_v34 }
 0x164   :  { %v1208_v60 = vadd.f32 %v1852_v50, %v1120_v36 }
 0x166   :  { %1225 = vst [vmem:[#allocation2 + $0x60] sm:$0x3] %v1208_v60 }
 0x16d   :  { %v1238_v61 = vld [vmem:[#allocation2 + $0x60] sm:$0x3] }
 0x16e   :  { %v1251_v62 = vsel %vm1250_vm1, %v1238_v61, 0.0  ;;  %v1271_v6 = vmul.f32 %v1238_v61, %v1238_v61 }
 0x16f   :  { %v1252_v63 = vadd.f32 %v1251_v62, %v1249_v3 }
 0x170   :  { %v1283_v0 = vsel %vm1250_vm1, %v1271_v6, 0.0 }
 0x171   :  { %v1253_v2 = vrot.slane %v1252_v63, 4  ;;  %v1284_v4 = vadd.f32 %v1283_v0, %v1282_v59 }
 0x173   :  { %v1254_v8 = vadd.f32 %v1253_v2, %v1252_v63  ;;  %v1285_v7 = vrot.slane %v1284_v4, 4 }
 0x175   :  { %v1255_v9 = vrot.slane %v1254_v8, 2  ;;  %v1286_v49 = vadd.f32 %v1285_v7, %v1284_v4 }
 0x177   :  { %v1256_v12 = vadd.f32 %v1255_v9, %v1254_v8  ;;  %v1287_v16 = vrot.slane %v1286_v49, 2 }
 0x179   :  { %v1257_v13 = vrot.slane %v1256_v12, 1  ;;  %v1288_v14 = vadd.f32 %v1287_v16, %v1286_v49  ;;  %v1384_v16 = vld [vmem:[%s2589_s4 + $0x20] sm:$0xff] }
 0x17b   :  { %v1258_v15 = vadd.f32 %v1257_v13, %v1256_v12  ;;  %v1289_v17 = vrot.slane %v1288_v14, 1  ;;  %v1385_v13 = vld [vmem:[%s2589_s4 + $0x28] sm:$0xff] }
 0x17d   :  { %v1290_v18 = vadd.f32 %v1289_v17, %v1288_v14  ;;  %v1291_v19 = vmul.f32 0.010204081, %v1258_v15  ;;  %v1386_v17 = vld [vmem:[%s2589_s4 + $0x30] sm:$0xff] }
 0x17f   :  { %v1292_v21 = vmul.f32 0.010204081, %v1290_v18  ;;  %v1293_v23 = vmul.f32 %v1291_v19, %v1291_v19 }
 0x181   :  { %v1294_v24 = vsub.f32 %v1292_v21, %v1293_v23 }
 0x183   :  { %v1295_v51 = vmax.f32 %v1294_v24, 0.0  ;;  %v1387_v24 = vld [vmem:[%s2589_s4 + $0x38] sm:$0xff] }
 0x185   :  { %v1297_v22 = vadd.f32 1e-05, %v1295_v51 }
 0x187   :  { %1992 = vrsqrt.f32 %v1297_v22 }
 0x191   :  { %v1993_v29 = vpop.eup %1992 }
 0x192   :  { %v1299_v31 = vmul.f32 %v1993_v29, %v1296_v27 }
 0x194   :  { %v1301_v37 = vmul.f32 %v1299_v31, %v1291_v19  ;;  %v1307_v40 = vrot.slane %v1299_v31, %v1306_v28 }
 0x196   :  { %v1302_v41 = vsub.f32 %v1300_v33, %v1301_v37  ;;  %v1309_v42 = vmul.f32 %v1307_v40, %v2413_v32  ;;  %v1310_v1 = vmul.f32 %v1307_v40, %v2416_v35  ;;  %v1311_v45 = vmul.f32 %v1307_v40, %v2419_v52 }
 0x197   :  { %v1312_v34 = vmul.f32 %v1307_v40, %v2423_v54  ;;  %v1313_v46 = vmul.f32 %v1307_v40, %v2430_v10  ;;  %v1314_v56 = vmul.f32 %v1307_v40, %v2437_v20  ;;  %v1315_v3 = vmul.f32 %v1307_v40, %v2446_v39  ;;  %v1380_v39 = vld [vmem:[%s2589_s4] sm:$0xff] }
 0x198   :  { %v2500_v47 = vrot.slane %v1302_v41, %v1306_v28  ;;  %v1316_v48 = vmul.f32 %v1307_v40, %v2450_v43  ;;  %v1318_v50 = vmul.f32 %v1307_v40, %v2466_v11  ;;  %v1317_v32 = vmul.f32 %v1307_v40, %v2461_v5  ;;  %v1381_v5 = vld [vmem:[%s2589_s4 + $0x8] sm:$0xff]  ;;  %v1388_v41 = vld [vmem:[%s2589_s4 + $0x40] sm:$0xff] }
 0x199   :  { %v1319_v35 = vmul.f32 %v1307_v40, %v2473_v30  ;;  %v2508_v52 = vmul.f32 %v1307_v40, %v2479_v38  ;;  %v2510_v54 = vmul.f32 %v1307_v40, %v1238_v61  ;;  %v1382_v30 = vld [vmem:[%s2589_s4 + $0x10] sm:$0xff]  ;;  %v1383_v38 = vld [vmem:[%s2589_s4 + $0x18] sm:$0xff] }
 0x19a   :  { %v1328_v10 = vadd.f32 %v2500_v47, %v1309_v42  ;;  %v1329_v20 = vadd.f32 %v2500_v47, %v1310_v1  ;;  %v1330_v43 = vadd.f32 %v2500_v47, %v1311_v45  ;;  %v1331_v11 = vadd.f32 %v2500_v47, %v1312_v34  ;;  %v1389_v1 = vld [vmem:[%s2589_s4 + $0x48] sm:$0xff] }
 0x19b   :  { %v1332_v58 = vadd.f32 %v2500_v47, %v1313_v46  ;;  %v1333_v55 = vadd.f32 %v2500_v47, %v1314_v56  ;;  %v1334_v36 = vadd.f32 %v2500_v47, %v1315_v3  ;;  %v1335_v57 = vadd.f32 %v2500_v47, %v1316_v48  ;;  %v1390_v3 = vld [vmem:[%s2589_s4 + $0x50] sm:$0xff] }
 0x19c   :  { %vm1341_vm2 = vcmp.ge.f32.partialorder %v1328_v10, 0.0  ;;  %vm1342_vm3 = vcmp.ge.f32.partialorder %v1329_v20, 0.0  ;;  %v1354_v59 = vmul.f32 0.2, %v1328_v10  ;;  %v1355_v60 = vmul.f32 0.2, %v1329_v20 }
 0x19d   :  { %vm1343_vm4 = vcmp.ge.f32.partialorder %v1330_v43, 0.0  ;;  %vm1344_vm5 = vcmp.ge.f32.partialorder %v1331_v11, 0.0  ;;  %v1356_v61 = vmul.f32 0.2, %v1330_v43  ;;  %v1357_v62 = vmul.f32 0.2, %v1331_v11 }
 0x19e   :  { %v1367_v6 = vsel %vm1341_vm2, %v1328_v10, %v1354_v59  ;;  %v1368_v63 = vsel %vm1342_vm3, %v1329_v20, %v1355_v60  ;;  %vm1345_vm6 = vcmp.ge.f32.partialorder %v1332_v58, 0.0  ;;  %vm1346_vm7 = vcmp.ge.f32.partialorder %v1333_v55, 0.0 }
 0x19f   :  { %v1393_v0 = vmul.f32 %v1380_v39, %v1367_v6  ;;  %v1394_v2 = vmul.f32 %v1381_v5, %v1368_v63  ;;  %v1369_v4 = vsel %vm1343_vm4, %v1330_v43, %v1356_v61  ;;  %v1370_v8 = vsel %vm1344_vm5, %v1331_v11, %v1357_v62 }
 0x1a0   :  { %v1395_v7 = vmul.f32 %v1382_v30, %v1369_v4  ;;  %v1396_v9 = vmul.f32 %v1383_v38, %v1370_v8  ;;  %v1358_v49 = vmul.f32 0.2, %v1332_v58  ;;  %v1359_v12 = vmul.f32 0.2, %v1333_v55  ;;  %v1392_v38 = vld [vmem:[%s2589_s4 + $0x60] sm:$0x3] }
 0x1a1   :  { %v1900_v14 = vpack.c.bf16 %v1394_v2, %v1393_v0  ;;  %vm1347_vm8 = vcmp.ge.f32.partialorder %v1334_v36, 0.0  ;;  %vm1348_vm9 = vcmp.ge.f32.partialorder %v1335_v57, 0.0  ;;  %v1360_v15 = vmul.f32 0.2, %v1334_v36 }
 0x1a2   :  { %v1903_v18 = vpack.c.bf16 %v1396_v9, %v1395_v7  ;;  %v1371_v19 = vsel %vm1345_vm6, %v1332_v58, %v1358_v49  ;;  %v1372_v21 = vsel %vm1346_vm7, %v1333_v55, %v1359_v12  ;;  %v1361_v23 = vmul.f32 0.2, %v1335_v57  ;;  %v1406_v55 = vld [vmem:[%s2590_s6] sm:$0x3] }
 0x1a3   :  { %1901 = vmatpush3.bf16.msra.mxu0 %v1900_v14  ;;  %v1397_v51 = vmul.f32 %v1384_v16, %v1371_v19  ;;  %v1398_v22 = vmul.f32 %v1385_v13, %v1372_v21  ;;  %v1373_v25 = vsel %vm1347_vm8, %v1334_v36, %v1360_v15  ;;  %v1336_v26 = vadd.f32 %v2500_v47, %v1317_v32 }
 0x1a4   :  { %1902 = vmatprep.subr.bf16.mxu0 %v1994_v44  ;;  %v1374_v27 = vsel %vm1348_vm9, %v1335_v57, %v1361_v23  ;;  %v1399_v28 = vmul.f32 %v1386_v17, %v1373_v25  ;;  %v1337_v29 = vadd.f32 %v2500_v47, %v1318_v50  ;;  %v1338_v31 = vadd.f32 %v2500_v47, %v1319_v35 }
 0x1a5   :  { %v1906_v33 = vpack.c.bf16 %v1398_v22, %v1397_v51  ;;  %v1400_v37 = vmul.f32 %v1387_v24, %v1374_v27  ;;  %vm1349_vm10 = vcmp.ge.f32.partialorder %v1336_v26, 0.0  ;;  %v1362_v40 = vmul.f32 0.2, %v1336_v26 }
 0x1a6   :  { %vm1350_vm11 = vcmp.ge.f32.partialorder %v1337_v29, 0.0  ;;  %v1363_v42 = vmul.f32 0.2, %v1337_v29  ;;  %v1339_v45 = vadd.f32 %v2500_v47, %v2508_v52  ;;  %vm1351_vm12 = vcmp.ge.f32.partialorder %v1338_v31, 0.0  ;;  %v1391_v52 = vld [vmem:[%s2589_s4 + $0x58] sm:$0xff] }
 0x1a7   :  { %1904 = vmatpush3.bf16.msra.mxu0 %v1903_v18  ;;  %v1909_v34 = vpack.c.bf16 %v1400_v37, %v1399_v28  ;;  %v1375_v46 = vsel %vm1349_vm10, %v1336_v26, %v1362_v40  ;;  %v1364_v56 = vmul.f32 0.2, %v1338_v31  ;;  %v1340_v48 = vadd.f32 %v2500_v47, %v2510_v54 }
 0x1a8   :  { %1905 = vmatprep.subr.bf16.mxu0 %v1994_v44  ;;  %v1376_v50 = vsel %vm1350_vm11, %v1337_v29, %v1363_v42  ;;  %v1401_v32 = vmul.f32 %v1388_v41, %v1375_v46  ;;  %vm1352_vm13 = vcmp.ge.f32.partialorder %v1339_v45, 0.0  ;;  %v1365_v35 = vmul.f32 0.2, %v1339_v45 }
 0x1a9   :  { %v1402_v10 = vmul.f32 %v1389_v1, %v1376_v50  ;;  %v1377_v20 = vsel %vm1351_vm12, %v1338_v31, %v1364_v56  ;;  %v1366_v54 = vmul.f32 0.2, %v1340_v48  ;;  %vm1353_vm14 = vcmp.ge.f32.partialorder %v1340_v48, 0.0 }
 0x1aa   :  { %v1378_v39 = vsel %vm1352_vm13, %v1339_v45, %v1365_v35  ;;  %v1403_v43 = vmul.f32 %v1390_v3, %v1377_v20 }
 0x1ab   :  { %1907 = vmatpush3.bf16.msra.mxu0 %v1906_v33  ;;  %v1912_v11 = vpack.c.bf16 %v1402_v10, %v1401_v32  ;;  %v1404_v5 = vmul.f32 %v1391_v52, %v1378_v39  ;;  %v1379_v30 = vsel %vm1353_vm14, %v1340_v48, %v1366_v54 }
 0x1ac   :  { %1908 = vmatprep.subr.bf16.mxu0 %v1994_v44  ;;  %v1405_v58 = vmul.f32 %v1392_v38, %v1379_v30 }
 0x1ad   :  { %v1915_v47 = vpack.c.bf16 %v1404_v5, %v1403_v43 }
 0x1af   :  { %1910 = vmatpush3.bf16.msra.mxu0 %v1909_v34 }
 0x1b0   :  { %1911 = vmatprep.subr.bf16.mxu0 %v1994_v44 }
 0x1b3   :  { %1913 = vmatpush3.bf16.msra.mxu0 %v1912_v11 }
 0x1b4   :  { %1914 = vmatprep.subr.bf16.mxu0 %v1994_v44  ;;  %v12_v44 = vstv %s2591_s5 }
 0x1b5   :  { %13 = vst [vmem:[#allocation3] sm:$0x1] %v12_v44 }
 0x1b7   :  { %1916 = vmatpush3.bf16.msra.mxu0 %v1915_v47 }
 0x1b8   :  { %1894 = vmatprep.subr.mxu0 %v1996_v53 }
 0x1bb   :  { %1895 = vmatpush3.msk.msra.mxu0 %vm1250_vm1, %v1405_v58 }
 0x1bc   :  { %1897 = vmatmul.mubr.msk.f32.vlgmr.msra.gmra.mrb[56].mxu0 %vm1407_vm15, %v1406_v55  ;;  %v1623_v53 = vld [vmem:[#allocation3] ss:$0 sm:$0xff] }
 0x28f   :  { %v1480_v36 = vpop.f32.mrb[56].mxu0 }
 0x290   :  { %v1898_v57 = vpop.f32.mrb[57].mxu0  ;;  %v1484_v59 = vsel %vm1250_vm1, %v1480_v36, 0.0 }
 0x291   :  { %1485 = vadd.xlane.f32.xlu0 %v1484_v59 }
 0x31e   :  { %v1486_v60 = vpop.xlane.xlu0 %1485 }
 0x31f   :  { %v1494_v61 = vadd.f32 %v1623_v53, %v1486_v60 }
 0x321   :  { %1496 = vst.msk [vmem:[%s2592_s7] sm:$0x3] %vm1495_vm0, %v1494_v61 }

</bundles_post_ra>
